<compile_context>
chip_gen: v7x
topology: tpu7x:2x2x1
jax: 0.10.0
libtpu: 0.0.40
codegen_flags: <defaults>
</compile_context>

<pallas_src>
import jax
import jax.numpy as jnp
import numpy as np
from jax import lax
from jax.experimental import pallas as pl
from jax.experimental.pallas import tpu as pltpu

# ------------------------- hyper-params (args.*) ----------------------------
NUM_USERS  = 4      # args.num_users
INFO_DIM   = 8      # args.info_dim
GRU_INPUT  = 16     # args.gru_input
GRU_HIDDEN = 32     # args.gru_hidden
GRU_LAYERS = 1      # args.gru_layers (must be 1, see TODO above)
NUM_CLS    = 10

LANE      = 128                                  # vreg lane width
X_WIDTH   = GRU_HIDDEN + INFO_DIM + 2            # 42 = [h | targ | delt | 1]
ROW_H     = 0                                    # h    -> rows/lanes 0:32
ROW_TARG  = GRU_HIDDEN                           # targ -> rows/lanes 32:40
ROW_DELT  = GRU_HIDDEN + INFO_DIM                # delt -> row/lane 40
ROW_ONE   = GRU_HIDDEN + INFO_DIM + 1            # 1.0  -> row/lane 41
N_BLOCKS  = 7                                    # gi_r gi_z gi_n gh_r gh_z gh_n targ
OUT_WIDTH = N_BLOCKS * LANE                      # 896


# ------------------------------ Pallas kernel --------------------------------
def online_anom_kernel(users_ref, targets_ref, delts_ref,      # SMEM (T,)
                       hid0_ref, targ0_ref,                    # VMEM (U, 42)
                       w_full_ref,                             # VMEM (U, 42, 896)
                       w_cls_ref, b_cls_ref,                   # VMEM (42,128), (1,128)
                       probs_ref, hid_ref, targ_ref):          # VMEM (T,128), (U,42), (U,42)
    f32 = jnp.float32
    B, XW = LANE, X_WIDTH
    T = users_ref.shape[0]
    U = hid0_ref.shape[0]

    # Hoisted constants (iota must be >= 2D on TPU).
    row_ids  = lax.broadcasted_iota(jnp.int32, (U, 1), 0)          # (U, 1)
    lane_ids = lax.broadcasted_iota(jnp.int32, (1, XW), 1)         # (1, 42)
    e_delt = (lane_ids == ROW_DELT).astype(f32)                    # one-hot lane 40
    e_one  = (lane_ids == ROW_ONE).astype(f32)                     # one-hot lane 41

    w_cls = w_cls_ref[...]                                         # (42, 128)
    b_cls = b_cls_ref[...]                                         # (1, 128)

    def step(t, carry):
        hid, targ = carry                                          # (U, 42) each
        u = users_ref[t]                                           # SMEM scalar reads
        v = targets_ref[t]
        delt = delts_ref[t]

        # Row select from the loop-carried state (payloads are lane-disjoint).
        h_u    = jnp.sum(jnp.where(row_ids == u, hid,  0.0), axis=0, keepdims=True)
        targ_v = jnp.sum(jnp.where(row_ids == v, targ, 0.0), axis=0, keepdims=True)

        # x = [h | targ | delt | 1] with no lane concatenation.
        x = h_u + targ_v + delt * e_delt + e_one                   # (1, 42)

        # Single fused block-diagonal matmul:
        #   gi = conc @ (W_agg o w_ih[u]) + (b_agg o w_ih[u] + b_ih[u])
        #   gh = h    @  w_hh[u]          +  b_hh[u]
        #   targ_new = conc @ W_info + b_info
        out = jnp.dot(x, w_full_ref[u], preferred_element_type=f32)  # (1, 896)

        # GRU cell (gate order r, z, n); all slices are 128-lane aligned.
        pre_rz = out[:, 0:2 * B] + out[:, 3 * B:5 * B]
        rz = jax.nn.sigmoid(pre_rz)
        r = rz[:, 0:B]
        z = rz[:, B:2 * B]
        n = jnp.tanh(out[:, 2 * B:3 * B] + r * out[:, 5 * B:6 * B])

        z42 = z[:, 0:XW]
        n42 = n[:, 0:XW]
        h_new = n42 + z42 * (h_u - n42)                 # (1,42), payload lanes 0:32
        targ_new = out[:, 6 * B:6 * B + XW]             # (1,42), payload lanes 32:40

        hid  = jnp.where(row_ids == u, h_new, hid)
        targ = jnp.where(row_ids == v, targ_new, targ)

        # Classifier + softmax.  The bias row holds -1e30 in lanes 10:127 so the
        # padded lanes contribute exactly zero and the store is lane-dense.
        logits = jnp.dot(h_new, w_cls, preferred_element_type=f32) + b_cls  # (1,128)
        m = jnp.max(logits, axis=-1, keepdims=True)
        e = jnp.exp(logits - m)
        s = jnp.sum(e, axis=-1, keepdims=True)
        inv = pl.reciprocal(s, approx=True)             # EUP
        inv = inv * (2.0 - s * inv)                     # one Newton step -> ~f32 exact
        probs_ref[pl.ds(t, 1), :] = e * inv

        return (hid, targ)

    hid_f, targ_f = lax.fori_loop(0, T, step,
                                  (hid0_ref[...], targ0_ref[...]),
                                  unroll=True)
    hid_ref[...] = hid_f
    targ_ref[...] = targ_f


# ------------------------------- wrapper --------------------------------------
def online_anom_forward_seq(users, targets, delts, hid0, targ0, packed):
    """Run T sequential events in one grid-less pallas_call.

    Returns (probs[T, 10], new_HID[num_users, H], new_TARG[num_users, D])."""
    D, H, U = INFO_DIM, GRU_HIDDEN, NUM_USERS
    T = int(users.shape[0])
    f32 = jnp.float32

    users = users.astype(jnp.int32)
    targets = targets.astype(jnp.int32)
    delts = jnp.asarray(delts, f32).reshape(T)

    # Pad state into the 42-lane carry layout (h at lanes 0:32, targ at 32:40).
    hid0_pad = jnp.zeros((U, X_WIDTH), f32).at[:, ROW_H:ROW_H + H].set(
        jnp.asarray(hid0, f32))
    targ0_pad = jnp.zeros((U, X_WIDTH), f32).at[:, ROW_TARG:ROW_TARG + D].set(
        jnp.asarray(targ0, f32))

    smem = pl.BlockSpec(memory_space=pltpu.MemorySpace.SMEM)
    vmem = pl.BlockSpec(memory_space=pltpu.MemorySpace.VMEM)

    probs, hid_new, targ_new = pl.pallas_call(
        online_anom_kernel,
        out_shape=(
            jax.ShapeDtypeStruct((T, LANE), f32),        # lane-dense probs
            jax.ShapeDtypeStruct((U, X_WIDTH), f32),     # final HID (padded layout)
            jax.ShapeDtypeStruct((U, X_WIDTH), f32),     # final TARG (padded layout)
        ),
        in_specs=[smem, smem, smem, vmem, vmem, vmem, vmem, vmem],
        out_specs=(vmem, vmem, vmem),
    )(users, targets, delts, hid0_pad, targ0_pad,
      packed["w_full"], packed["w_cls"], packed["b_cls"])

    return (probs[:, :NUM_CLS],
            hid_new[:, ROW_H:ROW_H + H],
            targ_new[:, ROW_TARG:ROW_TARG + D])


# ------------------ pack "natural" (PyTorch-like) params ----------------------
def pack_params(nat):
    """Build the fused, lane-padded kernel layouts from per-gate parameters."""
    D, G, H, U = INFO_DIM, GRU_INPUT, GRU_HIDDEN, NUM_USERS
    w_agg  = np.asarray(nat["w_agg"],  np.float32)   # (D+1, G), row 0 = delt
    b_agg  = np.asarray(nat["b_agg"],  np.float32)   # (G,)
    w_info = np.asarray(nat["w_info"], np.float32)   # (D+1, D)
    b_info = np.asarray(nat["b_info"], np.float32)   # (D,)
    w_ih   = np.asarray(nat["w_ih"],   np.float32)   # (U, 3, G, H) gates r,z,n
    w_hh   = np.asarray(nat["w_hh"],   np.float32)   # (U, 3, H, H)
    b_ih   = np.asarray(nat["b_ih"],   np.float32)   # (U, 3, H)
    b_hh   = np.asarray(nat["b_hh"],   np.float32)   # (U, 3, H)

    w_full = np.zeros((U, X_WIDTH, OUT_WIDTH), np.float32)
    for u in range(U):
        for g in range(3):                            # r, z, n
            gi_col = LANE * g
            gh_col = LANE * (3 + g)
            w_gi = w_agg @ w_ih[u, g]                 # (D+1, H): precomposed agg->gate
            b_gi = b_agg @ w_ih[u, g] + b_ih[u, g]    # (H,)
            w_full[u, ROW_DELT, gi_col:gi_col + H] = w_gi[0]
            w_full[u, ROW_TARG:ROW_TARG + D, gi_col:gi_col + H] = w_gi[1:1 + D]
            w_full[u, ROW_ONE, gi_col:gi_col + H] = b_gi
            w_full[u, ROW_H:ROW_H + H, gh_col:gh_col + H] = w_hh[u, g]
            w_full[u, ROW_ONE, gh_col:gh_col + H] = b_hh[u, g]
        # targ_new (info_up) block, emitted directly in TARG-carry lane layout.
        tcol = LANE * 6 + ROW_TARG
        w_full[u, ROW_DELT, tcol:tcol + D] = w_info[0]
        w_full[u, ROW_TARG:ROW_TARG + D, tcol:tcol + D] = w_info[1:1 + D]
        w_full[u, ROW_ONE, tcol:tcol + D] = b_info

    w_cls_slab = np.zeros((X_WIDTH, LANE), np.float32)
    w_cls_slab[ROW_H:ROW_H + H, 0:NUM_CLS] = np.asarray(nat["w_cls"], np.float32)
    b_cls_row = np.full((1, LANE), -1e30, np.float32)   # kills padded softmax lanes
    b_cls_row[0, 0:NUM_CLS] = np.asarray(nat["b_cls"], np.float32)

    return {"w_full": jnp.asarray(w_full),
            "w_cls": jnp.asarray(w_cls_slab),
            "b_cls": jnp.asarray(b_cls_row)}


# ------------------------- pure-JAX reference ---------------------------------
def reference_forward_seq(users, targets, delts, hid0, targ0, nat):
    HID = jnp.asarray(hid0)
    TARG = jnp.asarray(targ0)
    probs_all = []
    users_np = np.asarray(users)
    targets_np = np.asarray(targets)
    for t in range(users_np.shape[0]):
        u = int(users_np[t]); v = int(targets_np[t]); d = delts[t]
        conc = jnp.concatenate([jnp.reshape(d, (1,)), TARG[v]])           # (D+1,)
        agg = conc @ nat["w_agg"] + nat["b_agg"]                          # (G,)
        info = conc @ nat["w_info"] + nat["b_info"]                       # (D,)
        h = HID[u]
        gi = [agg @ nat["w_ih"][u, g] + nat["b_ih"][u, g] for g in range(3)]
        gh = [h @ nat["w_hh"][u, g] + nat["b_hh"][u, g] for g in range(3)]
        r = jax.nn.sigmoid(gi[0] + gh[0])
        z = jax.nn.sigmoid(gi[1] + gh[1])
        n = jnp.tanh(gi[2] + r * gh[2])
        h_new = (1.0 - z) * n + z * h
        HID = HID.at[u].set(h_new)
        TARG = TARG.at[v].set(info)
        logits = h_new @ nat["w_cls"] + nat["b_cls"]
        probs_all.append(jax.nn.softmax(logits))
    return jnp.stack(probs_all), HID, TARG


# ---------------------------------- main ---------------------------------------
if __name__ == "__main__":
    D, G, H, U = INFO_DIM, GRU_INPUT, GRU_HIDDEN, NUM_USERS
    T = 16  # number of events processed by a single pallas_call

    key = jax.random.PRNGKey(0)
    ks = jax.random.split(key, 20)

    def rnd(k, shape, scale=0.1):
        return (scale * jax.random.normal(k, shape)).astype(jnp.float32)

    nat = {
        "w_ih":   rnd(ks[0], (U, 3, G, H)),     # per-user, per-gate (r,z,n), pre-transposed
        "w_hh":   rnd(ks[1], (U, 3, H, H)),
        "b_ih":   rnd(ks[2], (U, 3, H)),
        "b_hh":   rnd(ks[3], (U, 3, H)),
        "w_agg":  rnd(ks[4], (D + 1, G)),       # row 0 = delt row
        "b_agg":  rnd(ks[5], (G,)),
        "w_info": rnd(ks[6], (D + 1, D)),
        "b_info": rnd(ks[7], (D,)),
        "w_cls":  rnd(ks[8], (H, NUM_CLS)),
        "b_cls":  rnd(ks[9], (NUM_CLS,)),
    }
    packed = pack_params(nat)

    hid0 = rnd(ks[10], (U, H), scale=1.0)       # self.GRU_HID
    targ0 = rnd(ks[11], (U, D), scale=1.0)      # self.TARG_LIST

    users = jax.random.randint(ks[12], (T,), 0, U, dtype=jnp.int32)
    targets = jax.random.randint(ks[13], (T,), 0, U, dtype=jnp.int32)
    delts = rnd(ks[14], (T,), scale=1.0)

    probs, hid_new, targ_new = online_anom_forward_seq(
        users, targets, delts, hid0, targ0, packed)
    probs = jax.block_until_ready(probs)
    hid_new = jax.block_until_ready(hid_new)
    targ_new = jax.block_until_ready(targ_new)

    ref_probs, ref_hid, ref_targ = reference_forward_seq(
        users, targets, delts, hid0, targ0, nat)

    # probs go through the EUP approx-reciprocal + Newton step -> slightly looser tol;
    # the agg∘w_ih precomposition reassociates f32 sums -> keep tolerances loose-ish.
    np.testing.assert_allclose(np.asarray(probs), np.asarray(ref_probs),
                               rtol=1e-3, atol=1e-5)
    np.testing.assert_allclose(np.asarray(jnp.sum(probs, axis=-1)),
                               np.ones((T,)), rtol=1e-3, atol=1e-4)
    np.testing.assert_allclose(np.asarray(hid_new), np.asarray(ref_hid),
                               rtol=5e-4, atol=1e-5)
    np.testing.assert_allclose(np.asarray(targ_new), np.asarray(ref_targ),
                               rtol=5e-4, atol=1e-5)

    print("KERNEL_OK")
</pallas_src>

<mosaic_0001>
module attributes {stable_mosaic.version = 11 : i64} {
  func.func @online_anom_kernel(%arg0: memref<16xi32, #tpu.memory_space<smem>>, %arg1: memref<16xi32, #tpu.memory_space<smem>>, %arg2: memref<16xf32, #tpu.memory_space<smem>>, %arg3: memref<4x42xf32, #tpu.memory_space<vmem>>, %arg4: memref<4x42xf32, #tpu.memory_space<vmem>>, %arg5: memref<4x42x896xf32, #tpu.memory_space<vmem>>, %arg6: memref<42x128xf32, #tpu.memory_space<vmem>>, %arg7: memref<1x128xf32, #tpu.memory_space<vmem>>, %arg8: memref<16x128xf32, #tpu.memory_space<vmem>>, %arg9: memref<4x42xf32, #tpu.memory_space<vmem>>, %arg10: memref<4x42xf32, #tpu.memory_space<vmem>>) attributes {dimension_semantics = [], scalar_prefetch = 0 : i64, scratch_operands = 0 : i64, tpu.core_type = #tpu.core_type<tc>} {
    %0 = tpu.iota {dimensions = array<i32: 0>} : vector<4x1xi32>
    %1 = tpu.iota {dimensions = array<i32: 1>} : vector<1x42xi32>
    %c40_i32 = arith.constant 40 : i32
    %2 = vector.broadcast %c40_i32 : i32 to vector<1x42xi32>
    %3 = arith.cmpi eq, %1, %2 : vector<1x42xi32>
    %4 = arith.extui %3 : vector<1x42xi1> to vector<1x42xi32>
    %5 = arith.sitofp %4 : vector<1x42xi32> to vector<1x42xf32>
    %c41_i32 = arith.constant 41 : i32
    %6 = vector.broadcast %c41_i32 : i32 to vector<1x42xi32>
    %7 = arith.cmpi eq, %1, %6 : vector<1x42xi32>
    %8 = arith.extui %7 : vector<1x42xi1> to vector<1x42xi32>
    %9 = arith.sitofp %8 : vector<1x42xi32> to vector<1x42xf32>
    %c0 = arith.constant 0 : index
    %c0_0 = arith.constant 0 : index
    %10 = vector.load %arg6[%c0, %c0_0] : memref<42x128xf32, #tpu.memory_space<vmem>>, vector<42x128xf32>
    %c0_1 = arith.constant 0 : index
    %c0_2 = arith.constant 0 : index
    %11 = vector.load %arg7[%c0_1, %c0_2] : memref<1x128xf32, #tpu.memory_space<vmem>>, vector<1x128xf32>
    %c0_3 = arith.constant 0 : index
    %c0_4 = arith.constant 0 : index
    %12 = vector.load %arg3[%c0_3, %c0_4] : memref<4x42xf32, #tpu.memory_space<vmem>>, vector<4x42xf32>
    %c0_5 = arith.constant 0 : index
    %c0_6 = arith.constant 0 : index
    %13 = vector.load %arg4[%c0_5, %c0_6] : memref<4x42xf32, #tpu.memory_space<vmem>>, vector<4x42xf32>
    %c0_i32 = arith.constant 0 : i32
    %14 = arith.index_cast %c0_i32 : i32 to index
    %15 = memref.load %arg0[%14] : memref<16xi32, #tpu.memory_space<smem>>
    %16 = arith.index_cast %c0_i32 : i32 to index
    %17 = memref.load %arg1[%16] : memref<16xi32, #tpu.memory_space<smem>>
    %18 = arith.index_cast %c0_i32 : i32 to index
    %19 = memref.load %arg2[%18] : memref<16xf32, #tpu.memory_space<smem>>
    %20 = vector.broadcast %15 : i32 to vector<4x1xi32>
    %21 = arith.cmpi eq, %0, %20 : vector<4x1xi32>
    %cst = arith.constant 0.000000e+00 : f32
    %22 = vector.shape_cast %21 : vector<4x1xi1> to vector<4x1xi1>
    %23 = vector.broadcast %22 : vector<4x1xi1> to vector<4x42xi1>
    %24 = vector.broadcast %cst : f32 to vector<4x42xf32>
    %25 = arith.select %23, %12, %24 : vector<4x42xi1>, vector<4x42xf32>
    %cst_7 = arith.constant dense<0.000000e+00> : vector<42xf32>
    %26 = vector.multi_reduction <add>, %25, %cst_7 [0] : vector<4x42xf32> to vector<42xf32>
    %27 = vector.shape_cast %26 : vector<42xf32> to vector<1x42xf32>
    %28 = vector.broadcast %17 : i32 to vector<4x1xi32>
    %29 = arith.cmpi eq, %0, %28 : vector<4x1xi32>
    %cst_8 = arith.constant 0.000000e+00 : f32
    %30 = vector.shape_cast %29 : vector<4x1xi1> to vector<4x1xi1>
    %31 = vector.broadcast %30 : vector<4x1xi1> to vector<4x42xi1>
    %32 = vector.broadcast %cst_8 : f32 to vector<4x42xf32>
    %33 = arith.select %31, %13, %32 : vector<4x42xi1>, vector<4x42xf32>
    %cst_9 = arith.constant dense<0.000000e+00> : vector<42xf32>
    %34 = vector.multi_reduction <add>, %33, %cst_9 [0] : vector<4x42xf32> to vector<42xf32>
    %35 = vector.shape_cast %34 : vector<42xf32> to vector<1x42xf32>
    %36 = arith.addf %27, %35 : vector<1x42xf32>
    %37 = vector.broadcast %19 : f32 to vector<1x42xf32>
    %38 = arith.mulf %37, %5 : vector<1x42xf32>
    %39 = arith.addf %36, %38 : vector<1x42xf32>
    %40 = arith.addf %39, %9 : vector<1x42xf32>
    %41 = arith.index_cast %15 : i32 to index
    %c0_10 = arith.constant 0 : index
    %c0_11 = arith.constant 0 : index
    %42 = vector.load %arg5[%41, %c0_10, %c0_11] : memref<4x42x896xf32, #tpu.memory_space<vmem>>, vector<1x42x896xf32>
    %43 = vector.shape_cast %42 : vector<1x42x896xf32> to vector<42x896xf32>
    %cst_12 = arith.constant dense<0.000000e+00> : vector<1x896xf32>
    %44 = tpu.matmul %40, %43, %cst_12 {dimension_numbers = #tpu.dot_dimension_numbers<[1], [0], [0], [1], [0, 0, 1, 1], [], []>} : vector<1x42xf32>, vector<42x896xf32>, vector<1x896xf32> -> vector<1x896xf32>
    %45 = vector.extract_strided_slice %44 {offsets = [0, 0], sizes = [1, 256], strides = [1, 1]} : vector<1x896xf32> to vector<1x256xf32>
    %46 = vector.extract_strided_slice %44 {offsets = [0, 384], sizes = [1, 256], strides = [1, 1]} : vector<1x896xf32> to vector<1x256xf32>
    %47 = arith.addf %45, %46 : vector<1x256xf32>
    %48 = arith.negf %47 : vector<1x256xf32>
    %49 = math.exp %48 : vector<1x256xf32>
    %cst_13 = arith.constant 1.000000e+00 : f32
    %50 = vector.broadcast %cst_13 : f32 to vector<1x256xf32>
    %51 = arith.addf %50, %49 : vector<1x256xf32>
    %52 = arith.divf %50, %51 : vector<1x256xf32>
    %53 = vector.extract_strided_slice %52 {offsets = [0, 0], sizes = [1, 128], strides = [1, 1]} : vector<1x256xf32> to vector<1x128xf32>
    %54 = vector.extract_strided_slice %52 {offsets = [0, 128], sizes = [1, 128], strides = [1, 1]} : vector<1x256xf32> to vector<1x128xf32>
    %55 = vector.extract_strided_slice %44 {offsets = [0, 256], sizes = [1, 128], strides = [1, 1]} : vector<1x896xf32> to vector<1x128xf32>
    %56 = vector.extract_strided_slice %44 {offsets = [0, 640], sizes = [1, 128], strides = [1, 1]} : vector<1x896xf32> to vector<1x128xf32>
    %57 = arith.mulf %53, %56 : vector<1x128xf32>
    %58 = arith.addf %55, %57 : vector<1x128xf32>
    %59 = math.tanh %58 : vector<1x128xf32>
    %60 = vector.extract_strided_slice %54 {offsets = [0, 0], sizes = [1, 42], strides = [1, 1]} : vector<1x128xf32> to vector<1x42xf32>
    %61 = vector.extract_strided_slice %59 {offsets = [0, 0], sizes = [1, 42], strides = [1, 1]} : vector<1x128xf32> to vector<1x42xf32>
    %62 = arith.subf %27, %61 : vector<1x42xf32>
    %63 = arith.mulf %60, %62 : vector<1x42xf32>
    %64 = arith.addf %61, %63 : vector<1x42xf32>
    %65 = vector.extract_strided_slice %44 {offsets = [0, 768], sizes = [1, 42], strides = [1, 1]} : vector<1x896xf32> to vector<1x42xf32>
    %66 = vector.broadcast %15 : i32 to vector<4x1xi32>
    %67 = arith.cmpi eq, %0, %66 : vector<4x1xi32>
    %68 = vector.shape_cast %67 : vector<4x1xi1> to vector<4x1xi1>
    %69 = vector.broadcast %68 : vector<4x1xi1> to vector<4x42xi1>
    %70 = vector.shape_cast %64 : vector<1x42xf32> to vector<1x42xf32>
    %71 = vector.broadcast %70 : vector<1x42xf32> to vector<4x42xf32>
    %72 = arith.select %69, %71, %12 : vector<4x42xi1>, vector<4x42xf32>
    %73 = vector.broadcast %17 : i32 to vector<4x1xi32>
    %74 = arith.cmpi eq, %0, %73 : vector<4x1xi32>
    %75 = vector.shape_cast %74 : vector<4x1xi1> to vector<4x1xi1>
    %76 = vector.broadcast %75 : vector<4x1xi1> to vector<4x42xi1>
    %77 = vector.shape_cast %65 : vector<1x42xf32> to vector<1x42xf32>
    %78 = vector.broadcast %77 : vector<1x42xf32> to vector<4x42xf32>
    %79 = arith.select %76, %78, %13 : vector<4x42xi1>, vector<4x42xf32>
    %cst_14 = arith.constant dense<0.000000e+00> : vector<1x128xf32>
    %80 = tpu.matmul %64, %10, %cst_14 {dimension_numbers = #tpu.dot_dimension_numbers<[1], [0], [0], [1], [0, 0, 1, 1], [], []>} : vector<1x42xf32>, vector<42x128xf32>, vector<1x128xf32> -> vector<1x128xf32>
    %81 = arith.addf %80, %11 : vector<1x128xf32>
    %cst_15 = arith.constant dense<0xFF800000> : vector<1xf32>
    %82 = vector.multi_reduction <maximumf>, %81, %cst_15 [1] : vector<1x128xf32> to vector<1xf32>
    %83 = vector.shape_cast %82 : vector<1xf32> to vector<1x1xf32>
    %84 = vector.broadcast %83 : vector<1x1xf32> to vector<1x128xf32>
    %85 = arith.subf %81, %84 : vector<1x128xf32>
    %86 = math.exp %85 : vector<1x128xf32>
    %cst_16 = arith.constant dense<0.000000e+00> : vector<1xf32>
    %87 = vector.multi_reduction <add>, %86, %cst_16 [1] : vector<1x128xf32> to vector<1xf32>
    %88 = vector.shape_cast %87 : vector<1xf32> to vector<1x1xf32>
    %89 = tpu.reciprocal %88 {approx = true} : vector<1x1xf32> -> vector<1x1xf32>
    %90 = arith.mulf %88, %89 : vector<1x1xf32>
    %cst_17 = arith.constant 2.000000e+00 : f32
    %91 = vector.broadcast %cst_17 : f32 to vector<1x1xf32>
    %92 = arith.subf %91, %90 : vector<1x1xf32>
    %93 = arith.mulf %89, %92 : vector<1x1xf32>
    %94 = vector.broadcast %93 : vector<1x1xf32> to vector<1x128xf32>
    %95 = arith.mulf %86, %94 : vector<1x128xf32>
    %96 = arith.index_cast %c0_i32 : i32 to index
    %c0_18 = arith.constant 0 : index
    %97 = vector.load %arg8[%96, %c0_18] : memref<16x128xf32, #tpu.memory_space<vmem>>, vector<1x128xf32>
    tpu.vector_store %arg8[%96, %c0_18], %95 {strides = array<i32>} : memref<16x128xf32, #tpu.memory_space<vmem>>, vector<1x128xf32>,
    %c1_i32 = arith.constant 1 : i32
    %98 = arith.index_cast %c1_i32 : i32 to index
    %99 = memref.load %arg0[%98] : memref<16xi32, #tpu.memory_space<smem>>
    %100 = arith.index_cast %c1_i32 : i32 to index
    %101 = memref.load %arg1[%100] : memref<16xi32, #tpu.memory_space<smem>>
    %102 = arith.index_cast %c1_i32 : i32 to index
    %103 = memref.load %arg2[%102] : memref<16xf32, #tpu.memory_space<smem>>
    %104 = vector.broadcast %99 : i32 to vector<4x1xi32>
    %105 = arith.cmpi eq, %0, %104 : vector<4x1xi32>
    %cst_19 = arith.constant 0.000000e+00 : f32
    %106 = vector.shape_cast %105 : vector<4x1xi1> to vector<4x1xi1>
    %107 = vector.broadcast %106 : vector<4x1xi1> to vector<4x42xi1>
    %108 = vector.broadcast %cst_19 : f32 to vector<4x42xf32>
    %109 = arith.select %107, %72, %108 : vector<4x42xi1>, vector<4x42xf32>
    %cst_20 = arith.constant dense<0.000000e+00> : vector<42xf32>
    %110 = vector.multi_reduction <add>, %109, %cst_20 [0] : vector<4x42xf32> to vector<42xf32>
    %111 = vector.shape_cast %110 : vector<42xf32> to vector<1x42xf32>
    %112 = vector.broadcast %101 : i32 to vector<4x1xi32>
    %113 = arith.cmpi eq, %0, %112 : vector<4x1xi32>
    %cst_21 = arith.constant 0.000000e+00 : f32
    %114 = vector.shape_cast %113 : vector<4x1xi1> to vector<4x1xi1>
    %115 = vector.broadcast %114 : vector<4x1xi1> to vector<4x42xi1>
    %116 = vector.broadcast %cst_21 : f32 to vector<4x42xf32>
    %117 = arith.select %115, %79, %116 : vector<4x42xi1>, vector<4x42xf32>
    %cst_22 = arith.constant dense<0.000000e+00> : vector<42xf32>
    %118 = vector.multi_reduction <add>, %117, %cst_22 [0] : vector<4x42xf32> to vector<42xf32>
    %119 = vector.shape_cast %118 : vector<42xf32> to vector<1x42xf32>
    %120 = arith.addf %111, %119 : vector<1x42xf32>
    %121 = vector.broadcast %103 : f32 to vector<1x42xf32>
    %122 = arith.mulf %121, %5 : vector<1x42xf32>
    %123 = arith.addf %120, %122 : vector<1x42xf32>
    %124 = arith.addf %123, %9 : vector<1x42xf32>
    %125 = arith.index_cast %99 : i32 to index
    %c0_23 = arith.constant 0 : index
    %c0_24 = arith.constant 0 : index
    %126 = vector.load %arg5[%125, %c0_23, %c0_24] : memref<4x42x896xf32, #tpu.memory_space<vmem>>, vector<1x42x896xf32>
    %127 = vector.shape_cast %126 : vector<1x42x896xf32> to vector<42x896xf32>
    %cst_25 = arith.constant dense<0.000000e+00> : vector<1x896xf32>
    %128 = tpu.matmul %124, %127, %cst_25 {dimension_numbers = #tpu.dot_dimension_numbers<[1], [0], [0], [1], [0, 0, 1, 1], [], []>} : vector<1x42xf32>, vector<42x896xf32>, vector<1x896xf32> -> vector<1x896xf32>
    %129 = vector.extract_strided_slice %128 {offsets = [0, 0], sizes = [1, 256], strides = [1, 1]} : vector<1x896xf32> to vector<1x256xf32>
    %130 = vector.extract_strided_slice %128 {offsets = [0, 384], sizes = [1, 256], strides = [1, 1]} : vector<1x896xf32> to vector<1x256xf32>
    %131 = arith.addf %129, %130 : vector<1x256xf32>
    %132 = arith.negf %131 : vector<1x256xf32>
    %133 = math.exp %132 : vector<1x256xf32>
    %cst_26 = arith.constant 1.000000e+00 : f32
    %134 = vector.broadcast %cst_26 : f32 to vector<1x256xf32>
    %135 = arith.addf %134, %133 : vector<1x256xf32>
    %136 = arith.divf %134, %135 : vector<1x256xf32>
    %137 = vector.extract_strided_slice %136 {offsets = [0, 0], sizes = [1, 128], strides = [1, 1]} : vector<1x256xf32> to vector<1x128xf32>
    %138 = vector.extract_strided_slice %136 {offsets = [0, 128], sizes = [1, 128], strides = [1, 1]} : vector<1x256xf32> to vector<1x128xf32>
    %139 = vector.extract_strided_slice %128 {offsets = [0, 256], sizes = [1, 128], strides = [1, 1]} : vector<1x896xf32> to vector<1x128xf32>
    %140 = vector.extract_strided_slice %128 {offsets = [0, 640], sizes = [1, 128], strides = [1, 1]} : vector<1x896xf32> to vector<1x128xf32>
    %141 = arith.mulf %137, %140 : vector<1x128xf32>
    %142 = arith.addf %139, %141 : vector<1x128xf32>
    %143 = math.tanh %142 : vector<1x128xf32>
    %144 = vector.extract_strided_slice %138 {offsets = [0, 0], sizes = [1, 42], strides = [1, 1]} : vector<1x128xf32> to vector<1x42xf32>
    %145 = vector.extract_strided_slice %143 {offsets = [0, 0], sizes = [1, 42], strides = [1, 1]} : vector<1x128xf32> to vector<1x42xf32>
    %146 = arith.subf %111, %145 : vector<1x42xf32>
    %147 = arith.mulf %144, %146 : vector<1x42xf32>
    %148 = arith.addf %145, %147 : vector<1x42xf32>
    %149 = vector.extract_strided_slice %128 {offsets = [0, 768], sizes = [1, 42], strides = [1, 1]} : vector<1x896xf32> to vector<1x42xf32>
    %150 = vector.broadcast %99 : i32 to vector<4x1xi32>
    %151 = arith.cmpi eq, %0, %150 : vector<4x1xi32>
    %152 = vector.shape_cast %151 : vector<4x1xi1> to vector<4x1xi1>
    %153 = vector.broadcast %152 : vector<4x1xi1> to vector<4x42xi1>
    %154 = vector.shape_cast %148 : vector<1x42xf32> to vector<1x42xf32>
    %155 = vector.broadcast %154 : vector<1x42xf32> to vector<4x42xf32>
    %156 = arith.select %153, %155, %72 : vector<4x42xi1>, vector<4x42xf32>
    %157 = vector.broadcast %101 : i32 to vector<4x1xi32>
    %158 = arith.cmpi eq, %0, %157 : vector<4x1xi32>
    %159 = vector.shape_cast %158 : vector<4x1xi1> to vector<4x1xi1>
    %160 = vector.broadcast %159 : vector<4x1xi1> to vector<4x42xi1>
    %161 = vector.shape_cast %149 : vector<1x42xf32> to vector<1x42xf32>
    %162 = vector.broadcast %161 : vector<1x42xf32> to vector<4x42xf32>
    %163 = arith.select %160, %162, %79 : vector<4x42xi1>, vector<4x42xf32>
    %cst_27 = arith.constant dense<0.000000e+00> : vector<1x128xf32>
    %164 = tpu.matmul %148, %10, %cst_27 {dimension_numbers = #tpu.dot_dimension_numbers<[1], [0], [0], [1], [0, 0, 1, 1], [], []>} : vector<1x42xf32>, vector<42x128xf32>, vector<1x128xf32> -> vector<1x128xf32>
    %165 = arith.addf %164, %11 : vector<1x128xf32>
    %cst_28 = arith.constant dense<0xFF800000> : vector<1xf32>
    %166 = vector.multi_reduction <maximumf>, %165, %cst_28 [1] : vector<1x128xf32> to vector<1xf32>
    %167 = vector.shape_cast %166 : vector<1xf32> to vector<1x1xf32>
    %168 = vector.broadcast %167 : vector<1x1xf32> to vector<1x128xf32>
    %169 = arith.subf %165, %168 : vector<1x128xf32>
    %170 = math.exp %169 : vector<1x128xf32>
    %cst_29 = arith.constant dense<0.000000e+00> : vector<1xf32>
    %171 = vector.multi_reduction <add>, %170, %cst_29 [1] : vector<1x128xf32> to vector<1xf32>
    %172 = vector.shape_cast %171 : vector<1xf32> to vector<1x1xf32>
    %173 = tpu.reciprocal %172 {approx = true} : vector<1x1xf32> -> vector<1x1xf32>
    %174 = arith.mulf %172, %173 : vector<1x1xf32>
    %cst_30 = arith.constant 2.000000e+00 : f32
    %175 = vector.broadcast %cst_30 : f32 to vector<1x1xf32>
    %176 = arith.subf %175, %174 : vector<1x1xf32>
    %177 = arith.mulf %173, %176 : vector<1x1xf32>
    %178 = vector.broadcast %177 : vector<1x1xf32> to vector<1x128xf32>
    %179 = arith.mulf %170, %178 : vector<1x128xf32>
    %180 = arith.index_cast %c1_i32 : i32 to index
    %c0_31 = arith.constant 0 : index
    %181 = vector.load %arg8[%180, %c0_31] : memref<16x128xf32, #tpu.memory_space<vmem>>, vector<1x128xf32>
    tpu.vector_store %arg8[%180, %c0_31], %179 {strides = array<i32>} : memref<16x128xf32, #tpu.memory_space<vmem>>, vector<1x128xf32>,
    %c2_i32 = arith.constant 2 : i32
    %182 = arith.index_cast %c2_i32 : i32 to index
    %183 = memref.load %arg0[%182] : memref<16xi32, #tpu.memory_space<smem>>
    %184 = arith.index_cast %c2_i32 : i32 to index
    %185 = memref.load %arg1[%184] : memref<16xi32, #tpu.memory_space<smem>>
    %186 = arith.index_cast %c2_i32 : i32 to index
    %187 = memref.load %arg2[%186] : memref<16xf32, #tpu.memory_space<smem>>
    %188 = vector.broadcast %183 : i32 to vector<4x1xi32>
    %189 = arith.cmpi eq, %0, %188 : vector<4x1xi32>
    %cst_32 = arith.constant 0.000000e+00 : f32
    %190 = vector.shape_cast %189 : vector<4x1xi1> to vector<4x1xi1>
    %191 = vector.broadcast %190 : vector<4x1xi1> to vector<4x42xi1>
    %192 = vector.broadcast %cst_32 : f32 to vector<4x42xf32>
    %193 = arith.select %191, %156, %192 : vector<4x42xi1>, vector<4x42xf32>
    %cst_33 = arith.constant dense<0.000000e+00> : vector<42xf32>
    %194 = vector.multi_reduction <add>, %193, %cst_33 [0] : vector<4x42xf32> to vector<42xf32>
    %195 = vector.shape_cast %194 : vector<42xf32> to vector<1x42xf32>
    %196 = vector.broadcast %185 : i32 to vector<4x1xi32>
    %197 = arith.cmpi eq, %0, %196 : vector<4x1xi32>
    %cst_34 = arith.constant 0.000000e+00 : f32
    %198 = vector.shape_cast %197 : vector<4x1xi1> to vector<4x1xi1>
    %199 = vector.broadcast %198 : vector<4x1xi1> to vector<4x42xi1>
    %200 = vector.broadcast %cst_34 : f32 to vector<4x42xf32>
    %201 = arith.select %199, %163, %200 : vector<4x42xi1>, vector<4x42xf32>
    %cst_35 = arith.constant dense<0.000000e+00> : vector<42xf32>
    %202 = vector.multi_reduction <add>, %201, %cst_35 [0] : vector<4x42xf32> to vector<42xf32>
    %203 = vector.shape_cast %202 : vector<42xf32> to vector<1x42xf32>
    %204 = arith.addf %195, %203 : vector<1x42xf32>
    %205 = vector.broadcast %187 : f32 to vector<1x42xf32>
    %206 = arith.mulf %205, %5 : vector<1x42xf32>
    %207 = arith.addf %204, %206 : vector<1x42xf32>
    %208 = arith.addf %207, %9 : vector<1x42xf32>
    %209 = arith.index_cast %183 : i32 to index
    %c0_36 = arith.constant 0 : index
    %c0_37 = arith.constant 0 : index
    %210 = vector.load %arg5[%209, %c0_36, %c0_37] : memref<4x42x896xf32, #tpu.memory_space<vmem>>, vector<1x42x896xf32>
    %211 = vector.shape_cast %210 : vector<1x42x896xf32> to vector<42x896xf32>
    %cst_38 = arith.constant dense<0.000000e+00> : vector<1x896xf32>
    %212 = tpu.matmul %208, %211, %cst_38 {dimension_numbers = #tpu.dot_dimension_numbers<[1], [0], [0], [1], [0, 0, 1, 1], [], []>} : vector<1x42xf32>, vector<42x896xf32>, vector<1x896xf32> -> vector<1x896xf32>
    %213 = vector.extract_strided_slice %212 {offsets = [0, 0], sizes = [1, 256], strides = [1, 1]} : vector<1x896xf32> to vector<1x256xf32>
    %214 = vector.extract_strided_slice %212 {offsets = [0, 384], sizes = [1, 256], strides = [1, 1]} : vector<1x896xf32> to vector<1x256xf32>
    %215 = arith.addf %213, %214 : vector<1x256xf32>
    %216 = arith.negf %215 : vector<1x256xf32>
    %217 = math.exp %216 : vector<1x256xf32>
    %cst_39 = arith.constant 1.000000e+00 : f32
    %218 = vector.broadcast %cst_39 : f32 to vector<1x256xf32>
    %219 = arith.addf %218, %217 : vector<1x256xf32>
    %220 = arith.divf %218, %219 : vector<1x256xf32>
    %221 = vector.extract_strided_slice %220 {offsets = [0, 0], sizes = [1, 128], strides = [1, 1]} : vector<1x256xf32> to vector<1x128xf32>
    %222 = vector.extract_strided_slice %220 {offsets = [0, 128], sizes = [1, 128], strides = [1, 1]} : vector<1x256xf32> to vector<1x128xf32>
    %223 = vector.extract_strided_slice %212 {offsets = [0, 256], sizes = [1, 128], strides = [1, 1]} : vector<1x896xf32> to vector<1x128xf32>
    %224 = vector.extract_strided_slice %212 {offsets = [0, 640], sizes = [1, 128], strides = [1, 1]} : vector<1x896xf32> to vector<1x128xf32>
    %225 = arith.mulf %221, %224 : vector<1x128xf32>
    %226 = arith.addf %223, %225 : vector<1x128xf32>
    %227 = math.tanh %226 : vector<1x128xf32>
    %228 = vector.extract_strided_slice %222 {offsets = [0, 0], sizes = [1, 42], strides = [1, 1]} : vector<1x128xf32> to vector<1x42xf32>
    %229 = vector.extract_strided_slice %227 {offsets = [0, 0], sizes = [1, 42], strides = [1, 1]} : vector<1x128xf32> to vector<1x42xf32>
    %230 = arith.subf %195, %229 : vector<1x42xf32>
    %231 = arith.mulf %228, %230 : vector<1x42xf32>
    %232 = arith.addf %229, %231 : vector<1x42xf32>
    %233 = vector.extract_strided_slice %212 {offsets = [0, 768], sizes = [1, 42], strides = [1, 1]} : vector<1x896xf32> to vector<1x42xf32>
    %234 = vector.broadcast %183 : i32 to vector<4x1xi32>
    %235 = arith.cmpi eq, %0, %234 : vector<4x1xi32>
    %236 = vector.shape_cast %235 : vector<4x1xi1> to vector<4x1xi1>
    %237 = vector.broadcast %236 : vector<4x1xi1> to vector<4x42xi1>
    %238 = vector.shape_cast %232 : vector<1x42xf32> to vector<1x42xf32>
    %239 = vector.broadcast %238 : vector<1x42xf32> to vector<4x42xf32>
    %240 = arith.select %237, %239, %156 : vector<4x42xi1>, vector<4x42xf32>
    %241 = vector.broadcast %185 : i32 to vector<4x1xi32>
    %242 = arith.cmpi eq, %0, %241 : vector<4x1xi32>
    %243 = vector.shape_cast %242 : vector<4x1xi1> to vector<4x1xi1>
    %244 = vector.broadcast %243 : vector<4x1xi1> to vector<4x42xi1>
    %245 = vector.shape_cast %233 : vector<1x42xf32> to vector<1x42xf32>
    %246 = vector.broadcast %245 : vector<1x42xf32> to vector<4x42xf32>
    %247 = arith.select %244, %246, %163 : vector<4x42xi1>, vector<4x42xf32>
    %cst_40 = arith.constant dense<0.000000e+00> : vector<1x128xf32>
    %248 = tpu.matmul %232, %10, %cst_40 {dimension_numbers = #tpu.dot_dimension_numbers<[1], [0], [0], [1], [0, 0, 1, 1], [], []>} : vector<1x42xf32>, vector<42x128xf32>, vector<1x128xf32> -> vector<1x128xf32>
    %249 = arith.addf %248, %11 : vector<1x128xf32>
    %cst_41 = arith.constant dense<0xFF800000> : vector<1xf32>
    %250 = vector.multi_reduction <maximumf>, %249, %cst_41 [1] : vector<1x128xf32> to vector<1xf32>
    %251 = vector.shape_cast %250 : vector<1xf32> to vector<1x1xf32>
    %252 = vector.broadcast %251 : vector<1x1xf32> to vector<1x128xf32>
    %253 = arith.subf %249, %252 : vector<1x128xf32>
    %254 = math.exp %253 : vector<1x128xf32>
    %cst_42 = arith.constant dense<0.000000e+00> : vector<1xf32>
    %255 = vector.multi_reduction <add>, %254, %cst_42 [1] : vector<1x128xf32> to vector<1xf32>
    %256 = vector.shape_cast %255 : vector<1xf32> to vector<1x1xf32>
    %257 = tpu.reciprocal %256 {approx = true} : vector<1x1xf32> -> vector<1x1xf32>
    %258 = arith.mulf %256, %257 : vector<1x1xf32>
    %cst_43 = arith.constant 2.000000e+00 : f32
    %259 = vector.broadcast %cst_43 : f32 to vector<1x1xf32>
    %260 = arith.subf %259, %258 : vector<1x1xf32>
    %261 = arith.mulf %257, %260 : vector<1x1xf32>
    %262 = vector.broadcast %261 : vector<1x1xf32> to vector<1x128xf32>
    %263 = arith.mulf %254, %262 : vector<1x128xf32>
    %264 = arith.index_cast %c2_i32 : i32 to index
    %c0_44 = arith.constant 0 : index
    %265 = vector.load %arg8[%264, %c0_44] : memref<16x128xf32, #tpu.memory_space<vmem>>, vector<1x128xf32>
    tpu.vector_store %arg8[%264, %c0_44], %263 {strides = array<i32>} : memref<16x128xf32, #tpu.memory_space<vmem>>, vector<1x128xf32>,
    %c3_i32 = arith.constant 3 : i32
    %266 = arith.index_cast %c3_i32 : i32 to index
    %267 = memref.load %arg0[%266] : memref<16xi32, #tpu.memory_space<smem>>
    %268 = arith.index_cast %c3_i32 : i32 to index
    %269 = memref.load %arg1[%268] : memref<16xi32, #tpu.memory_space<smem>>
    %270 = arith.index_cast %c3_i32 : i32 to index
    %271 = memref.load %arg2[%270] : memref<16xf32, #tpu.memory_space<smem>>
    %272 = vector.broadcast %267 : i32 to vector<4x1xi32>
    %273 = arith.cmpi eq, %0, %272 : vector<4x1xi32>
    %cst_45 = arith.constant 0.000000e+00 : f32
    %274 = vector.shape_cast %273 : vector<4x1xi1> to vector<4x1xi1>
    %275 = vector.broadcast %274 : vector<4x1xi1> to vector<4x42xi1>
    %276 = vector.broadcast %cst_45 : f32 to vector<4x42xf32>
    %277 = arith.select %275, %240, %276 : vector<4x42xi1>, vector<4x42xf32>
    %cst_46 = arith.constant dense<0.000000e+00> : vector<42xf32>
    %278 = vector.multi_reduction <add>, %277, %cst_46 [0] : vector<4x42xf32> to vector<42xf32>
    %279 = vector.shape_cast %278 : vector<42xf32> to vector<1x42xf32>
    %280 = vector.broadcast %269 : i32 to vector<4x1xi32>
    %281 = arith.cmpi eq, %0, %280 : vector<4x1xi32>
    %cst_47 = arith.constant 0.000000e+00 : f32
    %282 = vector.shape_cast %281 : vector<4x1xi1> to vector<4x1xi1>
    %283 = vector.broadcast %282 : vector<4x1xi1> to vector<4x42xi1>
    %284 = vector.broadcast %cst_47 : f32 to vector<4x42xf32>
    %285 = arith.select %283, %247, %284 : vector<4x42xi1>, vector<4x42xf32>
    %cst_48 = arith.constant dense<0.000000e+00> : vector<42xf32>
    %286 = vector.multi_reduction <add>, %285, %cst_48 [0] : vector<4x42xf32> to vector<42xf32>
    %287 = vector.shape_cast %286 : vector<42xf32> to vector<1x42xf32>
    %288 = arith.addf %279, %287 : vector<1x42xf32>
    %289 = vector.broadcast %271 : f32 to vector<1x42xf32>
    %290 = arith.mulf %289, %5 : vector<1x42xf32>
    %291 = arith.addf %288, %290 : vector<1x42xf32>
    %292 = arith.addf %291, %9 : vector<1x42xf32>
    %293 = arith.index_cast %267 : i32 to index
    %c0_49 = arith.constant 0 : index
    %c0_50 = arith.constant 0 : index
    %294 = vector.load %arg5[%293, %c0_49, %c0_50] : memref<4x42x896xf32, #tpu.memory_space<vmem>>, vector<1x42x896xf32>
    %295 = vector.shape_cast %294 : vector<1x42x896xf32> to vector<42x896xf32>
    %cst_51 = arith.constant dense<0.000000e+00> : vector<1x896xf32>
    %296 = tpu.matmul %292, %295, %cst_51 {dimension_numbers = #tpu.dot_dimension_numbers<[1], [0], [0], [1], [0, 0, 1, 1], [], []>} : vector<1x42xf32>, vector<42x896xf32>, vector<1x896xf32> -> vector<1x896xf32>
    %297 = vector.extract_strided_slice %296 {offsets = [0, 0], sizes = [1, 256], strides = [1, 1]} : vector<1x896xf32> to vector<1x256xf32>
    %298 = vector.extract_strided_slice %296 {offsets = [0, 384], sizes = [1, 256], strides = [1, 1]} : vector<1x896xf32> to vector<1x256xf32>
    %299 = arith.addf %297, %298 : vector<1x256xf32>
    %300 = arith.negf %299 : vector<1x256xf32>
    %301 = math.exp %300 : vector<1x256xf32>
    %cst_52 = arith.constant 1.000000e+00 : f32
    %302 = vector.broadcast %cst_52 : f32 to vector<1x256xf32>
    %303 = arith.addf %302, %301 : vector<1x256xf32>
    %304 = arith.divf %302, %303 : vector<1x256xf32>
    %305 = vector.extract_strided_slice %304 {offsets = [0, 0], sizes = [1, 128], strides = [1, 1]} : vector<1x256xf32> to vector<1x128xf32>
    %306 = vector.extract_strided_slice %304 {offsets = [0, 128], sizes = [1, 128], strides = [1, 1]} : vector<1x256xf32> to vector<1x128xf32>
    %307 = vector.extract_strided_slice %296 {offsets = [0, 256], sizes = [1, 128], strides = [1, 1]} : vector<1x896xf32> to vector<1x128xf32>
    %308 = vector.extract_strided_slice %296 {offsets = [0, 640], sizes = [1, 128], strides = [1, 1]} : vector<1x896xf32> to vector<1x128xf32>
    %309 = arith.mulf %305, %308 : vector<1x128xf32>
    %310 = arith.addf %307, %309 : vector<1x128xf32>
    %311 = math.tanh %310 : vector<1x128xf32>
    %312 = vector.extract_strided_slice %306 {offsets = [0, 0], sizes = [1, 42], strides = [1, 1]} : vector<1x128xf32> to vector<1x42xf32>
    %313 = vector.extract_strided_slice %311 {offsets = [0, 0], sizes = [1, 42], strides = [1, 1]} : vector<1x128xf32> to vector<1x42xf32>
    %314 = arith.subf %279, %313 : vector<1x42xf32>
    %315 = arith.mulf %312, %314 : vector<1x42xf32>
    %316 = arith.addf %313, %315 : vector<1x42xf32>
    %317 = vector.extract_strided_slice %296 {offsets = [0, 768], sizes = [1, 42], strides = [1, 1]} : vector<1x896xf32> to vector<1x42xf32>
    %318 = vector.broadcast %267 : i32 to vector<4x1xi32>
    %319 = arith.cmpi eq, %0, %318 : vector<4x1xi32>
    %320 = vector.shape_cast %319 : vector<4x1xi1> to vector<4x1xi1>
    %321 = vector.broadcast %320 : vector<4x1xi1> to vector<4x42xi1>
    %322 = vector.shape_cast %316 : vector<1x42xf32> to vector<1x42xf32>
    %323 = vector.broadcast %322 : vector<1x42xf32> to vector<4x42xf32>
    %324 = arith.select %321, %323, %240 : vector<4x42xi1>, vector<4x42xf32>
    %325 = vector.broadcast %269 : i32 to vector<4x1xi32>
    %326 = arith.cmpi eq, %0, %325 : vector<4x1xi32>
    %327 = vector.shape_cast %326 : vector<4x1xi1> to vector<4x1xi1>
    %328 = vector.broadcast %327 : vector<4x1xi1> to vector<4x42xi1>
    %329 = vector.shape_cast %317 : vector<1x42xf32> to vector<1x42xf32>
    %330 = vector.broadcast %329 : vector<1x42xf32> to vector<4x42xf32>
    %331 = arith.select %328, %330, %247 : vector<4x42xi1>, vector<4x42xf32>
    %cst_53 = arith.constant dense<0.000000e+00> : vector<1x128xf32>
    %332 = tpu.matmul %316, %10, %cst_53 {dimension_numbers = #tpu.dot_dimension_numbers<[1], [0], [0], [1], [0, 0, 1, 1], [], []>} : vector<1x42xf32>, vector<42x128xf32>, vector<1x128xf32> -> vector<1x128xf32>
    %333 = arith.addf %332, %11 : vector<1x128xf32>
    %cst_54 = arith.constant dense<0xFF800000> : vector<1xf32>
    %334 = vector.multi_reduction <maximumf>, %333, %cst_54 [1] : vector<1x128xf32> to vector<1xf32>
    %335 = vector.shape_cast %334 : vector<1xf32> to vector<1x1xf32>
    %336 = vector.broadcast %335 : vector<1x1xf32> to vector<1x128xf32>
    %337 = arith.subf %333, %336 : vector<1x128xf32>
    %338 = math.exp %337 : vector<1x128xf32>
    %cst_55 = arith.constant dense<0.000000e+00> : vector<1xf32>
    %339 = vector.multi_reduction <add>, %338, %cst_55 [1] : vector<1x128xf32> to vector<1xf32>
    %340 = vector.shape_cast %339 : vector<1xf32> to vector<1x1xf32>
    %341 = tpu.reciprocal %340 {approx = true} : vector<1x1xf32> -> vector<1x1xf32>
    %342 = arith.mulf %340, %341 : vector<1x1xf32>
    %cst_56 = arith.constant 2.000000e+00 : f32
    %343 = vector.broadcast %cst_56 : f32 to vector<1x1xf32>
    %344 = arith.subf %343, %342 : vector<1x1xf32>
    %345 = arith.mulf %341, %344 : vector<1x1xf32>
    %346 = vector.broadcast %345 : vector<1x1xf32> to vector<1x128xf32>
    %347 = arith.mulf %338, %346 : vector<1x128xf32>
    %348 = arith.index_cast %c3_i32 : i32 to index
    %c0_57 = arith.constant 0 : index
    %349 = vector.load %arg8[%348, %c0_57] : memref<16x128xf32, #tpu.memory_space<vmem>>, vector<1x128xf32>
    tpu.vector_store %arg8[%348, %c0_57], %347 {strides = array<i32>} : memref<16x128xf32, #tpu.memory_space<vmem>>, vector<1x128xf32>,
    %c4_i32 = arith.constant 4 : i32
    %350 = arith.index_cast %c4_i32 : i32 to index
    %351 = memref.load %arg0[%350] : memref<16xi32, #tpu.memory_space<smem>>
    %352 = arith.index_cast %c4_i32 : i32 to index
    %353 = memref.load %arg1[%352] : memref<16xi32, #tpu.memory_space<smem>>
    %354 = arith.index_cast %c4_i32 : i32 to index
    %355 = memref.load %arg2[%354] : memref<16xf32, #tpu.memory_space<smem>>
    %356 = vector.broadcast %351 : i32 to vector<4x1xi32>
    %357 = arith.cmpi eq, %0, %356 : vector<4x1xi32>
    %cst_58 = arith.constant 0.000000e+00 : f32
    %358 = vector.shape_cast %357 : vector<4x1xi1> to vector<4x1xi1>
    %359 = vector.broadcast %358 : vector<4x1xi1> to vector<4x42xi1>
    %360 = vector.broadcast %cst_58 : f32 to vector<4x42xf32>
    %361 = arith.select %359, %324, %360 : vector<4x42xi1>, vector<4x42xf32>
    %cst_59 = arith.constant dense<0.000000e+00> : vector<42xf32>
    %362 = vector.multi_reduction <add>, %361, %cst_59 [0] : vector<4x42xf32> to vector<42xf32>
    %363 = vector.shape_cast %362 : vector<42xf32> to vector<1x42xf32>
    %364 = vector.broadcast %353 : i32 to vector<4x1xi32>
    %365 = arith.cmpi eq, %0, %364 : vector<4x1xi32>
    %cst_60 = arith.constant 0.000000e+00 : f32
    %366 = vector.shape_cast %365 : vector<4x1xi1> to vector<4x1xi1>
    %367 = vector.broadcast %366 : vector<4x1xi1> to vector<4x42xi1>
    %368 = vector.broadcast %cst_60 : f32 to vector<4x42xf32>
    %369 = arith.select %367, %331, %368 : vector<4x42xi1>, vector<4x42xf32>
    %cst_61 = arith.constant dense<0.000000e+00> : vector<42xf32>
    %370 = vector.multi_reduction <add>, %369, %cst_61 [0] : vector<4x42xf32> to vector<42xf32>
    %371 = vector.shape_cast %370 : vector<42xf32> to vector<1x42xf32>
    %372 = arith.addf %363, %371 : vector<1x42xf32>
    %373 = vector.broadcast %355 : f32 to vector<1x42xf32>
    %374 = arith.mulf %373, %5 : vector<1x42xf32>
    %375 = arith.addf %372, %374 : vector<1x42xf32>
    %376 = arith.addf %375, %9 : vector<1x42xf32>
    %377 = arith.index_cast %351 : i32 to index
    %c0_62 = arith.constant 0 : index
    %c0_63 = arith.constant 0 : index
    %378 = vector.load %arg5[%377, %c0_62, %c0_63] : memref<4x42x896xf32, #tpu.memory_space<vmem>>, vector<1x42x896xf32>
    %379 = vector.shape_cast %378 : vector<1x42x896xf32> to vector<42x896xf32>
    %cst_64 = arith.constant dense<0.000000e+00> : vector<1x896xf32>
    %380 = tpu.matmul %376, %379, %cst_64 {dimension_numbers = #tpu.dot_dimension_numbers<[1], [0], [0], [1], [0, 0, 1, 1], [], []>} : vector<1x42xf32>, vector<42x896xf32>, vector<1x896xf32> -> vector<1x896xf32>
    %381 = vector.extract_strided_slice %380 {offsets = [0, 0], sizes = [1, 256], strides = [1, 1]} : vector<1x896xf32> to vector<1x256xf32>
    %382 = vector.extract_strided_slice %380 {offsets = [0, 384], sizes = [1, 256], strides = [1, 1]} : vector<1x896xf32> to vector<1x256xf32>
    %383 = arith.addf %381, %382 : vector<1x256xf32>
    %384 = arith.negf %383 : vector<1x256xf32>
    %385 = math.exp %384 : vector<1x256xf32>
    %cst_65 = arith.constant 1.000000e+00 : f32
    %386 = vector.broadcast %cst_65 : f32 to vector<1x256xf32>
    %387 = arith.addf %386, %385 : vector<1x256xf32>
    %388 = arith.divf %386, %387 : vector<1x256xf32>
    %389 = vector.extract_strided_slice %388 {offsets = [0, 0], sizes = [1, 128], strides = [1, 1]} : vector<1x256xf32> to vector<1x128xf32>
    %390 = vector.extract_strided_slice %388 {offsets = [0, 128], sizes = [1, 128], strides = [1, 1]} : vector<1x256xf32> to vector<1x128xf32>
    %391 = vector.extract_strided_slice %380 {offsets = [0, 256], sizes = [1, 128], strides = [1, 1]} : vector<1x896xf32> to vector<1x128xf32>
    %392 = vector.extract_strided_slice %380 {offsets = [0, 640], sizes = [1, 128], strides = [1, 1]} : vector<1x896xf32> to vector<1x128xf32>
    %393 = arith.mulf %389, %392 : vector<1x128xf32>
    %394 = arith.addf %391, %393 : vector<1x128xf32>
    %395 = math.tanh %394 : vector<1x128xf32>
    %396 = vector.extract_strided_slice %390 {offsets = [0, 0], sizes = [1, 42], strides = [1, 1]} : vector<1x128xf32> to vector<1x42xf32>
    %397 = vector.extract_strided_slice %395 {offsets = [0, 0], sizes = [1, 42], strides = [1, 1]} : vector<1x128xf32> to vector<1x42xf32>
    %398 = arith.subf %363, %397 : vector<1x42xf32>
    %399 = arith.mulf %396, %398 : vector<1x42xf32>
    %400 = arith.addf %397, %399 : vector<1x42xf32>
    %401 = vector.extract_strided_slice %380 {offsets = [0, 768], sizes = [1, 42], strides = [1, 1]} : vector<1x896xf32> to vector<1x42xf32>
    %402 = vector.broadcast %351 : i32 to vector<4x1xi32>
    %403 = arith.cmpi eq, %0, %402 : vector<4x1xi32>
    %404 = vector.shape_cast %403 : vector<4x1xi1> to vector<4x1xi1>
    %405 = vector.broadcast %404 : vector<4x1xi1> to vector<4x42xi1>
    %406 = vector.shape_cast %400 : vector<1x42xf32> to vector<1x42xf32>
    %407 = vector.broadcast %406 : vector<1x42xf32> to vector<4x42xf32>
    %408 = arith.select %405, %407, %324 : vector<4x42xi1>, vector<4x42xf32>
    %409 = vector.broadcast %353 : i32 to vector<4x1xi32>
    %410 = arith.cmpi eq, %0, %409 : vector<4x1xi32>
    %411 = vector.shape_cast %410 : vector<4x1xi1> to vector<4x1xi1>
    %412 = vector.broadcast %411 : vector<4x1xi1> to vector<4x42xi1>
    %413 = vector.shape_cast %401 : vector<1x42xf32> to vector<1x42xf32>
    %414 = vector.broadcast %413 : vector<1x42xf32> to vector<4x42xf32>
    %415 = arith.select %412, %414, %331 : vector<4x42xi1>, vector<4x42xf32>
    %cst_66 = arith.constant dense<0.000000e+00> : vector<1x128xf32>
    %416 = tpu.matmul %400, %10, %cst_66 {dimension_numbers = #tpu.dot_dimension_numbers<[1], [0], [0], [1], [0, 0, 1, 1], [], []>} : vector<1x42xf32>, vector<42x128xf32>, vector<1x128xf32> -> vector<1x128xf32>
    %417 = arith.addf %416, %11 : vector<1x128xf32>
    %cst_67 = arith.constant dense<0xFF800000> : vector<1xf32>
    %418 = vector.multi_reduction <maximumf>, %417, %cst_67 [1] : vector<1x128xf32> to vector<1xf32>
    %419 = vector.shape_cast %418 : vector<1xf32> to vector<1x1xf32>
    %420 = vector.broadcast %419 : vector<1x1xf32> to vector<1x128xf32>
    %421 = arith.subf %417, %420 : vector<1x128xf32>
    %422 = math.exp %421 : vector<1x128xf32>
    %cst_68 = arith.constant dense<0.000000e+00> : vector<1xf32>
    %423 = vector.multi_reduction <add>, %422, %cst_68 [1] : vector<1x128xf32> to vector<1xf32>
    %424 = vector.shape_cast %423 : vector<1xf32> to vector<1x1xf32>
    %425 = tpu.reciprocal %424 {approx = true} : vector<1x1xf32> -> vector<1x1xf32>
    %426 = arith.mulf %424, %425 : vector<1x1xf32>
    %cst_69 = arith.constant 2.000000e+00 : f32
    %427 = vector.broadcast %cst_69 : f32 to vector<1x1xf32>
    %428 = arith.subf %427, %426 : vector<1x1xf32>
    %429 = arith.mulf %425, %428 : vector<1x1xf32>
    %430 = vector.broadcast %429 : vector<1x1xf32> to vector<1x128xf32>
    %431 = arith.mulf %422, %430 : vector<1x128xf32>
    %432 = arith.index_cast %c4_i32 : i32 to index
    %c0_70 = arith.constant 0 : index
    %433 = vector.load %arg8[%432, %c0_70] : memref<16x128xf32, #tpu.memory_space<vmem>>, vector<1x128xf32>
    tpu.vector_store %arg8[%432, %c0_70], %431 {strides = array<i32>} : memref<16x128xf32, #tpu.memory_space<vmem>>, vector<1x128xf32>,
    %c5_i32 = arith.constant 5 : i32
    %434 = arith.index_cast %c5_i32 : i32 to index
    %435 = memref.load %arg0[%434] : memref<16xi32, #tpu.memory_space<smem>>
    %436 = arith.index_cast %c5_i32 : i32 to index
    %437 = memref.load %arg1[%436] : memref<16xi32, #tpu.memory_space<smem>>
    %438 = arith.index_cast %c5_i32 : i32 to index
    %439 = memref.load %arg2[%438] : memref<16xf32, #tpu.memory_space<smem>>
    %440 = vector.broadcast %435 : i32 to vector<4x1xi32>
    %441 = arith.cmpi eq, %0, %440 : vector<4x1xi32>
    %cst_71 = arith.constant 0.000000e+00 : f32
    %442 = vector.shape_cast %441 : vector<4x1xi1> to vector<4x1xi1>
    %443 = vector.broadcast %442 : vector<4x1xi1> to vector<4x42xi1>
    %444 = vector.broadcast %cst_71 : f32 to vector<4x42xf32>
    %445 = arith.select %443, %408, %444 : vector<4x42xi1>, vector<4x42xf32>
    %cst_72 = arith.constant dense<0.000000e+00> : vector<42xf32>
    %446 = vector.multi_reduction <add>, %445, %cst_72 [0] : vector<4x42xf32> to vector<42xf32>
    %447 = vector.shape_cast %446 : vector<42xf32> to vector<1x42xf32>
    %448 = vector.broadcast %437 : i32 to vector<4x1xi32>
    %449 = arith.cmpi eq, %0, %448 : vector<4x1xi32>
    %cst_73 = arith.constant 0.000000e+00 : f32
    %450 = vector.shape_cast %449 : vector<4x1xi1> to vector<4x1xi1>
    %451 = vector.broadcast %450 : vector<4x1xi1> to vector<4x42xi1>
    %452 = vector.broadcast %cst_73 : f32 to vector<4x42xf32>
    %453 = arith.select %451, %415, %452 : vector<4x42xi1>, vector<4x42xf32>
    %cst_74 = arith.constant dense<0.000000e+00> : vector<42xf32>
    %454 = vector.multi_reduction <add>, %453, %cst_74 [0] : vector<4x42xf32> to vector<42xf32>
    %455 = vector.shape_cast %454 : vector<42xf32> to vector<1x42xf32>
    %456 = arith.addf %447, %455 : vector<1x42xf32>
    %457 = vector.broadcast %439 : f32 to vector<1x42xf32>
    %458 = arith.mulf %457, %5 : vector<1x42xf32>
    %459 = arith.addf %456, %458 : vector<1x42xf32>
    %460 = arith.addf %459, %9 : vector<1x42xf32>
    %461 = arith.index_cast %435 : i32 to index
    %c0_75 = arith.constant 0 : index
    %c0_76 = arith.constant 0 : index
    %462 = vector.load %arg5[%461, %c0_75, %c0_76] : memref<4x42x896xf32, #tpu.memory_space<vmem>>, vector<1x42x896xf32>
    %463 = vector.shape_cast %462 : vector<1x42x896xf32> to vector<42x896xf32>
    %cst_77 = arith.constant dense<0.000000e+00> : vector<1x896xf32>
    %464 = tpu.matmul %460, %463, %cst_77 {dimension_numbers = #tpu.dot_dimension_numbers<[1], [0], [0], [1], [0, 0, 1, 1], [], []>} : vector<1x42xf32>, vector<42x896xf32>, vector<1x896xf32> -> vector<1x896xf32>
    %465 = vector.extract_strided_slice %464 {offsets = [0, 0], sizes = [1, 256], strides = [1, 1]} : vector<1x896xf32> to vector<1x256xf32>
    %466 = vector.extract_strided_slice %464 {offsets = [0, 384], sizes = [1, 256], strides = [1, 1]} : vector<1x896xf32> to vector<1x256xf32>
    %467 = arith.addf %465, %466 : vector<1x256xf32>
    %468 = arith.negf %467 : vector<1x256xf32>
    %469 = math.exp %468 : vector<1x256xf32>
    %cst_78 = arith.constant 1.000000e+00 : f32
    %470 = vector.broadcast %cst_78 : f32 to vector<1x256xf32>
    %471 = arith.addf %470, %469 : vector<1x256xf32>
    %472 = arith.divf %470, %471 : vector<1x256xf32>
    %473 = vector.extract_strided_slice %472 {offsets = [0, 0], sizes = [1, 128], strides = [1, 1]} : vector<1x256xf32> to vector<1x128xf32>
    %474 = vector.extract_strided_slice %472 {offsets = [0, 128], sizes = [1, 128], strides = [1, 1]} : vector<1x256xf32> to vector<1x128xf32>
    %475 = vector.extract_strided_slice %464 {offsets = [0, 256], sizes = [1, 128], strides = [1, 1]} : vector<1x896xf32> to vector<1x128xf32>
    %476 = vector.extract_strided_slice %464 {offsets = [0, 640], sizes = [1, 128], strides = [1, 1]} : vector<1x896xf32> to vector<1x128xf32>
    %477 = arith.mulf %473, %476 : vector<1x128xf32>
    %478 = arith.addf %475, %477 : vector<1x128xf32>
    %479 = math.tanh %478 : vector<1x128xf32>
    %480 = vector.extract_strided_slice %474 {offsets = [0, 0], sizes = [1, 42], strides = [1, 1]} : vector<1x128xf32> to vector<1x42xf32>
    %481 = vector.extract_strided_slice %479 {offsets = [0, 0], sizes = [1, 42], strides = [1, 1]} : vector<1x128xf32> to vector<1x42xf32>
    %482 = arith.subf %447, %481 : vector<1x42xf32>
    %483 = arith.mulf %480, %482 : vector<1x42xf32>
    %484 = arith.addf %481, %483 : vector<1x42xf32>
    %485 = vector.extract_strided_slice %464 {offsets = [0, 768], sizes = [1, 42], strides = [1, 1]} : vector<1x896xf32> to vector<1x42xf32>
    %486 = vector.broadcast %435 : i32 to vector<4x1xi32>
    %487 = arith.cmpi eq, %0, %486 : vector<4x1xi32>
    %488 = vector.shape_cast %487 : vector<4x1xi1> to vector<4x1xi1>
    %489 = vector.broadcast %488 : vector<4x1xi1> to vector<4x42xi1>
    %490 = vector.shape_cast %484 : vector<1x42xf32> to vector<1x42xf32>
    %491 = vector.broadcast %490 : vector<1x42xf32> to vector<4x42xf32>
    %492 = arith.select %489, %491, %408 : vector<4x42xi1>, vector<4x42xf32>
    %493 = vector.broadcast %437 : i32 to vector<4x1xi32>
    %494 = arith.cmpi eq, %0, %493 : vector<4x1xi32>
    %495 = vector.shape_cast %494 : vector<4x1xi1> to vector<4x1xi1>
    %496 = vector.broadcast %495 : vector<4x1xi1> to vector<4x42xi1>
    %497 = vector.shape_cast %485 : vector<1x42xf32> to vector<1x42xf32>
    %498 = vector.broadcast %497 : vector<1x42xf32> to vector<4x42xf32>
    %499 = arith.select %496, %498, %415 : vector<4x42xi1>, vector<4x42xf32>
    %cst_79 = arith.constant dense<0.000000e+00> : vector<1x128xf32>
    %500 = tpu.matmul %484, %10, %cst_79 {dimension_numbers = #tpu.dot_dimension_numbers<[1], [0], [0], [1], [0, 0, 1, 1], [], []>} : vector<1x42xf32>, vector<42x128xf32>, vector<1x128xf32> -> vector<1x128xf32>
    %501 = arith.addf %500, %11 : vector<1x128xf32>
    %cst_80 = arith.constant dense<0xFF800000> : vector<1xf32>
    %502 = vector.multi_reduction <maximumf>, %501, %cst_80 [1] : vector<1x128xf32> to vector<1xf32>
    %503 = vector.shape_cast %502 : vector<1xf32> to vector<1x1xf32>
    %504 = vector.broadcast %503 : vector<1x1xf32> to vector<1x128xf32>
    %505 = arith.subf %501, %504 : vector<1x128xf32>
    %506 = math.exp %505 : vector<1x128xf32>
    %cst_81 = arith.constant dense<0.000000e+00> : vector<1xf32>
    %507 = vector.multi_reduction <add>, %506, %cst_81 [1] : vector<1x128xf32> to vector<1xf32>
    %508 = vector.shape_cast %507 : vector<1xf32> to vector<1x1xf32>
    %509 = tpu.reciprocal %508 {approx = true} : vector<1x1xf32> -> vector<1x1xf32>
    %510 = arith.mulf %508, %509 : vector<1x1xf32>
    %cst_82 = arith.constant 2.000000e+00 : f32
    %511 = vector.broadcast %cst_82 : f32 to vector<1x1xf32>
    %512 = arith.subf %511, %510 : vector<1x1xf32>
    %513 = arith.mulf %509, %512 : vector<1x1xf32>
    %514 = vector.broadcast %513 : vector<1x1xf32> to vector<1x128xf32>
    %515 = arith.mulf %506, %514 : vector<1x128xf32>
    %516 = arith.index_cast %c5_i32 : i32 to index
    %c0_83 = arith.constant 0 : index
    %517 = vector.load %arg8[%516, %c0_83] : memref<16x128xf32, #tpu.memory_space<vmem>>, vector<1x128xf32>
    tpu.vector_store %arg8[%516, %c0_83], %515 {strides = array<i32>} : memref<16x128xf32, #tpu.memory_space<vmem>>, vector<1x128xf32>,
    %c6_i32 = arith.constant 6 : i32
    %518 = arith.index_cast %c6_i32 : i32 to index
    %519 = memref.load %arg0[%518] : memref<16xi32, #tpu.memory_space<smem>>
    %520 = arith.index_cast %c6_i32 : i32 to index
    %521 = memref.load %arg1[%520] : memref<16xi32, #tpu.memory_space<smem>>
    %522 = arith.index_cast %c6_i32 : i32 to index
    %523 = memref.load %arg2[%522] : memref<16xf32, #tpu.memory_space<smem>>
    %524 = vector.broadcast %519 : i32 to vector<4x1xi32>
    %525 = arith.cmpi eq, %0, %524 : vector<4x1xi32>
    %cst_84 = arith.constant 0.000000e+00 : f32
    %526 = vector.shape_cast %525 : vector<4x1xi1> to vector<4x1xi1>
    %527 = vector.broadcast %526 : vector<4x1xi1> to vector<4x42xi1>
    %528 = vector.broadcast %cst_84 : f32 to vector<4x42xf32>
    %529 = arith.select %527, %492, %528 : vector<4x42xi1>, vector<4x42xf32>
    %cst_85 = arith.constant dense<0.000000e+00> : vector<42xf32>
    %530 = vector.multi_reduction <add>, %529, %cst_85 [0] : vector<4x42xf32> to vector<42xf32>
    %531 = vector.shape_cast %530 : vector<42xf32> to vector<1x42xf32>
    %532 = vector.broadcast %521 : i32 to vector<4x1xi32>
    %533 = arith.cmpi eq, %0, %532 : vector<4x1xi32>
    %cst_86 = arith.constant 0.000000e+00 : f32
    %534 = vector.shape_cast %533 : vector<4x1xi1> to vector<4x1xi1>
    %535 = vector.broadcast %534 : vector<4x1xi1> to vector<4x42xi1>
    %536 = vector.broadcast %cst_86 : f32 to vector<4x42xf32>
    %537 = arith.select %535, %499, %536 : vector<4x42xi1>, vector<4x42xf32>
    %cst_87 = arith.constant dense<0.000000e+00> : vector<42xf32>
    %538 = vector.multi_reduction <add>, %537, %cst_87 [0] : vector<4x42xf32> to vector<42xf32>
    %539 = vector.shape_cast %538 : vector<42xf32> to vector<1x42xf32>
    %540 = arith.addf %531, %539 : vector<1x42xf32>
    %541 = vector.broadcast %523 : f32 to vector<1x42xf32>
    %542 = arith.mulf %541, %5 : vector<1x42xf32>
    %543 = arith.addf %540, %542 : vector<1x42xf32>
    %544 = arith.addf %543, %9 : vector<1x42xf32>
    %545 = arith.index_cast %519 : i32 to index
    %c0_88 = arith.constant 0 : index
    %c0_89 = arith.constant 0 : index
    %546 = vector.load %arg5[%545, %c0_88, %c0_89] : memref<4x42x896xf32, #tpu.memory_space<vmem>>, vector<1x42x896xf32>
    %547 = vector.shape_cast %546 : vector<1x42x896xf32> to vector<42x896xf32>
    %cst_90 = arith.constant dense<0.000000e+00> : vector<1x896xf32>
    %548 = tpu.matmul %544, %547, %cst_90 {dimension_numbers = #tpu.dot_dimension_numbers<[1], [0], [0], [1], [0, 0, 1, 1], [], []>} : vector<1x42xf32>, vector<42x896xf32>, vector<1x896xf32> -> vector<1x896xf32>
    %549 = vector.extract_strided_slice %548 {offsets = [0, 0], sizes = [1, 256], strides = [1, 1]} : vector<1x896xf32> to vector<1x256xf32>
    %550 = vector.extract_strided_slice %548 {offsets = [0, 384], sizes = [1, 256], strides = [1, 1]} : vector<1x896xf32> to vector<1x256xf32>
    %551 = arith.addf %549, %550 : vector<1x256xf32>
    %552 = arith.negf %551 : vector<1x256xf32>
    %553 = math.exp %552 : vector<1x256xf32>
    %cst_91 = arith.constant 1.000000e+00 : f32
    %554 = vector.broadcast %cst_91 : f32 to vector<1x256xf32>
    %555 = arith.addf %554, %553 : vector<1x256xf32>
    %556 = arith.divf %554, %555 : vector<1x256xf32>
    %557 = vector.extract_strided_slice %556 {offsets = [0, 0], sizes = [1, 128], strides = [1, 1]} : vector<1x256xf32> to vector<1x128xf32>
    %558 = vector.extract_strided_slice %556 {offsets = [0, 128], sizes = [1, 128], strides = [1, 1]} : vector<1x256xf32> to vector<1x128xf32>
    %559 = vector.extract_strided_slice %548 {offsets = [0, 256], sizes = [1, 128], strides = [1, 1]} : vector<1x896xf32> to vector<1x128xf32>
    %560 = vector.extract_strided_slice %548 {offsets = [0, 640], sizes = [1, 128], strides = [1, 1]} : vector<1x896xf32> to vector<1x128xf32>
    %561 = arith.mulf %557, %560 : vector<1x128xf32>
    %562 = arith.addf %559, %561 : vector<1x128xf32>
    %563 = math.tanh %562 : vector<1x128xf32>
    %564 = vector.extract_strided_slice %558 {offsets = [0, 0], sizes = [1, 42], strides = [1, 1]} : vector<1x128xf32> to vector<1x42xf32>
    %565 = vector.extract_strided_slice %563 {offsets = [0, 0], sizes = [1, 42], strides = [1, 1]} : vector<1x128xf32> to vector<1x42xf32>
    %566 = arith.subf %531, %565 : vector<1x42xf32>
    %567 = arith.mulf %564, %566 : vector<1x42xf32>
    %568 = arith.addf %565, %567 : vector<1x42xf32>
    %569 = vector.extract_strided_slice %548 {offsets = [0, 768], sizes = [1, 42], strides = [1, 1]} : vector<1x896xf32> to vector<1x42xf32>
    %570 = vector.broadcast %519 : i32 to vector<4x1xi32>
    %571 = arith.cmpi eq, %0, %570 : vector<4x1xi32>
    %572 = vector.shape_cast %571 : vector<4x1xi1> to vector<4x1xi1>
    %573 = vector.broadcast %572 : vector<4x1xi1> to vector<4x42xi1>
    %574 = vector.shape_cast %568 : vector<1x42xf32> to vector<1x42xf32>
    %575 = vector.broadcast %574 : vector<1x42xf32> to vector<4x42xf32>
    %576 = arith.select %573, %575, %492 : vector<4x42xi1>, vector<4x42xf32>
    %577 = vector.broadcast %521 : i32 to vector<4x1xi32>
    %578 = arith.cmpi eq, %0, %577 : vector<4x1xi32>
    %579 = vector.shape_cast %578 : vector<4x1xi1> to vector<4x1xi1>
    %580 = vector.broadcast %579 : vector<4x1xi1> to vector<4x42xi1>
    %581 = vector.shape_cast %569 : vector<1x42xf32> to vector<1x42xf32>
    %582 = vector.broadcast %581 : vector<1x42xf32> to vector<4x42xf32>
    %583 = arith.select %580, %582, %499 : vector<4x42xi1>, vector<4x42xf32>
    %cst_92 = arith.constant dense<0.000000e+00> : vector<1x128xf32>
    %584 = tpu.matmul %568, %10, %cst_92 {dimension_numbers = #tpu.dot_dimension_numbers<[1], [0], [0], [1], [0, 0, 1, 1], [], []>} : vector<1x42xf32>, vector<42x128xf32>, vector<1x128xf32> -> vector<1x128xf32>
    %585 = arith.addf %584, %11 : vector<1x128xf32>
    %cst_93 = arith.constant dense<0xFF800000> : vector<1xf32>
    %586 = vector.multi_reduction <maximumf>, %585, %cst_93 [1] : vector<1x128xf32> to vector<1xf32>
    %587 = vector.shape_cast %586 : vector<1xf32> to vector<1x1xf32>
    %588 = vector.broadcast %587 : vector<1x1xf32> to vector<1x128xf32>
    %589 = arith.subf %585, %588 : vector<1x128xf32>
    %590 = math.exp %589 : vector<1x128xf32>
    %cst_94 = arith.constant dense<0.000000e+00> : vector<1xf32>
    %591 = vector.multi_reduction <add>, %590, %cst_94 [1] : vector<1x128xf32> to vector<1xf32>
    %592 = vector.shape_cast %591 : vector<1xf32> to vector<1x1xf32>
    %593 = tpu.reciprocal %592 {approx = true} : vector<1x1xf32> -> vector<1x1xf32>
    %594 = arith.mulf %592, %593 : vector<1x1xf32>
    %cst_95 = arith.constant 2.000000e+00 : f32
    %595 = vector.broadcast %cst_95 : f32 to vector<1x1xf32>
    %596 = arith.subf %595, %594 : vector<1x1xf32>
    %597 = arith.mulf %593, %596 : vector<1x1xf32>
    %598 = vector.broadcast %597 : vector<1x1xf32> to vector<1x128xf32>
    %599 = arith.mulf %590, %598 : vector<1x128xf32>
    %600 = arith.index_cast %c6_i32 : i32 to index
    %c0_96 = arith.constant 0 : index
    %601 = vector.load %arg8[%600, %c0_96] : memref<16x128xf32, #tpu.memory_space<vmem>>, vector<1x128xf32>
    tpu.vector_store %arg8[%600, %c0_96], %599 {strides = array<i32>} : memref<16x128xf32, #tpu.memory_space<vmem>>, vector<1x128xf32>,
    %c7_i32 = arith.constant 7 : i32
    %602 = arith.index_cast %c7_i32 : i32 to index
    %603 = memref.load %arg0[%602] : memref<16xi32, #tpu.memory_space<smem>>
    %604 = arith.index_cast %c7_i32 : i32 to index
    %605 = memref.load %arg1[%604] : memref<16xi32, #tpu.memory_space<smem>>
    %606 = arith.index_cast %c7_i32 : i32 to index
    %607 = memref.load %arg2[%606] : memref<16xf32, #tpu.memory_space<smem>>
    %608 = vector.broadcast %603 : i32 to vector<4x1xi32>
    %609 = arith.cmpi eq, %0, %608 : vector<4x1xi32>
    %cst_97 = arith.constant 0.000000e+00 : f32
    %610 = vector.shape_cast %609 : vector<4x1xi1> to vector<4x1xi1>
    %611 = vector.broadcast %610 : vector<4x1xi1> to vector<4x42xi1>
    %612 = vector.broadcast %cst_97 : f32 to vector<4x42xf32>
    %613 = arith.select %611, %576, %612 : vector<4x42xi1>, vector<4x42xf32>
    %cst_98 = arith.constant dense<0.000000e+00> : vector<42xf32>
    %614 = vector.multi_reduction <add>, %613, %cst_98 [0] : vector<4x42xf32> to vector<42xf32>
    %615 = vector.shape_cast %614 : vector<42xf32> to vector<1x42xf32>
    %616 = vector.broadcast %605 : i32 to vector<4x1xi32>
    %617 = arith.cmpi eq, %0, %616 : vector<4x1xi32>
    %cst_99 = arith.constant 0.000000e+00 : f32
    %618 = vector.shape_cast %617 : vector<4x1xi1> to vector<4x1xi1>
    %619 = vector.broadcast %618 : vector<4x1xi1> to vector<4x42xi1>
    %620 = vector.broadcast %cst_99 : f32 to vector<4x42xf32>
    %621 = arith.select %619, %583, %620 : vector<4x42xi1>, vector<4x42xf32>
    %cst_100 = arith.constant dense<0.000000e+00> : vector<42xf32>
    %622 = vector.multi_reduction <add>, %621, %cst_100 [0] : vector<4x42xf32> to vector<42xf32>
    %623 = vector.shape_cast %622 : vector<42xf32> to vector<1x42xf32>
    %624 = arith.addf %615, %623 : vector<1x42xf32>
    %625 = vector.broadcast %607 : f32 to vector<1x42xf32>
    %626 = arith.mulf %625, %5 : vector<1x42xf32>
    %627 = arith.addf %624, %626 : vector<1x42xf32>
    %628 = arith.addf %627, %9 : vector<1x42xf32>
    %629 = arith.index_cast %603 : i32 to index
    %c0_101 = arith.constant 0 : index
    %c0_102 = arith.constant 0 : index
    %630 = vector.load %arg5[%629, %c0_101, %c0_102] : memref<4x42x896xf32, #tpu.memory_space<vmem>>, vector<1x42x896xf32>
    %631 = vector.shape_cast %630 : vector<1x42x896xf32> to vector<42x896xf32>
    %cst_103 = arith.constant dense<0.000000e+00> : vector<1x896xf32>
    %632 = tpu.matmul %628, %631, %cst_103 {dimension_numbers = #tpu.dot_dimension_numbers<[1], [0], [0], [1], [0, 0, 1, 1], [], []>} : vector<1x42xf32>, vector<42x896xf32>, vector<1x896xf32> -> vector<1x896xf32>
    %633 = vector.extract_strided_slice %632 {offsets = [0, 0], sizes = [1, 256], strides = [1, 1]} : vector<1x896xf32> to vector<1x256xf32>
    %634 = vector.extract_strided_slice %632 {offsets = [0, 384], sizes = [1, 256], strides = [1, 1]} : vector<1x896xf32> to vector<1x256xf32>
    %635 = arith.addf %633, %634 : vector<1x256xf32>
    %636 = arith.negf %635 : vector<1x256xf32>
    %637 = math.exp %636 : vector<1x256xf32>
    %cst_104 = arith.constant 1.000000e+00 : f32
    %638 = vector.broadcast %cst_104 : f32 to vector<1x256xf32>
    %639 = arith.addf %638, %637 : vector<1x256xf32>
    %640 = arith.divf %638, %639 : vector<1x256xf32>
    %641 = vector.extract_strided_slice %640 {offsets = [0, 0], sizes = [1, 128], strides = [1, 1]} : vector<1x256xf32> to vector<1x128xf32>
    %642 = vector.extract_strided_slice %640 {offsets = [0, 128], sizes = [1, 128], strides = [1, 1]} : vector<1x256xf32> to vector<1x128xf32>
    %643 = vector.extract_strided_slice %632 {offsets = [0, 256], sizes = [1, 128], strides = [1, 1]} : vector<1x896xf32> to vector<1x128xf32>
    %644 = vector.extract_strided_slice %632 {offsets = [0, 640], sizes = [1, 128], strides = [1, 1]} : vector<1x896xf32> to vector<1x128xf32>
    %645 = arith.mulf %641, %644 : vector<1x128xf32>
    %646 = arith.addf %643, %645 : vector<1x128xf32>
    %647 = math.tanh %646 : vector<1x128xf32>
    %648 = vector.extract_strided_slice %642 {offsets = [0, 0], sizes = [1, 42], strides = [1, 1]} : vector<1x128xf32> to vector<1x42xf32>
    %649 = vector.extract_strided_slice %647 {offsets = [0, 0], sizes = [1, 42], strides = [1, 1]} : vector<1x128xf32> to vector<1x42xf32>
    %650 = arith.subf %615, %649 : vector<1x42xf32>
    %651 = arith.mulf %648, %650 : vector<1x42xf32>
    %652 = arith.addf %649, %651 : vector<1x42xf32>
    %653 = vector.extract_strided_slice %632 {offsets = [0, 768], sizes = [1, 42], strides = [1, 1]} : vector<1x896xf32> to vector<1x42xf32>
    %654 = vector.broadcast %603 : i32 to vector<4x1xi32>
    %655 = arith.cmpi eq, %0, %654 : vector<4x1xi32>
    %656 = vector.shape_cast %655 : vector<4x1xi1> to vector<4x1xi1>
    %657 = vector.broadcast %656 : vector<4x1xi1> to vector<4x42xi1>
    %658 = vector.shape_cast %652 : vector<1x42xf32> to vector<1x42xf32>
    %659 = vector.broadcast %658 : vector<1x42xf32> to vector<4x42xf32>
    %660 = arith.select %657, %659, %576 : vector<4x42xi1>, vector<4x42xf32>
    %661 = vector.broadcast %605 : i32 to vector<4x1xi32>
    %662 = arith.cmpi eq, %0, %661 : vector<4x1xi32>
    %663 = vector.shape_cast %662 : vector<4x1xi1> to vector<4x1xi1>
    %664 = vector.broadcast %663 : vector<4x1xi1> to vector<4x42xi1>
    %665 = vector.shape_cast %653 : vector<1x42xf32> to vector<1x42xf32>
    %666 = vector.broadcast %665 : vector<1x42xf32> to vector<4x42xf32>
    %667 = arith.select %664, %666, %583 : vector<4x42xi1>, vector<4x42xf32>
    %cst_105 = arith.constant dense<0.000000e+00> : vector<1x128xf32>
    %668 = tpu.matmul %652, %10, %cst_105 {dimension_numbers = #tpu.dot_dimension_numbers<[1], [0], [0], [1], [0, 0, 1, 1], [], []>} : vector<1x42xf32>, vector<42x128xf32>, vector<1x128xf32> -> vector<1x128xf32>
    %669 = arith.addf %668, %11 : vector<1x128xf32>
    %cst_106 = arith.constant dense<0xFF800000> : vector<1xf32>
    %670 = vector.multi_reduction <maximumf>, %669, %cst_106 [1] : vector<1x128xf32> to vector<1xf32>
    %671 = vector.shape_cast %670 : vector<1xf32> to vector<1x1xf32>
    %672 = vector.broadcast %671 : vector<1x1xf32> to vector<1x128xf32>
    %673 = arith.subf %669, %672 : vector<1x128xf32>
    %674 = math.exp %673 : vector<1x128xf32>
    %cst_107 = arith.constant dense<0.000000e+00> : vector<1xf32>
    %675 = vector.multi_reduction <add>, %674, %cst_107 [1] : vector<1x128xf32> to vector<1xf32>
    %676 = vector.shape_cast %675 : vector<1xf32> to vector<1x1xf32>
    %677 = tpu.reciprocal %676 {approx = true} : vector<1x1xf32> -> vector<1x1xf32>
    %678 = arith.mulf %676, %677 : vector<1x1xf32>
    %cst_108 = arith.constant 2.000000e+00 : f32
    %679 = vector.broadcast %cst_108 : f32 to vector<1x1xf32>
    %680 = arith.subf %679, %678 : vector<1x1xf32>
    %681 = arith.mulf %677, %680 : vector<1x1xf32>
    %682 = vector.broadcast %681 : vector<1x1xf32> to vector<1x128xf32>
    %683 = arith.mulf %674, %682 : vector<1x128xf32>
    %684 = arith.index_cast %c7_i32 : i32 to index
    %c0_109 = arith.constant 0 : index
    %685 = vector.load %arg8[%684, %c0_109] : memref<16x128xf32, #tpu.memory_space<vmem>>, vector<1x128xf32>
    tpu.vector_store %arg8[%684, %c0_109], %683 {strides = array<i32>} : memref<16x128xf32, #tpu.memory_space<vmem>>, vector<1x128xf32>,
    %c8_i32 = arith.constant 8 : i32
    %686 = arith.index_cast %c8_i32 : i32 to index
    %687 = memref.load %arg0[%686] : memref<16xi32, #tpu.memory_space<smem>>
    %688 = arith.index_cast %c8_i32 : i32 to index
    %689 = memref.load %arg1[%688] : memref<16xi32, #tpu.memory_space<smem>>
    %690 = arith.index_cast %c8_i32 : i32 to index
    %691 = memref.load %arg2[%690] : memref<16xf32, #tpu.memory_space<smem>>
    %692 = vector.broadcast %687 : i32 to vector<4x1xi32>
    %693 = arith.cmpi eq, %0, %692 : vector<4x1xi32>
    %cst_110 = arith.constant 0.000000e+00 : f32
    %694 = vector.shape_cast %693 : vector<4x1xi1> to vector<4x1xi1>
    %695 = vector.broadcast %694 : vector<4x1xi1> to vector<4x42xi1>
    %696 = vector.broadcast %cst_110 : f32 to vector<4x42xf32>
    %697 = arith.select %695, %660, %696 : vector<4x42xi1>, vector<4x42xf32>
    %cst_111 = arith.constant dense<0.000000e+00> : vector<42xf32>
    %698 = vector.multi_reduction <add>, %697, %cst_111 [0] : vector<4x42xf32> to vector<42xf32>
    %699 = vector.shape_cast %698 : vector<42xf32> to vector<1x42xf32>
    %700 = vector.broadcast %689 : i32 to vector<4x1xi32>
    %701 = arith.cmpi eq, %0, %700 : vector<4x1xi32>
    %cst_112 = arith.constant 0.000000e+00 : f32
    %702 = vector.shape_cast %701 : vector<4x1xi1> to vector<4x1xi1>
    %703 = vector.broadcast %702 : vector<4x1xi1> to vector<4x42xi1>
    %704 = vector.broadcast %cst_112 : f32 to vector<4x42xf32>
    %705 = arith.select %703, %667, %704 : vector<4x42xi1>, vector<4x42xf32>
    %cst_113 = arith.constant dense<0.000000e+00> : vector<42xf32>
    %706 = vector.multi_reduction <add>, %705, %cst_113 [0] : vector<4x42xf32> to vector<42xf32>
    %707 = vector.shape_cast %706 : vector<42xf32> to vector<1x42xf32>
    %708 = arith.addf %699, %707 : vector<1x42xf32>
    %709 = vector.broadcast %691 : f32 to vector<1x42xf32>
    %710 = arith.mulf %709, %5 : vector<1x42xf32>
    %711 = arith.addf %708, %710 : vector<1x42xf32>
    %712 = arith.addf %711, %9 : vector<1x42xf32>
    %713 = arith.index_cast %687 : i32 to index
    %c0_114 = arith.constant 0 : index
    %c0_115 = arith.constant 0 : index
    %714 = vector.load %arg5[%713, %c0_114, %c0_115] : memref<4x42x896xf32, #tpu.memory_space<vmem>>, vector<1x42x896xf32>
    %715 = vector.shape_cast %714 : vector<1x42x896xf32> to vector<42x896xf32>
    %cst_116 = arith.constant dense<0.000000e+00> : vector<1x896xf32>
    %716 = tpu.matmul %712, %715, %cst_116 {dimension_numbers = #tpu.dot_dimension_numbers<[1], [0], [0], [1], [0, 0, 1, 1], [], []>} : vector<1x42xf32>, vector<42x896xf32>, vector<1x896xf32> -> vector<1x896xf32>
    %717 = vector.extract_strided_slice %716 {offsets = [0, 0], sizes = [1, 256], strides = [1, 1]} : vector<1x896xf32> to vector<1x256xf32>
    %718 = vector.extract_strided_slice %716 {offsets = [0, 384], sizes = [1, 256], strides = [1, 1]} : vector<1x896xf32> to vector<1x256xf32>
    %719 = arith.addf %717, %718 : vector<1x256xf32>
    %720 = arith.negf %719 : vector<1x256xf32>
    %721 = math.exp %720 : vector<1x256xf32>
    %cst_117 = arith.constant 1.000000e+00 : f32
    %722 = vector.broadcast %cst_117 : f32 to vector<1x256xf32>
    %723 = arith.addf %722, %721 : vector<1x256xf32>
    %724 = arith.divf %722, %723 : vector<1x256xf32>
    %725 = vector.extract_strided_slice %724 {offsets = [0, 0], sizes = [1, 128], strides = [1, 1]} : vector<1x256xf32> to vector<1x128xf32>
    %726 = vector.extract_strided_slice %724 {offsets = [0, 128], sizes = [1, 128], strides = [1, 1]} : vector<1x256xf32> to vector<1x128xf32>
    %727 = vector.extract_strided_slice %716 {offsets = [0, 256], sizes = [1, 128], strides = [1, 1]} : vector<1x896xf32> to vector<1x128xf32>
    %728 = vector.extract_strided_slice %716 {offsets = [0, 640], sizes = [1, 128], strides = [1, 1]} : vector<1x896xf32> to vector<1x128xf32>
    %729 = arith.mulf %725, %728 : vector<1x128xf32>
    %730 = arith.addf %727, %729 : vector<1x128xf32>
    %731 = math.tanh %730 : vector<1x128xf32>
    %732 = vector.extract_strided_slice %726 {offsets = [0, 0], sizes = [1, 42], strides = [1, 1]} : vector<1x128xf32> to vector<1x42xf32>
    %733 = vector.extract_strided_slice %731 {offsets = [0, 0], sizes = [1, 42], strides = [1, 1]} : vector<1x128xf32> to vector<1x42xf32>
    %734 = arith.subf %699, %733 : vector<1x42xf32>
    %735 = arith.mulf %732, %734 : vector<1x42xf32>
    %736 = arith.addf %733, %735 : vector<1x42xf32>
    %737 = vector.extract_strided_slice %716 {offsets = [0, 768], sizes = [1, 42], strides = [1, 1]} : vector<1x896xf32> to vector<1x42xf32>
    %738 = vector.broadcast %687 : i32 to vector<4x1xi32>
    %739 = arith.cmpi eq, %0, %738 : vector<4x1xi32>
    %740 = vector.shape_cast %739 : vector<4x1xi1> to vector<4x1xi1>
    %741 = vector.broadcast %740 : vector<4x1xi1> to vector<4x42xi1>
    %742 = vector.shape_cast %736 : vector<1x42xf32> to vector<1x42xf32>
    %743 = vector.broadcast %742 : vector<1x42xf32> to vector<4x42xf32>
    %744 = arith.select %741, %743, %660 : vector<4x42xi1>, vector<4x42xf32>
    %745 = vector.broadcast %689 : i32 to vector<4x1xi32>
    %746 = arith.cmpi eq, %0, %745 : vector<4x1xi32>
    %747 = vector.shape_cast %746 : vector<4x1xi1> to vector<4x1xi1>
    %748 = vector.broadcast %747 : vector<4x1xi1> to vector<4x42xi1>
    %749 = vector.shape_cast %737 : vector<1x42xf32> to vector<1x42xf32>
    %750 = vector.broadcast %749 : vector<1x42xf32> to vector<4x42xf32>
    %751 = arith.select %748, %750, %667 : vector<4x42xi1>, vector<4x42xf32>
    %cst_118 = arith.constant dense<0.000000e+00> : vector<1x128xf32>
    %752 = tpu.matmul %736, %10, %cst_118 {dimension_numbers = #tpu.dot_dimension_numbers<[1], [0], [0], [1], [0, 0, 1, 1], [], []>} : vector<1x42xf32>, vector<42x128xf32>, vector<1x128xf32> -> vector<1x128xf32>
    %753 = arith.addf %752, %11 : vector<1x128xf32>
    %cst_119 = arith.constant dense<0xFF800000> : vector<1xf32>
    %754 = vector.multi_reduction <maximumf>, %753, %cst_119 [1] : vector<1x128xf32> to vector<1xf32>
    %755 = vector.shape_cast %754 : vector<1xf32> to vector<1x1xf32>
    %756 = vector.broadcast %755 : vector<1x1xf32> to vector<1x128xf32>
    %757 = arith.subf %753, %756 : vector<1x128xf32>
    %758 = math.exp %757 : vector<1x128xf32>
    %cst_120 = arith.constant dense<0.000000e+00> : vector<1xf32>
    %759 = vector.multi_reduction <add>, %758, %cst_120 [1] : vector<1x128xf32> to vector<1xf32>
    %760 = vector.shape_cast %759 : vector<1xf32> to vector<1x1xf32>
    %761 = tpu.reciprocal %760 {approx = true} : vector<1x1xf32> -> vector<1x1xf32>
    %762 = arith.mulf %760, %761 : vector<1x1xf32>
    %cst_121 = arith.constant 2.000000e+00 : f32
    %763 = vector.broadcast %cst_121 : f32 to vector<1x1xf32>
    %764 = arith.subf %763, %762 : vector<1x1xf32>
    %765 = arith.mulf %761, %764 : vector<1x1xf32>
    %766 = vector.broadcast %765 : vector<1x1xf32> to vector<1x128xf32>
    %767 = arith.mulf %758, %766 : vector<1x128xf32>
    %768 = arith.index_cast %c8_i32 : i32 to index
    %c0_122 = arith.constant 0 : index
    %769 = vector.load %arg8[%768, %c0_122] : memref<16x128xf32, #tpu.memory_space<vmem>>, vector<1x128xf32>
    tpu.vector_store %arg8[%768, %c0_122], %767 {strides = array<i32>} : memref<16x128xf32, #tpu.memory_space<vmem>>, vector<1x128xf32>,
    %c9_i32 = arith.constant 9 : i32
    %770 = arith.index_cast %c9_i32 : i32 to index
    %771 = memref.load %arg0[%770] : memref<16xi32, #tpu.memory_space<smem>>
    %772 = arith.index_cast %c9_i32 : i32 to index
    %773 = memref.load %arg1[%772] : memref<16xi32, #tpu.memory_space<smem>>
    %774 = arith.index_cast %c9_i32 : i32 to index
    %775 = memref.load %arg2[%774] : memref<16xf32, #tpu.memory_space<smem>>
    %776 = vector.broadcast %771 : i32 to vector<4x1xi32>
    %777 = arith.cmpi eq, %0, %776 : vector<4x1xi32>
    %cst_123 = arith.constant 0.000000e+00 : f32
    %778 = vector.shape_cast %777 : vector<4x1xi1> to vector<4x1xi1>
    %779 = vector.broadcast %778 : vector<4x1xi1> to vector<4x42xi1>
    %780 = vector.broadcast %cst_123 : f32 to vector<4x42xf32>
    %781 = arith.select %779, %744, %780 : vector<4x42xi1>, vector<4x42xf32>
    %cst_124 = arith.constant dense<0.000000e+00> : vector<42xf32>
    %782 = vector.multi_reduction <add>, %781, %cst_124 [0] : vector<4x42xf32> to vector<42xf32>
    %783 = vector.shape_cast %782 : vector<42xf32> to vector<1x42xf32>
    %784 = vector.broadcast %773 : i32 to vector<4x1xi32>
    %785 = arith.cmpi eq, %0, %784 : vector<4x1xi32>
    %cst_125 = arith.constant 0.000000e+00 : f32
    %786 = vector.shape_cast %785 : vector<4x1xi1> to vector<4x1xi1>
    %787 = vector.broadcast %786 : vector<4x1xi1> to vector<4x42xi1>
    %788 = vector.broadcast %cst_125 : f32 to vector<4x42xf32>
    %789 = arith.select %787, %751, %788 : vector<4x42xi1>, vector<4x42xf32>
    %cst_126 = arith.constant dense<0.000000e+00> : vector<42xf32>
    %790 = vector.multi_reduction <add>, %789, %cst_126 [0] : vector<4x42xf32> to vector<42xf32>
    %791 = vector.shape_cast %790 : vector<42xf32> to vector<1x42xf32>
    %792 = arith.addf %783, %791 : vector<1x42xf32>
    %793 = vector.broadcast %775 : f32 to vector<1x42xf32>
    %794 = arith.mulf %793, %5 : vector<1x42xf32>
    %795 = arith.addf %792, %794 : vector<1x42xf32>
    %796 = arith.addf %795, %9 : vector<1x42xf32>
    %797 = arith.index_cast %771 : i32 to index
    %c0_127 = arith.constant 0 : index
    %c0_128 = arith.constant 0 : index
    %798 = vector.load %arg5[%797, %c0_127, %c0_128] : memref<4x42x896xf32, #tpu.memory_space<vmem>>, vector<1x42x896xf32>
    %799 = vector.shape_cast %798 : vector<1x42x896xf32> to vector<42x896xf32>
    %cst_129 = arith.constant dense<0.000000e+00> : vector<1x896xf32>
    %800 = tpu.matmul %796, %799, %cst_129 {dimension_numbers = #tpu.dot_dimension_numbers<[1], [0], [0], [1], [0, 0, 1, 1], [], []>} : vector<1x42xf32>, vector<42x896xf32>, vector<1x896xf32> -> vector<1x896xf32>
    %801 = vector.extract_strided_slice %800 {offsets = [0, 0], sizes = [1, 256], strides = [1, 1]} : vector<1x896xf32> to vector<1x256xf32>
    %802 = vector.extract_strided_slice %800 {offsets = [0, 384], sizes = [1, 256], strides = [1, 1]} : vector<1x896xf32> to vector<1x256xf32>
    %803 = arith.addf %801, %802 : vector<1x256xf32>
    %804 = arith.negf %803 : vector<1x256xf32>
    %805 = math.exp %804 : vector<1x256xf32>
    %cst_130 = arith.constant 1.000000e+00 : f32
    %806 = vector.broadcast %cst_130 : f32 to vector<1x256xf32>
    %807 = arith.addf %806, %805 : vector<1x256xf32>
    %808 = arith.divf %806, %807 : vector<1x256xf32>
    %809 = vector.extract_strided_slice %808 {offsets = [0, 0], sizes = [1, 128], strides = [1, 1]} : vector<1x256xf32> to vector<1x128xf32>
    %810 = vector.extract_strided_slice %808 {offsets = [0, 128], sizes = [1, 128], strides = [1, 1]} : vector<1x256xf32> to vector<1x128xf32>
    %811 = vector.extract_strided_slice %800 {offsets = [0, 256], sizes = [1, 128], strides = [1, 1]} : vector<1x896xf32> to vector<1x128xf32>
    %812 = vector.extract_strided_slice %800 {offsets = [0, 640], sizes = [1, 128], strides = [1, 1]} : vector<1x896xf32> to vector<1x128xf32>
    %813 = arith.mulf %809, %812 : vector<1x128xf32>
    %814 = arith.addf %811, %813 : vector<1x128xf32>
    %815 = math.tanh %814 : vector<1x128xf32>
    %816 = vector.extract_strided_slice %810 {offsets = [0, 0], sizes = [1, 42], strides = [1, 1]} : vector<1x128xf32> to vector<1x42xf32>
    %817 = vector.extract_strided_slice %815 {offsets = [0, 0], sizes = [1, 42], strides = [1, 1]} : vector<1x128xf32> to vector<1x42xf32>
    %818 = arith.subf %783, %817 : vector<1x42xf32>
    %819 = arith.mulf %816, %818 : vector<1x42xf32>
    %820 = arith.addf %817, %819 : vector<1x42xf32>
    %821 = vector.extract_strided_slice %800 {offsets = [0, 768], sizes = [1, 42], strides = [1, 1]} : vector<1x896xf32> to vector<1x42xf32>
    %822 = vector.broadcast %771 : i32 to vector<4x1xi32>
    %823 = arith.cmpi eq, %0, %822 : vector<4x1xi32>
    %824 = vector.shape_cast %823 : vector<4x1xi1> to vector<4x1xi1>
    %825 = vector.broadcast %824 : vector<4x1xi1> to vector<4x42xi1>
    %826 = vector.shape_cast %820 : vector<1x42xf32> to vector<1x42xf32>
    %827 = vector.broadcast %826 : vector<1x42xf32> to vector<4x42xf32>
    %828 = arith.select %825, %827, %744 : vector<4x42xi1>, vector<4x42xf32>
    %829 = vector.broadcast %773 : i32 to vector<4x1xi32>
    %830 = arith.cmpi eq, %0, %829 : vector<4x1xi32>
    %831 = vector.shape_cast %830 : vector<4x1xi1> to vector<4x1xi1>
    %832 = vector.broadcast %831 : vector<4x1xi1> to vector<4x42xi1>
    %833 = vector.shape_cast %821 : vector<1x42xf32> to vector<1x42xf32>
    %834 = vector.broadcast %833 : vector<1x42xf32> to vector<4x42xf32>
    %835 = arith.select %832, %834, %751 : vector<4x42xi1>, vector<4x42xf32>
    %cst_131 = arith.constant dense<0.000000e+00> : vector<1x128xf32>
    %836 = tpu.matmul %820, %10, %cst_131 {dimension_numbers = #tpu.dot_dimension_numbers<[1], [0], [0], [1], [0, 0, 1, 1], [], []>} : vector<1x42xf32>, vector<42x128xf32>, vector<1x128xf32> -> vector<1x128xf32>
    %837 = arith.addf %836, %11 : vector<1x128xf32>
    %cst_132 = arith.constant dense<0xFF800000> : vector<1xf32>
    %838 = vector.multi_reduction <maximumf>, %837, %cst_132 [1] : vector<1x128xf32> to vector<1xf32>
    %839 = vector.shape_cast %838 : vector<1xf32> to vector<1x1xf32>
    %840 = vector.broadcast %839 : vector<1x1xf32> to vector<1x128xf32>
    %841 = arith.subf %837, %840 : vector<1x128xf32>
    %842 = math.exp %841 : vector<1x128xf32>
    %cst_133 = arith.constant dense<0.000000e+00> : vector<1xf32>
    %843 = vector.multi_reduction <add>, %842, %cst_133 [1] : vector<1x128xf32> to vector<1xf32>
    %844 = vector.shape_cast %843 : vector<1xf32> to vector<1x1xf32>
    %845 = tpu.reciprocal %844 {approx = true} : vector<1x1xf32> -> vector<1x1xf32>
    %846 = arith.mulf %844, %845 : vector<1x1xf32>
    %cst_134 = arith.constant 2.000000e+00 : f32
    %847 = vector.broadcast %cst_134 : f32 to vector<1x1xf32>
    %848 = arith.subf %847, %846 : vector<1x1xf32>
    %849 = arith.mulf %845, %848 : vector<1x1xf32>
    %850 = vector.broadcast %849 : vector<1x1xf32> to vector<1x128xf32>
    %851 = arith.mulf %842, %850 : vector<1x128xf32>
    %852 = arith.index_cast %c9_i32 : i32 to index
    %c0_135 = arith.constant 0 : index
    %853 = vector.load %arg8[%852, %c0_135] : memref<16x128xf32, #tpu.memory_space<vmem>>, vector<1x128xf32>
    tpu.vector_store %arg8[%852, %c0_135], %851 {strides = array<i32>} : memref<16x128xf32, #tpu.memory_space<vmem>>, vector<1x128xf32>,
    %c10_i32 = arith.constant 10 : i32
    %854 = arith.index_cast %c10_i32 : i32 to index
    %855 = memref.load %arg0[%854] : memref<16xi32, #tpu.memory_space<smem>>
    %856 = arith.index_cast %c10_i32 : i32 to index
    %857 = memref.load %arg1[%856] : memref<16xi32, #tpu.memory_space<smem>>
    %858 = arith.index_cast %c10_i32 : i32 to index
    %859 = memref.load %arg2[%858] : memref<16xf32, #tpu.memory_space<smem>>
    %860 = vector.broadcast %855 : i32 to vector<4x1xi32>
    %861 = arith.cmpi eq, %0, %860 : vector<4x1xi32>
    %cst_136 = arith.constant 0.000000e+00 : f32
    %862 = vector.shape_cast %861 : vector<4x1xi1> to vector<4x1xi1>
    %863 = vector.broadcast %862 : vector<4x1xi1> to vector<4x42xi1>
    %864 = vector.broadcast %cst_136 : f32 to vector<4x42xf32>
    %865 = arith.select %863, %828, %864 : vector<4x42xi1>, vector<4x42xf32>
    %cst_137 = arith.constant dense<0.000000e+00> : vector<42xf32>
    %866 = vector.multi_reduction <add>, %865, %cst_137 [0] : vector<4x42xf32> to vector<42xf32>
    %867 = vector.shape_cast %866 : vector<42xf32> to vector<1x42xf32>
    %868 = vector.broadcast %857 : i32 to vector<4x1xi32>
    %869 = arith.cmpi eq, %0, %868 : vector<4x1xi32>
    %cst_138 = arith.constant 0.000000e+00 : f32
    %870 = vector.shape_cast %869 : vector<4x1xi1> to vector<4x1xi1>
    %871 = vector.broadcast %870 : vector<4x1xi1> to vector<4x42xi1>
    %872 = vector.broadcast %cst_138 : f32 to vector<4x42xf32>
    %873 = arith.select %871, %835, %872 : vector<4x42xi1>, vector<4x42xf32>
    %cst_139 = arith.constant dense<0.000000e+00> : vector<42xf32>
    %874 = vector.multi_reduction <add>, %873, %cst_139 [0] : vector<4x42xf32> to vector<42xf32>
    %875 = vector.shape_cast %874 : vector<42xf32> to vector<1x42xf32>
    %876 = arith.addf %867, %875 : vector<1x42xf32>
    %877 = vector.broadcast %859 : f32 to vector<1x42xf32>
    %878 = arith.mulf %877, %5 : vector<1x42xf32>
    %879 = arith.addf %876, %878 : vector<1x42xf32>
    %880 = arith.addf %879, %9 : vector<1x42xf32>
    %881 = arith.index_cast %855 : i32 to index
    %c0_140 = arith.constant 0 : index
    %c0_141 = arith.constant 0 : index
    %882 = vector.load %arg5[%881, %c0_140, %c0_141] : memref<4x42x896xf32, #tpu.memory_space<vmem>>, vector<1x42x896xf32>
    %883 = vector.shape_cast %882 : vector<1x42x896xf32> to vector<42x896xf32>
    %cst_142 = arith.constant dense<0.000000e+00> : vector<1x896xf32>
    %884 = tpu.matmul %880, %883, %cst_142 {dimension_numbers = #tpu.dot_dimension_numbers<[1], [0], [0], [1], [0, 0, 1, 1], [], []>} : vector<1x42xf32>, vector<42x896xf32>, vector<1x896xf32> -> vector<1x896xf32>
    %885 = vector.extract_strided_slice %884 {offsets = [0, 0], sizes = [1, 256], strides = [1, 1]} : vector<1x896xf32> to vector<1x256xf32>
    %886 = vector.extract_strided_slice %884 {offsets = [0, 384], sizes = [1, 256], strides = [1, 1]} : vector<1x896xf32> to vector<1x256xf32>
    %887 = arith.addf %885, %886 : vector<1x256xf32>
    %888 = arith.negf %887 : vector<1x256xf32>
    %889 = math.exp %888 : vector<1x256xf32>
    %cst_143 = arith.constant 1.000000e+00 : f32
    %890 = vector.broadcast %cst_143 : f32 to vector<1x256xf32>
    %891 = arith.addf %890, %889 : vector<1x256xf32>
    %892 = arith.divf %890, %891 : vector<1x256xf32>
    %893 = vector.extract_strided_slice %892 {offsets = [0, 0], sizes = [1, 128], strides = [1, 1]} : vector<1x256xf32> to vector<1x128xf32>
    %894 = vector.extract_strided_slice %892 {offsets = [0, 128], sizes = [1, 128], strides = [1, 1]} : vector<1x256xf32> to vector<1x128xf32>
    %895 = vector.extract_strided_slice %884 {offsets = [0, 256], sizes = [1, 128], strides = [1, 1]} : vector<1x896xf32> to vector<1x128xf32>
    %896 = vector.extract_strided_slice %884 {offsets = [0, 640], sizes = [1, 128], strides = [1, 1]} : vector<1x896xf32> to vector<1x128xf32>
    %897 = arith.mulf %893, %896 : vector<1x128xf32>
    %898 = arith.addf %895, %897 : vector<1x128xf32>
    %899 = math.tanh %898 : vector<1x128xf32>
    %900 = vector.extract_strided_slice %894 {offsets = [0, 0], sizes = [1, 42], strides = [1, 1]} : vector<1x128xf32> to vector<1x42xf32>
    %901 = vector.extract_strided_slice %899 {offsets = [0, 0], sizes = [1, 42], strides = [1, 1]} : vector<1x128xf32> to vector<1x42xf32>
    %902 = arith.subf %867, %901 : vector<1x42xf32>
    %903 = arith.mulf %900, %902 : vector<1x42xf32>
    %904 = arith.addf %901, %903 : vector<1x42xf32>
    %905 = vector.extract_strided_slice %884 {offsets = [0, 768], sizes = [1, 42], strides = [1, 1]} : vector<1x896xf32> to vector<1x42xf32>
    %906 = vector.broadcast %855 : i32 to vector<4x1xi32>
    %907 = arith.cmpi eq, %0, %906 : vector<4x1xi32>
    %908 = vector.shape_cast %907 : vector<4x1xi1> to vector<4x1xi1>
    %909 = vector.broadcast %908 : vector<4x1xi1> to vector<4x42xi1>
    %910 = vector.shape_cast %904 : vector<1x42xf32> to vector<1x42xf32>
    %911 = vector.broadcast %910 : vector<1x42xf32> to vector<4x42xf32>
    %912 = arith.select %909, %911, %828 : vector<4x42xi1>, vector<4x42xf32>
    %913 = vector.broadcast %857 : i32 to vector<4x1xi32>
    %914 = arith.cmpi eq, %0, %913 : vector<4x1xi32>
    %915 = vector.shape_cast %914 : vector<4x1xi1> to vector<4x1xi1>
    %916 = vector.broadcast %915 : vector<4x1xi1> to vector<4x42xi1>
    %917 = vector.shape_cast %905 : vector<1x42xf32> to vector<1x42xf32>
    %918 = vector.broadcast %917 : vector<1x42xf32> to vector<4x42xf32>
    %919 = arith.select %916, %918, %835 : vector<4x42xi1>, vector<4x42xf32>
    %cst_144 = arith.constant dense<0.000000e+00> : vector<1x128xf32>
    %920 = tpu.matmul %904, %10, %cst_144 {dimension_numbers = #tpu.dot_dimension_numbers<[1], [0], [0], [1], [0, 0, 1, 1], [], []>} : vector<1x42xf32>, vector<42x128xf32>, vector<1x128xf32> -> vector<1x128xf32>
    %921 = arith.addf %920, %11 : vector<1x128xf32>
    %cst_145 = arith.constant dense<0xFF800000> : vector<1xf32>
    %922 = vector.multi_reduction <maximumf>, %921, %cst_145 [1] : vector<1x128xf32> to vector<1xf32>
    %923 = vector.shape_cast %922 : vector<1xf32> to vector<1x1xf32>
    %924 = vector.broadcast %923 : vector<1x1xf32> to vector<1x128xf32>
    %925 = arith.subf %921, %924 : vector<1x128xf32>
    %926 = math.exp %925 : vector<1x128xf32>
    %cst_146 = arith.constant dense<0.000000e+00> : vector<1xf32>
    %927 = vector.multi_reduction <add>, %926, %cst_146 [1] : vector<1x128xf32> to vector<1xf32>
    %928 = vector.shape_cast %927 : vector<1xf32> to vector<1x1xf32>
    %929 = tpu.reciprocal %928 {approx = true} : vector<1x1xf32> -> vector<1x1xf32>
    %930 = arith.mulf %928, %929 : vector<1x1xf32>
    %cst_147 = arith.constant 2.000000e+00 : f32
    %931 = vector.broadcast %cst_147 : f32 to vector<1x1xf32>
    %932 = arith.subf %931, %930 : vector<1x1xf32>
    %933 = arith.mulf %929, %932 : vector<1x1xf32>
    %934 = vector.broadcast %933 : vector<1x1xf32> to vector<1x128xf32>
    %935 = arith.mulf %926, %934 : vector<1x128xf32>
    %936 = arith.index_cast %c10_i32 : i32 to index
    %c0_148 = arith.constant 0 : index
    %937 = vector.load %arg8[%936, %c0_148] : memref<16x128xf32, #tpu.memory_space<vmem>>, vector<1x128xf32>
    tpu.vector_store %arg8[%936, %c0_148], %935 {strides = array<i32>} : memref<16x128xf32, #tpu.memory_space<vmem>>, vector<1x128xf32>,
    %c11_i32 = arith.constant 11 : i32
    %938 = arith.index_cast %c11_i32 : i32 to index
    %939 = memref.load %arg0[%938] : memref<16xi32, #tpu.memory_space<smem>>
    %940 = arith.index_cast %c11_i32 : i32 to index
    %941 = memref.load %arg1[%940] : memref<16xi32, #tpu.memory_space<smem>>
    %942 = arith.index_cast %c11_i32 : i32 to index
    %943 = memref.load %arg2[%942] : memref<16xf32, #tpu.memory_space<smem>>
    %944 = vector.broadcast %939 : i32 to vector<4x1xi32>
    %945 = arith.cmpi eq, %0, %944 : vector<4x1xi32>
    %cst_149 = arith.constant 0.000000e+00 : f32
    %946 = vector.shape_cast %945 : vector<4x1xi1> to vector<4x1xi1>
    %947 = vector.broadcast %946 : vector<4x1xi1> to vector<4x42xi1>
    %948 = vector.broadcast %cst_149 : f32 to vector<4x42xf32>
    %949 = arith.select %947, %912, %948 : vector<4x42xi1>, vector<4x42xf32>
    %cst_150 = arith.constant dense<0.000000e+00> : vector<42xf32>
    %950 = vector.multi_reduction <add>, %949, %cst_150 [0] : vector<4x42xf32> to vector<42xf32>
    %951 = vector.shape_cast %950 : vector<42xf32> to vector<1x42xf32>
    %952 = vector.broadcast %941 : i32 to vector<4x1xi32>
    %953 = arith.cmpi eq, %0, %952 : vector<4x1xi32>
    %cst_151 = arith.constant 0.000000e+00 : f32
    %954 = vector.shape_cast %953 : vector<4x1xi1> to vector<4x1xi1>
    %955 = vector.broadcast %954 : vector<4x1xi1> to vector<4x42xi1>
    %956 = vector.broadcast %cst_151 : f32 to vector<4x42xf32>
    %957 = arith.select %955, %919, %956 : vector<4x42xi1>, vector<4x42xf32>
    %cst_152 = arith.constant dense<0.000000e+00> : vector<42xf32>
    %958 = vector.multi_reduction <add>, %957, %cst_152 [0] : vector<4x42xf32> to vector<42xf32>
    %959 = vector.shape_cast %958 : vector<42xf32> to vector<1x42xf32>
    %960 = arith.addf %951, %959 : vector<1x42xf32>
    %961 = vector.broadcast %943 : f32 to vector<1x42xf32>
    %962 = arith.mulf %961, %5 : vector<1x42xf32>
    %963 = arith.addf %960, %962 : vector<1x42xf32>
    %964 = arith.addf %963, %9 : vector<1x42xf32>
    %965 = arith.index_cast %939 : i32 to index
    %c0_153 = arith.constant 0 : index
    %c0_154 = arith.constant 0 : index
    %966 = vector.load %arg5[%965, %c0_153, %c0_154] : memref<4x42x896xf32, #tpu.memory_space<vmem>>, vector<1x42x896xf32>
    %967 = vector.shape_cast %966 : vector<1x42x896xf32> to vector<42x896xf32>
    %cst_155 = arith.constant dense<0.000000e+00> : vector<1x896xf32>
    %968 = tpu.matmul %964, %967, %cst_155 {dimension_numbers = #tpu.dot_dimension_numbers<[1], [0], [0], [1], [0, 0, 1, 1], [], []>} : vector<1x42xf32>, vector<42x896xf32>, vector<1x896xf32> -> vector<1x896xf32>
    %969 = vector.extract_strided_slice %968 {offsets = [0, 0], sizes = [1, 256], strides = [1, 1]} : vector<1x896xf32> to vector<1x256xf32>
    %970 = vector.extract_strided_slice %968 {offsets = [0, 384], sizes = [1, 256], strides = [1, 1]} : vector<1x896xf32> to vector<1x256xf32>
    %971 = arith.addf %969, %970 : vector<1x256xf32>
    %972 = arith.negf %971 : vector<1x256xf32>
    %973 = math.exp %972 : vector<1x256xf32>
    %cst_156 = arith.constant 1.000000e+00 : f32
    %974 = vector.broadcast %cst_156 : f32 to vector<1x256xf32>
    %975 = arith.addf %974, %973 : vector<1x256xf32>
    %976 = arith.divf %974, %975 : vector<1x256xf32>
    %977 = vector.extract_strided_slice %976 {offsets = [0, 0], sizes = [1, 128], strides = [1, 1]} : vector<1x256xf32> to vector<1x128xf32>
    %978 = vector.extract_strided_slice %976 {offsets = [0, 128], sizes = [1, 128], strides = [1, 1]} : vector<1x256xf32> to vector<1x128xf32>
    %979 = vector.extract_strided_slice %968 {offsets = [0, 256], sizes = [1, 128], strides = [1, 1]} : vector<1x896xf32> to vector<1x128xf32>
    %980 = vector.extract_strided_slice %968 {offsets = [0, 640], sizes = [1, 128], strides = [1, 1]} : vector<1x896xf32> to vector<1x128xf32>
    %981 = arith.mulf %977, %980 : vector<1x128xf32>
    %982 = arith.addf %979, %981 : vector<1x128xf32>
    %983 = math.tanh %982 : vector<1x128xf32>
    %984 = vector.extract_strided_slice %978 {offsets = [0, 0], sizes = [1, 42], strides = [1, 1]} : vector<1x128xf32> to vector<1x42xf32>
    %985 = vector.extract_strided_slice %983 {offsets = [0, 0], sizes = [1, 42], strides = [1, 1]} : vector<1x128xf32> to vector<1x42xf32>
    %986 = arith.subf %951, %985 : vector<1x42xf32>
    %987 = arith.mulf %984, %986 : vector<1x42xf32>
    %988 = arith.addf %985, %987 : vector<1x42xf32>
    %989 = vector.extract_strided_slice %968 {offsets = [0, 768], sizes = [1, 42], strides = [1, 1]} : vector<1x896xf32> to vector<1x42xf32>
    %990 = vector.broadcast %939 : i32 to vector<4x1xi32>
    %991 = arith.cmpi eq, %0, %990 : vector<4x1xi32>
    %992 = vector.shape_cast %991 : vector<4x1xi1> to vector<4x1xi1>
    %993 = vector.broadcast %992 : vector<4x1xi1> to vector<4x42xi1>
    %994 = vector.shape_cast %988 : vector<1x42xf32> to vector<1x42xf32>
    %995 = vector.broadcast %994 : vector<1x42xf32> to vector<4x42xf32>
    %996 = arith.select %993, %995, %912 : vector<4x42xi1>, vector<4x42xf32>
    %997 = vector.broadcast %941 : i32 to vector<4x1xi32>
    %998 = arith.cmpi eq, %0, %997 : vector<4x1xi32>
    %999 = vector.shape_cast %998 : vector<4x1xi1> to vector<4x1xi1>
    %1000 = vector.broadcast %999 : vector<4x1xi1> to vector<4x42xi1>
    %1001 = vector.shape_cast %989 : vector<1x42xf32> to vector<1x42xf32>
    %1002 = vector.broadcast %1001 : vector<1x42xf32> to vector<4x42xf32>
    %1003 = arith.select %1000, %1002, %919 : vector<4x42xi1>, vector<4x42xf32>
    %cst_157 = arith.constant dense<0.000000e+00> : vector<1x128xf32>
    %1004 = tpu.matmul %988, %10, %cst_157 {dimension_numbers = #tpu.dot_dimension_numbers<[1], [0], [0], [1], [0, 0, 1, 1], [], []>} : vector<1x42xf32>, vector<42x128xf32>, vector<1x128xf32> -> vector<1x128xf32>
    %1005 = arith.addf %1004, %11 : vector<1x128xf32>
    %cst_158 = arith.constant dense<0xFF800000> : vector<1xf32>
    %1006 = vector.multi_reduction <maximumf>, %1005, %cst_158 [1] : vector<1x128xf32> to vector<1xf32>
    %1007 = vector.shape_cast %1006 : vector<1xf32> to vector<1x1xf32>
    %1008 = vector.broadcast %1007 : vector<1x1xf32> to vector<1x128xf32>
    %1009 = arith.subf %1005, %1008 : vector<1x128xf32>
    %1010 = math.exp %1009 : vector<1x128xf32>
    %cst_159 = arith.constant dense<0.000000e+00> : vector<1xf32>
    %1011 = vector.multi_reduction <add>, %1010, %cst_159 [1] : vector<1x128xf32> to vector<1xf32>
    %1012 = vector.shape_cast %1011 : vector<1xf32> to vector<1x1xf32>
    %1013 = tpu.reciprocal %1012 {approx = true} : vector<1x1xf32> -> vector<1x1xf32>
    %1014 = arith.mulf %1012, %1013 : vector<1x1xf32>
    %cst_160 = arith.constant 2.000000e+00 : f32
    %1015 = vector.broadcast %cst_160 : f32 to vector<1x1xf32>
    %1016 = arith.subf %1015, %1014 : vector<1x1xf32>
    %1017 = arith.mulf %1013, %1016 : vector<1x1xf32>
    %1018 = vector.broadcast %1017 : vector<1x1xf32> to vector<1x128xf32>
    %1019 = arith.mulf %1010, %1018 : vector<1x128xf32>
    %1020 = arith.index_cast %c11_i32 : i32 to index
    %c0_161 = arith.constant 0 : index
    %1021 = vector.load %arg8[%1020, %c0_161] : memref<16x128xf32, #tpu.memory_space<vmem>>, vector<1x128xf32>
    tpu.vector_store %arg8[%1020, %c0_161], %1019 {strides = array<i32>} : memref<16x128xf32, #tpu.memory_space<vmem>>, vector<1x128xf32>,
    %c12_i32 = arith.constant 12 : i32
    %1022 = arith.index_cast %c12_i32 : i32 to index
    %1023 = memref.load %arg0[%1022] : memref<16xi32, #tpu.memory_space<smem>>
    %1024 = arith.index_cast %c12_i32 : i32 to index
    %1025 = memref.load %arg1[%1024] : memref<16xi32, #tpu.memory_space<smem>>
    %1026 = arith.index_cast %c12_i32 : i32 to index
    %1027 = memref.load %arg2[%1026] : memref<16xf32, #tpu.memory_space<smem>>
    %1028 = vector.broadcast %1023 : i32 to vector<4x1xi32>
    %1029 = arith.cmpi eq, %0, %1028 : vector<4x1xi32>
    %cst_162 = arith.constant 0.000000e+00 : f32
    %1030 = vector.shape_cast %1029 : vector<4x1xi1> to vector<4x1xi1>
    %1031 = vector.broadcast %1030 : vector<4x1xi1> to vector<4x42xi1>
    %1032 = vector.broadcast %cst_162 : f32 to vector<4x42xf32>
    %1033 = arith.select %1031, %996, %1032 : vector<4x42xi1>, vector<4x42xf32>
    %cst_163 = arith.constant dense<0.000000e+00> : vector<42xf32>
    %1034 = vector.multi_reduction <add>, %1033, %cst_163 [0] : vector<4x42xf32> to vector<42xf32>
    %1035 = vector.shape_cast %1034 : vector<42xf32> to vector<1x42xf32>
    %1036 = vector.broadcast %1025 : i32 to vector<4x1xi32>
    %1037 = arith.cmpi eq, %0, %1036 : vector<4x1xi32>
    %cst_164 = arith.constant 0.000000e+00 : f32
    %1038 = vector.shape_cast %1037 : vector<4x1xi1> to vector<4x1xi1>
    %1039 = vector.broadcast %1038 : vector<4x1xi1> to vector<4x42xi1>
    %1040 = vector.broadcast %cst_164 : f32 to vector<4x42xf32>
    %1041 = arith.select %1039, %1003, %1040 : vector<4x42xi1>, vector<4x42xf32>
    %cst_165 = arith.constant dense<0.000000e+00> : vector<42xf32>
    %1042 = vector.multi_reduction <add>, %1041, %cst_165 [0] : vector<4x42xf32> to vector<42xf32>
    %1043 = vector.shape_cast %1042 : vector<42xf32> to vector<1x42xf32>
    %1044 = arith.addf %1035, %1043 : vector<1x42xf32>
    %1045 = vector.broadcast %1027 : f32 to vector<1x42xf32>
    %1046 = arith.mulf %1045, %5 : vector<1x42xf32>
    %1047 = arith.addf %1044, %1046 : vector<1x42xf32>
    %1048 = arith.addf %1047, %9 : vector<1x42xf32>
    %1049 = arith.index_cast %1023 : i32 to index
    %c0_166 = arith.constant 0 : index
    %c0_167 = arith.constant 0 : index
    %1050 = vector.load %arg5[%1049, %c0_166, %c0_167] : memref<4x42x896xf32, #tpu.memory_space<vmem>>, vector<1x42x896xf32>
    %1051 = vector.shape_cast %1050 : vector<1x42x896xf32> to vector<42x896xf32>
    %cst_168 = arith.constant dense<0.000000e+00> : vector<1x896xf32>
    %1052 = tpu.matmul %1048, %1051, %cst_168 {dimension_numbers = #tpu.dot_dimension_numbers<[1], [0], [0], [1], [0, 0, 1, 1], [], []>} : vector<1x42xf32>, vector<42x896xf32>, vector<1x896xf32> -> vector<1x896xf32>
    %1053 = vector.extract_strided_slice %1052 {offsets = [0, 0], sizes = [1, 256], strides = [1, 1]} : vector<1x896xf32> to vector<1x256xf32>
    %1054 = vector.extract_strided_slice %1052 {offsets = [0, 384], sizes = [1, 256], strides = [1, 1]} : vector<1x896xf32> to vector<1x256xf32>
    %1055 = arith.addf %1053, %1054 : vector<1x256xf32>
    %1056 = arith.negf %1055 : vector<1x256xf32>
    %1057 = math.exp %1056 : vector<1x256xf32>
    %cst_169 = arith.constant 1.000000e+00 : f32
    %1058 = vector.broadcast %cst_169 : f32 to vector<1x256xf32>
    %1059 = arith.addf %1058, %1057 : vector<1x256xf32>
    %1060 = arith.divf %1058, %1059 : vector<1x256xf32>
    %1061 = vector.extract_strided_slice %1060 {offsets = [0, 0], sizes = [1, 128], strides = [1, 1]} : vector<1x256xf32> to vector<1x128xf32>
    %1062 = vector.extract_strided_slice %1060 {offsets = [0, 128], sizes = [1, 128], strides = [1, 1]} : vector<1x256xf32> to vector<1x128xf32>
    %1063 = vector.extract_strided_slice %1052 {offsets = [0, 256], sizes = [1, 128], strides = [1, 1]} : vector<1x896xf32> to vector<1x128xf32>
    %1064 = vector.extract_strided_slice %1052 {offsets = [0, 640], sizes = [1, 128], strides = [1, 1]} : vector<1x896xf32> to vector<1x128xf32>
    %1065 = arith.mulf %1061, %1064 : vector<1x128xf32>
    %1066 = arith.addf %1063, %1065 : vector<1x128xf32>
    %1067 = math.tanh %1066 : vector<1x128xf32>
    %1068 = vector.extract_strided_slice %1062 {offsets = [0, 0], sizes = [1, 42], strides = [1, 1]} : vector<1x128xf32> to vector<1x42xf32>
    %1069 = vector.extract_strided_slice %1067 {offsets = [0, 0], sizes = [1, 42], strides = [1, 1]} : vector<1x128xf32> to vector<1x42xf32>
    %1070 = arith.subf %1035, %1069 : vector<1x42xf32>
    %1071 = arith.mulf %1068, %1070 : vector<1x42xf32>
    %1072 = arith.addf %1069, %1071 : vector<1x42xf32>
    %1073 = vector.extract_strided_slice %1052 {offsets = [0, 768], sizes = [1, 42], strides = [1, 1]} : vector<1x896xf32> to vector<1x42xf32>
    %1074 = vector.broadcast %1023 : i32 to vector<4x1xi32>
    %1075 = arith.cmpi eq, %0, %1074 : vector<4x1xi32>
    %1076 = vector.shape_cast %1075 : vector<4x1xi1> to vector<4x1xi1>
    %1077 = vector.broadcast %1076 : vector<4x1xi1> to vector<4x42xi1>
    %1078 = vector.shape_cast %1072 : vector<1x42xf32> to vector<1x42xf32>
    %1079 = vector.broadcast %1078 : vector<1x42xf32> to vector<4x42xf32>
    %1080 = arith.select %1077, %1079, %996 : vector<4x42xi1>, vector<4x42xf32>
    %1081 = vector.broadcast %1025 : i32 to vector<4x1xi32>
    %1082 = arith.cmpi eq, %0, %1081 : vector<4x1xi32>
    %1083 = vector.shape_cast %1082 : vector<4x1xi1> to vector<4x1xi1>
    %1084 = vector.broadcast %1083 : vector<4x1xi1> to vector<4x42xi1>
    %1085 = vector.shape_cast %1073 : vector<1x42xf32> to vector<1x42xf32>
    %1086 = vector.broadcast %1085 : vector<1x42xf32> to vector<4x42xf32>
    %1087 = arith.select %1084, %1086, %1003 : vector<4x42xi1>, vector<4x42xf32>
    %cst_170 = arith.constant dense<0.000000e+00> : vector<1x128xf32>
    %1088 = tpu.matmul %1072, %10, %cst_170 {dimension_numbers = #tpu.dot_dimension_numbers<[1], [0], [0], [1], [0, 0, 1, 1], [], []>} : vector<1x42xf32>, vector<42x128xf32>, vector<1x128xf32> -> vector<1x128xf32>
    %1089 = arith.addf %1088, %11 : vector<1x128xf32>
    %cst_171 = arith.constant dense<0xFF800000> : vector<1xf32>
    %1090 = vector.multi_reduction <maximumf>, %1089, %cst_171 [1] : vector<1x128xf32> to vector<1xf32>
    %1091 = vector.shape_cast %1090 : vector<1xf32> to vector<1x1xf32>
    %1092 = vector.broadcast %1091 : vector<1x1xf32> to vector<1x128xf32>
    %1093 = arith.subf %1089, %1092 : vector<1x128xf32>
    %1094 = math.exp %1093 : vector<1x128xf32>
    %cst_172 = arith.constant dense<0.000000e+00> : vector<1xf32>
    %1095 = vector.multi_reduction <add>, %1094, %cst_172 [1] : vector<1x128xf32> to vector<1xf32>
    %1096 = vector.shape_cast %1095 : vector<1xf32> to vector<1x1xf32>
    %1097 = tpu.reciprocal %1096 {approx = true} : vector<1x1xf32> -> vector<1x1xf32>
    %1098 = arith.mulf %1096, %1097 : vector<1x1xf32>
    %cst_173 = arith.constant 2.000000e+00 : f32
    %1099 = vector.broadcast %cst_173 : f32 to vector<1x1xf32>
    %1100 = arith.subf %1099, %1098 : vector<1x1xf32>
    %1101 = arith.mulf %1097, %1100 : vector<1x1xf32>
    %1102 = vector.broadcast %1101 : vector<1x1xf32> to vector<1x128xf32>
    %1103 = arith.mulf %1094, %1102 : vector<1x128xf32>
    %1104 = arith.index_cast %c12_i32 : i32 to index
    %c0_174 = arith.constant 0 : index
    %1105 = vector.load %arg8[%1104, %c0_174] : memref<16x128xf32, #tpu.memory_space<vmem>>, vector<1x128xf32>
    tpu.vector_store %arg8[%1104, %c0_174], %1103 {strides = array<i32>} : memref<16x128xf32, #tpu.memory_space<vmem>>, vector<1x128xf32>,
    %c13_i32 = arith.constant 13 : i32
    %1106 = arith.index_cast %c13_i32 : i32 to index
    %1107 = memref.load %arg0[%1106] : memref<16xi32, #tpu.memory_space<smem>>
    %1108 = arith.index_cast %c13_i32 : i32 to index
    %1109 = memref.load %arg1[%1108] : memref<16xi32, #tpu.memory_space<smem>>
    %1110 = arith.index_cast %c13_i32 : i32 to index
    %1111 = memref.load %arg2[%1110] : memref<16xf32, #tpu.memory_space<smem>>
    %1112 = vector.broadcast %1107 : i32 to vector<4x1xi32>
    %1113 = arith.cmpi eq, %0, %1112 : vector<4x1xi32>
    %cst_175 = arith.constant 0.000000e+00 : f32
    %1114 = vector.shape_cast %1113 : vector<4x1xi1> to vector<4x1xi1>
    %1115 = vector.broadcast %1114 : vector<4x1xi1> to vector<4x42xi1>
    %1116 = vector.broadcast %cst_175 : f32 to vector<4x42xf32>
    %1117 = arith.select %1115, %1080, %1116 : vector<4x42xi1>, vector<4x42xf32>
    %cst_176 = arith.constant dense<0.000000e+00> : vector<42xf32>
    %1118 = vector.multi_reduction <add>, %1117, %cst_176 [0] : vector<4x42xf32> to vector<42xf32>
    %1119 = vector.shape_cast %1118 : vector<42xf32> to vector<1x42xf32>
    %1120 = vector.broadcast %1109 : i32 to vector<4x1xi32>
    %1121 = arith.cmpi eq, %0, %1120 : vector<4x1xi32>
    %cst_177 = arith.constant 0.000000e+00 : f32
    %1122 = vector.shape_cast %1121 : vector<4x1xi1> to vector<4x1xi1>
    %1123 = vector.broadcast %1122 : vector<4x1xi1> to vector<4x42xi1>
    %1124 = vector.broadcast %cst_177 : f32 to vector<4x42xf32>
    %1125 = arith.select %1123, %1087, %1124 : vector<4x42xi1>, vector<4x42xf32>
    %cst_178 = arith.constant dense<0.000000e+00> : vector<42xf32>
    %1126 = vector.multi_reduction <add>, %1125, %cst_178 [0] : vector<4x42xf32> to vector<42xf32>
    %1127 = vector.shape_cast %1126 : vector<42xf32> to vector<1x42xf32>
    %1128 = arith.addf %1119, %1127 : vector<1x42xf32>
    %1129 = vector.broadcast %1111 : f32 to vector<1x42xf32>
    %1130 = arith.mulf %1129, %5 : vector<1x42xf32>
    %1131 = arith.addf %1128, %1130 : vector<1x42xf32>
    %1132 = arith.addf %1131, %9 : vector<1x42xf32>
    %1133 = arith.index_cast %1107 : i32 to index
    %c0_179 = arith.constant 0 : index
    %c0_180 = arith.constant 0 : index
    %1134 = vector.load %arg5[%1133, %c0_179, %c0_180] : memref<4x42x896xf32, #tpu.memory_space<vmem>>, vector<1x42x896xf32>
    %1135 = vector.shape_cast %1134 : vector<1x42x896xf32> to vector<42x896xf32>
    %cst_181 = arith.constant dense<0.000000e+00> : vector<1x896xf32>
    %1136 = tpu.matmul %1132, %1135, %cst_181 {dimension_numbers = #tpu.dot_dimension_numbers<[1], [0], [0], [1], [0, 0, 1, 1], [], []>} : vector<1x42xf32>, vector<42x896xf32>, vector<1x896xf32> -> vector<1x896xf32>
    %1137 = vector.extract_strided_slice %1136 {offsets = [0, 0], sizes = [1, 256], strides = [1, 1]} : vector<1x896xf32> to vector<1x256xf32>
    %1138 = vector.extract_strided_slice %1136 {offsets = [0, 384], sizes = [1, 256], strides = [1, 1]} : vector<1x896xf32> to vector<1x256xf32>
    %1139 = arith.addf %1137, %1138 : vector<1x256xf32>
    %1140 = arith.negf %1139 : vector<1x256xf32>
    %1141 = math.exp %1140 : vector<1x256xf32>
    %cst_182 = arith.constant 1.000000e+00 : f32
    %1142 = vector.broadcast %cst_182 : f32 to vector<1x256xf32>
    %1143 = arith.addf %1142, %1141 : vector<1x256xf32>
    %1144 = arith.divf %1142, %1143 : vector<1x256xf32>
    %1145 = vector.extract_strided_slice %1144 {offsets = [0, 0], sizes = [1, 128], strides = [1, 1]} : vector<1x256xf32> to vector<1x128xf32>
    %1146 = vector.extract_strided_slice %1144 {offsets = [0, 128], sizes = [1, 128], strides = [1, 1]} : vector<1x256xf32> to vector<1x128xf32>
    %1147 = vector.extract_strided_slice %1136 {offsets = [0, 256], sizes = [1, 128], strides = [1, 1]} : vector<1x896xf32> to vector<1x128xf32>
    %1148 = vector.extract_strided_slice %1136 {offsets = [0, 640], sizes = [1, 128], strides = [1, 1]} : vector<1x896xf32> to vector<1x128xf32>
    %1149 = arith.mulf %1145, %1148 : vector<1x128xf32>
    %1150 = arith.addf %1147, %1149 : vector<1x128xf32>
    %1151 = math.tanh %1150 : vector<1x128xf32>
    %1152 = vector.extract_strided_slice %1146 {offsets = [0, 0], sizes = [1, 42], strides = [1, 1]} : vector<1x128xf32> to vector<1x42xf32>
    %1153 = vector.extract_strided_slice %1151 {offsets = [0, 0], sizes = [1, 42], strides = [1, 1]} : vector<1x128xf32> to vector<1x42xf32>
    %1154 = arith.subf %1119, %1153 : vector<1x42xf32>
    %1155 = arith.mulf %1152, %1154 : vector<1x42xf32>
    %1156 = arith.addf %1153, %1155 : vector<1x42xf32>
    %1157 = vector.extract_strided_slice %1136 {offsets = [0, 768], sizes = [1, 42], strides = [1, 1]} : vector<1x896xf32> to vector<1x42xf32>
    %1158 = vector.broadcast %1107 : i32 to vector<4x1xi32>
    %1159 = arith.cmpi eq, %0, %1158 : vector<4x1xi32>
    %1160 = vector.shape_cast %1159 : vector<4x1xi1> to vector<4x1xi1>
    %1161 = vector.broadcast %1160 : vector<4x1xi1> to vector<4x42xi1>
    %1162 = vector.shape_cast %1156 : vector<1x42xf32> to vector<1x42xf32>
    %1163 = vector.broadcast %1162 : vector<1x42xf32> to vector<4x42xf32>
    %1164 = arith.select %1161, %1163, %1080 : vector<4x42xi1>, vector<4x42xf32>
    %1165 = vector.broadcast %1109 : i32 to vector<4x1xi32>
    %1166 = arith.cmpi eq, %0, %1165 : vector<4x1xi32>
    %1167 = vector.shape_cast %1166 : vector<4x1xi1> to vector<4x1xi1>
    %1168 = vector.broadcast %1167 : vector<4x1xi1> to vector<4x42xi1>
    %1169 = vector.shape_cast %1157 : vector<1x42xf32> to vector<1x42xf32>
    %1170 = vector.broadcast %1169 : vector<1x42xf32> to vector<4x42xf32>
    %1171 = arith.select %1168, %1170, %1087 : vector<4x42xi1>, vector<4x42xf32>
    %cst_183 = arith.constant dense<0.000000e+00> : vector<1x128xf32>
    %1172 = tpu.matmul %1156, %10, %cst_183 {dimension_numbers = #tpu.dot_dimension_numbers<[1], [0], [0], [1], [0, 0, 1, 1], [], []>} : vector<1x42xf32>, vector<42x128xf32>, vector<1x128xf32> -> vector<1x128xf32>
    %1173 = arith.addf %1172, %11 : vector<1x128xf32>
    %cst_184 = arith.constant dense<0xFF800000> : vector<1xf32>
    %1174 = vector.multi_reduction <maximumf>, %1173, %cst_184 [1] : vector<1x128xf32> to vector<1xf32>
    %1175 = vector.shape_cast %1174 : vector<1xf32> to vector<1x1xf32>
    %1176 = vector.broadcast %1175 : vector<1x1xf32> to vector<1x128xf32>
    %1177 = arith.subf %1173, %1176 : vector<1x128xf32>
    %1178 = math.exp %1177 : vector<1x128xf32>
    %cst_185 = arith.constant dense<0.000000e+00> : vector<1xf32>
    %1179 = vector.multi_reduction <add>, %1178, %cst_185 [1] : vector<1x128xf32> to vector<1xf32>
    %1180 = vector.shape_cast %1179 : vector<1xf32> to vector<1x1xf32>
    %1181 = tpu.reciprocal %1180 {approx = true} : vector<1x1xf32> -> vector<1x1xf32>
    %1182 = arith.mulf %1180, %1181 : vector<1x1xf32>
    %cst_186 = arith.constant 2.000000e+00 : f32
    %1183 = vector.broadcast %cst_186 : f32 to vector<1x1xf32>
    %1184 = arith.subf %1183, %1182 : vector<1x1xf32>
    %1185 = arith.mulf %1181, %1184 : vector<1x1xf32>
    %1186 = vector.broadcast %1185 : vector<1x1xf32> to vector<1x128xf32>
    %1187 = arith.mulf %1178, %1186 : vector<1x128xf32>
    %1188 = arith.index_cast %c13_i32 : i32 to index
    %c0_187 = arith.constant 0 : index
    %1189 = vector.load %arg8[%1188, %c0_187] : memref<16x128xf32, #tpu.memory_space<vmem>>, vector<1x128xf32>
    tpu.vector_store %arg8[%1188, %c0_187], %1187 {strides = array<i32>} : memref<16x128xf32, #tpu.memory_space<vmem>>, vector<1x128xf32>,
    %c14_i32 = arith.constant 14 : i32
    %1190 = arith.index_cast %c14_i32 : i32 to index
    %1191 = memref.load %arg0[%1190] : memref<16xi32, #tpu.memory_space<smem>>
    %1192 = arith.index_cast %c14_i32 : i32 to index
    %1193 = memref.load %arg1[%1192] : memref<16xi32, #tpu.memory_space<smem>>
    %1194 = arith.index_cast %c14_i32 : i32 to index
    %1195 = memref.load %arg2[%1194] : memref<16xf32, #tpu.memory_space<smem>>
    %1196 = vector.broadcast %1191 : i32 to vector<4x1xi32>
    %1197 = arith.cmpi eq, %0, %1196 : vector<4x1xi32>
    %cst_188 = arith.constant 0.000000e+00 : f32
    %1198 = vector.shape_cast %1197 : vector<4x1xi1> to vector<4x1xi1>
    %1199 = vector.broadcast %1198 : vector<4x1xi1> to vector<4x42xi1>
    %1200 = vector.broadcast %cst_188 : f32 to vector<4x42xf32>
    %1201 = arith.select %1199, %1164, %1200 : vector<4x42xi1>, vector<4x42xf32>
    %cst_189 = arith.constant dense<0.000000e+00> : vector<42xf32>
    %1202 = vector.multi_reduction <add>, %1201, %cst_189 [0] : vector<4x42xf32> to vector<42xf32>
    %1203 = vector.shape_cast %1202 : vector<42xf32> to vector<1x42xf32>
    %1204 = vector.broadcast %1193 : i32 to vector<4x1xi32>
    %1205 = arith.cmpi eq, %0, %1204 : vector<4x1xi32>
    %cst_190 = arith.constant 0.000000e+00 : f32
    %1206 = vector.shape_cast %1205 : vector<4x1xi1> to vector<4x1xi1>
    %1207 = vector.broadcast %1206 : vector<4x1xi1> to vector<4x42xi1>
    %1208 = vector.broadcast %cst_190 : f32 to vector<4x42xf32>
    %1209 = arith.select %1207, %1171, %1208 : vector<4x42xi1>, vector<4x42xf32>
    %cst_191 = arith.constant dense<0.000000e+00> : vector<42xf32>
    %1210 = vector.multi_reduction <add>, %1209, %cst_191 [0] : vector<4x42xf32> to vector<42xf32>
    %1211 = vector.shape_cast %1210 : vector<42xf32> to vector<1x42xf32>
    %1212 = arith.addf %1203, %1211 : vector<1x42xf32>
    %1213 = vector.broadcast %1195 : f32 to vector<1x42xf32>
    %1214 = arith.mulf %1213, %5 : vector<1x42xf32>
    %1215 = arith.addf %1212, %1214 : vector<1x42xf32>
    %1216 = arith.addf %1215, %9 : vector<1x42xf32>
    %1217 = arith.index_cast %1191 : i32 to index
    %c0_192 = arith.constant 0 : index
    %c0_193 = arith.constant 0 : index
    %1218 = vector.load %arg5[%1217, %c0_192, %c0_193] : memref<4x42x896xf32, #tpu.memory_space<vmem>>, vector<1x42x896xf32>
    %1219 = vector.shape_cast %1218 : vector<1x42x896xf32> to vector<42x896xf32>
    %cst_194 = arith.constant dense<0.000000e+00> : vector<1x896xf32>
    %1220 = tpu.matmul %1216, %1219, %cst_194 {dimension_numbers = #tpu.dot_dimension_numbers<[1], [0], [0], [1], [0, 0, 1, 1], [], []>} : vector<1x42xf32>, vector<42x896xf32>, vector<1x896xf32> -> vector<1x896xf32>
    %1221 = vector.extract_strided_slice %1220 {offsets = [0, 0], sizes = [1, 256], strides = [1, 1]} : vector<1x896xf32> to vector<1x256xf32>
    %1222 = vector.extract_strided_slice %1220 {offsets = [0, 384], sizes = [1, 256], strides = [1, 1]} : vector<1x896xf32> to vector<1x256xf32>
    %1223 = arith.addf %1221, %1222 : vector<1x256xf32>
    %1224 = arith.negf %1223 : vector<1x256xf32>
    %1225 = math.exp %1224 : vector<1x256xf32>
    %cst_195 = arith.constant 1.000000e+00 : f32
    %1226 = vector.broadcast %cst_195 : f32 to vector<1x256xf32>
    %1227 = arith.addf %1226, %1225 : vector<1x256xf32>
    %1228 = arith.divf %1226, %1227 : vector<1x256xf32>
    %1229 = vector.extract_strided_slice %1228 {offsets = [0, 0], sizes = [1, 128], strides = [1, 1]} : vector<1x256xf32> to vector<1x128xf32>
    %1230 = vector.extract_strided_slice %1228 {offsets = [0, 128], sizes = [1, 128], strides = [1, 1]} : vector<1x256xf32> to vector<1x128xf32>
    %1231 = vector.extract_strided_slice %1220 {offsets = [0, 256], sizes = [1, 128], strides = [1, 1]} : vector<1x896xf32> to vector<1x128xf32>
    %1232 = vector.extract_strided_slice %1220 {offsets = [0, 640], sizes = [1, 128], strides = [1, 1]} : vector<1x896xf32> to vector<1x128xf32>
    %1233 = arith.mulf %1229, %1232 : vector<1x128xf32>
    %1234 = arith.addf %1231, %1233 : vector<1x128xf32>
    %1235 = math.tanh %1234 : vector<1x128xf32>
    %1236 = vector.extract_strided_slice %1230 {offsets = [0, 0], sizes = [1, 42], strides = [1, 1]} : vector<1x128xf32> to vector<1x42xf32>
    %1237 = vector.extract_strided_slice %1235 {offsets = [0, 0], sizes = [1, 42], strides = [1, 1]} : vector<1x128xf32> to vector<1x42xf32>
    %1238 = arith.subf %1203, %1237 : vector<1x42xf32>
    %1239 = arith.mulf %1236, %1238 : vector<1x42xf32>
    %1240 = arith.addf %1237, %1239 : vector<1x42xf32>
    %1241 = vector.extract_strided_slice %1220 {offsets = [0, 768], sizes = [1, 42], strides = [1, 1]} : vector<1x896xf32> to vector<1x42xf32>
    %1242 = vector.broadcast %1191 : i32 to vector<4x1xi32>
    %1243 = arith.cmpi eq, %0, %1242 : vector<4x1xi32>
    %1244 = vector.shape_cast %1243 : vector<4x1xi1> to vector<4x1xi1>
    %1245 = vector.broadcast %1244 : vector<4x1xi1> to vector<4x42xi1>
    %1246 = vector.shape_cast %1240 : vector<1x42xf32> to vector<1x42xf32>
    %1247 = vector.broadcast %1246 : vector<1x42xf32> to vector<4x42xf32>
    %1248 = arith.select %1245, %1247, %1164 : vector<4x42xi1>, vector<4x42xf32>
    %1249 = vector.broadcast %1193 : i32 to vector<4x1xi32>
    %1250 = arith.cmpi eq, %0, %1249 : vector<4x1xi32>
    %1251 = vector.shape_cast %1250 : vector<4x1xi1> to vector<4x1xi1>
    %1252 = vector.broadcast %1251 : vector<4x1xi1> to vector<4x42xi1>
    %1253 = vector.shape_cast %1241 : vector<1x42xf32> to vector<1x42xf32>
    %1254 = vector.broadcast %1253 : vector<1x42xf32> to vector<4x42xf32>
    %1255 = arith.select %1252, %1254, %1171 : vector<4x42xi1>, vector<4x42xf32>
    %cst_196 = arith.constant dense<0.000000e+00> : vector<1x128xf32>
    %1256 = tpu.matmul %1240, %10, %cst_196 {dimension_numbers = #tpu.dot_dimension_numbers<[1], [0], [0], [1], [0, 0, 1, 1], [], []>} : vector<1x42xf32>, vector<42x128xf32>, vector<1x128xf32> -> vector<1x128xf32>
    %1257 = arith.addf %1256, %11 : vector<1x128xf32>
    %cst_197 = arith.constant dense<0xFF800000> : vector<1xf32>
    %1258 = vector.multi_reduction <maximumf>, %1257, %cst_197 [1] : vector<1x128xf32> to vector<1xf32>
    %1259 = vector.shape_cast %1258 : vector<1xf32> to vector<1x1xf32>
    %1260 = vector.broadcast %1259 : vector<1x1xf32> to vector<1x128xf32>
    %1261 = arith.subf %1257, %1260 : vector<1x128xf32>
    %1262 = math.exp %1261 : vector<1x128xf32>
    %cst_198 = arith.constant dense<0.000000e+00> : vector<1xf32>
    %1263 = vector.multi_reduction <add>, %1262, %cst_198 [1] : vector<1x128xf32> to vector<1xf32>
    %1264 = vector.shape_cast %1263 : vector<1xf32> to vector<1x1xf32>
    %1265 = tpu.reciprocal %1264 {approx = true} : vector<1x1xf32> -> vector<1x1xf32>
    %1266 = arith.mulf %1264, %1265 : vector<1x1xf32>
    %cst_199 = arith.constant 2.000000e+00 : f32
    %1267 = vector.broadcast %cst_199 : f32 to vector<1x1xf32>
    %1268 = arith.subf %1267, %1266 : vector<1x1xf32>
    %1269 = arith.mulf %1265, %1268 : vector<1x1xf32>
    %1270 = vector.broadcast %1269 : vector<1x1xf32> to vector<1x128xf32>
    %1271 = arith.mulf %1262, %1270 : vector<1x128xf32>
    %1272 = arith.index_cast %c14_i32 : i32 to index
    %c0_200 = arith.constant 0 : index
    %1273 = vector.load %arg8[%1272, %c0_200] : memref<16x128xf32, #tpu.memory_space<vmem>>, vector<1x128xf32>
    tpu.vector_store %arg8[%1272, %c0_200], %1271 {strides = array<i32>} : memref<16x128xf32, #tpu.memory_space<vmem>>, vector<1x128xf32>,
    %c15_i32 = arith.constant 15 : i32
    %1274 = arith.index_cast %c15_i32 : i32 to index
    %1275 = memref.load %arg0[%1274] : memref<16xi32, #tpu.memory_space<smem>>
    %1276 = arith.index_cast %c15_i32 : i32 to index
    %1277 = memref.load %arg1[%1276] : memref<16xi32, #tpu.memory_space<smem>>
    %1278 = arith.index_cast %c15_i32 : i32 to index
    %1279 = memref.load %arg2[%1278] : memref<16xf32, #tpu.memory_space<smem>>
    %1280 = vector.broadcast %1275 : i32 to vector<4x1xi32>
    %1281 = arith.cmpi eq, %0, %1280 : vector<4x1xi32>
    %cst_201 = arith.constant 0.000000e+00 : f32
    %1282 = vector.shape_cast %1281 : vector<4x1xi1> to vector<4x1xi1>
    %1283 = vector.broadcast %1282 : vector<4x1xi1> to vector<4x42xi1>
    %1284 = vector.broadcast %cst_201 : f32 to vector<4x42xf32>
    %1285 = arith.select %1283, %1248, %1284 : vector<4x42xi1>, vector<4x42xf32>
    %cst_202 = arith.constant dense<0.000000e+00> : vector<42xf32>
    %1286 = vector.multi_reduction <add>, %1285, %cst_202 [0] : vector<4x42xf32> to vector<42xf32>
    %1287 = vector.shape_cast %1286 : vector<42xf32> to vector<1x42xf32>
    %1288 = vector.broadcast %1277 : i32 to vector<4x1xi32>
    %1289 = arith.cmpi eq, %0, %1288 : vector<4x1xi32>
    %cst_203 = arith.constant 0.000000e+00 : f32
    %1290 = vector.shape_cast %1289 : vector<4x1xi1> to vector<4x1xi1>
    %1291 = vector.broadcast %1290 : vector<4x1xi1> to vector<4x42xi1>
    %1292 = vector.broadcast %cst_203 : f32 to vector<4x42xf32>
    %1293 = arith.select %1291, %1255, %1292 : vector<4x42xi1>, vector<4x42xf32>
    %cst_204 = arith.constant dense<0.000000e+00> : vector<42xf32>
    %1294 = vector.multi_reduction <add>, %1293, %cst_204 [0] : vector<4x42xf32> to vector<42xf32>
    %1295 = vector.shape_cast %1294 : vector<42xf32> to vector<1x42xf32>
    %1296 = arith.addf %1287, %1295 : vector<1x42xf32>
    %1297 = vector.broadcast %1279 : f32 to vector<1x42xf32>
    %1298 = arith.mulf %1297, %5 : vector<1x42xf32>
    %1299 = arith.addf %1296, %1298 : vector<1x42xf32>
    %1300 = arith.addf %1299, %9 : vector<1x42xf32>
    %1301 = arith.index_cast %1275 : i32 to index
    %c0_205 = arith.constant 0 : index
    %c0_206 = arith.constant 0 : index
    %1302 = vector.load %arg5[%1301, %c0_205, %c0_206] : memref<4x42x896xf32, #tpu.memory_space<vmem>>, vector<1x42x896xf32>
    %1303 = vector.shape_cast %1302 : vector<1x42x896xf32> to vector<42x896xf32>
    %cst_207 = arith.constant dense<0.000000e+00> : vector<1x896xf32>
    %1304 = tpu.matmul %1300, %1303, %cst_207 {dimension_numbers = #tpu.dot_dimension_numbers<[1], [0], [0], [1], [0, 0, 1, 1], [], []>} : vector<1x42xf32>, vector<42x896xf32>, vector<1x896xf32> -> vector<1x896xf32>
    %1305 = vector.extract_strided_slice %1304 {offsets = [0, 0], sizes = [1, 256], strides = [1, 1]} : vector<1x896xf32> to vector<1x256xf32>
    %1306 = vector.extract_strided_slice %1304 {offsets = [0, 384], sizes = [1, 256], strides = [1, 1]} : vector<1x896xf32> to vector<1x256xf32>
    %1307 = arith.addf %1305, %1306 : vector<1x256xf32>
    %1308 = arith.negf %1307 : vector<1x256xf32>
    %1309 = math.exp %1308 : vector<1x256xf32>
    %cst_208 = arith.constant 1.000000e+00 : f32
    %1310 = vector.broadcast %cst_208 : f32 to vector<1x256xf32>
    %1311 = arith.addf %1310, %1309 : vector<1x256xf32>
    %1312 = arith.divf %1310, %1311 : vector<1x256xf32>
    %1313 = vector.extract_strided_slice %1312 {offsets = [0, 0], sizes = [1, 128], strides = [1, 1]} : vector<1x256xf32> to vector<1x128xf32>
    %1314 = vector.extract_strided_slice %1312 {offsets = [0, 128], sizes = [1, 128], strides = [1, 1]} : vector<1x256xf32> to vector<1x128xf32>
    %1315 = vector.extract_strided_slice %1304 {offsets = [0, 256], sizes = [1, 128], strides = [1, 1]} : vector<1x896xf32> to vector<1x128xf32>
    %1316 = vector.extract_strided_slice %1304 {offsets = [0, 640], sizes = [1, 128], strides = [1, 1]} : vector<1x896xf32> to vector<1x128xf32>
    %1317 = arith.mulf %1313, %1316 : vector<1x128xf32>
    %1318 = arith.addf %1315, %1317 : vector<1x128xf32>
    %1319 = math.tanh %1318 : vector<1x128xf32>
    %1320 = vector.extract_strided_slice %1314 {offsets = [0, 0], sizes = [1, 42], strides = [1, 1]} : vector<1x128xf32> to vector<1x42xf32>
    %1321 = vector.extract_strided_slice %1319 {offsets = [0, 0], sizes = [1, 42], strides = [1, 1]} : vector<1x128xf32> to vector<1x42xf32>
    %1322 = arith.subf %1287, %1321 : vector<1x42xf32>
    %1323 = arith.mulf %1320, %1322 : vector<1x42xf32>
    %1324 = arith.addf %1321, %1323 : vector<1x42xf32>
    %1325 = vector.extract_strided_slice %1304 {offsets = [0, 768], sizes = [1, 42], strides = [1, 1]} : vector<1x896xf32> to vector<1x42xf32>
    %1326 = vector.broadcast %1275 : i32 to vector<4x1xi32>
    %1327 = arith.cmpi eq, %0, %1326 : vector<4x1xi32>
    %1328 = vector.shape_cast %1327 : vector<4x1xi1> to vector<4x1xi1>
    %1329 = vector.broadcast %1328 : vector<4x1xi1> to vector<4x42xi1>
    %1330 = vector.shape_cast %1324 : vector<1x42xf32> to vector<1x42xf32>
    %1331 = vector.broadcast %1330 : vector<1x42xf32> to vector<4x42xf32>
    %1332 = arith.select %1329, %1331, %1248 : vector<4x42xi1>, vector<4x42xf32>
    %1333 = vector.broadcast %1277 : i32 to vector<4x1xi32>
    %1334 = arith.cmpi eq, %0, %1333 : vector<4x1xi32>
    %1335 = vector.shape_cast %1334 : vector<4x1xi1> to vector<4x1xi1>
    %1336 = vector.broadcast %1335 : vector<4x1xi1> to vector<4x42xi1>
    %1337 = vector.shape_cast %1325 : vector<1x42xf32> to vector<1x42xf32>
    %1338 = vector.broadcast %1337 : vector<1x42xf32> to vector<4x42xf32>
    %1339 = arith.select %1336, %1338, %1255 : vector<4x42xi1>, vector<4x42xf32>
    %cst_209 = arith.constant dense<0.000000e+00> : vector<1x128xf32>
    %1340 = tpu.matmul %1324, %10, %cst_209 {dimension_numbers = #tpu.dot_dimension_numbers<[1], [0], [0], [1], [0, 0, 1, 1], [], []>} : vector<1x42xf32>, vector<42x128xf32>, vector<1x128xf32> -> vector<1x128xf32>
    %1341 = arith.addf %1340, %11 : vector<1x128xf32>
    %cst_210 = arith.constant dense<0xFF800000> : vector<1xf32>
    %1342 = vector.multi_reduction <maximumf>, %1341, %cst_210 [1] : vector<1x128xf32> to vector<1xf32>
    %1343 = vector.shape_cast %1342 : vector<1xf32> to vector<1x1xf32>
    %1344 = vector.broadcast %1343 : vector<1x1xf32> to vector<1x128xf32>
    %1345 = arith.subf %1341, %1344 : vector<1x128xf32>
    %1346 = math.exp %1345 : vector<1x128xf32>
    %cst_211 = arith.constant dense<0.000000e+00> : vector<1xf32>
    %1347 = vector.multi_reduction <add>, %1346, %cst_211 [1] : vector<1x128xf32> to vector<1xf32>
    %1348 = vector.shape_cast %1347 : vector<1xf32> to vector<1x1xf32>
    %1349 = tpu.reciprocal %1348 {approx = true} : vector<1x1xf32> -> vector<1x1xf32>
    %1350 = arith.mulf %1348, %1349 : vector<1x1xf32>
    %cst_212 = arith.constant 2.000000e+00 : f32
    %1351 = vector.broadcast %cst_212 : f32 to vector<1x1xf32>
    %1352 = arith.subf %1351, %1350 : vector<1x1xf32>
    %1353 = arith.mulf %1349, %1352 : vector<1x1xf32>
    %1354 = vector.broadcast %1353 : vector<1x1xf32> to vector<1x128xf32>
    %1355 = arith.mulf %1346, %1354 : vector<1x128xf32>
    %1356 = arith.index_cast %c15_i32 : i32 to index
    %c0_213 = arith.constant 0 : index
    %1357 = vector.load %arg8[%1356, %c0_213] : memref<16x128xf32, #tpu.memory_space<vmem>>, vector<1x128xf32>
    tpu.vector_store %arg8[%1356, %c0_213], %1355 {strides = array<i32>} : memref<16x128xf32, #tpu.memory_space<vmem>>, vector<1x128xf32>,
    %c16_i32 = arith.constant 16 : i32
    %c0_214 = arith.constant 0 : index
    %c0_215 = arith.constant 0 : index
    %1358 = vector.load %arg9[%c0_214, %c0_215] : memref<4x42xf32, #tpu.memory_space<vmem>>, vector<4x42xf32>
    tpu.vector_store %arg9[%c0_214, %c0_215], %1332 {strides = array<i32>} : memref<4x42xf32, #tpu.memory_space<vmem>>, vector<4x42xf32>,
    %c0_216 = arith.constant 0 : index
    %c0_217 = arith.constant 0 : index
    %1359 = vector.load %arg10[%c0_216, %c0_217] : memref<4x42xf32, #tpu.memory_space<vmem>>, vector<4x42xf32>
    tpu.vector_store %arg10[%c0_216, %c0_217], %1339 {strides = array<i32>} : memref<4x42xf32, #tpu.memory_space<vmem>>, vector<4x42xf32>,
    return
  }
}

</mosaic_0001>

<bundles_post_ra>
// kernel: tpu_custom_call.1
= control target key start
LH: loop header
LB: loop body
LE: loop exit
PB: predicated region body
PF: predicated region fallthrough
CT: control target
= control target key end

     0   :  { %16 = vsyncpa [#allocation4], 0  ;;  %s12920_s0 = inlined_call_operand.vmem [shape: s32[16], index: 0, kind: input, shape index: {}]   ;;  %s12921_s1 = inlined_call_operand.vmem [shape: s32[16], index: 1, kind: input, shape index: {}]   ;;  %s12922_s2 = inlined_call_operand.vmem [shape: f32[16], index: 2, kind: input, shape index: {}]   ;;  %s12923_s3 = inlined_call_operand.vmem [shape: f32[4,42], index: 3, kind: input, shape index: {}]   ;;  %s12924_s4 = inlined_call_operand.vmem [shape: f32[4,42], index: 4, kind: input, shape index: {}]   ;;  %s12925_s5 = inlined_call_operand.vmem [shape: f32[4,42,896], index: 5, kind: input, shape index: {}]   ;;  %s12926_s6 = inlined_call_operand.vmem [shape: f32[42,128], index: 6, kind: input, shape index: {}]   ;;  %s12927_s7 = inlined_call_operand.vmem [shape: f32[1,128], index: 7, kind: input, shape index: {}]   ;;  %s12928_s8 = inlined_call_operand.hbm [shape: f32[16,128], index: 8, kind: output, shape index: {0}]   ;;  %s12929_s9 = inlined_call_operand.hbm [shape: f32[4,42], index: 9, kind: output, shape index: {1}]   ;;  %s12930_s10 = inlined_call_operand.hbm [shape: f32[4,42], index: 10, kind: output, shape index: {2}]  }
   0x1   :  { %17 = vsyncpa [#allocation6], 0 }
   0x2   :  { %18 = vsyncpa [#allocation3], 0  ;;  %s36_s15 = sshll.u32 %s12921_s1, 4  ;;  %s37_s15 = int_to_ptr.vmem [resolvable:$true] %s36_s15 }
   0x3   :  { %19 = vsyncpa [#allocation10], 0  ;;  %s26_s18 = sshll.u32 %s12920_s0, 4  ;;  %s10462_s19 = scalar_lea.vmem %s37_s15, 16  ;;  %s27_s18 = int_to_ptr.vmem [resolvable:$true] %s26_s18 }
   0x4   :  { %p10463_p0 = scmp.ne.s32.totalorder %s37_s15, %s10462_s19  ;;  %p10467_p1 = scmp.lt.s32.totalorder %s37_s15, %s37_s15 }
   0x5   :  { %p10468_p2 = scmp.lt.s32.totalorder %s10462_s19, %s10462_s19 }
   0x7   :  { %p10469_p3 = por %p10468_p2, %p10467_p1 }
   0x9   :  { %p10470_p4 = pnand %p10469_p3, %p10463_p0 }
   0xb   :  { %10473 = shalt.err (!%p10470_p4)
}
   0xc   :  { %s10572_s20 = smov [#allocation5]   ;;  %s10474_s21 = scalar_lea.vmem %s27_s18, 16 }
   0xd   :  { %39 = dma.vmem_to_smem %s37_s15, 16, %s10572_s20, [#allocation6]  }
   0xe   :  { %p10475_p5 = scmp.ne.s32.totalorder %s27_s18, %s10474_s21  ;;  %p10479_p6 = scmp.lt.s32.totalorder %s27_s18, %s27_s18 }
   0xf   :  { %p10480_p7 = scmp.lt.s32.totalorder %s10474_s21, %s10474_s21 }
  0x11   :  { %p10481_p8 = por %p10480_p7, %p10479_p6 }
  0x13   :  { %p10482_p9 = pnand %p10481_p8, %p10475_p5 }
  0x15   :  { %10485 = shalt.err (!%p10482_p9)
}
  0x16   :  { %s10573_s1 = smov [#allocation2]   ;;  %s46_s23 = sshll.u32 %s12922_s2, 4  ;;  %s47_s23 = int_to_ptr.vmem [resolvable:$true] %s46_s23 }
  0x17   :  { %29 = dma.vmem_to_smem %s27_s18, 16, %s10573_s1, [#allocation4]  }
  0x18   :  { %s10486_s24 = scalar_lea.vmem %s47_s23, 16  ;;  %p10491_p11 = scmp.lt.s32.totalorder %s47_s23, %s47_s23 }
  0x19   :  { %p10487_p10 = scmp.ne.s32.totalorder %s47_s23, %s10486_s24  ;;  %p10492_p12 = scmp.lt.s32.totalorder %s10486_s24, %s10486_s24 }
  0x1b   :  { %p10493_p13 = por %p10492_p12, %p10491_p11 }
  0x1d   :  { %p10494_p0 = pnand %p10493_p13, %p10487_p10 }
  0x1f   :  { %10497 = shalt.err (!%p10494_p0)
}
  0x20   :  { %s10574_s25 = smov [#allocation7]  }
  0x21   :  { %49 = dma.vmem_to_smem %s47_s23, 16, %s10574_s25, [#allocation6]  }
  0x22   :  { %10564 = dma.done.wait [#allocation4], 16  }
  0x23   :  { %10565 = vsyncadd [#allocation4], 4294967280 }
  0x24   :  { %10566 = dma.done.wait [#allocation6], 32  }
  0x25   :  { %10567 = vsyncadd [#allocation6], 4294967264 }
  0x26   :  { %69 = sfence }
  0x27   :  { %s89_s26 = sld [smem:[#allocation2]]  ;;  %v70_v0 = vlaneseq  ;;  %v10575_v1 = vmov 0.0   ;;  %vm171_vm0 = vcmask 1041408   ;;  %v10655_v3 = vld [vmem:[%s12923_s3] sm:$0xf]  ;;  %vm97_vm1 = vcmask 338944  }
  0x28   :  { %257 = vmatprep.mubr.f32.mxu0 %v10575_v1  ;;  %328 = vmatprep.mubr.f32.mxu1 %v10575_v1  ;;  %s90_s2 = sld [smem:[#allocation5]]  ;;  %v10660_v4 = vld [vmem:[%s12924_s4] sm:$0xf]  ;;  %vm10576_vm3 = vmmov 1   ;;  %vm167_vm8 = vcmask 343040   ;;  %vm10578_vm9 = vmmov 0  }
  0x29   :  { %v10650_v2 = vshrl.u32 %v70_v0, 7  ;;  %vm10672_vm4 = vmpackc.low %vm171_vm0, %vm10576_vm3  ;;  %s10676_s3 = sld [smem:[#allocation7]]  ;;  %v10696_v20 = vand.u32 127, %v70_v0  ;;  %s10810_s24 = sld [smem:[#allocation2 + $0x1]]  ;;  %vm582_vm12 = vcmask 1040384  }
  0x2a   :  { %s8227_s28 = sld [smem:[#allocation7 + $0x1]]  ;;  %s8245_s4 = sld [smem:[#allocation5 + $0x2]] }
  0x2b   :  { %vm74_vm6 = vcmp.eq.s32.totalorder %v10696_v20, 40  ;;  %vm77_vm7 = vcmp.eq.s32.totalorder %v10696_v20, 41  ;;  %s8246_s15 = sld [smem:[#allocation7 + $0x2]]  ;;  %s11071_s16 = sld [smem:[#allocation2 + $0x3]] }
  0x2c   :  { %v10723_v59 = vsel %vm74_vm6, 1.0, %v10575_v1  ;;  %s8264_s21 = sld [smem:[#allocation5 + $0x3]]  ;;  %s11200_s0 = sld [smem:[#allocation2 + $0x4]] }
  0x2d   :  { %s8510_s29 = smul.u32 336, %s89_s26  ;;  %v92_v5 = vstv %s89_s26  ;;  %s8265_s1 = sld [smem:[#allocation7 + $0x3]] }
  0x2e   :  { %vm10663_vm2 = vcmp.eq.s32.totalorder %v10650_v2, %v92_v5  ;;  %v105_v7 = vstv %s90_s2  ;;  %s8283_s26 = sld [smem:[#allocation5 + $0x4]]  ;;  %s8321_s18 = sld [smem:[#allocation5 + $0x6]] }
  0x2f   :  { %s10670_s14 = scalar_lea.vmem %s12925_s5, %s8510_s29  ;;  %v96_v9 = vsel %vm10663_vm2, %v10655_v3, 0.0  ;;  %vm10682_vm5 = vcmp.eq.s32.totalorder %v10650_v2, %v105_v7  ;;  %v118_v0 = vstv %s10676_s3  ;;  %s8511_s25 = smul.u32 336, %s10810_s24 }
  0x30   :  { %v126_v11 = vld [vmem:[%s10670_s14 + $0x8] sm:$0xff]  ;;  %v133_v12 = vld [vmem:[%s10670_s14 + $0x40] sm:$0xff]  ;;  %v98_v14 = vsel %vm97_vm1, %v96_v9, 0.0  ;;  %v109_v15 = vsel %vm10682_vm5, %v10660_v4, 0.0  ;;  %v132_v17 = vld [vmem:[%s10670_s14 + $0x38] sm:$0xff]  ;;  %s10937_s29 = sld [smem:[#allocation2 + $0x2]] }
  0x31   :  { %v125_v13 = vld [vmem:[%s10670_s14] sm:$0xff]  ;;  %v9230_v16 = vpack.c.bf16 %v133_v12, %v126_v11  ;;  %v128_v18 = vld [vmem:[%s10670_s14 + $0x18] sm:$0xff]  ;;  %v135_v19 = vld [vmem:[%s10670_s14 + $0x50] sm:$0xff]  ;;  %v99_v21 = vrot.slane %v98_v14, 4  ;;  %v110_v22 = vsel %vm97_vm1, %v109_v15, 0.0  ;;  %v119_v11 = vmul.f32 %v10723_v59, %v118_v0  ;;  %s10816_s27 = scalar_lea.vmem %s12925_s5, %s8511_s25  ;;  %s8513_s17 = smul.u32 336, %s11071_s16 }
  0x32   :  { %v9232_v23 = vpack.c.bf16 %v132_v17, %v125_v13  ;;  %v9244_v24 = vpack.c.bf16 %v135_v19, %v128_v18  ;;  %v127_v25 = vld [vmem:[%s10670_s14 + $0x10] sm:$0xff]  ;;  %v134_v26 = vld [vmem:[%s10670_s14 + $0x48] sm:$0xff]  ;;  %v140_v27 = vld [vmem:[%s10670_s14 + $0x78] sm:$0xff]  ;;  %v111_v28 = vrot.slane %v110_v22, 4  ;;  %v10744_v17 = vsel %vm77_vm7, 1.0, %v10575_v1  ;;  %s8514_s22 = smul.u32 336, %s11200_s0 }
  0x33   :  { %9231 = vmatprep.subr.bf16.mxu0 %v9230_v16  ;;  %v9246_v29 = vpack.c.bf16 %v134_v26, %v127_v25  ;;  %v147_v30 = vld [vmem:[%s10670_s14 + $0xb0] sm:$0xff]  ;;  %v146_v32 = vld [vmem:[%s10670_s14 + $0xa8] sm:$0xff]  ;;  %v100_v33 = vadd.f32 %v99_v21, %v98_v14  ;;  %v149_v37 = vld [vmem:[%s10670_s14 + $0xc0] sm:$0xff]  ;;  %v10577_v16 = vmov 0.0|0.0   ;;  %s11077_s20 = scalar_lea.vmem %s12925_s5, %s8513_s17  ;;  %s8284_s2 = sld [smem:[#allocation7 + $0x4]] }
  0x34   :  { %v139_v31 = vld [vmem:[%s10670_s14 + $0x70] sm:$0xff]  ;;  %9233 = vmatpush1.bf16.msra.mxu0 %v9232_v23  ;;  %9245 = vmatprep.subr.bf16.mxu1 %v9244_v24  ;;  %v9234_v34 = vpack.c.bf16 %v147_v30, %v140_v27  ;;  %v142_v36 = vld [vmem:[%s10670_s14 + $0x88] sm:$0xff]  ;;  %v141_v38 = vld [vmem:[%s10670_s14 + $0x80] sm:$0xff]  ;;  %v112_v39 = vadd.f32 %v111_v28, %v110_v22  ;;  %s11206_s25 = scalar_lea.vmem %s12925_s5, %s8514_s22  ;;  %s11463_s3 = sld [smem:[#allocation2 + $0x6]] }
  0x35   :  { %v9236_v35 = vpack.c.bf16 %v146_v32, %v139_v31  ;;  %9247 = vmatpush1.bf16.msra.mxu1 %v9246_v29  ;;  %v9248_v40 = vpack.c.bf16 %v149_v37, %v142_v36  ;;  %v148_v41 = vld [vmem:[%s10670_s14 + $0xb8] sm:$0xff]  ;;  %v154_v42 = vld [vmem:[%s10670_s14 + $0xe8] sm:$0xff]  ;;  %v161_v43 = vld [vmem:[%s10670_s14 + $0x120] sm:$0x3]  ;;  %v101_v44 = vrot.slane %v100_v33, 2  ;;  %s8322_s19 = sld [smem:[#allocation7 + $0x6]] }
  0x36   :  { %9235 = vmatprep.subr.bf16.mxu0 %v9234_v34  ;;  %v9250_v45 = vpack.c.bf16 %v148_v41, %v141_v38  ;;  %v9238_v46 = vpack.c.bf16 %v161_v43, %v154_v42  ;;  %v153_v47 = vld [vmem:[%s10670_s14 + $0xe0] sm:$0xff]  ;;  %v160_v48 = vld [vmem:[%s10670_s14 + $0x118] sm:$0x3]  ;;  %v113_v50 = vrot.slane %v112_v39, 2  ;;  %v163_v51 = vld [vmem:[%s10670_s14 + $0x130] sm:$0x3] }
  0x37   :  { %v156_v49 = vld [vmem:[%s10670_s14 + $0xf8] sm:$0xff]  ;;  %9249 = vmatprep.subr.bf16.mxu1 %v9248_v40  ;;  %v155_v52 = vld [vmem:[%s10670_s14 + $0xf0] sm:$0xff]  ;;  %v162_v53 = vld [vmem:[%s10670_s14 + $0x128] sm:$0x3]  ;;  %v102_v54 = vadd.f32 %v101_v44, %v100_v33  ;;  %v9241_v55 = vpack.c.bf16 %v160_v48, %v153_v47  ;;  %s8512_s30 = smul.u32 336, %s10937_s29  ;;  %s8340_s23 = sld [smem:[#allocation5 + $0x7]] }
  0x38   :  { %9237 = vmatpush1.bf16.msra.mxu0 %v9236_v35  ;;  %v9252_v56 = vpack.c.bf16 %v163_v51, %v156_v49  ;;  %v130_v57 = vld [vmem:[%s10670_s14 + $0x28] sm:$0xff]  ;;  %v137_v58 = vld [vmem:[%s10670_s14 + $0x60] sm:$0xff]  ;;  %v114_v60 = vadd.f32 %v113_v50, %v112_v39  ;;  %v9255_v61 = vpack.c.bf16 %v162_v53, %v155_v52  ;;  %v136_v14 = vld [vmem:[%s10670_s14 + $0x58] sm:$0xff]  ;;  %s8360_s11 = sld [smem:[#allocation7 + $0x8]]  ;;  %s11855_s12 = sld [smem:[#allocation2 + $0x9]] }
  0x39   :  { %9251 = vmatpush1.bf16.msra.mxu1 %v9250_v45  ;;  %9240 = vmatprep.subr.msk.bf16.mxu0 %vm10672_vm4, %v9238_v46  ;;  %v9258_v62 = vpack.c.bf16 %v137_v58, %v130_v57  ;;  %v103_v63 = vrot.slane %v102_v54, 1  ;;  %v129_v13 = vld [vmem:[%s10670_s14 + $0x20] sm:$0xff]  ;;  %v144_v15 = vld [vmem:[%s10670_s14 + $0x98] sm:$0xff]  ;;  %v151_v18 = vld [vmem:[%s10670_s14 + $0xd0] sm:$0xff]  ;;  %s10943_s13 = scalar_lea.vmem %s12925_s5, %s8512_s30 }
  0x3a   :  { %9254 = vmatprep.subr.msk.bf16.mxu1 %vm10672_vm4, %v9252_v56  ;;  %v115_v5 = vrot.slane %v114_v60, 1  ;;  %v131_v19 = vld [vmem:[%s10670_s14 + $0x30] sm:$0xff]  ;;  %v138_v20 = vld [vmem:[%s10670_s14 + $0x68] sm:$0xff]  ;;  %v9260_v22 = vpack.c.bf16 %v136_v14, %v129_v13  ;;  %v9262_v24 = vpack.c.bf16 %v151_v18, %v144_v15  ;;  %v165_v29 = vld [vmem:[%s10670_s14 + $0x140] sm:$0x3] }
  0x3b   :  { %v10730_v7 = vadd.f32 %v103_v63, %v102_v54  ;;  %v143_v25 = vld [vmem:[%s10670_s14 + $0x90] sm:$0xff]  ;;  %v150_v26 = vld [vmem:[%s10670_s14 + $0xc8] sm:$0xff]  ;;  %v9273_v28 = vpack.c.bf16 %v138_v20, %v131_v19  ;;  %v145_v30 = vld [vmem:[%s10670_s14 + $0xa0] sm:$0xff] }
  0x3c   :  { %9243 = vmatpush1.bf16.msk.msra.mxu0 %vm10672_vm4, %v9241_v55  ;;  %v116_v9 = vadd.f32 %v115_v5, %v114_v60  ;;  %v158_v27 = vld [vmem:[%s10670_s14 + $0x108] sm:$0xff]  ;;  %v152_v31 = vld [vmem:[%s10670_s14 + $0xd8] sm:$0xff]  ;;  %v9264_v32 = vpack.c.bf16 %v150_v26, %v143_v25  ;;  %v157_v34 = vld [vmem:[%s10670_s14 + $0x100] sm:$0xff] }
  0x3d   :  { %9257 = vmatpush1.bf16.msk.msra.mxu1 %vm10672_vm4, %v9255_v61  ;;  %9259 = vmatprep.subr.bf16.mxu0 %v9258_v62  ;;  %v9266_v33 = vpack.c.bf16 %v165_v29, %v158_v27  ;;  %v164_v35 = vld [vmem:[%s10670_s14 + $0x138] sm:$0x3]  ;;  %v9276_v36 = vpack.c.bf16 %v152_v31, %v145_v30  ;;  %v159_v37 = vld [vmem:[%s10670_s14 + $0x110] sm:$0xff]  ;;  %v166_v38 = vld [vmem:[%s10670_s14 + $0x148] sm:$0x3]  ;;  %s8303_s14 = sld [smem:[#allocation7 + $0x5]] }
  0x3e   :  { %v117_v12 = vadd.f32 %v116_v9, %v10730_v7  ;;  %9272 = vmatprep.subr.bf16.mxu1 %v10577_v16  ;;  %v9269_v39 = vpack.c.bf16 %v164_v35, %v157_v34  ;;  %v9279_v40 = vpack.c.bf16 %v166_v38, %v159_v37  ;;  %v80_v41 = vld [vmem:[%s12926_s6] sm:$0xff]  ;;  %v81_v42 = vld [vmem:[%s12926_s6 + $0x8] sm:$0xff]  ;;  %v82_v44 = vld [vmem:[%s12926_s6 + $0x10] sm:$0xff]  ;;  %v10839_v37 = vsub.s32 0, %v10650_v2 }
  0x3f   :  { %v10785_v43 = vpack.c.bf16 %v81_v42, %v80_v41  ;;  %v83_v45 = vld [vmem:[%s12926_s6 + $0x18] sm:$0xff]  ;;  %v84_v47 = vld [vmem:[%s12926_s6 + $0x20] sm:$0xff]  ;;  %v85_v48 = vld [vmem:[%s12926_s6 + $0x28] sm:$0x3]  ;;  %s8226_s6 = sld [smem:[#allocation5 + $0x1]] }
  0x40   :  { %v120_v21 = vadd.f32 %v119_v11, %v117_v12  ;;  %v10795_v46 = vpack.c.bf16 %v83_v45, %v82_v44  ;;  %v10805_v49 = vpack.c.bf16 %v85_v48, %v84_v47  ;;  %v634_v50 = vld [vmem:[%s10816_s27 + $0x8] sm:$0xff]  ;;  %v641_v51 = vld [vmem:[%s10816_s27 + $0x40] sm:$0xff]  ;;  %v636_v52 = vld [vmem:[%s10816_s27 + $0x18] sm:$0xff] }
  0x41   :  { %v9292_v53 = vpack.c.bf16 %v641_v51, %v634_v50  ;;  %v643_v54 = vld [vmem:[%s10816_s27 + $0x50] sm:$0xff]  ;;  %v633_v55 = vld [vmem:[%s10816_s27] sm:$0xff]  ;;  %v640_v56 = vld [vmem:[%s10816_s27 + $0x38] sm:$0xff] }
  0x42   :  { %v121_v23 = vadd.f32 %v10744_v17, %v120_v21  ;;  %v9306_v57 = vpack.c.bf16 %v643_v54, %v636_v52  ;;  %v9294_v58 = vpack.c.bf16 %v640_v56, %v633_v55  ;;  %v648_v60 = vld [vmem:[%s10816_s27 + $0x78] sm:$0xff]  ;;  %v655_v61 = vld [vmem:[%s10816_s27 + $0xb0] sm:$0xff]  ;;  %v654_v0 = vld [vmem:[%s10816_s27 + $0xa8] sm:$0xff] }
  0x43   :  { %v9296_v62 = vpack.c.bf16 %v655_v61, %v648_v60  ;;  %v647_v63 = vld [vmem:[%s10816_s27 + $0x70] sm:$0xff]  ;;  %v662_v9 = vld [vmem:[%s10816_s27 + $0xe8] sm:$0xff]  ;;  %v669_v11 = vld [vmem:[%s10816_s27 + $0x120] sm:$0x3] }
  0x44   :  { %8212 = vmatmul.mubr.msk.f32.vlgmr.msra.gmra.mrb[0].mxu0 %vm167_vm8, %v121_v23  ;;  %8215 = vmatmul.mubr.msk.f32.vlgmr.msra.gmra.mrb[0].mxu1 %vm167_vm8, %v121_v23  ;;  %v9298_v5 = vpack.c.bf16 %v654_v0, %v647_v63  ;;  %v9300_v12 = vpack.c.bf16 %v669_v11, %v662_v9  ;;  %v661_v13 = vld [vmem:[%s10816_s27 + $0xe0] sm:$0xff]  ;;  %v668_v14 = vld [vmem:[%s10816_s27 + $0x118] sm:$0x3]  ;;  %v638_v18 = vld [vmem:[%s10816_s27 + $0x28] sm:$0xff] }
  0x45   :  { %9261 = vmatpush1.bf16.msra.mxu0 %v9260_v22  ;;  %399 = vmatprep.mubr.f32.mxu0 %v10575_v1  ;;  %v9303_v15 = vpack.c.bf16 %v668_v14, %v661_v13  ;;  %v645_v19 = vld [vmem:[%s10816_s27 + $0x60] sm:$0xff]  ;;  %v613_v42 = vstv %s8226_s6  ;;  %v642_v10 = vld [vmem:[%s10816_s27 + $0x48] sm:$0xff]  ;;  %v656_v63 = vld [vmem:[%s10816_s27 + $0xb8] sm:$0xff] }
  0x46   :  { %9263 = vmatprep.subr.bf16.mxu0 %v9262_v24  ;;  %9274 = vmatpush3.bf16.msra.mxu1 %v9273_v28  ;;  %v9320_v20 = vpack.c.bf16 %v645_v19, %v638_v18  ;;  %vm10848_vm10 = vcmp.eq.s32.totalorder %v10650_v2, %v613_v42  ;;  %v650_v54 = vld [vmem:[%s10816_s27 + $0x88] sm:$0xff]  ;;  %v657_v55 = vld [vmem:[%s10816_s27 + $0xc0] sm:$0xff]  ;;  %v671_v9 = vld [vmem:[%s10816_s27 + $0x130] sm:$0x3] }
  0x47   :  { %9275 = vmatprep.subr.bf16.mxu1 %v10577_v16  ;;  %8762 = vmatprep.mubr.msk.f32.mxu1 %vm10578_vm9, %v10575_v1  ;;  %v9310_v61 = vpack.c.bf16 %v657_v55, %v650_v54  ;;  %v670_v18 = vld [vmem:[%s10816_s27 + $0x128] sm:$0x3] }
  0x48   :  { %v1144_v45 = vld [vmem:[%s10943_s13 + $0x48] sm:$0xff] }
  0x49   :  { %9265 = vmatpush1.bf16.msra.mxu0 %v9264_v32 }
  0x4a   :  { %9268 = vmatprep.subr.msk.bf16.mxu0 %vm10672_vm4, %v9266_v33  ;;  %9277 = vmatpush3.bf16.msra.mxu1 %v9276_v36 }
  0x4b   :  { %9278 = vmatprep.subr.bf16.mxu1 %v10577_v16 }
  0x4d   :  { %9271 = vmatpush1.bf16.msk.msra.mxu0 %vm10672_vm4, %v9269_v39 }
  0x4e   :  { %9281 = vmatpush3.bf16.msk.msra.mxu1 %vm10672_vm4, %v9279_v40  ;;  %9282 = vmatprep.subr.bf16.mxu0 %v10577_v16 }
  0x4f   :  { %9293 = vmatprep.subr.bf16.mxu1 %v9292_v53 }
  0x50   :  { %8218 = vmatmul.mubr.msk.f32.vlgmr.msra.gmra.mrb[2].mxu0 %vm167_vm8, %v121_v23 }
  0x51   :  { %8763 = vmatmul.mubr.msk.f32.vlgmr.msra.gmra.mrb[2].mxu1 %vm167_vm8, %v121_v23  ;;  %8777 = vmatprep.mubr.msk.f32.mxu0 %vm10578_vm9, %v10575_v1 }
  0x52   :  { %763 = vmatprep.mubr.f32.mxu1 %v10575_v1  ;;  %9284 = vmatpush3.bf16.msra.mxu0 %v10785_v43 }
  0x53   :  { %9285 = vmatprep.subr.bf16.mxu0 %v10577_v16  ;;  %9295 = vmatpush1.bf16.msra.mxu1 %v9294_v58 }
  0x54   :  { %9297 = vmatprep.subr.bf16.mxu1 %v9296_v62  ;;  %v649_v62 = vld [vmem:[%s10816_s27 + $0x80] sm:$0xff] }
  0x56   :  { %9287 = vmatpush3.bf16.msra.mxu0 %v10795_v46 }
  0x57   :  { %9288 = vmatprep.subr.bf16.mxu0 %v10577_v16  ;;  %9299 = vmatpush1.bf16.msra.mxu1 %v9298_v5  ;;  %v664_v5 = vld [vmem:[%s10816_s27 + $0xf8] sm:$0xff] }
  0x58   :  { %9302 = vmatprep.subr.msk.bf16.mxu1 %vm10672_vm4, %v9300_v12  ;;  %v9312_v12 = vpack.c.bf16 %v656_v63, %v649_v62  ;;  %v9314_v14 = vpack.c.bf16 %v671_v9, %v664_v5  ;;  %v1143_v5 = vld [vmem:[%s10943_s13 + $0x40] sm:$0xff]  ;;  %v1138_v9 = vld [vmem:[%s10943_s13 + $0x18] sm:$0xff] }
  0x5a   :  { %9291 = vmatpush3.bf16.msk.msra.mxu0 %vm10672_vm4, %v10805_v49 }
  0x5b   :  { %9307 = vmatprep.subr.bf16.mxu0 %v9306_v57  ;;  %9305 = vmatpush1.bf16.msk.msra.mxu1 %vm10672_vm4, %v9303_v15  ;;  %v601_v57 = vstv %s10810_s24  ;;  %v663_v15 = vld [vmem:[%s10816_s27 + $0xf0] sm:$0xff]  ;;  %s8341_s24 = sld [smem:[#allocation7 + $0x7]] }
  0x5c   :  { %9321 = vmatprep.subr.bf16.mxu1 %v9320_v20  ;;  %vm10869_vm11 = vcmp.eq.s32.totalorder %v10650_v2, %v601_v57 }
 0x117   :  { %v259_v21 = vpop.f32.mrb[0].mxu0  ;;  %v330_v22 = vpop.f32.mrb[0].mxu1 }
 0x118   :  { %v261_v23 = vpop.f32.mrb[1].mxu0  ;;  %v332_v24 = vpop.f32.mrb[1].mxu1 }
 0x119   :  { %v476_v25 = vadd.f32 %v332_v24, %v259_v21 }
 0x11b   :  { %v8221_v26 = vmul.f32 -1.442695, %v476_v25 }
 0x11d   :  { %10234 = vpow2.f32 %v8221_v26 }
 0x123   :  { %v401_v27 = vpop.f32.mrb[2].mxu0 }
 0x124   :  { %v477_v28 = vadd.f32 %v401_v27, %v261_v23  ;;  %v403_v29 = vpop.f32.mrb[3].mxu0  ;;  %v472_v30 = vpop.f32.mrb[2].mxu1  ;;  %v9317_v23 = vpack.c.bf16 %v670_v18, %v663_v15  ;;  %v626_v27 = vstv %s8227_s28  ;;  %v1142_v15 = vld [vmem:[%s10943_s13 + $0x38] sm:$0xff]  ;;  %s8417_s28 = sld [smem:[#allocation7 + $0xb]] }
 0x125   :  { %v8764_v31 = vpop.f32.mrb[3].mxu1  ;;  %v504_v41 = vrot.slane %v472_v30, %v10839_v37 }
 0x126   :  { %v8222_v32 = vmul.f32 -1.442695, %v477_v28  ;;  %v627_v31 = vmul.f32 %v10723_v59, %v626_v27  ;;  %v1163_v27 = vld [vmem:[%s10943_s13 + $0xe0] sm:$0xff] }
 0x127   :  { %v10235_v33 = vpop.eup %10234  ;;  %v10845_v44 = vsel %vm10682_vm5, %v504_v41, %v10660_v4  ;;  %v635_v4 = vld [vmem:[%s10816_s27 + $0x10] sm:$0xff] }
 0x128   :  { %v484_v34 = vadd.f32 1.0, %v10235_v33  ;;  %10236 = vpow2.f32 %v8222_v32  ;;  %v617_v47 = vsel %vm10848_vm10, %v10845_v44, 0.0  ;;  %v9308_v58 = vpack.c.bf16 %v642_v10, %v635_v4  ;;  %v637_v32 = vld [vmem:[%s10816_s27 + $0x20] sm:$0xff]  ;;  %v660_v10 = vld [vmem:[%s10816_s27 + $0xd8] sm:$0xff] }
 0x129   :  { %v618_v48 = vsel %vm97_vm1, %v617_v47, 0.0  ;;  %v651_v47 = vld [vmem:[%s10816_s27 + $0x90] sm:$0xff]  ;;  %v653_v4 = vld [vmem:[%s10816_s27 + $0xa0] sm:$0xff] }
 0x12a   :  { %10238 = vrcp.f32 %v484_v34  ;;  %v619_v53 = vrot.slane %v618_v48, 4  ;;  %v644_v34 = vld [vmem:[%s10816_s27 + $0x58] sm:$0xff]  ;;  %v9338_v55 = vpack.c.bf16 %v660_v10, %v653_v4 }
 0x12b   :  { %v9322_v41 = vpack.c.bf16 %v644_v34, %v637_v32  ;;  %v1147_v32 = vld [vmem:[%s10943_s13 + $0x60] sm:$0xff] }
 0x12c   :  { %v620_v0 = vadd.f32 %v619_v53, %v618_v48  ;;  %v673_v53 = vld [vmem:[%s10816_s27 + $0x140] sm:$0x3] }
 0x12d   :  { %v10968_v34 = vld [vmem:[%s12927_s7] sm:$0x1] }
 0x12e   :  { %v621_v19 = vrot.slane %v620_v0, 2 }
 0x132   :  { %v10237_v35 = vpop.eup %10236 }
 0x133   :  { %v485_v39 = vadd.f32 1.0, %v10237_v35  ;;  %v639_v35 = vld [vmem:[%s10816_s27 + $0x30] sm:$0xff] }
 0x134   :  { %v10239_v36 = vpop.eup %10238 }
 0x135   :  { %v490_v38 = vmul.f32 %v10239_v36, %v403_v29  ;;  %v646_v36 = vld [vmem:[%s10816_s27 + $0x68] sm:$0xff] }
 0x136   :  { %v9335_v42 = vpack.c.bf16 %v646_v36, %v639_v35 }
 0x137   :  { %v491_v40 = vadd.f32 %v490_v38, %v330_v22  ;;  %v652_v38 = vld [vmem:[%s10816_s27 + $0x98] sm:$0xff] }
 0x139   :  { %10240 = vtanh.f32 %v491_v40 }
 0x13a   :  { %10242 = vrcp.f32 %v485_v39  ;;  %v659_v39 = vld [vmem:[%s10816_s27 + $0xd0] sm:$0xff] }
 0x143   :  { %v10241_v50 = vpop.eup %10240 }
 0x144   :  { %v493_v51 = vsub.f32 %v10730_v7, %v10241_v50  ;;  %v10243_v52 = vpop.eup %10242 }
 0x146   :  { %v494_v56 = vmul.f32 %v10243_v52, %v493_v51  ;;  %v658_v51 = vld [vmem:[%s10816_s27 + $0xc8] sm:$0xff] }
 0x147   :  { %v666_v52 = vld [vmem:[%s10816_s27 + $0x108] sm:$0xff]  ;;  %v9326_v54 = vpack.c.bf16 %v658_v51, %v651_v47 }
 0x148   :  { %v495_v60 = vadd.f32 %v10241_v50, %v494_v56  ;;  %v9324_v50 = vpack.c.bf16 %v659_v39, %v652_v38  ;;  %v665_v56 = vld [vmem:[%s10816_s27 + $0x100] sm:$0xff]  ;;  %v9328_v57 = vpack.c.bf16 %v673_v53, %v666_v52 }
 0x14a   :  { %v499_v7 = vrot.slane %v495_v60, %v10839_v37  ;;  %8778 = vmatmul.mubr.msk.f32.vlgmr.msra.gmra.mrb[4].mxu0 %vm167_vm8, %v495_v60  ;;  %v667_v60 = vld [vmem:[%s10816_s27 + $0x110] sm:$0xff] }
 0x14b   :  { %9309 = vmatpush1.bf16.msra.mxu0 %v9308_v58  ;;  %834 = vmatprep.mubr.f32.mxu0 %v10575_v1  ;;  %v672_v58 = vld [vmem:[%s10816_s27 + $0x138] sm:$0x3] }
 0x14c   :  { %v10877_v13 = vsel %vm10663_vm2, %v499_v7, %v10655_v3  ;;  %9311 = vmatprep.subr.bf16.mxu0 %v9310_v61  ;;  %v622_v3 = vadd.f32 %v621_v19, %v620_v0  ;;  %v674_v61 = vld [vmem:[%s10816_s27 + $0x148] sm:$0x3]  ;;  %v9331_v62 = vpack.c.bf16 %v672_v58, %v665_v56  ;;  %s11329_s27 = sld [smem:[#allocation2 + $0x5]] }
 0x14d   :  { %v605_v20 = vsel %vm10869_vm11, %v10877_v13, 0.0  ;;  %v9341_v63 = vpack.c.bf16 %v674_v61, %v667_v60  ;;  %v1136_v0 = vld [vmem:[%s10943_s13 + $0x8] sm:$0xff] }
 0x14e   :  { %v606_v21 = vsel %vm97_vm1, %v605_v20, 0.0  ;;  %v623_v25 = vrot.slane %v622_v3, 1  ;;  %v9354_v7 = vpack.c.bf16 %v1143_v5, %v1136_v0  ;;  %v1150_v20 = vld [vmem:[%s10943_s13 + $0x78] sm:$0xff]  ;;  %v1115_v0 = vstv %s8245_s4  ;;  %s8516_s4 = smul.u32 336, %s11463_s3 }
 0x14f   :  { %v607_v22 = vrot.slane %v606_v21, 4  ;;  %9313 = vmatpush1.bf16.msra.mxu0 %v9312_v12  ;;  %v1145_v12 = vld [vmem:[%s10943_s13 + $0x50] sm:$0xff]  ;;  %vm10982_vm13 = vcmp.eq.s32.totalorder %v10650_v2, %v1115_v0 }
 0x150   :  { %9316 = vmatprep.subr.msk.bf16.mxu0 %vm10672_vm4, %v9314_v14  ;;  %v624_v29 = vadd.f32 %v623_v25, %v622_v3  ;;  %v1135_v14 = vld [vmem:[%s10943_s13] sm:$0xff]  ;;  %v9368_v18 = vpack.c.bf16 %v1145_v12, %v1138_v9  ;;  %v1156_v3 = vld [vmem:[%s10943_s13 + $0xa8] sm:$0xff]  ;;  %s11469_s17 = scalar_lea.vmem %s12925_s5, %s8516_s4 }
 0x151   :  { %v608_v6 = vadd.f32 %v607_v22, %v606_v21  ;;  %v9356_v19 = vpack.c.bf16 %v1142_v15, %v1135_v14  ;;  %v1157_v21 = vld [vmem:[%s10943_s13 + $0xb0] sm:$0xff]  ;;  %v1171_v25 = vld [vmem:[%s10943_s13 + $0x120] sm:$0x3]  ;;  %v1646_v9 = vld [vmem:[%s11077_s20 + $0x48] sm:$0xff] }
 0x152   :  { %v9358_v22 = vpack.c.bf16 %v1157_v21, %v1150_v20  ;;  %v1152_v20 = vld [vmem:[%s10943_s13 + $0x88] sm:$0xff]  ;;  %v1159_v21 = vld [vmem:[%s10943_s13 + $0xc0] sm:$0xff]  ;;  %s8515_s6 = smul.u32 336, %s11329_s27 }
 0x153   :  { %9319 = vmatpush1.bf16.msk.msra.mxu0 %vm10672_vm4, %v9317_v23  ;;  %v609_v24 = vrot.slane %v608_v6, 2  ;;  %v1149_v23 = vld [vmem:[%s10943_s13 + $0x70] sm:$0xff] }
 0x154   :  { %9334 = vmatprep.subr.bf16.mxu0 %v10577_v16  ;;  %s11335_s30 = scalar_lea.vmem %s12925_s5, %s8515_s6 }
 0x155   :  { %v610_v26 = vadd.f32 %v609_v24, %v608_v6  ;;  %v9360_v6 = vpack.c.bf16 %v1156_v3, %v1149_v23  ;;  %v1164_v24 = vld [vmem:[%s10943_s13 + $0xe8] sm:$0xff]  ;;  %v1103_v23 = vstv %s10937_s29  ;;  %s12247_s29 = sld [smem:[#allocation2 + $0xc]] }
 0x156   :  { %vm11003_vm14 = vcmp.eq.s32.totalorder %v10650_v2, %v1103_v23 }
 0x157   :  { %v611_v28 = vrot.slane %v610_v26, 1 }
 0x159   :  { %v10890_v30 = vadd.f32 %v611_v28, %v610_v26  ;;  %v9362_v26 = vpack.c.bf16 %v1171_v25, %v1164_v24  ;;  %v1170_v28 = vld [vmem:[%s10943_s13 + $0x118] sm:$0x3]  ;;  %v9372_v24 = vpack.c.bf16 %v1159_v21, %v1152_v20  ;;  %v1151_v25 = vld [vmem:[%s10943_s13 + $0x80] sm:$0xff]  ;;  %v1168_v20 = vld [vmem:[%s10943_s13 + $0x108] sm:$0xff] }
 0x15a   :  { %v1175_v21 = vld [vmem:[%s10943_s13 + $0x140] sm:$0x3] }
 0x15b   :  { %v625_v33 = vadd.f32 %v624_v29, %v10890_v30  ;;  %v9365_v29 = vpack.c.bf16 %v1170_v28, %v1163_v27  ;;  %v1166_v28 = vld [vmem:[%s10943_s13 + $0xf8] sm:$0xff] }
 0x15d   :  { %v628_v40 = vadd.f32 %v627_v31, %v625_v33  ;;  %v1140_v31 = vld [vmem:[%s10943_s13 + $0x28] sm:$0xff] }
 0x15e   :  { %v9382_v33 = vpack.c.bf16 %v1147_v32, %v1140_v31 }
 0x15f   :  { %v629_v48 = vadd.f32 %v10744_v17, %v628_v40 }
 0x161   :  { %8231 = vmatmul.mubr.msk.f32.vlgmr.msra.gmra.mrb[4].mxu1 %vm167_vm8, %v629_v48  ;;  %8234 = vmatmul.mubr.msk.f32.vlgmr.msra.gmra.mrb[6].mxu0 %vm167_vm8, %v629_v48 }
 0x162   :  { %9323 = vmatpush1.bf16.msra.mxu1 %v9322_v41  ;;  %9336 = vmatpush3.bf16.msra.mxu0 %v9335_v42 }
 0x163   :  { %9325 = vmatprep.subr.bf16.mxu1 %v9324_v50  ;;  %9337 = vmatprep.subr.bf16.mxu0 %v10577_v16 }
 0x164   :  { %905 = vmatprep.mubr.f32.mxu1 %v10575_v1  ;;  %8792 = vmatprep.mubr.msk.f32.mxu0 %vm10578_vm9, %v10575_v1 }
 0x166   :  { %9327 = vmatpush1.bf16.msra.mxu1 %v9326_v54  ;;  %9339 = vmatpush3.bf16.msra.mxu0 %v9338_v55 }
 0x167   :  { %9330 = vmatprep.subr.msk.bf16.mxu1 %vm10672_vm4, %v9328_v57  ;;  %9340 = vmatprep.subr.bf16.mxu0 %v10577_v16 }
 0x16a   :  { %9333 = vmatpush1.bf16.msk.msra.mxu1 %vm10672_vm4, %v9331_v62  ;;  %9343 = vmatpush3.bf16.msk.msra.mxu0 %vm10672_vm4, %v9341_v63 }
 0x16b   :  { %9344 = vmatprep.subr.bf16.mxu1 %v10577_v16  ;;  %9355 = vmatprep.subr.bf16.mxu0 %v9354_v7 }
 0x16d   :  { %8237 = vmatmul.mubr.msk.f32.vlgmr.msra.gmra.mrb[6].mxu1 %vm167_vm8, %v629_v48  ;;  %8793 = vmatmul.mubr.msk.f32.vlgmr.msra.gmra.mrb[8].mxu0 %vm167_vm8, %v629_v48 }
 0x16e   :  { %9346 = vmatpush3.bf16.msra.mxu1 %v10785_v43  ;;  %8807 = vmatprep.mubr.msk.f32.mxu1 %vm10578_vm9, %v10575_v1 }
 0x16f   :  { %9347 = vmatprep.subr.bf16.mxu1 %v10577_v16  ;;  %1265 = vmatprep.mubr.f32.mxu0 %v10575_v1 }
 0x170   :  { %9357 = vmatpush1.bf16.msra.mxu0 %v9356_v19 }
 0x171   :  { %9359 = vmatprep.subr.bf16.mxu0 %v9358_v22 }
 0x172   :  { %9349 = vmatpush3.bf16.msra.mxu1 %v10795_v46 }
 0x173   :  { %9350 = vmatprep.subr.bf16.mxu1 %v10577_v16 }
 0x174   :  { %9361 = vmatpush1.bf16.msra.mxu0 %v9360_v6 }
 0x175   :  { %9364 = vmatprep.subr.msk.bf16.mxu0 %vm10672_vm4, %v9362_v26  ;;  %v1158_v26 = vld [vmem:[%s10943_s13 + $0xb8] sm:$0xff] }
 0x176   :  { %9353 = vmatpush3.bf16.msk.msra.mxu1 %vm10672_vm4, %v10805_v49  ;;  %v9374_v32 = vpack.c.bf16 %v1158_v26, %v1151_v25  ;;  %v1169_v25 = vld [vmem:[%s10943_s13 + $0x110] sm:$0xff]  ;;  %v1176_v26 = vld [vmem:[%s10943_s13 + $0x148] sm:$0x3] }
 0x177   :  { %9369 = vmatprep.subr.bf16.mxu1 %v9368_v18 }
 0x178   :  { %9367 = vmatpush1.bf16.msk.msra.mxu0 %vm10672_vm4, %v9365_v29  ;;  %v1173_v29 = vld [vmem:[%s10943_s13 + $0x130] sm:$0x3] }
 0x179   :  { %9383 = vmatprep.subr.bf16.mxu0 %v9382_v33 }
 0x21d   :  { %v578_v35 = vpop.f32.mrb[4].mxu0 }
 0x21e   :  { %v10971_v36 = vadd.f32 %v578_v35, %v10968_v34  ;;  %v8779_v38 = vpop.f32.mrb[5].mxu0  ;;  %v9376_v35 = vpack.c.bf16 %v1173_v29, %v1166_v28  ;;  %v9403_v28 = vpack.c.bf16 %v1176_v26, %v1169_v25  ;;  %v1638_v29 = vld [vmem:[%s11077_s20 + $0x8] sm:$0xff] }
 0x21f   :  { %v1165_v38 = vld [vmem:[%s10943_s13 + $0xf0] sm:$0xff] }
 0x220   :  { %v583_v39 = vsel %vm582_vm12, %v10971_v36, -inf }
 0x221   :  { %584 = vmax.xlane.f32.xlu0 %v583_v39  ;;  %v1172_v39 = vld [vmem:[%s10943_s13 + $0x128] sm:$0x3] }
 0x234   :  { %v765_v40 = vpop.f32.mrb[4].mxu1  ;;  %v836_v41 = vpop.f32.mrb[6].mxu0 }
 0x235   :  { %v767_v42 = vpop.f32.mrb[5].mxu1  ;;  %v838_v47 = vpop.f32.mrb[7].mxu0 }
 0x236   :  { %v982_v48 = vadd.f32 %v838_v47, %v765_v40 }
 0x238   :  { %v8240_v50 = vmul.f32 -1.442695, %v982_v48  ;;  %v9379_v48 = vpack.c.bf16 %v1172_v39, %v1165_v38  ;;  %v1647_v38 = vld [vmem:[%s11077_s20 + $0x50] sm:$0xff]  ;;  %v1637_v39 = vld [vmem:[%s11077_s20] sm:$0xff] }
 0x23a   :  { %10244 = vpow2.f32 %v8240_v50 }
 0x240   :  { %v907_v51 = vpop.f32.mrb[6].mxu1  ;;  %v978_v4 = vpop.f32.mrb[8].mxu0 }
 0x241   :  { %v983_v10 = vadd.f32 %v907_v51, %v767_v42  ;;  %v909_v52 = vpop.f32.mrb[7].mxu1  ;;  %v8794_v53 = vpop.f32.mrb[9].mxu0  ;;  %v1010_v63 = vrot.slane %v978_v4, %v10839_v37 }
 0x243   :  { %v8241_v54 = vmul.f32 -1.442695, %v983_v10  ;;  %v10979_v5 = vsel %vm10848_vm10, %v1010_v63, %v10845_v44  ;;  %v1137_v44 = vld [vmem:[%s10943_s13 + $0x10] sm:$0xff]  ;;  %v1128_v10 = vstv %s8246_s15  ;;  %s8378_s15 = sld [smem:[#allocation5 + $0x9]] }
 0x244   :  { %v10245_v55 = vpop.eup %10244  ;;  %v1119_v7 = vsel %vm10982_vm13, %v10979_v5, 0.0  ;;  %v9370_v3 = vpack.c.bf16 %v1144_v45, %v1137_v44  ;;  %v1161_v63 = vld [vmem:[%s10943_s13 + $0xd0] sm:$0xff]  ;;  %v1160_v45 = vld [vmem:[%s10943_s13 + $0xc8] sm:$0xff] }
 0x245   :  { %v990_v56 = vadd.f32 1.0, %v10245_v55  ;;  %10246 = vpow2.f32 %v8241_v54  ;;  %v1120_v12 = vsel %vm97_vm1, %v1119_v7, 0.0  ;;  %v1129_v55 = vmul.f32 %v10723_v59, %v1128_v10  ;;  %v1673_v10 = vld [vmem:[%s11077_s20 + $0x120] sm:$0x3] }
 0x246   :  { %v1121_v19 = vrot.slane %v1120_v12, 4 }
 0x247   :  { %10248 = vrcp.f32 %v990_v56  ;;  %v1139_v56 = vld [vmem:[%s10943_s13 + $0x20] sm:$0xff] }
 0x248   :  { %v1122_v27 = vadd.f32 %v1121_v19, %v1120_v12  ;;  %v1162_v19 = vld [vmem:[%s10943_s13 + $0xd8] sm:$0xff] }
 0x24a   :  { %v1123_v40 = vrot.slane %v1122_v27, 2 }
 0x24c   :  { %v1124_v11 = vadd.f32 %v1123_v40, %v1122_v27  ;;  %v1644_v40 = vld [vmem:[%s11077_s20 + $0x38] sm:$0xff] }
 0x24e   :  { %v1125_v51 = vrot.slane %v1124_v11, 1 }
 0x24f   :  { %v10247_v57 = vpop.eup %10246 }
 0x250   :  { %v991_v61 = vadd.f32 1.0, %v10247_v57  ;;  %v1126_v53 = vadd.f32 %v1125_v51, %v1124_v11 }
 0x251   :  { %v10249_v58 = vpop.eup %10248 }
 0x252   :  { %v996_v60 = vmul.f32 %v10249_v58, %v909_v52  ;;  %v1146_v58 = vld [vmem:[%s10943_s13 + $0x58] sm:$0xff] }
 0x253   :  { %v9384_v7 = vpack.c.bf16 %v1146_v58, %v1139_v56  ;;  %v1649_v58 = vld [vmem:[%s11077_s20 + $0x60] sm:$0xff] }
 0x254   :  { %v997_v62 = vadd.f32 %v996_v60, %v836_v41  ;;  %v1141_v60 = vld [vmem:[%s10943_s13 + $0x30] sm:$0xff] }
 0x256   :  { %10250 = vtanh.f32 %v997_v62  ;;  %v1154_v62 = vld [vmem:[%s10943_s13 + $0x98] sm:$0xff] }
 0x257   :  { %10252 = vrcp.f32 %v991_v61  ;;  %v1148_v61 = vld [vmem:[%s10943_s13 + $0x68] sm:$0xff]  ;;  %v9386_v44 = vpack.c.bf16 %v1161_v63, %v1154_v62 }
 0x258   :  { %v9397_v12 = vpack.c.bf16 %v1148_v61, %v1141_v60 }
 0x260   :  { %v10251_v14 = vpop.eup %10250 }
 0x261   :  { %v999_v15 = vsub.f32 %v10890_v30, %v10251_v14  ;;  %v10253_v18 = vpop.eup %10252 }
 0x263   :  { %v1000_v22 = vmul.f32 %v10253_v18, %v999_v15  ;;  %v1155_v18 = vld [vmem:[%s10943_s13 + $0xa0] sm:$0xff] }
 0x264   :  { %v9400_v23 = vpack.c.bf16 %v1162_v19, %v1155_v18 }
 0x265   :  { %v1001_v6 = vadd.f32 %v10251_v14, %v1000_v22  ;;  %v1153_v14 = vld [vmem:[%s10943_s13 + $0x90] sm:$0xff] }
 0x266   :  { %v9388_v22 = vpack.c.bf16 %v1160_v45, %v1153_v14 }
 0x267   :  { %v1005_v30 = vrot.slane %v1001_v6, %v10839_v37  ;;  %8808 = vmatmul.mubr.msk.f32.vlgmr.msra.gmra.mrb[8].mxu1 %vm167_vm8, %v1001_v6  ;;  %v9390_v6 = vpack.c.bf16 %v1175_v21, %v1168_v20 }
 0x268   :  { %9371 = vmatpush1.bf16.msra.mxu1 %v9370_v3  ;;  %1336 = vmatprep.mubr.f32.mxu1 %v10575_v1  ;;  %v1167_v3 = vld [vmem:[%s10943_s13 + $0x100] sm:$0xff] }
 0x269   :  { %v11011_v33 = vsel %vm10869_vm11, %v1005_v30, %v10877_v13  ;;  %9373 = vmatprep.subr.bf16.mxu1 %v9372_v24  ;;  %v1174_v24 = vld [vmem:[%s10943_s13 + $0x138] sm:$0x3]  ;;  %v1645_v30 = vld [vmem:[%s11077_s20 + $0x40] sm:$0xff]  ;;  %s8302_s13 = sld [smem:[#allocation5 + $0x5]] }
 0x26a   :  { %v1107_v41 = vsel %vm11003_vm14, %v11011_v33, 0.0  ;;  %v9393_v27 = vpack.c.bf16 %v1174_v24, %v1167_v3 }
 0x26b   :  { %v1108_v42 = vsel %vm97_vm1, %v1107_v41, 0.0 }
 0x26c   :  { %v1109_v47 = vrot.slane %v1108_v42, 4  ;;  %9375 = vmatpush1.bf16.msra.mxu1 %v9374_v32  ;;  %v1640_v32 = vld [vmem:[%s11077_s20 + $0x18] sm:$0xff] }
 0x26d   :  { %9378 = vmatprep.subr.msk.bf16.mxu1 %vm10672_vm4, %v9376_v35  ;;  %v9416_v35 = vpack.c.bf16 %v1645_v30, %v1638_v29  ;;  %v9430_v41 = vpack.c.bf16 %v1647_v38, %v1640_v32  ;;  %v1617_v30 = vstv %s8264_s21 }
 0x26e   :  { %v1110_v13 = vadd.f32 %v1109_v47, %v1108_v42  ;;  %v9418_v42 = vpack.c.bf16 %v1644_v40, %v1637_v39  ;;  %v1652_v47 = vld [vmem:[%s11077_s20 + $0x78] sm:$0xff]  ;;  %vm11111_vm15 = vcmp.eq.s32.totalorder %v10650_v2, %v1617_v30  ;;  %v1663_v30 = vld [vmem:[%s11077_s20 + $0xd0] sm:$0xff] }
 0x270   :  { %9381 = vmatpush1.bf16.msk.msra.mxu1 %vm10672_vm4, %v9379_v48  ;;  %v1111_v50 = vrot.slane %v1110_v13, 2  ;;  %v1659_v48 = vld [vmem:[%s11077_s20 + $0xb0] sm:$0xff] }
 0x271   :  { %9396 = vmatprep.subr.bf16.mxu1 %v10577_v16  ;;  %v9420_v11 = vpack.c.bf16 %v1659_v48, %v1652_v47  ;;  %v1654_v48 = vld [vmem:[%s11077_s20 + $0x88] sm:$0xff] }
 0x272   :  { %v1112_v4 = vadd.f32 %v1111_v50, %v1110_v13  ;;  %v1651_v13 = vld [vmem:[%s11077_s20 + $0x70] sm:$0xff]  ;;  %v1658_v50 = vld [vmem:[%s11077_s20 + $0xa8] sm:$0xff] }
 0x273   :  { %v9422_v51 = vpack.c.bf16 %v1658_v50, %v1651_v13  ;;  %v1605_v50 = vstv %s11071_s16  ;;  %s8379_s16 = sld [smem:[#allocation7 + $0x9]] }
 0x274   :  { %v1113_v52 = vrot.slane %v1112_v4, 1  ;;  %vm11132_vm0 = vcmp.eq.s32.totalorder %v10650_v2, %v1605_v50 }
 0x276   :  { %v11024_v54 = vadd.f32 %v1113_v52, %v1112_v4  ;;  %v1666_v4 = vld [vmem:[%s11077_s20 + $0xe8] sm:$0xff] }
 0x277   :  { %v9424_v52 = vpack.c.bf16 %v1673_v10, %v1666_v4 }
 0x278   :  { %v1127_v57 = vadd.f32 %v1126_v53, %v11024_v54  ;;  %v1665_v53 = vld [vmem:[%s11077_s20 + $0xe0] sm:$0xff] }
 0x27a   :  { %v1130_v0 = vadd.f32 %v1129_v55, %v1127_v57  ;;  %v1672_v55 = vld [vmem:[%s11077_s20 + $0x118] sm:$0x3]  ;;  %v1642_v57 = vld [vmem:[%s11077_s20 + $0x28] sm:$0xff] }
 0x27b   :  { %v9427_v56 = vpack.c.bf16 %v1672_v55, %v1665_v53  ;;  %v9444_v60 = vpack.c.bf16 %v1649_v58, %v1642_v57  ;;  %v1660_v53 = vld [vmem:[%s11077_s20 + $0xb8] sm:$0xff]  ;;  %v1675_v57 = vld [vmem:[%s11077_s20 + $0x130] sm:$0x3] }
 0x27c   :  { %v1131_v15 = vadd.f32 %v10744_v17, %v1130_v0 }
 0x27e   :  { %8250 = vmatmul.mubr.msk.f32.vlgmr.msra.gmra.mrb[10].mxu0 %vm167_vm8, %v1131_v15  ;;  %8253 = vmatmul.mubr.msk.f32.vlgmr.msra.gmra.mrb[10].mxu1 %vm167_vm8, %v1131_v15 }
 0x27f   :  { %9385 = vmatpush1.bf16.msra.mxu0 %v9384_v7  ;;  %9398 = vmatpush3.bf16.msra.mxu1 %v9397_v12 }
 0x280   :  { %9387 = vmatprep.subr.bf16.mxu0 %v9386_v44  ;;  %9399 = vmatprep.subr.bf16.mxu1 %v10577_v16 }
 0x281   :  { %1407 = vmatprep.mubr.f32.mxu0 %v10575_v1  ;;  %8822 = vmatprep.mubr.msk.f32.mxu1 %vm10578_vm9, %v10575_v1 }
 0x283   :  { %9389 = vmatpush1.bf16.msra.mxu0 %v9388_v22  ;;  %9401 = vmatpush3.bf16.msra.mxu1 %v9400_v23 }
 0x284   :  { %9392 = vmatprep.subr.msk.bf16.mxu0 %vm10672_vm4, %v9390_v6  ;;  %9402 = vmatprep.subr.bf16.mxu1 %v10577_v16 }
 0x287   :  { %9395 = vmatpush1.bf16.msk.msra.mxu0 %vm10672_vm4, %v9393_v27  ;;  %9405 = vmatpush3.bf16.msk.msra.mxu1 %vm10672_vm4, %v9403_v28 }
 0x288   :  { %9406 = vmatprep.subr.bf16.mxu0 %v10577_v16  ;;  %9417 = vmatprep.subr.bf16.mxu1 %v9416_v35  ;;  %v2148_v35 = vld [vmem:[%s11206_s25 + $0x48] sm:$0xff] }
 0x28a   :  { %8256 = vmatmul.mubr.msk.f32.vlgmr.msra.gmra.mrb[12].mxu0 %vm167_vm8, %v1131_v15  ;;  %8823 = vmatmul.mubr.msk.f32.vlgmr.msra.gmra.mrb[12].mxu1 %vm167_vm8, %v1131_v15 }
 0x28b   :  { %9408 = vmatpush3.bf16.msra.mxu0 %v10785_v43  ;;  %8837 = vmatprep.mubr.msk.f32.mxu0 %vm10578_vm9, %v10575_v1 }
 0x28c   :  { %9409 = vmatprep.subr.bf16.mxu0 %v10577_v16  ;;  %1767 = vmatprep.mubr.f32.mxu1 %v10575_v1 }
 0x28d   :  { %9419 = vmatpush1.bf16.msra.mxu1 %v9418_v42 }
 0x28e   :  { %9421 = vmatprep.subr.bf16.mxu1 %v9420_v11  ;;  %v1661_v11 = vld [vmem:[%s11077_s20 + $0xc0] sm:$0xff] }
 0x28f   :  { %9411 = vmatpush3.bf16.msra.mxu0 %v10795_v46  ;;  %v9434_v10 = vpack.c.bf16 %v1661_v11, %v1654_v48  ;;  %v1664_v48 = vld [vmem:[%s11077_s20 + $0xd8] sm:$0xff]  ;;  %v1670_v11 = vld [vmem:[%s11077_s20 + $0x108] sm:$0xff] }
 0x290   :  { %9412 = vmatprep.subr.bf16.mxu0 %v10577_v16 }
 0x291   :  { %9423 = vmatpush1.bf16.msra.mxu1 %v9422_v51 }
 0x292   :  { %9426 = vmatprep.subr.msk.bf16.mxu1 %vm10672_vm4, %v9424_v52  ;;  %v1653_v52 = vld [vmem:[%s11077_s20 + $0x80] sm:$0xff] }
 0x293   :  { %9415 = vmatpush3.bf16.msk.msra.mxu0 %vm10672_vm4, %v10805_v49 }
 0x294   :  { %9431 = vmatprep.subr.bf16.mxu0 %v9430_v41 }
 0x295   :  { %9429 = vmatpush1.bf16.msk.msra.mxu1 %vm10672_vm4, %v9427_v56  ;;  %v1668_v56 = vld [vmem:[%s11077_s20 + $0xf8] sm:$0xff] }
 0x296   :  { %9445 = vmatprep.subr.bf16.mxu1 %v9444_v60  ;;  %v9436_v60 = vpack.c.bf16 %v1660_v53, %v1653_v52  ;;  %v1676_v52 = vld [vmem:[%s11077_s20 + $0x138] sm:$0x3]  ;;  %v1671_v53 = vld [vmem:[%s11077_s20 + $0x110] sm:$0xff] }
 0x33a   :  { %v1081_v61 = vpop.f32.mrb[8].mxu1 }
 0x33b   :  { %v11100_v62 = vadd.f32 %v1081_v61, %v10968_v34  ;;  %v8809_v63 = vpop.f32.mrb[9].mxu1 }
 0x33c   :  { %v9438_v63 = vpack.c.bf16 %v1675_v57, %v1668_v56 }
 0x33d   :  { %v1085_v0 = vsel %vm582_vm12, %v11100_v62, -inf }
 0x33e   :  { %1086 = vmax.xlane.f32.xlu0 %v1085_v0  ;;  %v1667_v0 = vld [vmem:[%s11077_s20 + $0xf0] sm:$0xff] }
 0x351   :  { %v1267_v7 = vpop.f32.mrb[10].mxu0  ;;  %v1338_v12 = vpop.f32.mrb[10].mxu1 }
 0x352   :  { %v1269_v14 = vpop.f32.mrb[11].mxu0  ;;  %v1340_v15 = vpop.f32.mrb[11].mxu1 }
 0x353   :  { %v1484_v44 = vadd.f32 %v1340_v15, %v1267_v7  ;;  %v1674_v7 = vld [vmem:[%s11077_s20 + $0x128] sm:$0x3] }
 0x355   :  { %v8259_v45 = vmul.f32 -1.442695, %v1484_v44 }
 0x357   :  { %10254 = vpow2.f32 %v8259_v45  ;;  %v9441_v45 = vpack.c.bf16 %v1674_v7, %v1667_v0  ;;  %v2149_v7 = vld [vmem:[%s11206_s25 + $0x50] sm:$0xff] }
 0x35d   :  { %v1409_v18 = vpop.f32.mrb[12].mxu0  ;;  %v1480_v19 = vpop.f32.mrb[12].mxu1 }
 0x35e   :  { %v1485_v20 = vadd.f32 %v1409_v18, %v1269_v14  ;;  %v1411_v21 = vpop.f32.mrb[13].mxu0  ;;  %v8824_v22 = vpop.f32.mrb[13].mxu1  ;;  %v1512_v29 = vrot.slane %v1480_v19, %v10839_v37 }
 0x360   :  { %v8260_v23 = vmul.f32 -1.442695, %v1485_v20  ;;  %v11108_v32 = vsel %vm10982_vm13, %v1512_v29, %v10979_v5  ;;  %v1639_v5 = vld [vmem:[%s11077_s20 + $0x10] sm:$0xff]  ;;  %v1656_v29 = vld [vmem:[%s11077_s20 + $0x98] sm:$0xff] }
 0x361   :  { %v10255_v3 = vpop.eup %10254  ;;  %v1621_v38 = vsel %vm11111_vm15, %v11108_v32, 0.0  ;;  %v9432_v51 = vpack.c.bf16 %v1646_v9, %v1639_v5  ;;  %v9448_v9 = vpack.c.bf16 %v1663_v30, %v1656_v29 }
 0x362   :  { %v1492_v6 = vadd.f32 1.0, %v10255_v3  ;;  %10256 = vpow2.f32 %v8260_v23  ;;  %v1622_v39 = vsel %vm97_vm1, %v1621_v38, 0.0 }
 0x363   :  { %v1623_v47 = vrot.slane %v1622_v39, 4 }
 0x364   :  { %10258 = vrcp.f32 %v1492_v6 }
 0x365   :  { %v1624_v55 = vadd.f32 %v1623_v47, %v1622_v39  ;;  %v1657_v47 = vld [vmem:[%s11077_s20 + $0xa0] sm:$0xff] }
 0x36c   :  { %v10257_v24 = vpop.eup %10256 }
 0x36d   :  { %v1493_v27 = vadd.f32 1.0, %v10257_v24  ;;  %v1641_v24 = vld [vmem:[%s11077_s20 + $0x20] sm:$0xff] }
 0x36e   :  { %v10259_v25 = vpop.eup %10258 }
 0x36f   :  { %v1498_v26 = vmul.f32 %v10259_v25, %v1411_v21  ;;  %v1630_v21 = vstv %s8265_s1  ;;  %s8397_s1 = sld [smem:[#allocation5 + $0xa]] }
 0x370   :  { %v1631_v6 = vmul.f32 %v10723_v59, %v1630_v21  ;;  %v2168_v21 = vld [vmem:[%s11206_s25 + $0xe8] sm:$0xff] }
 0x371   :  { %v1499_v28 = vadd.f32 %v1498_v26, %v1338_v12  ;;  %v1625_v12 = vrot.slane %v1624_v55, 2  ;;  %v1648_v26 = vld [vmem:[%s11077_s20 + $0x58] sm:$0xff] }
 0x372   :  { %v9446_v39 = vpack.c.bf16 %v1648_v26, %v1641_v24  ;;  %v2174_v24 = vld [vmem:[%s11206_s25 + $0x118] sm:$0x3]  ;;  %v2144_v26 = vld [vmem:[%s11206_s25 + $0x28] sm:$0xff] }
 0x373   :  { %10260 = vtanh.f32 %v1499_v28  ;;  %v1626_v31 = vadd.f32 %v1625_v12, %v1624_v55  ;;  %v1650_v28 = vld [vmem:[%s11077_s20 + $0x68] sm:$0xff]  ;;  %v2139_v12 = vld [vmem:[%s11206_s25] sm:$0xff] }
 0x374   :  { %10262 = vrcp.f32 %v1493_v27  ;;  %v1643_v27 = vld [vmem:[%s11077_s20 + $0x30] sm:$0xff]  ;;  %v1678_v55 = vld [vmem:[%s11077_s20 + $0x148] sm:$0x3] }
 0x375   :  { %v1627_v19 = vrot.slane %v1626_v31, 1  ;;  %v9465_v57 = vpack.c.bf16 %v1678_v55, %v1671_v53 }
 0x377   :  { %v1628_v23 = vadd.f32 %v1627_v19, %v1626_v31  ;;  %v2161_v31 = vld [vmem:[%s11206_s25 + $0xb0] sm:$0xff]  ;;  %v2160_v19 = vld [vmem:[%s11206_s25 + $0xa8] sm:$0xff] }
 0x37d   :  { %v10261_v40 = vpop.eup %10260 }
 0x37e   :  { %v1501_v41 = vsub.f32 %v11024_v54, %v10261_v40  ;;  %v10263_v42 = vpop.eup %10262 }
 0x380   :  { %v1502_v13 = vmul.f32 %v10263_v42, %v1501_v41  ;;  %v1655_v41 = vld [vmem:[%s11077_s20 + $0x90] sm:$0xff]  ;;  %v1662_v42 = vld [vmem:[%s11077_s20 + $0xc8] sm:$0xff] }
 0x381   :  { %v9450_v50 = vpack.c.bf16 %v1662_v42, %v1655_v41 }
 0x382   :  { %v1503_v4 = vadd.f32 %v10261_v40, %v1502_v13  ;;  %v9459_v40 = vpack.c.bf16 %v1650_v28, %v1643_v27  ;;  %v1677_v13 = vld [vmem:[%s11077_s20 + $0x140] sm:$0x3] }
 0x383   :  { %v2151_v27 = vld [vmem:[%s11206_s25 + $0x60] sm:$0xff] }
 0x384   :  { %v1507_v54 = vrot.slane %v1503_v4, %v10839_v37  ;;  %8838 = vmatmul.mubr.msk.f32.vlgmr.msra.gmra.mrb[14].mxu0 %vm167_vm8, %v1503_v4  ;;  %v1669_v4 = vld [vmem:[%s11077_s20 + $0x100] sm:$0xff]  ;;  %v9506_v28 = vpack.c.bf16 %v2151_v27, %v2144_v26  ;;  %v2177_v26 = vld [vmem:[%s11206_s25 + $0x130] sm:$0x3]  ;;  %s11592_s20 = sld [smem:[#allocation2 + $0x7]] }
 0x385   :  { %9433 = vmatpush1.bf16.msra.mxu0 %v9432_v51  ;;  %1838 = vmatprep.mubr.f32.mxu0 %v10575_v1  ;;  %v9462_v51 = vpack.c.bf16 %v1664_v48, %v1657_v47  ;;  %v9455_v56 = vpack.c.bf16 %v1676_v52, %v1669_v4 }
 0x386   :  { %v11140_v61 = vsel %vm11003_vm14, %v1507_v54, %v11011_v33  ;;  %9435 = vmatprep.subr.bf16.mxu0 %v9434_v10  ;;  %v9452_v10 = vpack.c.bf16 %v1677_v13, %v1670_v11  ;;  %v2140_v54 = vld [vmem:[%s11206_s25 + $0x8] sm:$0xff] }
 0x387   :  { %v1609_v14 = vsel %vm11132_vm0, %v11140_v61, 0.0 }
 0x388   :  { %v1610_v15 = vsel %vm97_vm1, %v1609_v14, 0.0  ;;  %v2146_v14 = vld [vmem:[%s11206_s25 + $0x38] sm:$0xff] }
 0x389   :  { %v1611_v44 = vrot.slane %v1610_v15, 4  ;;  %9437 = vmatpush1.bf16.msra.mxu0 %v9436_v60  ;;  %v2147_v60 = vld [vmem:[%s11206_s25 + $0x40] sm:$0xff] }
 0x38a   :  { %9440 = vmatprep.subr.msk.bf16.mxu0 %vm10672_vm4, %v9438_v63  ;;  %v2142_v63 = vld [vmem:[%s11206_s25 + $0x18] sm:$0xff]  ;;  %v9478_v0 = vpack.c.bf16 %v2147_v60, %v2140_v54  ;;  %v2119_v60 = vstv %s8283_s26  ;;  %s8517_s21 = smul.u32 336, %s11592_s20 }
 0x38b   :  { %v1612_v33 = vadd.f32 %v1611_v44, %v1610_v15  ;;  %v9492_v15 = vpack.c.bf16 %v2149_v7, %v2142_v63  ;;  %v9480_v44 = vpack.c.bf16 %v2146_v14, %v2139_v12  ;;  %vm11240_vm2 = vcmp.eq.s32.totalorder %v10650_v2, %v2119_v60  ;;  %v2165_v60 = vld [vmem:[%s11206_s25 + $0xd0] sm:$0xff] }
 0x38c   :  { %s11598_s22 = scalar_lea.vmem %s12925_s5, %s8517_s21 }
 0x38d   :  { %9443 = vmatpush1.bf16.msk.msra.mxu0 %vm10672_vm4, %v9441_v45  ;;  %v1613_v18 = vrot.slane %v1612_v33, 2  ;;  %v2154_v45 = vld [vmem:[%s11206_s25 + $0x78] sm:$0xff] }
 0x38e   :  { %9458 = vmatprep.subr.bf16.mxu0 %v10577_v16 }
 0x38f   :  { %v1614_v20 = vadd.f32 %v1613_v18, %v1612_v33  ;;  %v9482_v33 = vpack.c.bf16 %v2161_v31, %v2154_v45  ;;  %v2153_v18 = vld [vmem:[%s11206_s25 + $0x70] sm:$0xff]  ;;  %v2156_v31 = vld [vmem:[%s11206_s25 + $0x88] sm:$0xff] }
 0x391   :  { %v1615_v22 = vrot.slane %v1614_v20, 1 }
 0x393   :  { %v11153_v3 = vadd.f32 %v1615_v22, %v1614_v20  ;;  %v9484_v20 = vpack.c.bf16 %v2160_v19, %v2153_v18  ;;  %v2175_v22 = vld [vmem:[%s11206_s25 + $0x120] sm:$0x3]  ;;  %v2107_v19 = vstv %s11200_s0  ;;  %s8398_s0 = sld [smem:[#allocation7 + $0xa]] }
 0x394   :  { %vm11261_vm3 = vcmp.eq.s32.totalorder %v10650_v2, %v2107_v19 }
 0x395   :  { %v1629_v25 = vadd.f32 %v1628_v23, %v11153_v3  ;;  %v9486_v23 = vpack.c.bf16 %v2175_v22, %v2168_v21 }
 0x397   :  { %v1632_v38 = vadd.f32 %v1631_v6, %v1629_v25  ;;  %v2167_v6 = vld [vmem:[%s11206_s25 + $0xe0] sm:$0xff] }
 0x398   :  { %v9489_v25 = vpack.c.bf16 %v2174_v24, %v2167_v6  ;;  %v2162_v6 = vld [vmem:[%s11206_s25 + $0xb8] sm:$0xff] }
 0x399   :  { %v1633_v5 = vadd.f32 %v10744_v17, %v1632_v38 }
 0x39b   :  { %8269 = vmatmul.mubr.msk.f32.vlgmr.msra.gmra.mrb[14].mxu1 %vm167_vm8, %v1633_v5  ;;  %8272 = vmatmul.mubr.msk.f32.vlgmr.msra.gmra.mrb[16].mxu0 %vm167_vm8, %v1633_v5 }
 0x39c   :  { %9447 = vmatpush1.bf16.msra.mxu1 %v9446_v39  ;;  %9460 = vmatpush3.bf16.msra.mxu0 %v9459_v40 }
 0x39d   :  { %9449 = vmatprep.subr.bf16.mxu1 %v9448_v9  ;;  %9461 = vmatprep.subr.bf16.mxu0 %v10577_v16 }
 0x39e   :  { %1909 = vmatprep.mubr.f32.mxu1 %v10575_v1  ;;  %8852 = vmatprep.mubr.msk.f32.mxu0 %vm10578_vm9, %v10575_v1 }
 0x3a0   :  { %9451 = vmatpush1.bf16.msra.mxu1 %v9450_v50  ;;  %9463 = vmatpush3.bf16.msra.mxu0 %v9462_v51 }
 0x3a1   :  { %9454 = vmatprep.subr.msk.bf16.mxu1 %vm10672_vm4, %v9452_v10  ;;  %9464 = vmatprep.subr.bf16.mxu0 %v10577_v16 }
 0x3a4   :  { %9457 = vmatpush1.bf16.msk.msra.mxu1 %vm10672_vm4, %v9455_v56  ;;  %9467 = vmatpush3.bf16.msk.msra.mxu0 %vm10672_vm4, %v9465_v57 }
 0x3a5   :  { %9468 = vmatprep.subr.bf16.mxu1 %v10577_v16  ;;  %9479 = vmatprep.subr.bf16.mxu0 %v9478_v0  ;;  %v2650_v0 = vld [vmem:[%s11335_s30 + $0x48] sm:$0xff] }
 0x3a7   :  { %8275 = vmatmul.mubr.msk.f32.vlgmr.msra.gmra.mrb[16].mxu1 %vm167_vm8, %v1633_v5  ;;  %8853 = vmatmul.mubr.msk.f32.vlgmr.msra.gmra.mrb[18].mxu0 %vm167_vm8, %v1633_v5 }
 0x3a8   :  { %9470 = vmatpush3.bf16.msra.mxu1 %v10785_v43  ;;  %8867 = vmatprep.mubr.msk.f32.mxu1 %vm10578_vm9, %v10575_v1 }
 0x3a9   :  { %9471 = vmatprep.subr.bf16.mxu1 %v10577_v16  ;;  %2269 = vmatprep.mubr.f32.mxu0 %v10575_v1 }
 0x3aa   :  { %9481 = vmatpush1.bf16.msra.mxu0 %v9480_v44 }
 0x3ab   :  { %9483 = vmatprep.subr.bf16.mxu0 %v9482_v33  ;;  %v2163_v33 = vld [vmem:[%s11206_s25 + $0xc0] sm:$0xff] }
 0x3ac   :  { %9473 = vmatpush3.bf16.msra.mxu1 %v10795_v46  ;;  %v9496_v22 = vpack.c.bf16 %v2163_v33, %v2156_v31  ;;  %v2166_v31 = vld [vmem:[%s11206_s25 + $0xd8] sm:$0xff]  ;;  %v2172_v33 = vld [vmem:[%s11206_s25 + $0x108] sm:$0xff] }
 0x3ad   :  { %9474 = vmatprep.subr.bf16.mxu1 %v10577_v16 }
 0x3ae   :  { %9485 = vmatpush1.bf16.msra.mxu0 %v9484_v20 }
 0x3af   :  { %9488 = vmatprep.subr.msk.bf16.mxu0 %vm10672_vm4, %v9486_v23  ;;  %v2155_v23 = vld [vmem:[%s11206_s25 + $0x80] sm:$0xff] }
 0x3b0   :  { %9477 = vmatpush3.bf16.msk.msra.mxu1 %vm10672_vm4, %v10805_v49 }
 0x3b1   :  { %9493 = vmatprep.subr.bf16.mxu1 %v9492_v15 }
 0x3b2   :  { %9491 = vmatpush1.bf16.msk.msra.mxu0 %vm10672_vm4, %v9489_v25  ;;  %v2170_v25 = vld [vmem:[%s11206_s25 + $0xf8] sm:$0xff] }
 0x3b3   :  { %9507 = vmatprep.subr.bf16.mxu0 %v9506_v28  ;;  %v9498_v28 = vpack.c.bf16 %v2162_v6, %v2155_v23  ;;  %v2178_v23 = vld [vmem:[%s11206_s25 + $0x138] sm:$0x3]  ;;  %v2173_v6 = vld [vmem:[%s11206_s25 + $0x110] sm:$0xff] }
 0x457   :  { %v1583_v29 = vpop.f32.mrb[14].mxu0 }
 0x458   :  { %v11229_v30 = vadd.f32 %v1583_v29, %v10968_v34  ;;  %v8839_v38 = vpop.f32.mrb[15].mxu0 }
 0x459   :  { %v9500_v38 = vpack.c.bf16 %v2177_v26, %v2170_v25 }
 0x45a   :  { %v1587_v39 = vsel %vm582_vm12, %v11229_v30, -inf }
 0x45b   :  { %1588 = vmax.xlane.f32.xlu1 %v1587_v39  ;;  %v2169_v39 = vld [vmem:[%s11206_s25 + $0xf0] sm:$0xff] }
 0x46e   :  { %v1769_v40 = vpop.f32.mrb[14].mxu1  ;;  %v1840_v41 = vpop.f32.mrb[16].mxu0 }
 0x46f   :  { %v1771_v5 = vpop.f32.mrb[15].mxu1  ;;  %v1842_v9 = vpop.f32.mrb[17].mxu0 }
 0x470   :  { %v1986_v42 = vadd.f32 %v1842_v9, %v1769_v40  ;;  %v2176_v40 = vld [vmem:[%s11206_s25 + $0x128] sm:$0x3] }
 0x472   :  { %v8278_v47 = vmul.f32 -1.442695, %v1986_v42 }
 0x474   :  { %10264 = vpow2.f32 %v8278_v47  ;;  %v9503_v47 = vpack.c.bf16 %v2176_v40, %v2169_v39  ;;  %v2651_v40 = vld [vmem:[%s11335_s30 + $0x50] sm:$0xff] }
 0x47a   :  { %v1911_v48 = vpop.f32.mrb[16].mxu1  ;;  %v1982_v11 = vpop.f32.mrb[18].mxu0 }
 0x47b   :  { %v1987_v13 = vadd.f32 %v1911_v48, %v1771_v5  ;;  %v1913_v50 = vpop.f32.mrb[17].mxu1  ;;  %v8854_v51 = vpop.f32.mrb[19].mxu0  ;;  %v2014_v54 = vrot.slane %v1982_v11, %v10839_v37 }
 0x47d   :  { %v8279_v4 = vmul.f32 -1.442695, %v1987_v13  ;;  %v11237_v63 = vsel %vm11111_vm15, %v2014_v54, %v11108_v32  ;;  %v2141_v32 = vld [vmem:[%s11206_s25 + $0x10] sm:$0xff]  ;;  %v2158_v54 = vld [vmem:[%s11206_s25 + $0x98] sm:$0xff] }
 0x47e   :  { %v10265_v34 = vpop.eup %10264  ;;  %v2123_v7 = vsel %vm11240_vm2, %v11237_v63, 0.0  ;;  %v9494_v20 = vpack.c.bf16 %v2148_v35, %v2141_v32  ;;  %v9510_v35 = vpack.c.bf16 %v2165_v60, %v2158_v54  ;;  %v11360_v60 = vld [vmem:[%s12927_s7] sm:$0x1] }
 0x47f   :  { %v1994_v10 = vadd.f32 1.0, %v10265_v34  ;;  %10266 = vpow2.f32 %v8279_v4  ;;  %v2124_v12 = vsel %vm97_vm1, %v2123_v7, 0.0 }
 0x480   :  { %v2125_v45 = vrot.slane %v2124_v12, 4 }
 0x481   :  { %10268 = vrcp.f32 %v1994_v10 }
 0x482   :  { %v2126_v24 = vadd.f32 %v2125_v45, %v2124_v12  ;;  %v2159_v45 = vld [vmem:[%s11206_s25 + $0xa0] sm:$0xff] }
 0x489   :  { %v10267_v52 = vpop.eup %10266 }
 0x48a   :  { %v1995_v56 = vadd.f32 1.0, %v10267_v52  ;;  %v2143_v52 = vld [vmem:[%s11206_s25 + $0x20] sm:$0xff] }
 0x48b   :  { %v10269_v53 = vpop.eup %10268 }
 0x48c   :  { %v2000_v55 = vmul.f32 %v10269_v53, %v1913_v50  ;;  %v2132_v50 = vstv %s8284_s2  ;;  %s12639_s2 = sld [smem:[#allocation2 + $0xf]] }
 0x48d   :  { %v2133_v10 = vmul.f32 %v10723_v59, %v2132_v50  ;;  %v2670_v50 = vld [vmem:[%s11335_s30 + $0xe8] sm:$0xff] }
 0x48e   :  { %v2001_v57 = vadd.f32 %v2000_v55, %v1840_v41  ;;  %v2127_v41 = vrot.slane %v2126_v24, 2  ;;  %v2150_v55 = vld [vmem:[%s11206_s25 + $0x58] sm:$0xff] }
 0x48f   :  { %v9508_v12 = vpack.c.bf16 %v2150_v55, %v2143_v52  ;;  %v2676_v52 = vld [vmem:[%s11335_s30 + $0x118] sm:$0x3]  ;;  %v2646_v55 = vld [vmem:[%s11335_s30 + $0x28] sm:$0xff] }
 0x490   :  { %10270 = vtanh.f32 %v2001_v57  ;;  %v2128_v58 = vadd.f32 %v2127_v41, %v2126_v24  ;;  %v2152_v57 = vld [vmem:[%s11206_s25 + $0x68] sm:$0xff]  ;;  %v2641_v41 = vld [vmem:[%s11335_s30] sm:$0xff] }
 0x491   :  { %10272 = vrcp.f32 %v1995_v56  ;;  %v2145_v56 = vld [vmem:[%s11206_s25 + $0x30] sm:$0xff]  ;;  %v2180_v24 = vld [vmem:[%s11206_s25 + $0x148] sm:$0x3] }
 0x492   :  { %v2129_v11 = vrot.slane %v2128_v58, 1  ;;  %v9527_v26 = vpack.c.bf16 %v2180_v24, %v2173_v6 }
 0x494   :  { %v2130_v4 = vadd.f32 %v2129_v11, %v2128_v58  ;;  %v2663_v58 = vld [vmem:[%s11335_s30 + $0xb0] sm:$0xff]  ;;  %v2662_v11 = vld [vmem:[%s11335_s30 + $0xa8] sm:$0xff] }
 0x49a   :  { %v10271_v14 = vpop.eup %10270 }
 0x49b   :  { %v2003_v15 = vsub.f32 %v11153_v3, %v10271_v14  ;;  %v10273_v44 = vpop.eup %10272 }
 0x49d   :  { %v2004_v18 = vmul.f32 %v10273_v44, %v2003_v15  ;;  %v2157_v15 = vld [vmem:[%s11206_s25 + $0x90] sm:$0xff]  ;;  %v2164_v44 = vld [vmem:[%s11206_s25 + $0xc8] sm:$0xff] }
 0x49e   :  { %v9512_v19 = vpack.c.bf16 %v2164_v44, %v2157_v15 }
 0x49f   :  { %v2005_v21 = vadd.f32 %v10271_v14, %v2004_v18  ;;  %v9521_v14 = vpack.c.bf16 %v2152_v57, %v2145_v56  ;;  %v2179_v18 = vld [vmem:[%s11206_s25 + $0x140] sm:$0x3] }
 0x4a0   :  { %v2653_v56 = vld [vmem:[%s11335_s30 + $0x60] sm:$0xff] }
 0x4a1   :  { %v2009_v3 = vrot.slane %v2005_v21, %v10839_v37  ;;  %8868 = vmatmul.mubr.msk.f32.vlgmr.msra.gmra.mrb[18].mxu1 %vm167_vm8, %v2005_v21  ;;  %v2171_v21 = vld [vmem:[%s11206_s25 + $0x100] sm:$0xff]  ;;  %v9568_v57 = vpack.c.bf16 %v2653_v56, %v2646_v55  ;;  %v2672_v56 = vld [vmem:[%s11335_s30 + $0xf8] sm:$0xff]  ;;  %s11721_s25 = sld [smem:[#allocation2 + $0x8]] }
 0x4a2   :  { %9495 = vmatpush1.bf16.msra.mxu1 %v9494_v20  ;;  %2340 = vmatprep.mubr.f32.mxu1 %v10575_v1  ;;  %v9524_v20 = vpack.c.bf16 %v2166_v31, %v2159_v45  ;;  %v9517_v25 = vpack.c.bf16 %v2178_v23, %v2171_v21 }
 0x4a3   :  { %v11269_v29 = vsel %vm11132_vm0, %v2009_v3, %v11140_v61  ;;  %9497 = vmatprep.subr.bf16.mxu1 %v9496_v22  ;;  %v9514_v22 = vpack.c.bf16 %v2179_v18, %v2172_v33  ;;  %v2642_v3 = vld [vmem:[%s11335_s30 + $0x8] sm:$0xff] }
 0x4a4   :  { %v2111_v5 = vsel %vm11261_vm3, %v11269_v29, 0.0 }
 0x4a5   :  { %v2112_v9 = vsel %vm97_vm1, %v2111_v5, 0.0  ;;  %v2648_v5 = vld [vmem:[%s11335_s30 + $0x38] sm:$0xff] }
 0x4a6   :  { %v2113_v42 = vrot.slane %v2112_v9, 4  ;;  %9499 = vmatpush1.bf16.msra.mxu1 %v9498_v28  ;;  %v2649_v28 = vld [vmem:[%s11335_s30 + $0x40] sm:$0xff] }
 0x4a7   :  { %9502 = vmatprep.subr.msk.bf16.mxu1 %vm10672_vm4, %v9500_v38  ;;  %v2644_v38 = vld [vmem:[%s11335_s30 + $0x18] sm:$0xff]  ;;  %v9540_v39 = vpack.c.bf16 %v2649_v28, %v2642_v3  ;;  %s8518_s26 = smul.u32 336, %s11721_s25 }
 0x4a8   :  { %v2114_v61 = vadd.f32 %v2113_v42, %v2112_v9  ;;  %v9554_v9 = vpack.c.bf16 %v2651_v40, %v2644_v38  ;;  %v9542_v42 = vpack.c.bf16 %v2648_v5, %v2641_v41  ;;  %v3152_v41 = vld [vmem:[%s11469_s17 + $0x48] sm:$0xff] }
 0x4a9   :  { %s11727_s6 = scalar_lea.vmem %s12925_s5, %s8518_s26 }
 0x4aa   :  { %9505 = vmatpush1.bf16.msk.msra.mxu1 %vm10672_vm4, %v9503_v47  ;;  %v2115_v48 = vrot.slane %v2114_v61, 2  ;;  %v2656_v47 = vld [vmem:[%s11335_s30 + $0x78] sm:$0xff] }
 0x4ab   :  { %9520 = vmatprep.subr.bf16.mxu1 %v10577_v16 }
 0x4ac   :  { %v2116_v13 = vadd.f32 %v2115_v48, %v2114_v61  ;;  %v9544_v61 = vpack.c.bf16 %v2663_v58, %v2656_v47  ;;  %v2655_v48 = vld [vmem:[%s11335_s30 + $0x70] sm:$0xff] }
 0x4ae   :  { %v2117_v51 = vrot.slane %v2116_v13, 1 }
 0x4b0   :  { %v11282_v34 = vadd.f32 %v2117_v51, %v2116_v13  ;;  %v9546_v13 = vpack.c.bf16 %v2662_v11, %v2655_v48  ;;  %v2677_v51 = vld [vmem:[%s11335_s30 + $0x120] sm:$0x3]  ;;  %v2658_v48 = vld [vmem:[%s11335_s30 + $0x88] sm:$0xff] }
 0x4b1   :  { %v2665_v11 = vld [vmem:[%s11335_s30 + $0xc0] sm:$0xff] }
 0x4b2   :  { %v2131_v53 = vadd.f32 %v2130_v4, %v11282_v34  ;;  %v9548_v4 = vpack.c.bf16 %v2677_v51, %v2670_v50  ;;  %v2609_v50 = vstv %s11329_s27  ;;  %s8525_s27 = smul.u32 336, %s12639_s2 }
 0x4b3   :  { %vm11395_vm6 = vcmp.eq.s32.totalorder %v10650_v2, %v2609_v50  ;;  %v2674_v50 = vld [vmem:[%s11335_s30 + $0x108] sm:$0xff] }
 0x4b4   :  { %v2134_v7 = vadd.f32 %v2133_v10, %v2131_v53  ;;  %v2669_v10 = vld [vmem:[%s11335_s30 + $0xe0] sm:$0xff] }
 0x4b5   :  { %v9551_v53 = vpack.c.bf16 %v2676_v52, %v2669_v10  ;;  %v9558_v10 = vpack.c.bf16 %v2665_v11, %v2658_v48  ;;  %v2657_v52 = vld [vmem:[%s11335_s30 + $0x80] sm:$0xff]  ;;  %v2666_v48 = vld [vmem:[%s11335_s30 + $0xc8] sm:$0xff] }
 0x4b6   :  { %v2135_v32 = vadd.f32 %v10744_v17, %v2134_v7  ;;  %v2661_v11 = vld [vmem:[%s11335_s30 + $0xa0] sm:$0xff] }
 0x4b8   :  { %8288 = vmatmul.mubr.msk.f32.vlgmr.msra.gmra.mrb[20].mxu0 %vm167_vm8, %v2135_v32  ;;  %8291 = vmatmul.mubr.msk.f32.vlgmr.msra.gmra.mrb[20].mxu1 %vm167_vm8, %v2135_v32 }
 0x4b9   :  { %9509 = vmatpush1.bf16.msra.mxu0 %v9508_v12  ;;  %9522 = vmatpush3.bf16.msra.mxu1 %v9521_v14 }
 0x4ba   :  { %9511 = vmatprep.subr.bf16.mxu0 %v9510_v35  ;;  %9523 = vmatprep.subr.bf16.mxu1 %v10577_v16 }
 0x4bb   :  { %2411 = vmatprep.mubr.f32.mxu0 %v10575_v1  ;;  %8882 = vmatprep.mubr.msk.f32.mxu1 %vm10578_vm9, %v10575_v1 }
 0x4bd   :  { %9513 = vmatpush1.bf16.msra.mxu0 %v9512_v19  ;;  %9525 = vmatpush3.bf16.msra.mxu1 %v9524_v20 }
 0x4be   :  { %9516 = vmatprep.subr.msk.bf16.mxu0 %vm10672_vm4, %v9514_v22  ;;  %9526 = vmatprep.subr.bf16.mxu1 %v10577_v16 }
 0x4c1   :  { %9519 = vmatpush1.bf16.msk.msra.mxu0 %vm10672_vm4, %v9517_v25  ;;  %9529 = vmatpush3.bf16.msk.msra.mxu1 %vm10672_vm4, %v9527_v26 }
 0x4c2   :  { %9530 = vmatprep.subr.bf16.mxu0 %v10577_v16  ;;  %9541 = vmatprep.subr.bf16.mxu1 %v9540_v39  ;;  %v2621_v39 = vstv %s8302_s13  ;;  %s8519_s13 = smul.u32 336, %s11855_s12 }
 0x4c3   :  { %vm11374_vm5 = vcmp.eq.s32.totalorder %v10650_v2, %v2621_v39  ;;  %v2654_v39 = vld [vmem:[%s11335_s30 + $0x68] sm:$0xff] }
 0x4c4   :  { %8294 = vmatmul.mubr.msk.f32.vlgmr.msra.gmra.mrb[22].mxu0 %vm167_vm8, %v2135_v32  ;;  %8883 = vmatmul.mubr.msk.f32.vlgmr.msra.gmra.mrb[22].mxu1 %vm167_vm8, %v2135_v32  ;;  %s11861_s4 = scalar_lea.vmem %s12925_s5, %s8519_s13 }
 0x4c5   :  { %9532 = vmatpush3.bf16.msra.mxu0 %v10785_v43  ;;  %8897 = vmatprep.mubr.msk.f32.mxu0 %vm10578_vm9, %v10575_v1 }
 0x4c6   :  { %9533 = vmatprep.subr.bf16.mxu0 %v10577_v16  ;;  %2771 = vmatprep.mubr.f32.mxu1 %v10575_v1 }
 0x4c7   :  { %9543 = vmatpush1.bf16.msra.mxu1 %v9542_v42 }
 0x4c8   :  { %9545 = vmatprep.subr.bf16.mxu1 %v9544_v61 }
 0x4c9   :  { %9535 = vmatpush3.bf16.msra.mxu0 %v10795_v46 }
 0x4ca   :  { %9536 = vmatprep.subr.bf16.mxu0 %v10577_v16 }
 0x4cb   :  { %9547 = vmatpush1.bf16.msra.mxu1 %v9546_v13 }
 0x4cc   :  { %9550 = vmatprep.subr.msk.bf16.mxu1 %vm10672_vm4, %v9548_v4 }
 0x4cd   :  { %9539 = vmatpush3.bf16.msk.msra.mxu0 %vm10672_vm4, %v10805_v49 }
 0x4ce   :  { %9555 = vmatprep.subr.bf16.mxu0 %v9554_v9 }
 0x4cf   :  { %9553 = vmatpush1.bf16.msk.msra.mxu1 %vm10672_vm4, %v9551_v53  ;;  %v2664_v53 = vld [vmem:[%s11335_s30 + $0xb8] sm:$0xff] }
 0x4d0   :  { %9569 = vmatprep.subr.bf16.mxu1 %v9568_v57  ;;  %v2679_v57 = vld [vmem:[%s11335_s30 + $0x130] sm:$0x3] }
 0x574   :  { %v2085_v54 = vpop.f32.mrb[18].mxu1 }
 0x575   :  { %v11363_v7 = vadd.f32 %v11360_v60, %v2085_v54  ;;  %v8869_v12 = vpop.f32.mrb[19].mxu1 }
 0x576   :  { %v9560_v12 = vpack.c.bf16 %v2664_v53, %v2657_v52  ;;  %v2673_v52 = vld [vmem:[%s11335_s30 + $0x100] sm:$0xff] }
 0x577   :  { %v2089_v14 = vsel %vm582_vm12, %v11363_v7, -inf }
 0x578   :  { %2090 = vmax.xlane.f32.xlu1 %v2089_v14 }
 0x58b   :  { %v2271_v15 = vpop.f32.mrb[20].mxu0  ;;  %v2342_v32 = vpop.f32.mrb[20].mxu1 }
 0x58c   :  { %v2273_v35 = vpop.f32.mrb[21].mxu0  ;;  %v2344_v44 = vpop.f32.mrb[21].mxu1 }
 0x58d   :  { %v2488_v45 = vadd.f32 %v2344_v44, %v2271_v15  ;;  %v9562_v15 = vpack.c.bf16 %v2679_v57, %v2672_v56  ;;  %v2675_v56 = vld [vmem:[%s11335_s30 + $0x110] sm:$0xff]  ;;  %v2682_v57 = vld [vmem:[%s11335_s30 + $0x148] sm:$0x3] }
 0x58f   :  { %v8297_v31 = vmul.f32 -1.442695, %v2488_v45 }
 0x591   :  { %10274 = vpow2.f32 %v8297_v31 }
 0x597   :  { %v2413_v33 = vpop.f32.mrb[22].mxu0  ;;  %v2484_v18 = vpop.f32.mrb[22].mxu1 }
 0x598   :  { %v2489_v19 = vadd.f32 %v2413_v33, %v2273_v35  ;;  %v2415_v20 = vpop.f32.mrb[23].mxu0  ;;  %v8884_v21 = vpop.f32.mrb[23].mxu1  ;;  %v2516_v38 = vrot.slane %v2484_v18, %v10839_v37  ;;  %v2678_v35 = vld [vmem:[%s11335_s30 + $0x128] sm:$0x3] }
 0x59a   :  { %v8298_v22 = vmul.f32 -1.442695, %v2489_v19  ;;  %v11371_v40 = vsel %vm11240_vm2, %v2516_v38, %v11237_v63  ;;  %v2643_v63 = vld [vmem:[%s11335_s30 + $0x10] sm:$0xff] }
 0x59b   :  { %v10275_v23 = vpop.eup %10274  ;;  %v2625_v5 = vsel %vm11374_vm5, %v11371_v40, 0.0  ;;  %v9556_v51 = vpack.c.bf16 %v2650_v0, %v2643_v63  ;;  %v2647_v38 = vld [vmem:[%s11335_s30 + $0x30] sm:$0xff] }
 0x59c   :  { %v2496_v6 = vadd.f32 1.0, %v10275_v23  ;;  %10276 = vpow2.f32 %v8298_v22  ;;  %v2626_v9 = vsel %vm97_vm1, %v2625_v5, 0.0  ;;  %v2634_v22 = vstv %s8303_s14  ;;  %v2660_v5 = vld [vmem:[%s11335_s30 + $0x98] sm:$0xff]  ;;  %v2659_v0 = vld [vmem:[%s11335_s30 + $0x90] sm:$0xff]  ;;  %s8435_s14 = sld [smem:[#allocation5 + $0xc]] }
 0x59d   :  { %v2627_v61 = vrot.slane %v2626_v9, 4  ;;  %v9583_v63 = vpack.c.bf16 %v2654_v39, %v2647_v38  ;;  %v3148_v39 = vld [vmem:[%s11469_s17 + $0x28] sm:$0xff] }
 0x59e   :  { %10278 = vrcp.f32 %v2496_v6 }
 0x59f   :  { %v2628_v55 = vadd.f32 %v2627_v61, %v2626_v9  ;;  %v2667_v9 = vld [vmem:[%s11335_s30 + $0xd0] sm:$0xff] }
 0x5a0   :  { %v9572_v61 = vpack.c.bf16 %v2667_v9, %v2660_v5  ;;  %v3155_v5 = vld [vmem:[%s11469_s17 + $0x60] sm:$0xff] }
 0x5a1   :  { %v2629_v44 = vrot.slane %v2628_v55, 2  ;;  %v9630_v9 = vpack.c.bf16 %v3155_v5, %v3148_v39  ;;  %v3166_v39 = vld [vmem:[%s11469_s17 + $0xb8] sm:$0xff] }
 0x5a3   :  { %v2630_v27 = vadd.f32 %v2629_v44, %v2628_v55  ;;  %v2680_v55 = vld [vmem:[%s11335_s30 + $0x138] sm:$0x3] }
 0x5a6   :  { %v10277_v24 = vpop.eup %10276 }
 0x5a7   :  { %v2497_v3 = vadd.f32 1.0, %v10277_v24 }
 0x5a8   :  { %v10279_v25 = vpop.eup %10278 }
 0x5a9   :  { %v2502_v26 = vmul.f32 %v10279_v25, %v2415_v20  ;;  %v2631_v20 = vrot.slane %v2630_v27, 1  ;;  %v2635_v25 = vmul.f32 %v10723_v59, %v2634_v22  ;;  %v3164_v22 = vld [vmem:[%s11469_s17 + $0xa8] sm:$0xff] }
 0x5ab   :  { %v2503_v28 = vadd.f32 %v2502_v26, %v2342_v32  ;;  %v2671_v32 = vld [vmem:[%s11335_s30 + $0xf0] sm:$0xff]  ;;  %v2632_v6 = vadd.f32 %v2631_v20, %v2630_v27  ;;  %v2645_v26 = vld [vmem:[%s11335_s30 + $0x20] sm:$0xff] }
 0x5ac   :  { %v9565_v18 = vpack.c.bf16 %v2678_v35, %v2671_v32  ;;  %v3151_v32 = vld [vmem:[%s11469_s17 + $0x40] sm:$0xff]  ;;  %v3146_v35 = vld [vmem:[%s11469_s17 + $0x18] sm:$0xff] }
 0x5ad   :  { %10280 = vtanh.f32 %v2503_v28  ;;  %v2652_v28 = vld [vmem:[%s11335_s30 + $0x58] sm:$0xff] }
 0x5ae   :  { %10282 = vrcp.f32 %v2497_v3 }
 0x5b7   :  { %v10281_v42 = vpop.eup %10280 }
 0x5b8   :  { %v2505_v47 = vsub.f32 %v11282_v34, %v10281_v42  ;;  %v10283_v58 = vpop.eup %10282 }
 0x5ba   :  { %v2506_v13 = vmul.f32 %v10283_v58, %v2505_v47  ;;  %v9570_v47 = vpack.c.bf16 %v2652_v28, %v2645_v26  ;;  %v3178_v28 = vld [vmem:[%s11469_s17 + $0x118] sm:$0x3] }
 0x5bc   :  { %v2507_v4 = vadd.f32 %v10281_v42, %v2506_v13  ;;  %v2668_v13 = vld [vmem:[%s11335_s30 + $0xd8] sm:$0xff] }
 0x5be   :  { %v2511_v34 = vrot.slane %v2507_v4, %v10839_v37  ;;  %8898 = vmatmul.mubr.msk.f32.vlgmr.msra.gmra.mrb[24].mxu0 %vm167_vm8, %v2507_v4  ;;  %v9574_v4 = vpack.c.bf16 %v2666_v48, %v2659_v0 }
 0x5bf   :  { %9557 = vmatpush1.bf16.msra.mxu0 %v9556_v51  ;;  %2842 = vmatprep.mubr.f32.mxu0 %v10575_v1  ;;  %v2681_v51 = vld [vmem:[%s11335_s30 + $0x140] sm:$0x3]  ;;  %s8359_s30 = sld [smem:[#allocation5 + $0x8]] }
 0x5c0   :  { %v11403_v14 = vsel %vm11261_vm3, %v2511_v34, %v11269_v29  ;;  %9559 = vmatprep.subr.bf16.mxu0 %v9558_v10  ;;  %v9586_v10 = vpack.c.bf16 %v2668_v13, %v2661_v11  ;;  %v9576_v53 = vpack.c.bf16 %v2681_v51, %v2674_v50  ;;  %v9579_v34 = vpack.c.bf16 %v2680_v55, %v2673_v52 }
 0x5c1   :  { %v2613_v45 = vsel %vm11395_vm6, %v11403_v14, 0.0 }
 0x5c2   :  { %v2614_v31 = vsel %vm97_vm1, %v2613_v45, 0.0  ;;  %v3153_v45 = vld [vmem:[%s11469_s17 + $0x50] sm:$0xff] }
 0x5c3   :  { %v2615_v33 = vrot.slane %v2614_v31, 4  ;;  %9561 = vmatpush1.bf16.msra.mxu0 %v9560_v12  ;;  %v9589_v12 = vpack.c.bf16 %v2682_v57, %v2675_v56 }
 0x5c4   :  { %9564 = vmatprep.subr.msk.bf16.mxu0 %vm10672_vm4, %v9562_v15  ;;  %v3144_v15 = vld [vmem:[%s11469_s17 + $0x8] sm:$0xff] }
 0x5c5   :  { %v2616_v29 = vadd.f32 %v2615_v33, %v2614_v31  ;;  %v9602_v44 = vpack.c.bf16 %v3151_v32, %v3144_v15  ;;  %v3143_v31 = vld [vmem:[%s11469_s17] sm:$0xff]  ;;  %v3150_v33 = vld [vmem:[%s11469_s17 + $0x38] sm:$0xff] }
 0x5c6   :  { %v9604_v27 = vpack.c.bf16 %v3150_v33, %v3143_v31  ;;  %v3654_v33 = vld [vmem:[%s11598_s22 + $0x48] sm:$0xff] }
 0x5c7   :  { %9567 = vmatpush1.bf16.msk.msra.mxu0 %vm10672_vm4, %v9565_v18  ;;  %v2617_v19 = vrot.slane %v2616_v29, 2  ;;  %v9616_v18 = vpack.c.bf16 %v3153_v45, %v3146_v35  ;;  %v3123_v45 = vstv %s8321_s18 }
 0x5c8   :  { %9582 = vmatprep.subr.bf16.mxu0 %v10577_v16  ;;  %vm11503_vm7 = vcmp.eq.s32.totalorder %v10650_v2, %v3123_v45  ;;  %v3149_v45 = vld [vmem:[%s11469_s17 + $0x30] sm:$0xff] }
 0x5c9   :  { %v2618_v21 = vadd.f32 %v2617_v19, %v2616_v29  ;;  %v3158_v29 = vld [vmem:[%s11469_s17 + $0x78] sm:$0xff]  ;;  %v3165_v19 = vld [vmem:[%s11469_s17 + $0xb0] sm:$0xff] }
 0x5ca   :  { %v9606_v20 = vpack.c.bf16 %v3165_v19, %v3158_v29 }
 0x5cb   :  { %v2619_v23 = vrot.slane %v2618_v21, 1 }
 0x5cd   :  { %v11416_v24 = vadd.f32 %v2619_v23, %v2618_v21  ;;  %v3157_v21 = vld [vmem:[%s11469_s17 + $0x70] sm:$0xff] }
 0x5ce   :  { %v9608_v23 = vpack.c.bf16 %v3164_v22, %v3157_v21  ;;  %v3160_v22 = vld [vmem:[%s11469_s17 + $0x88] sm:$0xff] }
 0x5cf   :  { %v2633_v3 = vadd.f32 %v2632_v6, %v11416_v24  ;;  %v3172_v6 = vld [vmem:[%s11469_s17 + $0xe8] sm:$0xff] }
 0x5d1   :  { %v2636_v42 = vadd.f32 %v2635_v25, %v2633_v3  ;;  %v3179_v25 = vld [vmem:[%s11469_s17 + $0x120] sm:$0x3] }
 0x5d2   :  { %v9610_v26 = vpack.c.bf16 %v3179_v25, %v3172_v6  ;;  %v3171_v3 = vld [vmem:[%s11469_s17 + $0xe0] sm:$0xff]  ;;  %v3111_v25 = vstv %s11463_s3  ;;  %s8436_s3 = sld [smem:[#allocation7 + $0xc]] }
 0x5d3   :  { %v2637_v58 = vadd.f32 %v10744_v17, %v2636_v42  ;;  %v9613_v38 = vpack.c.bf16 %v3178_v28, %v3171_v3  ;;  %vm11524_vm10 = vcmp.eq.s32.totalorder %v10650_v2, %v3111_v25  ;;  %v3170_v25 = vld [vmem:[%s11469_s17 + $0xd8] sm:$0xff] }
 0x5d5   :  { %8307 = vmatmul.mubr.msk.f32.vlgmr.msra.gmra.mrb[24].mxu1 %vm167_vm8, %v2637_v58  ;;  %8310 = vmatmul.mubr.msk.f32.vlgmr.msra.gmra.mrb[26].mxu0 %vm167_vm8, %v2637_v58 }
 0x5d6   :  { %9571 = vmatpush1.bf16.msra.mxu1 %v9570_v47  ;;  %9584 = vmatpush3.bf16.msra.mxu0 %v9583_v63 }
 0x5d7   :  { %9573 = vmatprep.subr.bf16.mxu1 %v9572_v61  ;;  %9585 = vmatprep.subr.bf16.mxu0 %v10577_v16 }
 0x5d8   :  { %2913 = vmatprep.mubr.f32.mxu1 %v10575_v1  ;;  %8912 = vmatprep.mubr.msk.f32.mxu0 %vm10578_vm9, %v10575_v1 }
 0x5da   :  { %9575 = vmatpush1.bf16.msra.mxu1 %v9574_v4  ;;  %9587 = vmatpush3.bf16.msra.mxu0 %v9586_v10 }
 0x5db   :  { %9578 = vmatprep.subr.msk.bf16.mxu1 %vm10672_vm4, %v9576_v53  ;;  %9588 = vmatprep.subr.bf16.mxu0 %v10577_v16 }
 0x5de   :  { %9581 = vmatpush1.bf16.msk.msra.mxu1 %vm10672_vm4, %v9579_v34  ;;  %9591 = vmatpush3.bf16.msk.msra.mxu0 %vm10672_vm4, %v9589_v12 }
 0x5df   :  { %9592 = vmatprep.subr.bf16.mxu1 %v10577_v16  ;;  %9603 = vmatprep.subr.bf16.mxu0 %v9602_v44 }
 0x5e1   :  { %8313 = vmatmul.mubr.msk.f32.vlgmr.msra.gmra.mrb[26].mxu1 %vm167_vm8, %v2637_v58  ;;  %8913 = vmatmul.mubr.msk.f32.vlgmr.msra.gmra.mrb[28].mxu0 %vm167_vm8, %v2637_v58 }
 0x5e2   :  { %9594 = vmatpush3.bf16.msra.mxu1 %v10785_v43  ;;  %8927 = vmatprep.mubr.msk.f32.mxu1 %vm10578_vm9, %v10575_v1 }
 0x5e3   :  { %9595 = vmatprep.subr.bf16.mxu1 %v10577_v16  ;;  %3273 = vmatprep.mubr.f32.mxu0 %v10575_v1 }
 0x5e4   :  { %9605 = vmatpush1.bf16.msra.mxu0 %v9604_v27 }
 0x5e5   :  { %9607 = vmatprep.subr.bf16.mxu0 %v9606_v20 }
 0x5e6   :  { %9597 = vmatpush3.bf16.msra.mxu1 %v10795_v46 }
 0x5e7   :  { %9598 = vmatprep.subr.bf16.mxu1 %v10577_v16 }
 0x5e8   :  { %9609 = vmatpush1.bf16.msra.mxu0 %v9608_v23  ;;  %v3167_v23 = vld [vmem:[%s11469_s17 + $0xc0] sm:$0xff] }
 0x5e9   :  { %9612 = vmatprep.subr.msk.bf16.mxu0 %vm10672_vm4, %v9610_v26  ;;  %v9620_v28 = vpack.c.bf16 %v3167_v23, %v3160_v22  ;;  %v3168_v23 = vld [vmem:[%s11469_s17 + $0xc8] sm:$0xff] }
 0x5ea   :  { %9601 = vmatpush3.bf16.msk.msra.mxu1 %vm10672_vm4, %v10805_v49 }
 0x5eb   :  { %9617 = vmatprep.subr.bf16.mxu1 %v9616_v18 }
 0x5ec   :  { %9615 = vmatpush1.bf16.msk.msra.mxu0 %vm10672_vm4, %v9613_v38  ;;  %v3159_v38 = vld [vmem:[%s11469_s17 + $0x80] sm:$0xff] }
 0x5ed   :  { %9631 = vmatprep.subr.bf16.mxu0 %v9630_v9  ;;  %v3174_v9 = vld [vmem:[%s11469_s17 + $0xf8] sm:$0xff] }
 0x691   :  { %v2587_v42 = vpop.f32.mrb[24].mxu0 }
 0x692   :  { %v11492_v47 = vadd.f32 %v11360_v60, %v2587_v42  ;;  %v8899_v63 = vpop.f32.mrb[25].mxu0  ;;  %v3181_v42 = vld [vmem:[%s11469_s17 + $0x130] sm:$0x3] }
 0x694   :  { %v2591_v0 = vsel %vm582_vm12, %v11492_v47, -inf }
 0x695   :  { %2592 = vmax.xlane.f32.xlu0 %v2591_v0  ;;  %v9622_v0 = vpack.c.bf16 %v3166_v39, %v3159_v38  ;;  %v3175_v39 = vld [vmem:[%s11469_s17 + $0x100] sm:$0xff] }
 0x6a8   :  { %v2773_v58 = vpop.f32.mrb[24].mxu1  ;;  %v2844_v61 = vpop.f32.mrb[26].mxu0 }
 0x6a9   :  { %v2775_v48 = vpop.f32.mrb[25].mxu1  ;;  %v2846_v11 = vpop.f32.mrb[27].mxu0 }
 0x6aa   :  { %v2990_v13 = vadd.f32 %v2846_v11, %v2773_v58  ;;  %v3180_v11 = vld [vmem:[%s11469_s17 + $0x128] sm:$0x3] }
 0x6ac   :  { %v8316_v50 = vmul.f32 -1.442695, %v2990_v13 }
 0x6ae   :  { %10284 = vpow2.f32 %v8316_v50 }
 0x6b4   :  { %v2915_v51 = vpop.f32.mrb[26].mxu1  ;;  %v2986_v4 = vpop.f32.mrb[28].mxu0 }
 0x6b5   :  { %v2991_v10 = vadd.f32 %v2915_v51, %v2775_v48  ;;  %v2917_v52 = vpop.f32.mrb[27].mxu1  ;;  %v8914_v53 = vpop.f32.mrb[29].mxu0  ;;  %v3018_v44 = vrot.slane %v2986_v4, %v10839_v37  ;;  %v3173_v48 = vld [vmem:[%s11469_s17 + $0xf0] sm:$0xff] }
 0x6b7   :  { %v8317_v55 = vmul.f32 -1.442695, %v2991_v10  ;;  %v11500_v31 = vsel %vm11374_vm5, %v3018_v44, %v11371_v40  ;;  %v3145_v40 = vld [vmem:[%s11469_s17 + $0x10] sm:$0xff]  ;;  %v9627_v10 = vpack.c.bf16 %v3180_v11, %v3173_v48  ;;  %v3154_v44 = vld [vmem:[%s11469_s17 + $0x58] sm:$0xff]  ;;  %v3646_v48 = vld [vmem:[%s11598_s22 + $0x8] sm:$0xff] }
 0x6b8   :  { %v10285_v56 = vpop.eup %10284  ;;  %v3127_v18 = vsel %vm11503_vm7, %v11500_v31, 0.0  ;;  %v9618_v26 = vpack.c.bf16 %v3152_v41, %v3145_v40  ;;  %v3653_v11 = vld [vmem:[%s11598_s22 + $0x40] sm:$0xff] }
 0x6b9   :  { %v2998_v57 = vadd.f32 1.0, %v10285_v56  ;;  %10286 = vpow2.f32 %v8317_v55  ;;  %v3128_v27 = vsel %vm97_vm1, %v3127_v18, 0.0  ;;  %v3136_v56 = vstv %s8322_s19  ;;  %v3156_v18 = vld [vmem:[%s11469_s17 + $0x68] sm:$0xff]  ;;  %s8454_s19 = sld [smem:[#allocation5 + $0xd]] }
 0x6ba   :  { %v3129_v21 = vrot.slane %v3128_v27, 4  ;;  %v9645_v41 = vpack.c.bf16 %v3156_v18, %v3149_v45  ;;  %v3680_v45 = vld [vmem:[%s11598_s22 + $0x118] sm:$0x3] }
 0x6bb   :  { %10288 = vrcp.f32 %v2998_v57 }
 0x6bc   :  { %v3130_v5 = vadd.f32 %v3129_v21, %v3128_v27  ;;  %v3162_v27 = vld [vmem:[%s11469_s17 + $0x98] sm:$0xff] }
 0x6be   :  { %v3131_v13 = vrot.slane %v3130_v5, 2 }
 0x6c0   :  { %v3132_v54 = vadd.f32 %v3131_v13, %v3130_v5  ;;  %v3648_v13 = vld [vmem:[%s11598_s22 + $0x18] sm:$0xff] }
 0x6c2   :  { %v3133_v53 = vrot.slane %v3132_v54, 1 }
 0x6c3   :  { %v10287_v34 = vpop.eup %10286 }
 0x6c4   :  { %v2999_v32 = vadd.f32 1.0, %v10287_v34  ;;  %v3134_v34 = vadd.f32 %v3133_v53, %v3132_v54  ;;  %v3667_v53 = vld [vmem:[%s11598_s22 + $0xb0] sm:$0xff] }
 0x6c5   :  { %v10289_v12 = vpop.eup %10288 }
 0x6c6   :  { %v3004_v15 = vmul.f32 %v10289_v12, %v2917_v52 }
 0x6c8   :  { %v3005_v35 = vadd.f32 %v3004_v15, %v2844_v61  ;;  %v9624_v61 = vpack.c.bf16 %v3181_v42, %v3174_v9  ;;  %v3137_v15 = vmul.f32 %v10723_v59, %v3136_v56  ;;  %v3182_v9 = vld [vmem:[%s11469_s17 + $0x138] sm:$0x3]  ;;  %v3177_v42 = vld [vmem:[%s11469_s17 + $0x110] sm:$0xff] }
 0x6c9   :  { %v3659_v56 = vld [vmem:[%s11598_s22 + $0x70] sm:$0xff] }
 0x6ca   :  { %10290 = vtanh.f32 %v3005_v35 }
 0x6cb   :  { %10292 = vrcp.f32 %v2999_v32  ;;  %v3147_v32 = vld [vmem:[%s11469_s17 + $0x20] sm:$0xff] }
 0x6cc   :  { %v9632_v40 = vpack.c.bf16 %v3154_v44, %v3147_v32  ;;  %v3681_v32 = vld [vmem:[%s11598_s22 + $0x120] sm:$0x3] }
 0x6cd   :  { %v3673_v44 = vld [vmem:[%s11598_s22 + $0xe0] sm:$0xff] }
 0x6ce   :  { %v9675_v18 = vpack.c.bf16 %v3680_v45, %v3673_v44 }
 0x6d4   :  { %v10291_v29 = vpop.eup %10290 }
 0x6d5   :  { %v3007_v19 = vsub.f32 %v11416_v24, %v10291_v29  ;;  %v10293_v20 = vpop.eup %10292 }
 0x6d7   :  { %v3008_v6 = vmul.f32 %v10293_v20, %v3007_v19  ;;  %v3161_v20 = vld [vmem:[%s11469_s17 + $0x90] sm:$0xff] }
 0x6d9   :  { %v3009_v3 = vadd.f32 %v10291_v29, %v3008_v6  ;;  %v3169_v29 = vld [vmem:[%s11469_s17 + $0xd0] sm:$0xff]  ;;  %v3163_v6 = vld [vmem:[%s11469_s17 + $0xa0] sm:$0xff] }
 0x6da   :  { %v9634_v22 = vpack.c.bf16 %v3169_v29, %v3162_v27  ;;  %v9648_v38 = vpack.c.bf16 %v3170_v25, %v3163_v6  ;;  %v3650_v27 = vld [vmem:[%s11598_s22 + $0x28] sm:$0xff]  ;;  %v3657_v29 = vld [vmem:[%s11598_s22 + $0x60] sm:$0xff] }
 0x6db   :  { %v3013_v24 = vrot.slane %v3009_v3, %v10839_v37  ;;  %8928 = vmatmul.mubr.msk.f32.vlgmr.msra.gmra.mrb[28].mxu1 %vm167_vm8, %v3009_v3  ;;  %v3183_v3 = vld [vmem:[%s11469_s17 + $0x140] sm:$0x3] }
 0x6dc   :  { %9619 = vmatpush1.bf16.msra.mxu1 %v9618_v26  ;;  %3344 = vmatprep.mubr.f32.mxu1 %v10575_v1  ;;  %v3176_v26 = vld [vmem:[%s11469_s17 + $0x108] sm:$0xff] }
 0x6dd   :  { %v11532_v58 = vsel %vm11395_vm6, %v3013_v24, %v11403_v14  ;;  %9621 = vmatprep.subr.bf16.mxu1 %v9620_v28  ;;  %v9636_v28 = vpack.c.bf16 %v3168_v23, %v3161_v20  ;;  %v9638_v5 = vpack.c.bf16 %v3183_v3, %v3176_v26  ;;  %v3184_v24 = vld [vmem:[%s11469_s17 + $0x148] sm:$0x3]  ;;  %s11984_s17 = sld [smem:[#allocation2 + $0xa]] }
 0x6de   :  { %v3115_v50 = vsel %vm11524_vm10, %v11532_v58, 0.0 }
 0x6df   :  { %v3116_v51 = vsel %vm97_vm1, %v3115_v50, 0.0  ;;  %v9664_v50 = vpack.c.bf16 %v3653_v11, %v3646_v48 }
 0x6e0   :  { %v3117_v4 = vrot.slane %v3116_v51, 4  ;;  %9623 = vmatpush1.bf16.msra.mxu1 %v9622_v0  ;;  %v9641_v0 = vpack.c.bf16 %v3182_v9, %v3175_v39 }
 0x6e1   :  { %9626 = vmatprep.subr.msk.bf16.mxu1 %vm10672_vm4, %v9624_v61  ;;  %v9651_v61 = vpack.c.bf16 %v3184_v24, %v3177_v42 }
 0x6e2   :  { %v3118_v14 = vadd.f32 %v3117_v4, %v3116_v51  ;;  %v3655_v51 = vld [vmem:[%s11598_s22 + $0x50] sm:$0xff]  ;;  %v3645_v4 = vld [vmem:[%s11598_s22] sm:$0xff] }
 0x6e3   :  { %v9678_v54 = vpack.c.bf16 %v3655_v51, %v3648_v13  ;;  %v3625_v51 = vstv %s8340_s23  ;;  %s8520_s18 = smul.u32 336, %s11984_s17 }
 0x6e4   :  { %9629 = vmatpush1.bf16.msk.msra.mxu1 %vm10672_vm4, %v9627_v10  ;;  %v3119_v52 = vrot.slane %v3118_v14, 2  ;;  %v3652_v10 = vld [vmem:[%s11598_s22 + $0x38] sm:$0xff]  ;;  %vm11632_vm11 = vcmp.eq.s32.totalorder %v10650_v2, %v3625_v51  ;;  %v3651_v51 = vld [vmem:[%s11598_s22 + $0x30] sm:$0xff] }
 0x6e5   :  { %9644 = vmatprep.subr.bf16.mxu1 %v10577_v16  ;;  %s11990_s21 = scalar_lea.vmem %s12925_s5, %s8520_s18 }
 0x6e6   :  { %v3120_v55 = vadd.f32 %v3119_v52, %v3118_v14  ;;  %v9666_v14 = vpack.c.bf16 %v3652_v10, %v3645_v4  ;;  %v3660_v52 = vld [vmem:[%s11598_s22 + $0x78] sm:$0xff]  ;;  %v4156_v10 = vld [vmem:[%s11727_s6 + $0x48] sm:$0xff] }
 0x6e8   :  { %v3121_v57 = vrot.slane %v3120_v55, 1 }
 0x6ea   :  { %v11545_v12 = vadd.f32 %v3121_v57, %v3120_v55  ;;  %v9668_v55 = vpack.c.bf16 %v3667_v53, %v3660_v52  ;;  %v3666_v57 = vld [vmem:[%s11598_s22 + $0xa8] sm:$0xff] }
 0x6ec   :  { %v3135_v35 = vadd.f32 %v3134_v34, %v11545_v12  ;;  %v9670_v34 = vpack.c.bf16 %v3666_v57, %v3659_v56  ;;  %v3662_v57 = vld [vmem:[%s11598_s22 + $0x88] sm:$0xff] }
 0x6ee   :  { %v3138_v19 = vadd.f32 %v3137_v15, %v3135_v35  ;;  %v3674_v15 = vld [vmem:[%s11598_s22 + $0xe8] sm:$0xff] }
 0x6ef   :  { %v9672_v35 = vpack.c.bf16 %v3681_v32, %v3674_v15  ;;  %v3613_v32 = vstv %s11592_s20  ;;  %s8455_s20 = sld [smem:[#allocation7 + $0xd]] }
 0x6f0   :  { %v3139_v21 = vadd.f32 %v10744_v17, %v3138_v19  ;;  %v9692_v19 = vpack.c.bf16 %v3657_v29, %v3650_v27  ;;  %v3668_v27 = vld [vmem:[%s11598_s22 + $0xb8] sm:$0xff]  ;;  %vm11653_vm13 = vcmp.eq.s32.totalorder %v10650_v2, %v3613_v32 }
 0x6f1   :  { %v3672_v32 = vld [vmem:[%s11598_s22 + $0xd8] sm:$0xff] }
 0x6f2   :  { %8326 = vmatmul.mubr.msk.f32.vlgmr.msra.gmra.mrb[30].mxu0 %vm167_vm8, %v3139_v21  ;;  %8329 = vmatmul.mubr.msk.f32.vlgmr.msra.gmra.mrb[30].mxu1 %vm167_vm8, %v3139_v21 }
 0x6f3   :  { %9633 = vmatpush1.bf16.msra.mxu0 %v9632_v40  ;;  %9646 = vmatpush3.bf16.msra.mxu1 %v9645_v41 }
 0x6f4   :  { %9635 = vmatprep.subr.bf16.mxu0 %v9634_v22  ;;  %9647 = vmatprep.subr.bf16.mxu1 %v10577_v16 }
 0x6f5   :  { %3415 = vmatprep.mubr.f32.mxu0 %v10575_v1  ;;  %8942 = vmatprep.mubr.msk.f32.mxu1 %vm10578_vm9, %v10575_v1 }
 0x6f7   :  { %9637 = vmatpush1.bf16.msra.mxu0 %v9636_v28  ;;  %9649 = vmatpush3.bf16.msra.mxu1 %v9648_v38 }
 0x6f8   :  { %9640 = vmatprep.subr.msk.bf16.mxu0 %vm10672_vm4, %v9638_v5  ;;  %9650 = vmatprep.subr.bf16.mxu1 %v10577_v16 }
 0x6fb   :  { %9643 = vmatpush1.bf16.msk.msra.mxu0 %vm10672_vm4, %v9641_v0  ;;  %9653 = vmatpush3.bf16.msk.msra.mxu1 %vm10672_vm4, %v9651_v61 }
 0x6fc   :  { %9654 = vmatprep.subr.bf16.mxu0 %v10577_v16  ;;  %9665 = vmatprep.subr.bf16.mxu1 %v9664_v50 }
 0x6fe   :  { %8332 = vmatmul.mubr.msk.f32.vlgmr.msra.gmra.mrb[32].mxu0 %vm167_vm8, %v3139_v21  ;;  %8943 = vmatmul.mubr.msk.f32.vlgmr.msra.gmra.mrb[32].mxu1 %vm167_vm8, %v3139_v21 }
 0x6ff   :  { %9656 = vmatpush3.bf16.msra.mxu0 %v10785_v43  ;;  %8957 = vmatprep.mubr.msk.f32.mxu0 %vm10578_vm9, %v10575_v1 }
 0x700   :  { %9657 = vmatprep.subr.bf16.mxu0 %v10577_v16  ;;  %3775 = vmatprep.mubr.f32.mxu1 %v10575_v1 }
 0x701   :  { %9667 = vmatpush1.bf16.msra.mxu1 %v9666_v14 }
 0x702   :  { %9669 = vmatprep.subr.bf16.mxu1 %v9668_v55 }
 0x703   :  { %9659 = vmatpush3.bf16.msra.mxu0 %v10795_v46 }
 0x704   :  { %9660 = vmatprep.subr.bf16.mxu0 %v10577_v16 }
 0x705   :  { %9671 = vmatpush1.bf16.msra.mxu1 %v9670_v34  ;;  %v3669_v34 = vld [vmem:[%s11598_s22 + $0xc0] sm:$0xff] }
 0x706   :  { %9674 = vmatprep.subr.msk.bf16.mxu1 %vm10672_vm4, %v9672_v35  ;;  %v9682_v45 = vpack.c.bf16 %v3669_v34, %v3662_v57  ;;  %v3670_v34 = vld [vmem:[%s11598_s22 + $0xc8] sm:$0xff] }
 0x707   :  { %9663 = vmatpush3.bf16.msk.msra.mxu0 %vm10672_vm4, %v10805_v49 }
 0x708   :  { %9679 = vmatprep.subr.bf16.mxu0 %v9678_v54 }
 0x709   :  { %9677 = vmatpush1.bf16.msk.msra.mxu1 %vm10672_vm4, %v9675_v18  ;;  %v3661_v18 = vld [vmem:[%s11598_s22 + $0x80] sm:$0xff] }
 0x70a   :  { %9693 = vmatprep.subr.bf16.mxu1 %v9692_v19  ;;  %v3676_v19 = vld [vmem:[%s11598_s22 + $0xf8] sm:$0xff] }
 0x7ae   :  { %v3089_v40 = vpop.f32.mrb[28].mxu1 }
 0x7af   :  { %v11621_v41 = vadd.f32 %v11360_v60, %v3089_v40  ;;  %v8929_v20 = vpop.f32.mrb[29].mxu1  ;;  %v3683_v40 = vld [vmem:[%s11598_s22 + $0x130] sm:$0x3] }
 0x7b1   :  { %v3093_v21 = vsel %vm582_vm12, %v11621_v41, -inf }
 0x7b2   :  { %3094 = vmax.xlane.f32.xlu1 %v3093_v21  ;;  %v9684_v21 = vpack.c.bf16 %v3668_v27, %v3661_v18  ;;  %v3677_v27 = vld [vmem:[%s11598_s22 + $0x100] sm:$0xff] }
 0x7c5   :  { %v3275_v22 = vpop.f32.mrb[30].mxu0  ;;  %v3346_v23 = vpop.f32.mrb[30].mxu1 }
 0x7c6   :  { %v3277_v6 = vpop.f32.mrb[31].mxu0  ;;  %v3348_v25 = vpop.f32.mrb[31].mxu1 }
 0x7c7   :  { %v3492_v26 = vadd.f32 %v3348_v25, %v3275_v22  ;;  %v3682_v25 = vld [vmem:[%s11598_s22 + $0x128] sm:$0x3] }
 0x7c9   :  { %v8335_v3 = vmul.f32 -1.442695, %v3492_v26 }
 0x7cb   :  { %10294 = vpow2.f32 %v8335_v3 }
 0x7d1   :  { %v3417_v28 = vpop.f32.mrb[32].mxu0  ;;  %v3488_v38 = vpop.f32.mrb[32].mxu1 }
 0x7d2   :  { %v3493_v39 = vadd.f32 %v3417_v28, %v3277_v6  ;;  %v3419_v5 = vpop.f32.mrb[33].mxu0  ;;  %v8944_v9 = vpop.f32.mrb[33].mxu1  ;;  %v3520_v50 = vrot.slane %v3488_v38, %v10839_v37  ;;  %v3675_v6 = vld [vmem:[%s11598_s22 + $0xf0] sm:$0xff] }
 0x7d4   :  { %v8336_v42 = vmul.f32 -1.442695, %v3493_v39  ;;  %v11629_v4 = vsel %vm11503_vm7, %v3520_v50, %v11500_v31  ;;  %v3647_v31 = vld [vmem:[%s11598_s22 + $0x10] sm:$0xff]  ;;  %v9689_v39 = vpack.c.bf16 %v3682_v25, %v3675_v6  ;;  %v3656_v50 = vld [vmem:[%s11598_s22 + $0x58] sm:$0xff]  ;;  %v4148_v6 = vld [vmem:[%s11727_s6 + $0x8] sm:$0xff] }
 0x7d5   :  { %v10295_v60 = vpop.eup %10294  ;;  %v3629_v54 = vsel %vm11632_vm11, %v11629_v4, 0.0  ;;  %v9680_v35 = vpack.c.bf16 %v3654_v33, %v3647_v31  ;;  %v4155_v25 = vld [vmem:[%s11727_s6 + $0x40] sm:$0xff] }
 0x7d6   :  { %v3500_v24 = vadd.f32 1.0, %v10295_v60  ;;  %10296 = vpow2.f32 %v8336_v42  ;;  %v3630_v14 = vsel %vm97_vm1, %v3629_v54, 0.0  ;;  %v3638_v60 = vstv %s8341_s24  ;;  %v3658_v54 = vld [vmem:[%s11598_s22 + $0x68] sm:$0xff] }
 0x7d7   :  { %v3631_v56 = vrot.slane %v3630_v14, 4  ;;  %v9707_v33 = vpack.c.bf16 %v3658_v54, %v3651_v51  ;;  %v4182_v51 = vld [vmem:[%s11727_s6 + $0x118] sm:$0x3] }
 0x7d8   :  { %10298 = vrcp.f32 %v3500_v24 }
 0x7d9   :  { %v3632_v29 = vadd.f32 %v3631_v56, %v3630_v14  ;;  %v3664_v14 = vld [vmem:[%s11598_s22 + $0x98] sm:$0xff] }
 0x7db   :  { %v3633_v26 = vrot.slane %v3632_v29, 2 }
 0x7dd   :  { %v3634_v63 = vadd.f32 %v3633_v26, %v3632_v29  ;;  %v4150_v26 = vld [vmem:[%s11727_s6 + $0x18] sm:$0xff] }
 0x7df   :  { %v3635_v9 = vrot.slane %v3634_v63, 1 }
 0x7e0   :  { %v10297_v0 = vpop.eup %10296 }
 0x7e1   :  { %v3501_v11 = vadd.f32 1.0, %v10297_v0  ;;  %v3636_v0 = vadd.f32 %v3635_v9, %v3634_v63  ;;  %v4169_v9 = vld [vmem:[%s11727_s6 + $0xb0] sm:$0xff] }
 0x7e2   :  { %v10299_v61 = vpop.eup %10298 }
 0x7e3   :  { %v3506_v48 = vmul.f32 %v10299_v61, %v3419_v5 }
 0x7e5   :  { %v3507_v13 = vadd.f32 %v3506_v48, %v3346_v23  ;;  %v9686_v23 = vpack.c.bf16 %v3683_v40, %v3676_v19  ;;  %v3639_v48 = vmul.f32 %v10723_v59, %v3638_v60  ;;  %v3684_v19 = vld [vmem:[%s11598_s22 + $0x138] sm:$0x3]  ;;  %v3679_v40 = vld [vmem:[%s11598_s22 + $0x110] sm:$0xff] }
 0x7e6   :  { %v4161_v60 = vld [vmem:[%s11727_s6 + $0x70] sm:$0xff] }
 0x7e7   :  { %10300 = vtanh.f32 %v3507_v13 }
 0x7e8   :  { %10302 = vrcp.f32 %v3501_v11  ;;  %v3649_v11 = vld [vmem:[%s11598_s22 + $0x20] sm:$0xff] }
 0x7e9   :  { %v9694_v31 = vpack.c.bf16 %v3656_v50, %v3649_v11  ;;  %v4183_v11 = vld [vmem:[%s11727_s6 + $0x120] sm:$0x3] }
 0x7ea   :  { %v4175_v50 = vld [vmem:[%s11727_s6 + $0xe0] sm:$0xff] }
 0x7eb   :  { %v9737_v54 = vpack.c.bf16 %v4182_v51, %v4175_v50  ;;  %v4115_v50 = vstv %s11721_s25 }
 0x7ec   :  { %vm11787_vm15 = vcmp.eq.s32.totalorder %v10650_v2, %v4115_v50  ;;  %v4172_v50 = vld [vmem:[%s11727_s6 + $0xc8] sm:$0xff] }
 0x7f1   :  { %v10301_v52 = vpop.eup %10300 }
 0x7f2   :  { %v3509_v53 = vsub.f32 %v11545_v12, %v10301_v52  ;;  %v10303_v55 = vpop.eup %10302 }
 0x7f4   :  { %v3510_v15 = vmul.f32 %v10303_v55, %v3509_v53  ;;  %v3663_v55 = vld [vmem:[%s11598_s22 + $0x90] sm:$0xff] }
 0x7f6   :  { %v3511_v44 = vadd.f32 %v10301_v52, %v3510_v15  ;;  %v3671_v52 = vld [vmem:[%s11598_s22 + $0xd0] sm:$0xff]  ;;  %v3665_v15 = vld [vmem:[%s11598_s22 + $0xa0] sm:$0xff] }
 0x7f7   :  { %v9696_v57 = vpack.c.bf16 %v3671_v52, %v3664_v14  ;;  %v9710_v18 = vpack.c.bf16 %v3672_v32, %v3665_v15  ;;  %v4152_v14 = vld [vmem:[%s11727_s6 + $0x28] sm:$0xff]  ;;  %v4159_v52 = vld [vmem:[%s11727_s6 + $0x60] sm:$0xff] }
 0x7f8   :  { %v3515_v12 = vrot.slane %v3511_v44, %v10839_v37  ;;  %8958 = vmatmul.mubr.msk.f32.vlgmr.msra.gmra.mrb[34].mxu0 %vm167_vm8, %v3511_v44  ;;  %v3685_v44 = vld [vmem:[%s11598_s22 + $0x140] sm:$0x3] }
 0x7f9   :  { %9681 = vmatpush1.bf16.msra.mxu0 %v9680_v35  ;;  %3846 = vmatprep.mubr.f32.mxu0 %v10575_v1  ;;  %v3678_v35 = vld [vmem:[%s11598_s22 + $0x108] sm:$0xff] }
 0x7fa   :  { %v11661_v22 = vsel %vm11524_vm10, %v3515_v12, %v11532_v58  ;;  %9683 = vmatprep.subr.bf16.mxu0 %v9682_v45  ;;  %v9698_v45 = vpack.c.bf16 %v3670_v34, %v3663_v55  ;;  %v9700_v29 = vpack.c.bf16 %v3685_v44, %v3678_v35  ;;  %v3686_v12 = vld [vmem:[%s11598_s22 + $0x148] sm:$0x3]  ;;  %s12113_s22 = sld [smem:[#allocation2 + $0xb]] }
 0x7fb   :  { %v3617_v3 = vsel %vm11653_vm13, %v11661_v22, 0.0 }
 0x7fc   :  { %v3618_v28 = vsel %vm97_vm1, %v3617_v3, 0.0  ;;  %v9726_v3 = vpack.c.bf16 %v4155_v25, %v4148_v6 }
 0x7fd   :  { %v3619_v38 = vrot.slane %v3618_v28, 4  ;;  %9685 = vmatpush1.bf16.msra.mxu0 %v9684_v21  ;;  %v9703_v21 = vpack.c.bf16 %v3684_v19, %v3677_v27 }
 0x7fe   :  { %9688 = vmatprep.subr.msk.bf16.mxu0 %vm10672_vm4, %v9686_v23  ;;  %v9713_v23 = vpack.c.bf16 %v3686_v12, %v3679_v40 }
 0x7ff   :  { %v3620_v58 = vadd.f32 %v3619_v38, %v3618_v28  ;;  %v4157_v28 = vld [vmem:[%s11727_s6 + $0x50] sm:$0xff]  ;;  %v4147_v38 = vld [vmem:[%s11727_s6] sm:$0xff] }
 0x800   :  { %v9740_v63 = vpack.c.bf16 %v4157_v28, %v4150_v26  ;;  %s8521_s23 = smul.u32 336, %s12113_s22 }
 0x801   :  { %9691 = vmatpush1.bf16.msk.msra.mxu0 %vm10672_vm4, %v9689_v39  ;;  %v3621_v5 = vrot.slane %v3620_v58, 2  ;;  %v4154_v39 = vld [vmem:[%s11727_s6 + $0x38] sm:$0xff] }
 0x802   :  { %9706 = vmatprep.subr.bf16.mxu0 %v10577_v16  ;;  %s12119_s26 = scalar_lea.vmem %s12925_s5, %s8521_s23 }
 0x803   :  { %v3622_v42 = vadd.f32 %v3621_v5, %v3620_v58  ;;  %v9728_v58 = vpack.c.bf16 %v4154_v39, %v4147_v38  ;;  %v4162_v5 = vld [vmem:[%s11727_s6 + $0x78] sm:$0xff]  ;;  %v4127_v39 = vstv %s8359_s30  ;;  %s8522_s30 = smul.u32 336, %s12247_s29 }
 0x804   :  { %vm11766_vm14 = vcmp.eq.s32.totalorder %v10650_v2, %v4127_v39 }
 0x805   :  { %v3623_v24 = vrot.slane %v3622_v42, 1  ;;  %s12253_s13 = scalar_lea.vmem %s12925_s5, %s8522_s30  ;;  %s8493_s30 = sld [smem:[#allocation7 + $0xf]] }
 0x807   :  { %v11674_v61 = vadd.f32 %v3623_v24, %v3622_v42  ;;  %v9730_v42 = vpack.c.bf16 %v4169_v9, %v4162_v5  ;;  %v4168_v24 = vld [vmem:[%s11727_s6 + $0xa8] sm:$0xff] }
 0x809   :  { %v3637_v13 = vadd.f32 %v3636_v0, %v11674_v61  ;;  %v9732_v0 = vpack.c.bf16 %v4168_v24, %v4161_v60 }
 0x80b   :  { %v3640_v53 = vadd.f32 %v3639_v48, %v3637_v13  ;;  %v4176_v48 = vld [vmem:[%s11727_s6 + $0xe8] sm:$0xff] }
 0x80c   :  { %v9734_v13 = vpack.c.bf16 %v4183_v11, %v4176_v48  ;;  %v4164_v48 = vld [vmem:[%s11727_s6 + $0x88] sm:$0xff]  ;;  %v4171_v11 = vld [vmem:[%s11727_s6 + $0xc0] sm:$0xff] }
 0x80d   :  { %v3641_v56 = vadd.f32 %v10744_v17, %v3640_v53  ;;  %v9754_v53 = vpack.c.bf16 %v4159_v52, %v4152_v14  ;;  %v9744_v14 = vpack.c.bf16 %v4171_v11, %v4164_v48  ;;  %v4163_v52 = vld [vmem:[%s11727_s6 + $0x80] sm:$0xff]  ;;  %v4165_v48 = vld [vmem:[%s11727_s6 + $0x90] sm:$0xff] }
 0x80f   :  { %8345 = vmatmul.mubr.msk.f32.vlgmr.msra.gmra.mrb[34].mxu1 %vm167_vm8, %v3641_v56  ;;  %8348 = vmatmul.mubr.msk.f32.vlgmr.msra.gmra.mrb[36].mxu0 %vm167_vm8, %v3641_v56 }
 0x810   :  { %9695 = vmatpush1.bf16.msra.mxu1 %v9694_v31  ;;  %9708 = vmatpush3.bf16.msra.mxu0 %v9707_v33  ;;  %v11752_v33 = vld [vmem:[%s12927_s7] sm:$0x1] }
 0x811   :  { %9697 = vmatprep.subr.bf16.mxu1 %v9696_v57  ;;  %9709 = vmatprep.subr.bf16.mxu0 %v10577_v16 }
 0x812   :  { %3917 = vmatprep.mubr.f32.mxu1 %v10575_v1  ;;  %8972 = vmatprep.mubr.msk.f32.mxu0 %vm10578_vm9, %v10575_v1 }
 0x814   :  { %9699 = vmatpush1.bf16.msra.mxu1 %v9698_v45  ;;  %9711 = vmatpush3.bf16.msra.mxu0 %v9710_v18 }
 0x815   :  { %9702 = vmatprep.subr.msk.bf16.mxu1 %vm10672_vm4, %v9700_v29  ;;  %9712 = vmatprep.subr.bf16.mxu0 %v10577_v16 }
 0x818   :  { %9705 = vmatpush1.bf16.msk.msra.mxu1 %vm10672_vm4, %v9703_v21  ;;  %9715 = vmatpush3.bf16.msk.msra.mxu0 %vm10672_vm4, %v9713_v23 }
 0x819   :  { %9716 = vmatprep.subr.bf16.mxu1 %v10577_v16  ;;  %9727 = vmatprep.subr.bf16.mxu0 %v9726_v3 }
 0x81b   :  { %8351 = vmatmul.mubr.msk.f32.vlgmr.msra.gmra.mrb[36].mxu1 %vm167_vm8, %v3641_v56  ;;  %8973 = vmatmul.mubr.msk.f32.vlgmr.msra.gmra.mrb[38].mxu0 %vm167_vm8, %v3641_v56 }
 0x81c   :  { %9718 = vmatpush3.bf16.msra.mxu1 %v10785_v43  ;;  %8987 = vmatprep.mubr.msk.f32.mxu1 %vm10578_vm9, %v10575_v1 }
 0x81d   :  { %9719 = vmatprep.subr.bf16.mxu1 %v10577_v16  ;;  %4277 = vmatprep.mubr.f32.mxu0 %v10575_v1 }
 0x81e   :  { %9729 = vmatpush1.bf16.msra.mxu0 %v9728_v58  ;;  %v4658_v58 = vld [vmem:[%s11861_s4 + $0x48] sm:$0xff] }
 0x81f   :  { %9731 = vmatprep.subr.bf16.mxu0 %v9730_v42 }
 0x820   :  { %9721 = vmatpush3.bf16.msra.mxu1 %v10795_v46 }
 0x821   :  { %9722 = vmatprep.subr.bf16.mxu1 %v10577_v16 }
 0x822   :  { %9733 = vmatpush1.bf16.msra.mxu0 %v9732_v0 }
 0x823   :  { %9736 = vmatprep.subr.msk.bf16.mxu0 %vm10672_vm4, %v9734_v13 }
 0x824   :  { %9725 = vmatpush3.bf16.msk.msra.mxu1 %vm10672_vm4, %v10805_v49 }
 0x825   :  { %9741 = vmatprep.subr.bf16.mxu1 %v9740_v63 }
 0x826   :  { %9739 = vmatpush1.bf16.msk.msra.mxu0 %vm10672_vm4, %v9737_v54 }
 0x827   :  { %9755 = vmatprep.subr.bf16.mxu0 %v9754_v53  ;;  %v4170_v53 = vld [vmem:[%s11727_s6 + $0xb8] sm:$0xff] }
 0x8cb   :  { %v3591_v31 = vpop.f32.mrb[34].mxu0 }
 0x8cc   :  { %v11755_v55 = vadd.f32 %v11752_v33, %v3591_v31  ;;  %v8959_v56 = vpop.f32.mrb[35].mxu0 }
 0x8cd   :  { %v4178_v56 = vld [vmem:[%s11727_s6 + $0xf8] sm:$0xff] }
 0x8ce   :  { %v3595_v57 = vsel %vm582_vm12, %v11755_v55, -inf }
 0x8cf   :  { %3596 = vmax.xlane.f32.xlu0 %v3595_v57  ;;  %v4185_v57 = vld [vmem:[%s11727_s6 + $0x130] sm:$0x3] }
 0x8e2   :  { %v3777_v34 = vpop.f32.mrb[34].mxu1  ;;  %v3848_v15 = vpop.f32.mrb[36].mxu0 }
 0x8e3   :  { %v3779_v32 = vpop.f32.mrb[35].mxu1  ;;  %v3850_v35 = vpop.f32.mrb[37].mxu0 }
 0x8e4   :  { %v3994_v44 = vadd.f32 %v3850_v35, %v3777_v34  ;;  %v9748_v35 = vpack.c.bf16 %v4185_v57, %v4178_v56  ;;  %v4179_v56 = vld [vmem:[%s11727_s6 + $0x100] sm:$0xff] }
 0x8e6   :  { %v8354_v45 = vmul.f32 -1.442695, %v3994_v44  ;;  %v4177_v44 = vld [vmem:[%s11727_s6 + $0xf0] sm:$0xff] }
 0x8e8   :  { %10304 = vpow2.f32 %v8354_v45  ;;  %v4184_v45 = vld [vmem:[%s11727_s6 + $0x128] sm:$0x3] }
 0x8ee   :  { %v3919_v18 = vpop.f32.mrb[36].mxu1  ;;  %v3990_v27 = vpop.f32.mrb[38].mxu0 }
 0x8ef   :  { %v3995_v29 = vadd.f32 %v3919_v18, %v3779_v32  ;;  %v3921_v19 = vpop.f32.mrb[37].mxu1  ;;  %v8974_v40 = vpop.f32.mrb[39].mxu0  ;;  %v4022_v38 = vrot.slane %v3990_v27, %v10839_v37 }
 0x8f0   :  { %v9751_v40 = vpack.c.bf16 %v4184_v45, %v4177_v44 }
 0x8f1   :  { %v8355_v12 = vmul.f32 -1.442695, %v3995_v29  ;;  %v11763_v63 = vsel %vm11632_vm11, %v4022_v38, %v11629_v4  ;;  %v4149_v4 = vld [vmem:[%s11727_s6 + $0x10] sm:$0xff]  ;;  %v4151_v38 = vld [vmem:[%s11727_s6 + $0x20] sm:$0xff] }
 0x8f2   :  { %v10305_v21 = vpop.eup %10304  ;;  %v4131_v5 = vsel %vm11766_vm14, %v11763_v63, 0.0  ;;  %v9742_v51 = vpack.c.bf16 %v4156_v10, %v4149_v4  ;;  %v4173_v4 = vld [vmem:[%s11727_s6 + $0xd0] sm:$0xff] }
 0x8f3   :  { %v4002_v23 = vadd.f32 1.0, %v10305_v21  ;;  %10306 = vpow2.f32 %v8355_v12  ;;  %v4132_v9 = vsel %vm97_vm1, %v4131_v5, 0.0  ;;  %v4158_v5 = vld [vmem:[%s11727_s6 + $0x58] sm:$0xff] }
 0x8f4   :  { %v4133_v0 = vrot.slane %v4132_v9, 4 }
 0x8f5   :  { %10308 = vrcp.f32 %v4002_v23 }
 0x8f6   :  { %v4134_v31 = vadd.f32 %v4133_v0, %v4132_v9  ;;  %v4153_v9 = vld [vmem:[%s11727_s6 + $0x30] sm:$0xff] }
 0x8f8   :  { %v4135_v18 = vrot.slane %v4134_v31, 2 }
 0x8fa   :  { %v4136_v20 = vadd.f32 %v4135_v18, %v4134_v31  ;;  %v4650_v18 = vld [vmem:[%s11861_s4 + $0x8] sm:$0xff] }
 0x8fc   :  { %v4137_v21 = vrot.slane %v4136_v20, 1 }
 0x8fd   :  { %v10307_v6 = vpop.eup %10306 }
 0x8fe   :  { %v4003_v3 = vadd.f32 1.0, %v10307_v6  ;;  %v4140_v6 = vstv %s8360_s11  ;;  %s10579_s11 = smov [#allocation9]  }
 0x8ff   :  { %v10309_v25 = vpop.eup %10308 }
 0x900   :  { %v4008_v26 = vmul.f32 %v10309_v25, %v3921_v19 }
 0x902   :  { %v4009_v28 = vadd.f32 %v4008_v26, %v3848_v15  ;;  %v9746_v15 = vpack.c.bf16 %v4170_v53, %v4163_v52  ;;  %v4138_v26 = vadd.f32 %v4137_v21, %v4136_v20  ;;  %v4187_v52 = vld [vmem:[%s11727_s6 + $0x140] sm:$0x3]  ;;  %v9760_v53 = vpack.c.bf16 %v4172_v50, %v4165_v48 }
 0x903   :  { %v4649_v20 = vld [vmem:[%s11861_s4] sm:$0xff] }
 0x904   :  { %10310 = vtanh.f32 %v4009_v28  ;;  %v4141_v28 = vmul.f32 %v10723_v59, %v4140_v6  ;;  %v4671_v6 = vld [vmem:[%s11861_s4 + $0xb0] sm:$0xff] }
 0x905   :  { %10312 = vrcp.f32 %v4003_v3 }
 0x90e   :  { %v10311_v42 = vpop.eup %10310 }
 0x90f   :  { %v4011_v60 = vsub.f32 %v11674_v61, %v10311_v42  ;;  %v10313_v24 = vpop.eup %10312 }
 0x911   :  { %v4012_v13 = vmul.f32 %v10313_v24, %v4011_v60  ;;  %v4166_v60 = vld [vmem:[%s11727_s6 + $0x98] sm:$0xff]  ;;  %v9756_v24 = vpack.c.bf16 %v4158_v5, %v4151_v38  ;;  %v4685_v5 = vld [vmem:[%s11861_s4 + $0x120] sm:$0x3] }
 0x913   :  { %v4013_v54 = vadd.f32 %v10311_v42, %v4012_v13  ;;  %v4160_v42 = vld [vmem:[%s11727_s6 + $0x68] sm:$0xff]  ;;  %v9758_v13 = vpack.c.bf16 %v4173_v4, %v4166_v60  ;;  %v4684_v60 = vld [vmem:[%s11861_s4 + $0x118] sm:$0x3] }
 0x914   :  { %v9769_v0 = vpack.c.bf16 %v4160_v42, %v4153_v9  ;;  %v4677_v42 = vld [vmem:[%s11861_s4 + $0xe0] sm:$0xff] }
 0x915   :  { %v4017_v61 = vrot.slane %v4013_v54, %v10839_v37  ;;  %8988 = vmatmul.mubr.msk.f32.vlgmr.msra.gmra.mrb[38].mxu1 %vm167_vm8, %v4013_v54  ;;  %v4174_v54 = vld [vmem:[%s11727_s6 + $0xd8] sm:$0xff]  ;;  %v9799_v4 = vpack.c.bf16 %v4684_v60, %v4677_v42  ;;  %v4617_v60 = vstv %s11855_s12  ;;  %s8148_s12 = sshll.u32 %s10579_s11, 4  ;;  %s8149_s12 = int_to_ptr.vmem [resolvable:$true] %s8148_s12 }
 0x916   :  { %9743 = vmatpush1.bf16.msra.mxu1 %v9742_v51  ;;  %4348 = vmatprep.mubr.f32.mxu1 %v10575_v1  ;;  %v4167_v51 = vld [vmem:[%s11727_s6 + $0xa0] sm:$0xff]  ;;  %vm11916_vm2 = vcmp.eq.s32.totalorder %v10650_v2, %v4617_v60  ;;  %p10503_p2 = scmp.lt.s32.totalorder %s8149_s12, %s8149_s12 }
 0x917   :  { %v11795_v32 = vsel %vm11653_vm13, %v4017_v61, %v11661_v22  ;;  %9745 = vmatprep.subr.bf16.mxu1 %v9744_v14  ;;  %v4180_v14 = vld [vmem:[%s11727_s6 + $0x108] sm:$0xff]  ;;  %v9772_v31 = vpack.c.bf16 %v4174_v54, %v4167_v51  ;;  %v4186_v61 = vld [vmem:[%s11727_s6 + $0x138] sm:$0x3] }
 0x918   :  { %v4119_v27 = vsel %vm11787_vm15, %v11795_v32, 0.0  ;;  %v9762_v57 = vpack.c.bf16 %v4187_v52, %v4180_v14  ;;  %v9765_v44 = vpack.c.bf16 %v4186_v61, %v4179_v56 }
 0x919   :  { %v4120_v29 = vsel %vm97_vm1, %v4119_v27, 0.0  ;;  %v4657_v27 = vld [vmem:[%s11861_s4 + $0x40] sm:$0xff] }
 0x91a   :  { %v4121_v19 = vrot.slane %v4120_v29, 4  ;;  %9747 = vmatpush1.bf16.msra.mxu1 %v9746_v15  ;;  %v4181_v15 = vld [vmem:[%s11727_s6 + $0x110] sm:$0xff] }
 0x91b   :  { %9750 = vmatprep.subr.msk.bf16.mxu1 %vm10672_vm4, %v9748_v35  ;;  %v4188_v35 = vld [vmem:[%s11727_s6 + $0x148] sm:$0x3]  ;;  %s8416_s6 = sld [smem:[#allocation5 + $0xb]] }
 0x91c   :  { %v4122_v22 = vadd.f32 %v4121_v19, %v4120_v29  ;;  %v9775_v45 = vpack.c.bf16 %v4188_v35, %v4181_v15  ;;  %v4652_v29 = vld [vmem:[%s11861_s4 + $0x18] sm:$0xff]  ;;  %v9788_v19 = vpack.c.bf16 %v4657_v27, %v4650_v18 }
 0x91e   :  { %9753 = vmatpush1.bf16.msk.msra.mxu1 %vm10672_vm4, %v9751_v40  ;;  %v4123_v12 = vrot.slane %v4122_v22, 2  ;;  %v4659_v40 = vld [vmem:[%s11861_s4 + $0x50] sm:$0xff] }
 0x91f   :  { %9768 = vmatprep.subr.bf16.mxu1 %v10577_v16 }
 0x920   :  { %v4124_v23 = vadd.f32 %v4123_v12, %v4122_v22  ;;  %v4656_v22 = vld [vmem:[%s11861_s4 + $0x38] sm:$0xff]  ;;  %v9802_v12 = vpack.c.bf16 %v4659_v40, %v4652_v29 }
 0x921   :  { %v9790_v21 = vpack.c.bf16 %v4656_v22, %v4649_v20 }
 0x922   :  { %v4125_v25 = vrot.slane %v4124_v23, 1 }
 0x924   :  { %v11808_v3 = vadd.f32 %v4125_v25, %v4124_v23  ;;  %v4664_v23 = vld [vmem:[%s11861_s4 + $0x78] sm:$0xff] }
 0x925   :  { %v9792_v25 = vpack.c.bf16 %v4671_v6, %v4664_v23  ;;  %v5160_v23 = vld [vmem:[%s11990_s21 + $0x48] sm:$0xff] }
 0x926   :  { %v4139_v39 = vadd.f32 %v4138_v26, %v11808_v3  ;;  %v4663_v26 = vld [vmem:[%s11861_s4 + $0x70] sm:$0xff] }
 0x928   :  { %v4142_v10 = vadd.f32 %v4141_v28, %v4139_v39  ;;  %v4670_v28 = vld [vmem:[%s11861_s4 + $0xa8] sm:$0xff] }
 0x929   :  { %v9794_v38 = vpack.c.bf16 %v4670_v28, %v4663_v26  ;;  %v4678_v39 = vld [vmem:[%s11861_s4 + $0xe8] sm:$0xff] }
 0x92a   :  { %v4143_v11 = vadd.f32 %v10744_v17, %v4142_v10  ;;  %v9796_v9 = vpack.c.bf16 %v4685_v5, %v4678_v39  ;;  %v4654_v10 = vld [vmem:[%s11861_s4 + $0x28] sm:$0xff] }
 0x92b   :  { %v4666_v5 = vld [vmem:[%s11861_s4 + $0x88] sm:$0xff] }
 0x92c   :  { %8364 = vmatmul.mubr.msk.f32.vlgmr.msra.gmra.mrb[40].mxu0 %vm167_vm8, %v4143_v11  ;;  %8367 = vmatmul.mubr.msk.f32.vlgmr.msra.gmra.mrb[40].mxu1 %vm167_vm8, %v4143_v11 }
 0x92d   :  { %9757 = vmatpush1.bf16.msra.mxu0 %v9756_v24  ;;  %9770 = vmatpush3.bf16.msra.mxu1 %v9769_v0  ;;  %v4661_v24 = vld [vmem:[%s11861_s4 + $0x60] sm:$0xff] }
 0x92e   :  { %9759 = vmatprep.subr.bf16.mxu0 %v9758_v13  ;;  %9771 = vmatprep.subr.bf16.mxu1 %v10577_v16  ;;  %v9816_v0 = vpack.c.bf16 %v4661_v24, %v4654_v10 }
 0x92f   :  { %4419 = vmatprep.mubr.f32.mxu0 %v10575_v1  ;;  %9002 = vmatprep.mubr.msk.f32.mxu1 %vm10578_vm9, %v10575_v1 }
 0x931   :  { %9761 = vmatpush1.bf16.msra.mxu0 %v9760_v53  ;;  %9773 = vmatpush3.bf16.msra.mxu1 %v9772_v31 }
 0x932   :  { %9764 = vmatprep.subr.msk.bf16.mxu0 %vm10672_vm4, %v9762_v57  ;;  %9774 = vmatprep.subr.bf16.mxu1 %v10577_v16 }
 0x935   :  { %9767 = vmatpush1.bf16.msk.msra.mxu0 %vm10672_vm4, %v9765_v44  ;;  %9777 = vmatpush3.bf16.msk.msra.mxu1 %vm10672_vm4, %v9775_v45 }
 0x936   :  { %9778 = vmatprep.subr.bf16.mxu0 %v10577_v16  ;;  %9789 = vmatprep.subr.bf16.mxu1 %v9788_v19 }
 0x938   :  { %8370 = vmatmul.mubr.msk.f32.vlgmr.msra.gmra.mrb[42].mxu0 %vm167_vm8, %v4143_v11  ;;  %9003 = vmatmul.mubr.msk.f32.vlgmr.msra.gmra.mrb[42].mxu1 %vm167_vm8, %v4143_v11 }
 0x939   :  { %9780 = vmatpush3.bf16.msra.mxu0 %v10785_v43  ;;  %9017 = vmatprep.mubr.msk.f32.mxu0 %vm10578_vm9, %v10575_v1 }
 0x93a   :  { %9781 = vmatprep.subr.bf16.mxu0 %v10577_v16  ;;  %4779 = vmatprep.mubr.f32.mxu1 %v10575_v1 }
 0x93b   :  { %9791 = vmatpush1.bf16.msra.mxu1 %v9790_v21 }
 0x93c   :  { %9793 = vmatprep.subr.bf16.mxu1 %v9792_v25 }
 0x93d   :  { %9783 = vmatpush3.bf16.msra.mxu0 %v10795_v46 }
 0x93e   :  { %9784 = vmatprep.subr.bf16.mxu0 %v10577_v16 }
 0x93f   :  { %9795 = vmatpush1.bf16.msra.mxu1 %v9794_v38 }
 0x940   :  { %9798 = vmatprep.subr.msk.bf16.mxu1 %vm10672_vm4, %v9796_v9  ;;  %v4673_v9 = vld [vmem:[%s11861_s4 + $0xc0] sm:$0xff] }
 0x941   :  { %9787 = vmatpush3.bf16.msk.msra.mxu0 %vm10672_vm4, %v10805_v49  ;;  %v9806_v24 = vpack.c.bf16 %v4673_v9, %v4666_v5  ;;  %v4667_v9 = vld [vmem:[%s11861_s4 + $0x90] sm:$0xff] }
 0x942   :  { %9803 = vmatprep.subr.bf16.mxu0 %v9802_v12  ;;  %v4629_v12 = vstv %s8378_s15 }
 0x943   :  { %9801 = vmatpush1.bf16.msk.msra.mxu1 %vm10672_vm4, %v9799_v4  ;;  %vm11895_vm0 = vcmp.eq.s32.totalorder %v10650_v2, %v4629_v12  ;;  %v4653_v12 = vld [vmem:[%s11861_s4 + $0x20] sm:$0xff] }
 0x944   :  { %9817 = vmatprep.subr.bf16.mxu1 %v9816_v0  ;;  %v4665_v0 = vld [vmem:[%s11861_s4 + $0x80] sm:$0xff] }
 0x9e8   :  { %v4093_v48 = vpop.f32.mrb[38].mxu1 }
 0x9e9   :  { %v11884_v11 = vadd.f32 %v11752_v33, %v4093_v48  ;;  %v8989_v13 = vpop.f32.mrb[39].mxu1  ;;  %v4672_v48 = vld [vmem:[%s11861_s4 + $0xb8] sm:$0xff] }
 0x9eb   :  { %v4097_v50 = vsel %vm582_vm12, %v11884_v11, -inf }
 0x9ec   :  { %4098 = vmax.xlane.f32.xlu1 %v4097_v50  ;;  %v4680_v50 = vld [vmem:[%s11861_s4 + $0xf8] sm:$0xff] }
 0x9ff   :  { %v4279_v51 = vpop.f32.mrb[40].mxu0  ;;  %v4350_v54 = vpop.f32.mrb[40].mxu1 }
 0xa00   :  { %v4281_v14 = vpop.f32.mrb[41].mxu0  ;;  %v4352_v52 = vpop.f32.mrb[41].mxu1 }
 0xa01   :  { %v4496_v53 = vadd.f32 %v4352_v52, %v4279_v51  ;;  %v4687_v51 = vld [vmem:[%s11861_s4 + $0x130] sm:$0x3] }
 0xa03   :  { %v8373_v31 = vmul.f32 -1.442695, %v4496_v53  ;;  %v9810_v53 = vpack.c.bf16 %v4687_v51, %v4680_v50  ;;  %v4681_v51 = vld [vmem:[%s11861_s4 + $0x100] sm:$0xff] }
 0xa05   :  { %10314 = vpow2.f32 %v8373_v31  ;;  %v4679_v31 = vld [vmem:[%s11861_s4 + $0xf0] sm:$0xff] }
 0xa0b   :  { %v4421_v56 = vpop.f32.mrb[42].mxu0  ;;  %v4492_v57 = vpop.f32.mrb[42].mxu1 }
 0xa0c   :  { %v4497_v61 = vadd.f32 %v4421_v56, %v4281_v14  ;;  %v4423_v15 = vpop.f32.mrb[43].mxu0  ;;  %v9004_v35 = vpop.f32.mrb[43].mxu1  ;;  %v4524_v22 = vrot.slane %v4492_v57, %v10839_v37  ;;  %v9808_v14 = vpack.c.bf16 %v4672_v48, %v4665_v0  ;;  %v4686_v56 = vld [vmem:[%s11861_s4 + $0x128] sm:$0x3]  ;;  %v4689_v48 = vld [vmem:[%s11861_s4 + $0x140] sm:$0x3] }
 0xa0d   :  { %v4682_v0 = vld [vmem:[%s11861_s4 + $0x108] sm:$0xff] }
 0xa0e   :  { %v8374_v44 = vmul.f32 -1.442695, %v4497_v61  ;;  %v11892_v21 = vsel %vm11766_vm14, %v4524_v22, %v11763_v63  ;;  %v4651_v63 = vld [vmem:[%s11861_s4 + $0x10] sm:$0xff] }
 0xa0f   :  { %v10315_v45 = vpop.eup %10314  ;;  %v4633_v6 = vsel %vm11895_vm0, %v11892_v21, 0.0  ;;  %v9804_v4 = vpack.c.bf16 %v4658_v58, %v4651_v63  ;;  %v4668_v63 = vld [vmem:[%s11861_s4 + $0x98] sm:$0xff]  ;;  %v4675_v58 = vld [vmem:[%s11861_s4 + $0xd0] sm:$0xff] }
 0xa10   :  { %v4504_v18 = vadd.f32 1.0, %v10315_v45  ;;  %10316 = vpow2.f32 %v8374_v44  ;;  %v4634_v25 = vsel %vm97_vm1, %v4633_v6, 0.0  ;;  %v9813_v44 = vpack.c.bf16 %v4686_v56, %v4679_v31  ;;  %v4690_v31 = vld [vmem:[%s11861_s4 + $0x148] sm:$0x3] }
 0xa11   :  { %v4635_v39 = vrot.slane %v4634_v25, 4  ;;  %v9820_v60 = vpack.c.bf16 %v4675_v58, %v4668_v63  ;;  %v5179_v63 = vld [vmem:[%s11990_s21 + $0xe0] sm:$0xff]  ;;  %v5186_v58 = vld [vmem:[%s11990_s21 + $0x118] sm:$0x3] }
 0xa12   :  { %10318 = vrcp.f32 %v4504_v18 }
 0xa13   :  { %v4636_v13 = vadd.f32 %v4635_v39, %v4634_v25  ;;  %v4660_v25 = vld [vmem:[%s11861_s4 + $0x58] sm:$0xff] }
 0xa14   :  { %v9818_v39 = vpack.c.bf16 %v4660_v25, %v4653_v12  ;;  %v5172_v12 = vld [vmem:[%s11990_s21 + $0xa8] sm:$0xff] }
 0xa15   :  { %v4637_v57 = vrot.slane %v4636_v13, 2  ;;  %v5180_v25 = vld [vmem:[%s11990_s21 + $0xe8] sm:$0xff] }
 0xa17   :  { %v4638_v34 = vadd.f32 %v4637_v57, %v4636_v13 }
 0xa19   :  { %v4639_v18 = vrot.slane %v4638_v34, 1 }
 0xa1a   :  { %v10317_v27 = vpop.eup %10316 }
 0xa1b   :  { %v4505_v40 = vadd.f32 1.0, %v10317_v27 }
 0xa1c   :  { %v10319_v29 = vpop.eup %10318 }
 0xa1d   :  { %v4510_v19 = vmul.f32 %v10319_v29, %v4423_v15  ;;  %v4642_v29 = vstv %s8379_s16 }
 0xa1e   :  { %v4643_v22 = vmul.f32 %v10723_v59, %v4642_v29  ;;  %v5166_v29 = vld [vmem:[%s11990_s21 + $0x78] sm:$0xff] }
 0xa1f   :  { %v4511_v20 = vadd.f32 %v4510_v19, %v4350_v54 }
 0xa21   :  { %10320 = vtanh.f32 %v4511_v20 }
 0xa22   :  { %10322 = vrcp.f32 %v4505_v40  ;;  %v4640_v40 = vadd.f32 %v4639_v18, %v4638_v34  ;;  %v5161_v34 = vld [vmem:[%s11990_s21 + $0x50] sm:$0xff] }
 0xa2b   :  { %v10321_v26 = vpop.eup %10320 }
 0xa2c   :  { %v4513_v28 = vsub.f32 %v11808_v3, %v10321_v26  ;;  %v10323_v38 = vpop.eup %10322 }
 0xa2e   :  { %v4514_v42 = vmul.f32 %v10323_v38, %v4513_v28  ;;  %v4662_v28 = vld [vmem:[%s11861_s4 + $0x68] sm:$0xff] }
 0xa30   :  { %v4515_v10 = vadd.f32 %v10321_v26, %v4514_v42  ;;  %v4655_v26 = vld [vmem:[%s11861_s4 + $0x30] sm:$0xff] }
 0xa31   :  { %v9831_v5 = vpack.c.bf16 %v4662_v28, %v4655_v26  ;;  %v5187_v26 = vld [vmem:[%s11990_s21 + $0x120] sm:$0x3] }
 0xa32   :  { %v4519_v3 = vrot.slane %v4515_v10, %v10839_v37  ;;  %9018 = vmatmul.mubr.msk.f32.vlgmr.msra.gmra.mrb[44].mxu0 %vm167_vm8, %v4515_v10  ;;  %v4669_v10 = vld [vmem:[%s11861_s4 + $0xa0] sm:$0xff]  ;;  %v9858_v28 = vpack.c.bf16 %v5187_v26, %v5180_v25  ;;  %v5168_v26 = vld [vmem:[%s11990_s21 + $0x88] sm:$0xff] }
 0xa33   :  { %9805 = vmatpush1.bf16.msra.mxu0 %v9804_v4  ;;  %4850 = vmatprep.mubr.f32.mxu0 %v10575_v1  ;;  %v4674_v4 = vld [vmem:[%s11861_s4 + $0xc8] sm:$0xff] }
 0xa34   :  { %v11924_v52 = vsel %vm11787_vm15, %v4519_v3, %v11795_v32  ;;  %9807 = vmatprep.subr.bf16.mxu0 %v9806_v24  ;;  %v4676_v24 = vld [vmem:[%s11861_s4 + $0xd8] sm:$0xff]  ;;  %v9822_v13 = vpack.c.bf16 %v4674_v4, %v4667_v9  ;;  %v9824_v3 = vpack.c.bf16 %v4689_v48, %v4682_v0 }
 0xa35   :  { %v4621_v61 = vsel %vm11916_vm2, %v11924_v52, 0.0  ;;  %v9834_v50 = vpack.c.bf16 %v4676_v24, %v4669_v10 }
 0xa36   :  { %v4622_v15 = vsel %vm97_vm1, %v4621_v61, 0.0  ;;  %v5152_v61 = vld [vmem:[%s11990_s21 + $0x8] sm:$0xff] }
 0xa37   :  { %v4623_v35 = vrot.slane %v4622_v15, 4  ;;  %9809 = vmatpush1.bf16.msra.mxu0 %v9808_v14  ;;  %v4688_v14 = vld [vmem:[%s11861_s4 + $0x138] sm:$0x3] }
 0xa38   :  { %9812 = vmatprep.subr.msk.bf16.mxu0 %vm10672_vm4, %v9810_v53  ;;  %v4683_v53 = vld [vmem:[%s11861_s4 + $0x110] sm:$0xff]  ;;  %v9827_v56 = vpack.c.bf16 %v4688_v14, %v4681_v51  ;;  %s12376_s4 = sld [smem:[#allocation2 + $0xd]] }
 0xa39   :  { %v4624_v32 = vadd.f32 %v4623_v35, %v4622_v15  ;;  %v9837_v57 = vpack.c.bf16 %v4690_v31, %v4683_v53  ;;  %v5159_v15 = vld [vmem:[%s11990_s21 + $0x40] sm:$0xff]  ;;  %v5154_v35 = vld [vmem:[%s11990_s21 + $0x18] sm:$0xff] }
 0xa3a   :  { %v9864_v18 = vpack.c.bf16 %v5161_v34, %v5154_v35 }
 0xa3b   :  { %9815 = vmatpush1.bf16.msk.msra.mxu0 %vm10672_vm4, %v9813_v44  ;;  %v4625_v45 = vrot.slane %v4624_v32, 2  ;;  %v9850_v44 = vpack.c.bf16 %v5159_v15, %v5152_v61 }
 0xa3c   :  { %9830 = vmatprep.subr.bf16.mxu0 %v10577_v16 }
 0xa3d   :  { %v4626_v27 = vadd.f32 %v4625_v45, %v4624_v32  ;;  %v5151_v32 = vld [vmem:[%s11990_s21] sm:$0xff]  ;;  %v5158_v45 = vld [vmem:[%s11990_s21 + $0x38] sm:$0xff] }
 0xa3e   :  { %s8523_s15 = smul.u32 336, %s12376_s4 }
 0xa3f   :  { %v4627_v19 = vrot.slane %v4626_v27, 1 }
 0xa40   :  { %s12382_s18 = scalar_lea.vmem %s12925_s5, %s8523_s15 }
 0xa41   :  { %v11937_v20 = vadd.f32 %v4627_v19, %v4626_v27  ;;  %v9852_v27 = vpack.c.bf16 %v5158_v45, %v5151_v32  ;;  %v5173_v19 = vld [vmem:[%s11990_s21 + $0xb0] sm:$0xff] }
 0xa43   :  { %v4641_v6 = vadd.f32 %v4640_v40, %v11937_v20  ;;  %v9854_v40 = vpack.c.bf16 %v5173_v19, %v5166_v29  ;;  %v5662_v29 = vld [vmem:[%s12119_s26 + $0x48] sm:$0xff] }
 0xa45   :  { %v4644_v38 = vadd.f32 %v4643_v22, %v4641_v6  ;;  %v5165_v22 = vld [vmem:[%s11990_s21 + $0x70] sm:$0xff] }
 0xa46   :  { %v9856_v6 = vpack.c.bf16 %v5172_v12, %v5165_v22 }
 0xa47   :  { %v4645_v42 = vadd.f32 %v10744_v17, %v4644_v38  ;;  %v9861_v38 = vpack.c.bf16 %v5186_v58, %v5179_v63  ;;  %v5119_v58 = vstv %s11984_s17 }
 0xa48   :  { %vm12045_vm5 = vcmp.eq.s32.totalorder %v10650_v2, %v5119_v58 }
 0xa49   :  { %8383 = vmatmul.mubr.msk.f32.vlgmr.msra.gmra.mrb[44].mxu1 %vm167_vm8, %v4645_v42  ;;  %8386 = vmatmul.mubr.msk.f32.vlgmr.msra.gmra.mrb[46].mxu0 %vm167_vm8, %v4645_v42 }
 0xa4a   :  { %9819 = vmatpush1.bf16.msra.mxu1 %v9818_v39  ;;  %9832 = vmatpush3.bf16.msra.mxu0 %v9831_v5  ;;  %v5156_v39 = vld [vmem:[%s11990_s21 + $0x28] sm:$0xff]  ;;  %v5163_v5 = vld [vmem:[%s11990_s21 + $0x60] sm:$0xff] }
 0xa4b   :  { %9821 = vmatprep.subr.bf16.mxu1 %v9820_v60  ;;  %9833 = vmatprep.subr.bf16.mxu0 %v10577_v16  ;;  %v9878_v9 = vpack.c.bf16 %v5163_v5, %v5156_v39 }
 0xa4c   :  { %4921 = vmatprep.mubr.f32.mxu1 %v10575_v1  ;;  %9032 = vmatprep.mubr.msk.f32.mxu0 %vm10578_vm9, %v10575_v1 }
 0xa4e   :  { %9823 = vmatpush1.bf16.msra.mxu1 %v9822_v13  ;;  %9835 = vmatpush3.bf16.msra.mxu0 %v9834_v50 }
 0xa4f   :  { %9826 = vmatprep.subr.msk.bf16.mxu1 %vm10672_vm4, %v9824_v3  ;;  %9836 = vmatprep.subr.bf16.mxu0 %v10577_v16 }
 0xa52   :  { %9829 = vmatpush1.bf16.msk.msra.mxu1 %vm10672_vm4, %v9827_v56  ;;  %9839 = vmatpush3.bf16.msk.msra.mxu0 %vm10672_vm4, %v9837_v57 }
 0xa53   :  { %9840 = vmatprep.subr.bf16.mxu1 %v10577_v16  ;;  %9851 = vmatprep.subr.bf16.mxu0 %v9850_v44 }
 0xa55   :  { %8389 = vmatmul.mubr.msk.f32.vlgmr.msra.gmra.mrb[46].mxu1 %vm167_vm8, %v4645_v42  ;;  %9033 = vmatmul.mubr.msk.f32.vlgmr.msra.gmra.mrb[48].mxu0 %vm167_vm8, %v4645_v42 }
 0xa56   :  { %9842 = vmatpush3.bf16.msra.mxu1 %v10785_v43  ;;  %9047 = vmatprep.mubr.msk.f32.mxu1 %vm10578_vm9, %v10575_v1 }
 0xa57   :  { %9843 = vmatprep.subr.bf16.mxu1 %v10577_v16  ;;  %5281 = vmatprep.mubr.f32.mxu0 %v10575_v1 }
 0xa58   :  { %9853 = vmatpush1.bf16.msra.mxu0 %v9852_v27 }
 0xa59   :  { %9855 = vmatprep.subr.bf16.mxu0 %v9854_v40 }
 0xa5a   :  { %9845 = vmatpush3.bf16.msra.mxu1 %v10795_v46 }
 0xa5b   :  { %9846 = vmatprep.subr.bf16.mxu1 %v10577_v16 }
 0xa5c   :  { %9857 = vmatpush1.bf16.msra.mxu0 %v9856_v6 }
 0xa5d   :  { %9860 = vmatprep.subr.msk.bf16.mxu0 %vm10672_vm4, %v9858_v28  ;;  %v5175_v28 = vld [vmem:[%s11990_s21 + $0xc0] sm:$0xff] }
 0xa5e   :  { %9849 = vmatpush3.bf16.msk.msra.mxu1 %vm10672_vm4, %v10805_v49  ;;  %v9868_v5 = vpack.c.bf16 %v5175_v28, %v5168_v26  ;;  %v5169_v28 = vld [vmem:[%s11990_s21 + $0x90] sm:$0xff] }
 0xa5f   :  { %9865 = vmatprep.subr.bf16.mxu1 %v9864_v18  ;;  %v5131_v18 = vstv %s8397_s1 }
 0xa60   :  { %9863 = vmatpush1.bf16.msk.msra.mxu0 %vm10672_vm4, %v9861_v38  ;;  %vm12024_vm3 = vcmp.eq.s32.totalorder %v10650_v2, %v5131_v18  ;;  %v5155_v18 = vld [vmem:[%s11990_s21 + $0x20] sm:$0xff] }
 0xa61   :  { %9879 = vmatprep.subr.bf16.mxu0 %v9878_v9  ;;  %v5167_v9 = vld [vmem:[%s11990_s21 + $0x80] sm:$0xff] }
 0xb05   :  { %v4595_v42 = vpop.f32.mrb[44].mxu0 }
 0xb06   :  { %v12013_v60 = vadd.f32 %v11752_v33, %v4595_v42  ;;  %v9019_v4 = vpop.f32.mrb[45].mxu0  ;;  %v5174_v42 = vld [vmem:[%s11990_s21 + $0xb8] sm:$0xff] }
 0xb08   :  { %v4599_v10 = vsel %vm582_vm12, %v12013_v60, -inf }
 0xb09   :  { %4600 = vmax.xlane.f32.xlu0 %v4599_v10  ;;  %v5182_v10 = vld [vmem:[%s11990_s21 + $0xf8] sm:$0xff] }
 0xb1c   :  { %v4781_v24 = vpop.f32.mrb[44].mxu1  ;;  %v4852_v0 = vpop.f32.mrb[46].mxu0 }
 0xb1d   :  { %v4783_v48 = vpop.f32.mrb[45].mxu1  ;;  %v4854_v13 = vpop.f32.mrb[47].mxu0 }
 0xb1e   :  { %v4998_v50 = vadd.f32 %v4854_v13, %v4781_v24  ;;  %v5189_v24 = vld [vmem:[%s11990_s21 + $0x130] sm:$0x3] }
 0xb20   :  { %v8392_v51 = vmul.f32 -1.442695, %v4998_v50  ;;  %v9872_v50 = vpack.c.bf16 %v5189_v24, %v5182_v10  ;;  %v5183_v24 = vld [vmem:[%s11990_s21 + $0x100] sm:$0xff] }
 0xb22   :  { %10324 = vpow2.f32 %v8392_v51  ;;  %v5181_v51 = vld [vmem:[%s11990_s21 + $0xf0] sm:$0xff] }
 0xb28   :  { %v4923_v3 = vpop.f32.mrb[46].mxu1  ;;  %v4994_v14 = vpop.f32.mrb[48].mxu0 }
 0xb29   :  { %v4999_v53 = vadd.f32 %v4923_v3, %v4783_v48  ;;  %v4925_v31 = vpop.f32.mrb[47].mxu1  ;;  %v9034_v56 = vpop.f32.mrb[49].mxu0  ;;  %v5026_v45 = vrot.slane %v4994_v14, %v10839_v37  ;;  %v9870_v48 = vpack.c.bf16 %v5174_v42, %v5167_v9  ;;  %v5188_v3 = vld [vmem:[%s11990_s21 + $0x128] sm:$0x3]  ;;  %v5191_v42 = vld [vmem:[%s11990_s21 + $0x140] sm:$0x3] }
 0xb2a   :  { %v5184_v9 = vld [vmem:[%s11990_s21 + $0x108] sm:$0xff] }
 0xb2b   :  { %v8393_v57 = vmul.f32 -1.442695, %v4999_v53  ;;  %v12021_v27 = vsel %vm11895_vm0, %v5026_v45, %v11892_v21  ;;  %v5153_v21 = vld [vmem:[%s11990_s21 + $0x10] sm:$0xff] }
 0xb2c   :  { %v10325_v33 = vpop.eup %10324  ;;  %v5135_v19 = vsel %vm12024_vm3, %v12021_v27, 0.0  ;;  %v9866_v38 = vpack.c.bf16 %v5160_v23, %v5153_v21  ;;  %v5170_v21 = vld [vmem:[%s11990_s21 + $0x98] sm:$0xff]  ;;  %v5177_v23 = vld [vmem:[%s11990_s21 + $0xd0] sm:$0xff] }
 0xb2d   :  { %v5006_v61 = vadd.f32 1.0, %v10325_v33  ;;  %10326 = vpow2.f32 %v8393_v57  ;;  %v5136_v40 = vsel %vm97_vm1, %v5135_v19, 0.0  ;;  %v9875_v57 = vpack.c.bf16 %v5188_v3, %v5181_v51  ;;  %v5192_v51 = vld [vmem:[%s11990_s21 + $0x148] sm:$0x3] }
 0xb2e   :  { %v5137_v25 = vrot.slane %v5136_v40, 4  ;;  %v9882_v58 = vpack.c.bf16 %v5177_v23, %v5170_v21  ;;  %v5681_v21 = vld [vmem:[%s12119_s26 + $0xe0] sm:$0xff]  ;;  %v5688_v23 = vld [vmem:[%s12119_s26 + $0x118] sm:$0x3] }
 0xb2f   :  { %10328 = vrcp.f32 %v5006_v61 }
 0xb30   :  { %v5138_v4 = vadd.f32 %v5137_v25, %v5136_v40  ;;  %v5162_v40 = vld [vmem:[%s11990_s21 + $0x58] sm:$0xff] }
 0xb31   :  { %v9880_v25 = vpack.c.bf16 %v5162_v40, %v5155_v18  ;;  %v5674_v18 = vld [vmem:[%s12119_s26 + $0xa8] sm:$0xff] }
 0xb32   :  { %v5139_v14 = vrot.slane %v5138_v4, 2  ;;  %v5682_v40 = vld [vmem:[%s12119_s26 + $0xe8] sm:$0xff] }
 0xb34   :  { %v5140_v54 = vadd.f32 %v5139_v14, %v5138_v4 }
 0xb36   :  { %v5141_v61 = vrot.slane %v5140_v54, 1 }
 0xb37   :  { %v10327_v15 = vpop.eup %10326 }
 0xb38   :  { %v5007_v34 = vadd.f32 1.0, %v10327_v15 }
 0xb39   :  { %v10329_v35 = vpop.eup %10328 }
 0xb3a   :  { %v5012_v44 = vmul.f32 %v10329_v35, %v4925_v31  ;;  %v5144_v35 = vstv %s8398_s0 }
 0xb3b   :  { %v5145_v45 = vmul.f32 %v10723_v59, %v5144_v35  ;;  %v5668_v35 = vld [vmem:[%s12119_s26 + $0x78] sm:$0xff] }
 0xb3c   :  { %v5013_v32 = vadd.f32 %v5012_v44, %v4852_v0 }
 0xb3e   :  { %10330 = vtanh.f32 %v5013_v32 }
 0xb3f   :  { %10332 = vrcp.f32 %v5007_v34  ;;  %v5142_v34 = vadd.f32 %v5141_v61, %v5140_v54  ;;  %v5663_v54 = vld [vmem:[%s12119_s26 + $0x50] sm:$0xff] }
 0xb48   :  { %v10331_v22 = vpop.eup %10330 }
 0xb49   :  { %v5015_v12 = vsub.f32 %v11937_v20, %v10331_v22  ;;  %v10333_v6 = vpop.eup %10332 }
 0xb4b   :  { %v5016_v63 = vmul.f32 %v10333_v6, %v5015_v12  ;;  %v5164_v12 = vld [vmem:[%s11990_s21 + $0x68] sm:$0xff] }
 0xb4d   :  { %v5017_v39 = vadd.f32 %v10331_v22, %v5016_v63  ;;  %v5157_v22 = vld [vmem:[%s11990_s21 + $0x30] sm:$0xff] }
 0xb4e   :  { %v9893_v26 = vpack.c.bf16 %v5164_v12, %v5157_v22  ;;  %v5689_v22 = vld [vmem:[%s12119_s26 + $0x120] sm:$0x3] }
 0xb4f   :  { %v5021_v20 = vrot.slane %v5017_v39, %v10839_v37  ;;  %9048 = vmatmul.mubr.msk.f32.vlgmr.msra.gmra.mrb[48].mxu1 %vm167_vm8, %v5017_v39  ;;  %v5171_v39 = vld [vmem:[%s11990_s21 + $0xa0] sm:$0xff]  ;;  %v9920_v12 = vpack.c.bf16 %v5689_v22, %v5682_v40 }
 0xb50   :  { %9867 = vmatpush1.bf16.msra.mxu1 %v9866_v38  ;;  %5352 = vmatprep.mubr.f32.mxu1 %v10575_v1  ;;  %v5176_v38 = vld [vmem:[%s11990_s21 + $0xc8] sm:$0xff] }
 0xb51   :  { %v12053_v13 = vsel %vm11916_vm2, %v5021_v20, %v11924_v52  ;;  %9869 = vmatprep.subr.bf16.mxu1 %v9868_v5  ;;  %v5178_v5 = vld [vmem:[%s11990_s21 + $0xd8] sm:$0xff]  ;;  %v9884_v4 = vpack.c.bf16 %v5176_v38, %v5169_v28  ;;  %v9886_v20 = vpack.c.bf16 %v5191_v42, %v5184_v9 }
 0xb52   :  { %v5123_v53 = vsel %vm12045_vm5, %v12053_v13, 0.0  ;;  %v9896_v10 = vpack.c.bf16 %v5178_v5, %v5171_v39 }
 0xb53   :  { %v5124_v31 = vsel %vm97_vm1, %v5123_v53, 0.0  ;;  %v5654_v53 = vld [vmem:[%s12119_s26 + $0x8] sm:$0xff] }
 0xb54   :  { %v5125_v56 = vrot.slane %v5124_v31, 4  ;;  %9871 = vmatpush1.bf16.msra.mxu1 %v9870_v48  ;;  %v5190_v48 = vld [vmem:[%s11990_s21 + $0x138] sm:$0x3] }
 0xb55   :  { %9874 = vmatprep.subr.msk.bf16.mxu1 %vm10672_vm4, %v9872_v50  ;;  %v5185_v50 = vld [vmem:[%s11990_s21 + $0x110] sm:$0xff]  ;;  %v9889_v3 = vpack.c.bf16 %v5190_v48, %v5183_v24  ;;  %s12505_s21 = sld [smem:[#allocation2 + $0xe]] }
 0xb56   :  { %v5126_v52 = vadd.f32 %v5125_v56, %v5124_v31  ;;  %v9899_v14 = vpack.c.bf16 %v5192_v51, %v5185_v50  ;;  %v5661_v31 = vld [vmem:[%s12119_s26 + $0x40] sm:$0xff]  ;;  %v5656_v56 = vld [vmem:[%s12119_s26 + $0x18] sm:$0xff] }
 0xb57   :  { %v9926_v61 = vpack.c.bf16 %v5663_v54, %v5656_v56 }
 0xb58   :  { %9877 = vmatpush1.bf16.msk.msra.mxu1 %vm10672_vm4, %v9875_v57  ;;  %v5127_v33 = vrot.slane %v5126_v52, 2  ;;  %v9912_v57 = vpack.c.bf16 %v5661_v31, %v5654_v53 }
 0xb59   :  { %9892 = vmatprep.subr.bf16.mxu1 %v10577_v16 }
 0xb5a   :  { %v5128_v15 = vadd.f32 %v5127_v33, %v5126_v52  ;;  %v5653_v52 = vld [vmem:[%s12119_s26] sm:$0xff]  ;;  %v5660_v33 = vld [vmem:[%s12119_s26 + $0x38] sm:$0xff] }
 0xb5b   :  { %s8524_s1 = smul.u32 336, %s12505_s21 }
 0xb5c   :  { %v5129_v44 = vrot.slane %v5128_v15, 1 }
 0xb5d   :  { %s12511_s23 = scalar_lea.vmem %s12925_s5, %s8524_s1 }
 0xb5e   :  { %v12066_v32 = vadd.f32 %v5129_v44, %v5128_v15  ;;  %v9914_v15 = vpack.c.bf16 %v5660_v33, %v5653_v52  ;;  %v5675_v44 = vld [vmem:[%s12119_s26 + $0xb0] sm:$0xff] }
 0xb60   :  { %v5143_v19 = vadd.f32 %v5142_v34, %v12066_v32  ;;  %v9916_v34 = vpack.c.bf16 %v5675_v44, %v5668_v35  ;;  %v5633_v35 = vstv %s8416_s6 }
 0xb61   :  { %vm12158_vm6 = vcmp.eq.s32.totalorder %v10650_v2, %v5633_v35 }
 0xb62   :  { %v5146_v6 = vadd.f32 %v5145_v45, %v5143_v19  ;;  %v5667_v45 = vld [vmem:[%s12119_s26 + $0x70] sm:$0xff] }
 0xb63   :  { %v9918_v19 = vpack.c.bf16 %v5674_v18, %v5667_v45 }
 0xb64   :  { %v5147_v63 = vadd.f32 %v10744_v17, %v5146_v6  ;;  %v9923_v6 = vpack.c.bf16 %v5688_v23, %v5681_v21  ;;  %v5670_v21 = vld [vmem:[%s12119_s26 + $0x88] sm:$0xff]  ;;  %v5677_v23 = vld [vmem:[%s12119_s26 + $0xc0] sm:$0xff] }
 0xb66   :  { %8402 = vmatmul.mubr.msk.f32.vlgmr.msra.gmra.mrb[50].mxu0 %vm167_vm8, %v5147_v63  ;;  %8405 = vmatmul.mubr.msk.f32.vlgmr.msra.gmra.mrb[50].mxu1 %vm167_vm8, %v5147_v63 }
 0xb67   :  { %9881 = vmatpush1.bf16.msra.mxu0 %v9880_v25  ;;  %9894 = vmatpush3.bf16.msra.mxu1 %v9893_v26  ;;  %v5658_v25 = vld [vmem:[%s12119_s26 + $0x28] sm:$0xff]  ;;  %v5665_v26 = vld [vmem:[%s12119_s26 + $0x60] sm:$0xff] }
 0xb68   :  { %9883 = vmatprep.subr.bf16.mxu0 %v9882_v58  ;;  %9895 = vmatprep.subr.bf16.mxu1 %v10577_v16  ;;  %v9940_v28 = vpack.c.bf16 %v5665_v26, %v5658_v25  ;;  %v12144_v58 = vld [vmem:[%s12927_s7] sm:$0x1]  ;;  %v5621_v25 = vstv %s12113_s22 }
 0xb69   :  { %5423 = vmatprep.mubr.f32.mxu0 %v10575_v1  ;;  %9062 = vmatprep.mubr.msk.f32.mxu1 %vm10578_vm9, %v10575_v1  ;;  %vm12179_vm7 = vcmp.eq.s32.totalorder %v10650_v2, %v5621_v25  ;;  %v5671_v25 = vld [vmem:[%s12119_s26 + $0x90] sm:$0xff] }
 0xb6b   :  { %9885 = vmatpush1.bf16.msra.mxu0 %v9884_v4  ;;  %9897 = vmatpush3.bf16.msra.mxu1 %v9896_v10 }
 0xb6c   :  { %9888 = vmatprep.subr.msk.bf16.mxu0 %vm10672_vm4, %v9886_v20  ;;  %9898 = vmatprep.subr.bf16.mxu1 %v10577_v16 }
 0xb6f   :  { %9891 = vmatpush1.bf16.msk.msra.mxu0 %vm10672_vm4, %v9889_v3  ;;  %9901 = vmatpush3.bf16.msk.msra.mxu1 %vm10672_vm4, %v9899_v14 }
 0xb70   :  { %9902 = vmatprep.subr.bf16.mxu0 %v10577_v16  ;;  %9913 = vmatprep.subr.bf16.mxu1 %v9912_v57 }
 0xb72   :  { %8408 = vmatmul.mubr.msk.f32.vlgmr.msra.gmra.mrb[52].mxu0 %vm167_vm8, %v5147_v63  ;;  %9063 = vmatmul.mubr.msk.f32.vlgmr.msra.gmra.mrb[52].mxu1 %vm167_vm8, %v5147_v63 }
 0xb73   :  { %9904 = vmatpush3.bf16.msra.mxu0 %v10785_v43  ;;  %9077 = vmatprep.mubr.msk.f32.mxu0 %vm10578_vm9, %v10575_v1 }
 0xb74   :  { %9905 = vmatprep.subr.bf16.mxu0 %v10577_v16  ;;  %5783 = vmatprep.mubr.f32.mxu1 %v10575_v1 }
 0xb75   :  { %9915 = vmatpush1.bf16.msra.mxu1 %v9914_v15 }
 0xb76   :  { %9917 = vmatprep.subr.bf16.mxu1 %v9916_v34  ;;  %v6164_v34 = vld [vmem:[%s12253_s13 + $0x48] sm:$0xff] }
 0xb77   :  { %9907 = vmatpush3.bf16.msra.mxu0 %v10795_v46 }
 0xb78   :  { %9908 = vmatprep.subr.bf16.mxu0 %v10577_v16 }
 0xb79   :  { %9919 = vmatpush1.bf16.msra.mxu1 %v9918_v19 }
 0xb7a   :  { %9922 = vmatprep.subr.msk.bf16.mxu1 %vm10672_vm4, %v9920_v12 }
 0xb7b   :  { %9911 = vmatpush3.bf16.msk.msra.mxu0 %vm10672_vm4, %v10805_v49 }
 0xb7c   :  { %9927 = vmatprep.subr.bf16.mxu0 %v9926_v61 }
 0xb7d   :  { %9925 = vmatpush1.bf16.msk.msra.mxu1 %vm10672_vm4, %v9923_v6 }
 0xb7e   :  { %9941 = vmatprep.subr.bf16.mxu1 %v9940_v28 }
 0xc22   :  { %v5097_v63 = vpop.f32.mrb[48].mxu1 }
 0xc23   :  { %v12147_v38 = vadd.f32 %v12144_v58, %v5097_v63  ;;  %v9049_v39 = vpop.f32.mrb[49].mxu1  ;;  %v9930_v63 = vpack.c.bf16 %v5677_v23, %v5670_v21 }
 0xc24   :  { %v5669_v39 = vld [vmem:[%s12119_s26 + $0x80] sm:$0xff] }
 0xc25   :  { %v5101_v5 = vsel %vm582_vm12, %v12147_v38, -inf }
 0xc26   :  { %5102 = vmax.xlane.f32.xlu1 %v5101_v5  ;;  %v5676_v5 = vld [vmem:[%s12119_s26 + $0xb8] sm:$0xff] }
 0xc39   :  { %v5283_v9 = vpop.f32.mrb[50].mxu0  ;;  %v5354_v42 = vpop.f32.mrb[50].mxu1 }
 0xc3a   :  { %v5285_v4 = vpop.f32.mrb[51].mxu0  ;;  %v5356_v10 = vpop.f32.mrb[51].mxu1 }
 0xc3b   :  { %v5500_v24 = vadd.f32 %v5356_v10, %v5283_v9 }
 0xc3d   :  { %v8411_v20 = vmul.f32 -1.442695, %v5500_v24  ;;  %v9932_v24 = vpack.c.bf16 %v5676_v5, %v5669_v39  ;;  %v5673_v39 = vld [vmem:[%s12119_s26 + $0xa0] sm:$0xff]  ;;  %v5680_v5 = vld [vmem:[%s12119_s26 + $0xd8] sm:$0xff] }
 0xc3f   :  { %10334 = vpow2.f32 %v8411_v20 }
 0xc45   :  { %v5425_v48 = vpop.f32.mrb[52].mxu0  ;;  %v5496_v50 = vpop.f32.mrb[52].mxu1 }
 0xc46   :  { %v5501_v51 = vadd.f32 %v5425_v48, %v5285_v4  ;;  %v5427_v3 = vpop.f32.mrb[53].mxu0  ;;  %v9064_v14 = vpop.f32.mrb[53].mxu1  ;;  %v5528_v15 = vrot.slane %v5496_v50, %v10839_v37  ;;  %v5691_v4 = vld [vmem:[%s12119_s26 + $0x130] sm:$0x3] }
 0xc47   :  { %v5683_v50 = vld [vmem:[%s12119_s26 + $0xf0] sm:$0xff] }
 0xc48   :  { %v8412_v53 = vmul.f32 -1.442695, %v5501_v51  ;;  %v12155_v44 = vsel %vm12024_vm3, %v5528_v15, %v12021_v27  ;;  %v5655_v27 = vld [vmem:[%s12119_s26 + $0x10] sm:$0xff]  ;;  %v5690_v51 = vld [vmem:[%s12119_s26 + $0x128] sm:$0x3] }
 0xc49   :  { %v10335_v31 = vpop.eup %10334  ;;  %v5637_v45 = vsel %vm12158_vm6, %v12155_v44, 0.0  ;;  %v9928_v26 = vpack.c.bf16 %v5662_v29, %v5655_v27  ;;  %v5659_v27 = vld [vmem:[%s12119_s26 + $0x30] sm:$0xff]  ;;  %v5666_v29 = vld [vmem:[%s12119_s26 + $0x68] sm:$0xff] }
 0xc4a   :  { %v5508_v56 = vadd.f32 1.0, %v10335_v31  ;;  %10336 = vpow2.f32 %v8412_v53  ;;  %v5638_v18 = vsel %vm97_vm1, %v5637_v45, 0.0 }
 0xc4b   :  { %v5639_v12 = vrot.slane %v5638_v18, 4 }
 0xc4c   :  { %10338 = vrcp.f32 %v5508_v56  ;;  %v9937_v56 = vpack.c.bf16 %v5690_v51, %v5683_v50  ;;  %v5692_v50 = vld [vmem:[%s12119_s26 + $0x138] sm:$0x3]  ;;  %v5687_v51 = vld [vmem:[%s12119_s26 + $0x110] sm:$0xff] }
 0xc4d   :  { %v5640_v9 = vadd.f32 %v5639_v12, %v5638_v18  ;;  %v5657_v18 = vld [vmem:[%s12119_s26 + $0x20] sm:$0xff]  ;;  %v5679_v12 = vld [vmem:[%s12119_s26 + $0xd0] sm:$0xff] }
 0xc54   :  { %v10337_v57 = vpop.eup %10336 }
 0xc55   :  { %v5509_v33 = vadd.f32 1.0, %v10337_v57 }
 0xc56   :  { %v10339_v54 = vpop.eup %10338 }
 0xc57   :  { %v5514_v52 = vmul.f32 %v10339_v54, %v5427_v3  ;;  %v5641_v3 = vrot.slane %v5640_v9, 2 }
 0xc59   :  { %v5515_v61 = vadd.f32 %v5514_v52, %v5354_v42  ;;  %v5684_v42 = vld [vmem:[%s12119_s26 + $0xf8] sm:$0xff]  ;;  %v5642_v0 = vadd.f32 %v5641_v3, %v5640_v9  ;;  %v5686_v9 = vld [vmem:[%s12119_s26 + $0x108] sm:$0xff] }
 0xc5a   :  { %v9934_v48 = vpack.c.bf16 %v5691_v4, %v5684_v42  ;;  %v5693_v42 = vld [vmem:[%s12119_s26 + $0x140] sm:$0x3]  ;;  %v5694_v3 = vld [vmem:[%s12119_s26 + $0x148] sm:$0x3] }
 0xc5b   :  { %10340 = vtanh.f32 %v5515_v61  ;;  %v5643_v54 = vrot.slane %v5642_v0, 1 }
 0xc5c   :  { %10342 = vrcp.f32 %v5509_v33  ;;  %v5646_v33 = vstv %s8417_s28 }
 0xc5d   :  { %v5644_v15 = vadd.f32 %v5643_v54, %v5642_v0  ;;  %v5647_v45 = vmul.f32 %v10723_v59, %v5646_v33  ;;  %v6158_v0 = vld [vmem:[%s12253_s13 + $0x18] sm:$0xff]  ;;  %v6155_v54 = vld [vmem:[%s12253_s13] sm:$0xff] }
 0xc65   :  { %v10341_v19 = vpop.eup %10340 }
 0xc66   :  { %v5517_v40 = vsub.f32 %v12066_v32, %v10341_v19  ;;  %v10343_v22 = vpop.eup %10342 }
 0xc68   :  { %v5518_v6 = vmul.f32 %v10343_v22, %v5517_v40  ;;  %v5664_v40 = vld [vmem:[%s12119_s26 + $0x58] sm:$0xff] }
 0xc69   :  { %v5672_v22 = vld [vmem:[%s12119_s26 + $0x98] sm:$0xff]  ;;  %v9942_v23 = vpack.c.bf16 %v5664_v40, %v5657_v18  ;;  %v6176_v40 = vld [vmem:[%s12253_s13 + $0xa8] sm:$0xff] }
 0xc6a   :  { %v5519_v28 = vadd.f32 %v10341_v19, %v5518_v6  ;;  %v9955_v6 = vpack.c.bf16 %v5666_v29, %v5659_v27  ;;  %v6184_v29 = vld [vmem:[%s12253_s13 + $0xe8] sm:$0xff] }
 0xc6c   :  { %v5523_v32 = vrot.slane %v5519_v28, %v10839_v37  ;;  %9078 = vmatmul.mubr.msk.f32.vlgmr.msra.gmra.mrb[54].mxu0 %vm167_vm8, %v5519_v28  ;;  %v9944_v28 = vpack.c.bf16 %v5679_v12, %v5672_v22  ;;  %v6191_v22 = vld [vmem:[%s12253_s13 + $0x120] sm:$0x3] }
 0xc6d   :  { %9929 = vmatpush1.bf16.msra.mxu0 %v9928_v26  ;;  %5854 = vmatprep.mubr.f32.mxu0 %v10575_v1  ;;  %v9982_v12 = vpack.c.bf16 %v6191_v22, %v6184_v29 }
 0xc6e   :  { %v12187_v20 = vsel %vm12045_vm5, %v5523_v32, %v12053_v13  ;;  %9931 = vmatprep.subr.bf16.mxu0 %v9930_v63  ;;  %v5678_v63 = vld [vmem:[%s12119_s26 + $0xc8] sm:$0xff]  ;;  %v9958_v32 = vpack.c.bf16 %v5680_v5, %v5673_v39 }
 0xc6f   :  { %v5625_v14 = vsel %vm12179_vm7, %v12187_v20, 0.0  ;;  %v9946_v4 = vpack.c.bf16 %v5678_v63, %v5671_v25  ;;  %v6160_v25 = vld [vmem:[%s12253_s13 + $0x28] sm:$0xff] }
 0xc70   :  { %v5626_v53 = vsel %vm97_vm1, %v5625_v14, 0.0 }
 0xc71   :  { %v5627_v31 = vrot.slane %v5626_v53, 4  ;;  %9933 = vmatpush1.bf16.msra.mxu0 %v9932_v24  ;;  %v5685_v24 = vld [vmem:[%s12119_s26 + $0x100] sm:$0xff]  ;;  %s8474_s26 = sld [smem:[#allocation7 + $0xe]] }
 0xc72   :  { %9936 = vmatprep.subr.msk.bf16.mxu0 %vm10672_vm4, %v9934_v48  ;;  %v9948_v48 = vpack.c.bf16 %v5693_v42, %v5686_v9  ;;  %v9951_v14 = vpack.c.bf16 %v5692_v50, %v5685_v24 }
 0xc73   :  { %v5628_v13 = vadd.f32 %v5627_v31, %v5626_v53  ;;  %v9961_v53 = vpack.c.bf16 %v5694_v3, %v5687_v51  ;;  %v6156_v31 = vld [vmem:[%s12253_s13 + $0x8] sm:$0xff] }
 0xc75   :  { %9939 = vmatpush1.bf16.msk.msra.mxu0 %vm10672_vm4, %v9937_v56  ;;  %v5629_v57 = vrot.slane %v5628_v13, 2  ;;  %v6163_v56 = vld [vmem:[%s12253_s13 + $0x40] sm:$0xff] }
 0xc76   :  { %9954 = vmatprep.subr.bf16.mxu0 %v10577_v16 }
 0xc77   :  { %v5630_v52 = vadd.f32 %v5629_v57, %v5628_v13  ;;  %v9974_v13 = vpack.c.bf16 %v6163_v56, %v6156_v31  ;;  %v6165_v57 = vld [vmem:[%s12253_s13 + $0x50] sm:$0xff] }
 0xc78   :  { %v9988_v33 = vpack.c.bf16 %v6165_v57, %v6158_v0 }
 0xc79   :  { %v5631_v61 = vrot.slane %v5630_v52, 1 }
 0xc7b   :  { %v12200_v35 = vadd.f32 %v5631_v61, %v5630_v52  ;;  %v6162_v52 = vld [vmem:[%s12253_s13 + $0x38] sm:$0xff] }
 0xc7c   :  { %v9976_v61 = vpack.c.bf16 %v6162_v52, %v6155_v54 }
 0xc7d   :  { %v5645_v19 = vadd.f32 %v5644_v15, %v12200_v35  ;;  %v6170_v15 = vld [vmem:[%s12253_s13 + $0x78] sm:$0xff] }
 0xc7f   :  { %v5648_v21 = vadd.f32 %v5647_v45, %v5645_v19  ;;  %v6177_v45 = vld [vmem:[%s12253_s13 + $0xb0] sm:$0xff] }
 0xc80   :  { %v9978_v18 = vpack.c.bf16 %v6177_v45, %v6170_v15  ;;  %v6169_v19 = vld [vmem:[%s12253_s13 + $0x70] sm:$0xff]  ;;  %v6135_v45 = vstv %s8435_s14 }
 0xc81   :  { %v5649_v26 = vadd.f32 %v10744_v17, %v5648_v21  ;;  %v9980_v27 = vpack.c.bf16 %v6176_v40, %v6169_v19  ;;  %v6183_v21 = vld [vmem:[%s12253_s13 + $0xe0] sm:$0xff]  ;;  %vm12287_vm10 = vcmp.eq.s32.totalorder %v10650_v2, %v6135_v45  ;;  %v6666_v19 = vld [vmem:[%s12382_s18 + $0x48] sm:$0xff] }
 0xc83   :  { %8421 = vmatmul.mubr.msk.f32.vlgmr.msra.gmra.mrb[54].mxu1 %vm167_vm8, %v5649_v26  ;;  %8424 = vmatmul.mubr.msk.f32.vlgmr.msra.gmra.mrb[56].mxu0 %vm167_vm8, %v5649_v26 }
 0xc84   :  { %9943 = vmatpush1.bf16.msra.mxu1 %v9942_v23  ;;  %9956 = vmatpush3.bf16.msra.mxu0 %v9955_v6  ;;  %v6190_v23 = vld [vmem:[%s12253_s13 + $0x118] sm:$0x3] }
 0xc85   :  { %9945 = vmatprep.subr.bf16.mxu1 %v9944_v28  ;;  %9957 = vmatprep.subr.bf16.mxu0 %v10577_v16  ;;  %v9985_v6 = vpack.c.bf16 %v6190_v23, %v6183_v21  ;;  %v6172_v23 = vld [vmem:[%s12253_s13 + $0x88] sm:$0xff] }
 0xc86   :  { %5925 = vmatprep.mubr.f32.mxu1 %v10575_v1  ;;  %9092 = vmatprep.mubr.msk.f32.mxu0 %vm10578_vm9, %v10575_v1 }
 0xc88   :  { %9947 = vmatpush1.bf16.msra.mxu1 %v9946_v4  ;;  %9959 = vmatpush3.bf16.msra.mxu0 %v9958_v32 }
 0xc89   :  { %9950 = vmatprep.subr.msk.bf16.mxu1 %vm10672_vm4, %v9948_v48  ;;  %9960 = vmatprep.subr.bf16.mxu0 %v10577_v16 }
 0xc8c   :  { %9953 = vmatpush1.bf16.msk.msra.mxu1 %vm10672_vm4, %v9951_v14  ;;  %9963 = vmatpush3.bf16.msk.msra.mxu0 %vm10672_vm4, %v9961_v53 }
 0xc8d   :  { %9964 = vmatprep.subr.bf16.mxu1 %v10577_v16  ;;  %9975 = vmatprep.subr.bf16.mxu0 %v9974_v13 }
 0xc8f   :  { %8427 = vmatmul.mubr.msk.f32.vlgmr.msra.gmra.mrb[56].mxu1 %vm167_vm8, %v5649_v26  ;;  %9093 = vmatmul.mubr.msk.f32.vlgmr.msra.gmra.mrb[58].mxu0 %vm167_vm8, %v5649_v26  ;;  %v6167_v26 = vld [vmem:[%s12253_s13 + $0x60] sm:$0xff] }
 0xc90   :  { %9966 = vmatpush3.bf16.msra.mxu1 %v10785_v43  ;;  %9107 = vmatprep.mubr.msk.f32.mxu1 %vm10578_vm9, %v10575_v1  ;;  %v10002_v28 = vpack.c.bf16 %v6167_v26, %v6160_v25  ;;  %v6123_v26 = vstv %s12247_s29  ;;  %s12645_s29 = scalar_lea.vmem %s12925_s5, %s8525_s27  ;;  %s8492_s5 = sld [smem:[#allocation5 + $0xf]] }
 0xc91   :  { %9967 = vmatprep.subr.bf16.mxu1 %v10577_v16  ;;  %6285 = vmatprep.mubr.f32.mxu0 %v10575_v1  ;;  %vm12308_vm11 = vcmp.eq.s32.totalorder %v10650_v2, %v6123_v26 }
 0xc92   :  { %9977 = vmatpush1.bf16.msra.mxu0 %v9976_v61 }
 0xc93   :  { %9979 = vmatprep.subr.bf16.mxu0 %v9978_v18 }
 0xc94   :  { %9969 = vmatpush3.bf16.msra.mxu1 %v10795_v46 }
 0xc95   :  { %9970 = vmatprep.subr.bf16.mxu1 %v10577_v16 }
 0xc96   :  { %9981 = vmatpush1.bf16.msra.mxu0 %v9980_v27 }
 0xc97   :  { %9984 = vmatprep.subr.msk.bf16.mxu0 %vm10672_vm4, %v9982_v12 }
 0xc98   :  { %9973 = vmatpush3.bf16.msk.msra.mxu1 %vm10672_vm4, %v10805_v49 }
 0xc99   :  { %9989 = vmatprep.subr.bf16.mxu1 %v9988_v33 }
 0xc9a   :  { %9987 = vmatpush1.bf16.msk.msra.mxu0 %vm10672_vm4, %v9985_v6  ;;  %v6179_v6 = vld [vmem:[%s12253_s13 + $0xc0] sm:$0xff] }
 0xc9b   :  { %10003 = vmatprep.subr.bf16.mxu0 %v10002_v28 }
 0xd3f   :  { %v5599_v63 = vpop.f32.mrb[54].mxu0 }
 0xd40   :  { %v12276_v39 = vadd.f32 %v12144_v58, %v5599_v63  ;;  %v9079_v5 = vpop.f32.mrb[55].mxu0 }
 0xd41   :  { %v9992_v5 = vpack.c.bf16 %v6179_v6, %v6172_v23  ;;  %v6181_v23 = vld [vmem:[%s12253_s13 + $0xd0] sm:$0xff] }
 0xd42   :  { %v5603_v9 = vsel %vm582_vm12, %v12276_v39, -inf }
 0xd43   :  { %5604 = vmax.xlane.f32.xlu0 %v5603_v9  ;;  %v6171_v9 = vld [vmem:[%s12253_s13 + $0x80] sm:$0xff] }
 0xd56   :  { %v5785_v42 = vpop.f32.mrb[54].mxu1  ;;  %v5856_v4 = vpop.f32.mrb[56].mxu0 }
 0xd57   :  { %v5787_v32 = vpop.f32.mrb[55].mxu1  ;;  %v5858_v24 = vpop.f32.mrb[57].mxu0 }
 0xd58   :  { %v6002_v48 = vadd.f32 %v5858_v24, %v5785_v42  ;;  %v6178_v42 = vld [vmem:[%s12253_s13 + $0xb8] sm:$0xff]  ;;  %v6193_v24 = vld [vmem:[%s12253_s13 + $0x130] sm:$0x3] }
 0xd5a   :  { %v8430_v50 = vmul.f32 -1.442695, %v6002_v48 }
 0xd5c   :  { %10344 = vpow2.f32 %v8430_v50  ;;  %v9994_v50 = vpack.c.bf16 %v6178_v42, %v6171_v9  ;;  %v6180_v9 = vld [vmem:[%s12253_s13 + $0xc8] sm:$0xff]  ;;  %v6175_v42 = vld [vmem:[%s12253_s13 + $0xa0] sm:$0xff] }
 0xd62   :  { %v5927_v51 = vpop.f32.mrb[56].mxu1  ;;  %v5998_v3 = vpop.f32.mrb[58].mxu0 }
 0xd63   :  { %v6003_v14 = vadd.f32 %v5927_v51, %v5787_v32  ;;  %v5929_v53 = vpop.f32.mrb[57].mxu1  ;;  %v9094_v31 = vpop.f32.mrb[59].mxu0  ;;  %v6030_v15 = vrot.slane %v5998_v3, %v10839_v37  ;;  %v6186_v32 = vld [vmem:[%s12253_s13 + $0xf8] sm:$0xff] }
 0xd64   :  { %v9996_v3 = vpack.c.bf16 %v6193_v24, %v6186_v32  ;;  %v6188_v32 = vld [vmem:[%s12253_s13 + $0x108] sm:$0xff]  ;;  %v6195_v24 = vld [vmem:[%s12253_s13 + $0x140] sm:$0x3] }
 0xd65   :  { %v8431_v56 = vmul.f32 -1.442695, %v6003_v14  ;;  %v12284_v18 = vsel %vm12158_vm6, %v6030_v15, %v12155_v44  ;;  %v6157_v44 = vld [vmem:[%s12253_s13 + $0x10] sm:$0xff] }
 0xd66   :  { %v10345_v0 = vpop.eup %10344  ;;  %v6139_v40 = vsel %vm12287_vm10, %v12284_v18, 0.0  ;;  %v9990_v28 = vpack.c.bf16 %v6164_v34, %v6157_v44  ;;  %v6185_v14 = vld [vmem:[%s12253_s13 + $0xf0] sm:$0xff]  ;;  %v6166_v44 = vld [vmem:[%s12253_s13 + $0x58] sm:$0xff] }
 0xd67   :  { %v6010_v13 = vadd.f32 1.0, %v10345_v0  ;;  %10346 = vpow2.f32 %v8431_v56  ;;  %v6140_v27 = vsel %vm97_vm1, %v6139_v40, 0.0  ;;  %v6161_v34 = vld [vmem:[%s12253_s13 + $0x30] sm:$0xff] }
 0xd68   :  { %v6141_v21 = vrot.slane %v6140_v27, 4 }
 0xd69   :  { %10348 = vrcp.f32 %v6010_v13 }
 0xd71   :  { %v10347_v57 = vpop.eup %10346 }
 0xd72   :  { %v6011_v33 = vadd.f32 1.0, %v10347_v57 }
 0xd73   :  { %v10349_v54 = vpop.eup %10348 }
 0xd74   :  { %v6016_v52 = vmul.f32 %v10349_v54, %v5929_v53  ;;  %v6192_v53 = vld [vmem:[%s12253_s13 + $0x128] sm:$0x3] }
 0xd75   :  { %v9999_v57 = vpack.c.bf16 %v6192_v53, %v6185_v14  ;;  %v10010_v14 = vpack.c.bf16 %v6195_v24, %v6188_v32  ;;  %v6194_v53 = vld [vmem:[%s12253_s13 + $0x138] sm:$0x3] }
 0xd76   :  { %v6017_v61 = vadd.f32 %v6016_v52, %v5856_v4  ;;  %v6142_v4 = vadd.f32 %v6141_v21, %v6140_v27  ;;  %v6174_v21 = vld [vmem:[%s12253_s13 + $0x98] sm:$0xff] }
 0xd78   :  { %10350 = vtanh.f32 %v6017_v61  ;;  %v6143_v31 = vrot.slane %v6142_v4, 2  ;;  %v6148_v61 = vstv %s8436_s3 }
 0xd79   :  { %10352 = vrcp.f32 %v6011_v33  ;;  %v6149_v27 = vmul.f32 %v10723_v59, %v6148_v61  ;;  %v6664_v61 = vld [vmem:[%s12382_s18 + $0x38] sm:$0xff] }
 0xd7a   :  { %v6144_v10 = vadd.f32 %v6143_v31, %v6142_v4  ;;  %v6182_v4 = vld [vmem:[%s12253_s13 + $0xd8] sm:$0xff]  ;;  %v6189_v31 = vld [vmem:[%s12253_s13 + $0x110] sm:$0xff] }
 0xd7c   :  { %v6145_v52 = vrot.slane %v6144_v10, 1 }
 0xd7e   :  { %v6146_v45 = vadd.f32 %v6145_v52, %v6144_v10  ;;  %v6665_v10 = vld [vmem:[%s12382_s18 + $0x40] sm:$0xff]  ;;  %v6667_v52 = vld [vmem:[%s12382_s18 + $0x50] sm:$0xff] }
 0xd82   :  { %v10351_v29 = vpop.eup %10350 }
 0xd83   :  { %v6019_v22 = vsub.f32 %v12200_v35, %v10351_v29  ;;  %v10353_v12 = vpop.eup %10352 }
 0xd85   :  { %v6020_v25 = vmul.f32 %v10353_v12, %v6019_v22  ;;  %v6168_v12 = vld [vmem:[%s12253_s13 + $0x68] sm:$0xff] }
 0xd86   :  { %v10017_v26 = vpack.c.bf16 %v6168_v12, %v6161_v34  ;;  %v6678_v34 = vld [vmem:[%s12382_s18 + $0xa8] sm:$0xff] }
 0xd87   :  { %v6021_v63 = vadd.f32 %v10351_v29, %v6020_v25  ;;  %v6159_v29 = vld [vmem:[%s12253_s13 + $0x20] sm:$0xff] }
 0xd88   :  { %v10004_v25 = vpack.c.bf16 %v6166_v44, %v6159_v29  ;;  %v6679_v29 = vld [vmem:[%s12382_s18 + $0xb0] sm:$0xff] }
 0xd89   :  { %v6025_v35 = vrot.slane %v6021_v63, %v10839_v37  ;;  %9108 = vmatmul.mubr.msk.f32.vlgmr.msra.gmra.mrb[58].mxu1 %vm167_vm8, %v6021_v63  ;;  %v6671_v44 = vld [vmem:[%s12382_s18 + $0x70] sm:$0xff] }
 0xd8a   :  { %9991 = vmatpush1.bf16.msra.mxu1 %v9990_v28  ;;  %6356 = vmatprep.mubr.f32.mxu1 %v10575_v1  ;;  %v6173_v28 = vld [vmem:[%s12253_s13 + $0x90] sm:$0xff]  ;;  %v10042_v12 = vpack.c.bf16 %v6678_v34, %v6671_v44  ;;  %v7168_v44 = vld [vmem:[%s12511_s23 + $0x48] sm:$0xff] }
 0xd8b   :  { %v12316_v51 = vsel %vm12179_vm7, %v6025_v35, %v12187_v20  ;;  %9993 = vmatprep.subr.bf16.mxu1 %v9992_v5  ;;  %v10006_v5 = vpack.c.bf16 %v6181_v23, %v6174_v21  ;;  %v10008_v35 = vpack.c.bf16 %v6180_v9, %v6173_v28  ;;  %v6686_v21 = vld [vmem:[%s12382_s18 + $0xe8] sm:$0xff]  ;;  %v6693_v23 = vld [vmem:[%s12382_s18 + $0x120] sm:$0x3] }
 0xd8c   :  { %v6127_v56 = vsel %vm12308_vm11, %v12316_v51, 0.0 }
 0xd8d   :  { %v6128_v0 = vsel %vm97_vm1, %v6127_v56, 0.0  ;;  %v6196_v56 = vld [vmem:[%s12253_s13 + $0x148] sm:$0x3] }
 0xd8e   :  { %v6129_v13 = vrot.slane %v6128_v0, 4  ;;  %9995 = vmatpush1.bf16.msra.mxu1 %v9994_v50  ;;  %v10020_v50 = vpack.c.bf16 %v6182_v4, %v6175_v42 }
 0xd8f   :  { %9998 = vmatprep.subr.msk.bf16.mxu1 %vm10672_vm4, %v9996_v3  ;;  %v6187_v3 = vld [vmem:[%s12253_s13 + $0x100] sm:$0xff]  ;;  %s10498_s13 = scalar_lea.vmem %s8149_s12, 64 }
 0xd90   :  { %v6130_v20 = vadd.f32 %v6129_v13, %v6128_v0  ;;  %v10013_v0 = vpack.c.bf16 %v6194_v53, %v6187_v3  ;;  %v10023_v13 = vpack.c.bf16 %v6196_v56, %v6189_v31  ;;  %p10499_p1 = scmp.ne.s32.totalorder %s8149_s12, %s10498_s13  ;;  %p10504_p3 = scmp.lt.s32.totalorder %s10498_s13, %s10498_s13 }
 0xd92   :  { %10001 = vmatpush1.bf16.msk.msra.mxu1 %vm10672_vm4, %v9999_v57  ;;  %v6131_v54 = vrot.slane %v6130_v20, 2  ;;  %v6658_v57 = vld [vmem:[%s12382_s18 + $0x8] sm:$0xff]  ;;  %p10505_p4 = por %p10504_p3, %p10503_p2 }
 0xd93   :  { %10016 = vmatprep.subr.bf16.mxu1 %v10577_v16 }
 0xd94   :  { %v6132_v33 = vadd.f32 %v6131_v54, %v6130_v20  ;;  %v6660_v20 = vld [vmem:[%s12382_s18 + $0x18] sm:$0xff]  ;;  %v10036_v54 = vpack.c.bf16 %v6665_v10, %v6658_v57  ;;  %p10506_p5 = pnand %p10505_p4, %p10499_p1 }
 0xd96   :  { %v6133_v15 = vrot.slane %v6132_v33, 1 }
 0xd98   :  { %v12329_v40 = vadd.f32 %v6133_v15, %v6132_v33  ;;  %v6657_v33 = vld [vmem:[%s12382_s18] sm:$0xff]  ;;  %v10050_v15 = vpack.c.bf16 %v6667_v52, %v6660_v20 }
 0xd9a   :  { %v6147_v22 = vadd.f32 %v6146_v45, %v12329_v40  ;;  %v10038_v45 = vpack.c.bf16 %v6664_v61, %v6657_v33 }
 0xd9c   :  { %v6150_v6 = vadd.f32 %v6149_v27, %v6147_v22  ;;  %v6672_v27 = vld [vmem:[%s12382_s18 + $0x78] sm:$0xff] }
 0xd9d   :  { %v10040_v22 = vpack.c.bf16 %v6679_v29, %v6672_v27  ;;  %v6637_v29 = vstv %s8454_s19 }
 0xd9e   :  { %v6151_v63 = vadd.f32 %v10744_v17, %v6150_v6  ;;  %v10044_v6 = vpack.c.bf16 %v6693_v23, %v6686_v21  ;;  %vm12416_vm13 = vcmp.eq.s32.totalorder %v10650_v2, %v6637_v29 }
 0xda0   :  { %8440 = vmatmul.mubr.msk.f32.vlgmr.msra.gmra.mrb[60].mxu0 %vm167_vm8, %v6151_v63  ;;  %8443 = vmatmul.mubr.msk.f32.vlgmr.msra.gmra.mrb[60].mxu1 %vm167_vm8, %v6151_v63 }
 0xda1   :  { %10005 = vmatpush1.bf16.msra.mxu0 %v10004_v25  ;;  %10018 = vmatpush3.bf16.msra.mxu1 %v10017_v26  ;;  %v6685_v25 = vld [vmem:[%s12382_s18 + $0xe0] sm:$0xff]  ;;  %v6692_v26 = vld [vmem:[%s12382_s18 + $0x118] sm:$0x3] }
 0xda2   :  { %10007 = vmatprep.subr.bf16.mxu0 %v10006_v5  ;;  %10019 = vmatprep.subr.bf16.mxu1 %v10577_v16  ;;  %v10047_v28 = vpack.c.bf16 %v6692_v26, %v6685_v25  ;;  %v6669_v5 = vld [vmem:[%s12382_s18 + $0x60] sm:$0xff]  ;;  %v6674_v26 = vld [vmem:[%s12382_s18 + $0x88] sm:$0xff] }
 0xda3   :  { %6427 = vmatprep.mubr.f32.mxu0 %v10575_v1  ;;  %9122 = vmatprep.mubr.msk.f32.mxu1 %vm10578_vm9, %v10575_v1 }
 0xda5   :  { %10009 = vmatpush1.bf16.msra.mxu0 %v10008_v35  ;;  %10021 = vmatpush3.bf16.msra.mxu1 %v10020_v50 }
 0xda6   :  { %10012 = vmatprep.subr.msk.bf16.mxu0 %vm10672_vm4, %v10010_v14  ;;  %10022 = vmatprep.subr.bf16.mxu1 %v10577_v16 }
 0xda9   :  { %10015 = vmatpush1.bf16.msk.msra.mxu0 %vm10672_vm4, %v10013_v0  ;;  %10025 = vmatpush3.bf16.msk.msra.mxu1 %vm10672_vm4, %v10023_v13 }
 0xdaa   :  { %10026 = vmatprep.subr.bf16.mxu0 %v10577_v16  ;;  %10037 = vmatprep.subr.bf16.mxu1 %v10036_v54 }
 0xdac   :  { %8446 = vmatmul.mubr.msk.f32.vlgmr.msra.gmra.mrb[62].mxu0 %vm167_vm8, %v6151_v63  ;;  %9123 = vmatmul.mubr.msk.f32.vlgmr.msra.gmra.mrb[62].mxu1 %vm167_vm8, %v6151_v63  ;;  %v6662_v63 = vld [vmem:[%s12382_s18 + $0x28] sm:$0xff] }
 0xdad   :  { %10028 = vmatpush3.bf16.msra.mxu0 %v10785_v43  ;;  %9137 = vmatprep.mubr.msk.f32.mxu0 %vm10578_vm9, %v10575_v1  ;;  %v10064_v9 = vpack.c.bf16 %v6669_v5, %v6662_v63  ;;  %v6625_v5 = vstv %s12376_s4 }
 0xdae   :  { %10029 = vmatprep.subr.bf16.mxu0 %v10577_v16  ;;  %6787 = vmatprep.mubr.f32.mxu1 %v10575_v1  ;;  %vm12437_vm14 = vcmp.eq.s32.totalorder %v10650_v2, %v6625_v5 }
 0xdaf   :  { %10039 = vmatpush1.bf16.msra.mxu1 %v10038_v45 }
 0xdb0   :  { %10041 = vmatprep.subr.bf16.mxu1 %v10040_v22 }
 0xdb1   :  { %10031 = vmatpush3.bf16.msra.mxu0 %v10795_v46 }
 0xdb2   :  { %10032 = vmatprep.subr.bf16.mxu0 %v10577_v16 }
 0xdb3   :  { %10043 = vmatpush1.bf16.msra.mxu1 %v10042_v12 }
 0xdb4   :  { %10046 = vmatprep.subr.msk.bf16.mxu1 %vm10672_vm4, %v10044_v6 }
 0xdb5   :  { %10035 = vmatpush3.bf16.msk.msra.mxu0 %vm10672_vm4, %v10805_v49 }
 0xdb6   :  { %10051 = vmatprep.subr.bf16.mxu0 %v10050_v15 }
 0xdb7   :  { %10049 = vmatpush1.bf16.msk.msra.mxu1 %vm10672_vm4, %v10047_v28  ;;  %v6681_v28 = vld [vmem:[%s12382_s18 + $0xc0] sm:$0xff] }
 0xdb8   :  { %10065 = vmatprep.subr.bf16.mxu1 %v10064_v9 }
 0xe5c   :  { %v6101_v42 = vpop.f32.mrb[58].mxu1 }
 0xe5d   :  { %v12405_v4 = vadd.f32 %v12144_v58, %v6101_v42  ;;  %v9109_v32 = vpop.f32.mrb[59].mxu1 }
 0xe5e   :  { %v10054_v32 = vpack.c.bf16 %v6681_v28, %v6674_v26  ;;  %v6683_v26 = vld [vmem:[%s12382_s18 + $0xd0] sm:$0xff] }
 0xe5f   :  { %v6105_v24 = vsel %vm582_vm12, %v12405_v4, -inf }
 0xe60   :  { %6106 = vmax.xlane.f32.xlu1 %v6105_v24  ;;  %v6673_v24 = vld [vmem:[%s12382_s18 + $0x80] sm:$0xff] }
 0xe73   :  { %v6287_v35 = vpop.f32.mrb[60].mxu0  ;;  %v6358_v50 = vpop.f32.mrb[60].mxu1 }
 0xe74   :  { %v6289_v3 = vpop.f32.mrb[61].mxu0  ;;  %v6360_v14 = vpop.f32.mrb[61].mxu1 }
 0xe75   :  { %v6504_v53 = vadd.f32 %v6360_v14, %v6287_v35  ;;  %v6680_v35 = vld [vmem:[%s12382_s18 + $0xb8] sm:$0xff]  ;;  %v6695_v14 = vld [vmem:[%s12382_s18 + $0x130] sm:$0x3] }
 0xe77   :  { %v8449_v31 = vmul.f32 -1.442695, %v6504_v53 }
 0xe79   :  { %10354 = vpow2.f32 %v8449_v31  ;;  %v10056_v31 = vpack.c.bf16 %v6680_v35, %v6673_v24  ;;  %v6682_v24 = vld [vmem:[%s12382_s18 + $0xc8] sm:$0xff]  ;;  %v6677_v35 = vld [vmem:[%s12382_s18 + $0xa0] sm:$0xff] }
 0xe7f   :  { %v6429_v56 = vpop.f32.mrb[62].mxu0  ;;  %v6500_v0 = vpop.f32.mrb[62].mxu1 }
 0xe80   :  { %v6505_v13 = vadd.f32 %v6429_v56, %v6289_v3  ;;  %v6431_v57 = vpop.f32.mrb[63].mxu0  ;;  %v9124_v10 = vpop.f32.mrb[63].mxu1  ;;  %v6532_v27 = vrot.slane %v6500_v0, %v10839_v37  ;;  %v6688_v3 = vld [vmem:[%s12382_s18 + $0xf8] sm:$0xff] }
 0xe81   :  { %v10058_v0 = vpack.c.bf16 %v6695_v14, %v6688_v3  ;;  %v6690_v3 = vld [vmem:[%s12382_s18 + $0x108] sm:$0xff]  ;;  %v6697_v14 = vld [vmem:[%s12382_s18 + $0x140] sm:$0x3] }
 0xe82   :  { %v8450_v20 = vmul.f32 -1.442695, %v6505_v13  ;;  %v12413_v22 = vsel %vm12287_vm10, %v6532_v27, %v12284_v18  ;;  %v6659_v18 = vld [vmem:[%s12382_s18 + $0x10] sm:$0xff] }
 0xe83   :  { %v10355_v58 = vpop.eup %10354  ;;  %v6641_v34 = vsel %vm12416_vm13, %v12413_v22, 0.0  ;;  %v10052_v9 = vpack.c.bf16 %v6666_v19, %v6659_v18  ;;  %v6687_v13 = vld [vmem:[%s12382_s18 + $0xf0] sm:$0xff]  ;;  %v6668_v18 = vld [vmem:[%s12382_s18 + $0x58] sm:$0xff] }
 0xe84   :  { %v6512_v54 = vadd.f32 1.0, %v10355_v58  ;;  %10356 = vpow2.f32 %v8450_v20  ;;  %v6642_v12 = vsel %vm97_vm1, %v6641_v34, 0.0  ;;  %v6663_v19 = vld [vmem:[%s12382_s18 + $0x30] sm:$0xff] }
 0xe85   :  { %v6643_v25 = vrot.slane %v6642_v12, 4 }
 0xe86   :  { %10358 = vrcp.f32 %v6512_v54 }
 0xe8e   :  { %v10357_v52 = vpop.eup %10356 }
 0xe8f   :  { %v6513_v15 = vadd.f32 1.0, %v10357_v52 }
 0xe90   :  { %v10359_v33 = vpop.eup %10358 }
 0xe91   :  { %v6518_v61 = vmul.f32 %v10359_v33, %v6431_v57  ;;  %v6694_v57 = vld [vmem:[%s12382_s18 + $0x128] sm:$0x3] }
 0xe92   :  { %v10061_v52 = vpack.c.bf16 %v6694_v57, %v6687_v13  ;;  %v10072_v13 = vpack.c.bf16 %v6697_v14, %v6690_v3  ;;  %v6696_v57 = vld [vmem:[%s12382_s18 + $0x138] sm:$0x3] }
 0xe93   :  { %v6519_v45 = vadd.f32 %v6518_v61, %v6358_v50  ;;  %v6644_v50 = vadd.f32 %v6643_v25, %v6642_v12  ;;  %v6676_v25 = vld [vmem:[%s12382_s18 + $0x98] sm:$0xff] }
 0xe95   :  { %10360 = vtanh.f32 %v6519_v45  ;;  %v6645_v10 = vrot.slane %v6644_v50, 2  ;;  %v6650_v45 = vstv %s8455_s20 }
 0xe96   :  { %10362 = vrcp.f32 %v6513_v15  ;;  %v6651_v12 = vmul.f32 %v10723_v59, %v6650_v45  ;;  %v7166_v45 = vld [vmem:[%s12511_s23 + $0x38] sm:$0xff] }
 0xe97   :  { %v6646_v48 = vadd.f32 %v6645_v10, %v6644_v50  ;;  %v6684_v50 = vld [vmem:[%s12382_s18 + $0xd8] sm:$0xff]  ;;  %v6691_v10 = vld [vmem:[%s12382_s18 + $0x110] sm:$0xff] }
 0xe99   :  { %v6647_v61 = vrot.slane %v6646_v48, 1 }
 0xe9b   :  { %v6648_v29 = vadd.f32 %v6647_v61, %v6646_v48  ;;  %v7167_v48 = vld [vmem:[%s12511_s23 + $0x40] sm:$0xff]  ;;  %v7169_v61 = vld [vmem:[%s12511_s23 + $0x50] sm:$0xff] }
 0xe9f   :  { %v10361_v21 = vpop.eup %10360 }
 0xea0   :  { %v6521_v23 = vsub.f32 %v12329_v40, %v10361_v21  ;;  %v10363_v6 = vpop.eup %10362 }
 0xea2   :  { %v6522_v63 = vmul.f32 %v10363_v6, %v6521_v23  ;;  %v6670_v6 = vld [vmem:[%s12382_s18 + $0x68] sm:$0xff] }
 0xea3   :  { %v10079_v5 = vpack.c.bf16 %v6670_v6, %v6663_v19  ;;  %v7180_v19 = vld [vmem:[%s12511_s23 + $0xa8] sm:$0xff] }
 0xea4   :  { %v6523_v42 = vadd.f32 %v10361_v21, %v6522_v63  ;;  %v6661_v21 = vld [vmem:[%s12382_s18 + $0x20] sm:$0xff] }
 0xea5   :  { %v10066_v63 = vpack.c.bf16 %v6668_v18, %v6661_v21  ;;  %v7181_v21 = vld [vmem:[%s12511_s23 + $0xb0] sm:$0xff] }
 0xea6   :  { %v6527_v40 = vrot.slane %v6523_v42, %v10839_v37  ;;  %9138 = vmatmul.mubr.msk.f32.vlgmr.msra.gmra.mrb[64].mxu0 %vm167_vm8, %v6523_v42  ;;  %v7173_v18 = vld [vmem:[%s12511_s23 + $0x70] sm:$0xff] }
 0xea7   :  { %10053 = vmatpush1.bf16.msra.mxu0 %v10052_v9  ;;  %6858 = vmatprep.mubr.f32.mxu0 %v10575_v1  ;;  %v6675_v9 = vld [vmem:[%s12382_s18 + $0x90] sm:$0xff]  ;;  %v10104_v6 = vpack.c.bf16 %v7180_v19, %v7173_v18 }
 0xea8   :  { %v12445_v56 = vsel %vm12308_vm11, %v6527_v40, %v12316_v51  ;;  %10055 = vmatprep.subr.bf16.mxu0 %v10054_v32  ;;  %v10068_v32 = vpack.c.bf16 %v6683_v26, %v6676_v25  ;;  %v10070_v40 = vpack.c.bf16 %v6682_v24, %v6675_v9  ;;  %v7188_v25 = vld [vmem:[%s12511_s23 + $0xe8] sm:$0xff]  ;;  %v7195_v26 = vld [vmem:[%s12511_s23 + $0x120] sm:$0x3] }
 0xea9   :  { %v6629_v20 = vsel %vm12437_vm14, %v12445_v56, 0.0 }
 0xeaa   :  { %v6630_v58 = vsel %vm97_vm1, %v6629_v20, 0.0  ;;  %v6698_v20 = vld [vmem:[%s12382_s18 + $0x148] sm:$0x3] }
 0xeab   :  { %v6631_v54 = vrot.slane %v6630_v58, 4  ;;  %10057 = vmatpush1.bf16.msra.mxu0 %v10056_v31  ;;  %v10082_v31 = vpack.c.bf16 %v6684_v50, %v6677_v35  ;;  %v12536_v50 = vld [vmem:[%s12927_s7] sm:$0x1]  ;;  %s8473_s7 = sld [smem:[#allocation5 + $0xe]] }
 0xeac   :  { %10060 = vmatprep.subr.msk.bf16.mxu0 %vm10672_vm4, %v10058_v0  ;;  %v6689_v0 = vld [vmem:[%s12382_s18 + $0x100] sm:$0xff] }
 0xead   :  { %v6632_v51 = vadd.f32 %v6631_v54, %v6630_v58  ;;  %v10075_v58 = vpack.c.bf16 %v6696_v57, %v6689_v0  ;;  %v10085_v54 = vpack.c.bf16 %v6698_v20, %v6691_v10 }
 0xeaf   :  { %10063 = vmatpush1.bf16.msk.msra.mxu0 %vm10672_vm4, %v10061_v52  ;;  %v6633_v33 = vrot.slane %v6632_v51, 2  ;;  %v7160_v52 = vld [vmem:[%s12511_s23 + $0x8] sm:$0xff] }
 0xeb0   :  { %10078 = vmatprep.subr.bf16.mxu0 %v10577_v16 }
 0xeb1   :  { %v6634_v15 = vadd.f32 %v6633_v33, %v6632_v51  ;;  %v7162_v51 = vld [vmem:[%s12511_s23 + $0x18] sm:$0xff]  ;;  %v10098_v33 = vpack.c.bf16 %v7167_v48, %v7160_v52  ;;  %v7139_v18 = vstv %s8473_s7 }
 0xeb2   :  { %vm12550_vm15 = vcmp.eq.s32.totalorder %v10650_v2, %v7139_v18  ;;  %v7152_v18 = vstv %s8474_s26 }
 0xeb3   :  { %v6635_v27 = vrot.slane %v6634_v15, 1 }
 0xeb5   :  { %v12458_v34 = vadd.f32 %v6635_v27, %v6634_v15  ;;  %v7159_v15 = vld [vmem:[%s12511_s23] sm:$0xff]  ;;  %v10112_v27 = vpack.c.bf16 %v7169_v61, %v7162_v51 }
 0xeb7   :  { %v6649_v23 = vadd.f32 %v6648_v29, %v12458_v34  ;;  %v10100_v29 = vpack.c.bf16 %v7166_v45, %v7159_v15 }
 0xeb9   :  { %v6652_v28 = vadd.f32 %v6651_v12, %v6649_v23  ;;  %v7174_v12 = vld [vmem:[%s12511_s23 + $0x78] sm:$0xff] }
 0xeba   :  { %v10102_v23 = vpack.c.bf16 %v7181_v21, %v7174_v12 }
 0xebb   :  { %v6653_v42 = vadd.f32 %v10744_v17, %v6652_v28  ;;  %v10106_v28 = vpack.c.bf16 %v7195_v26, %v7188_v25 }
 0xebd   :  { %8459 = vmatmul.mubr.msk.f32.vlgmr.msra.gmra.mrb[64].mxu1 %vm167_vm8, %v6653_v42  ;;  %8462 = vmatmul.mubr.msk.f32.vlgmr.msra.gmra.mrb[66].mxu0 %vm167_vm8, %v6653_v42 }
 0xebe   :  { %10067 = vmatpush1.bf16.msra.mxu1 %v10066_v63  ;;  %10080 = vmatpush3.bf16.msra.mxu0 %v10079_v5  ;;  %v7187_v63 = vld [vmem:[%s12511_s23 + $0xe0] sm:$0xff]  ;;  %v7194_v5 = vld [vmem:[%s12511_s23 + $0x118] sm:$0x3] }
 0xebf   :  { %10069 = vmatprep.subr.bf16.mxu1 %v10068_v32  ;;  %10081 = vmatprep.subr.bf16.mxu0 %v10577_v16  ;;  %v10109_v9 = vpack.c.bf16 %v7194_v5, %v7187_v63  ;;  %v7171_v32 = vld [vmem:[%s12511_s23 + $0x60] sm:$0xff] }
 0xec0   :  { %6929 = vmatprep.mubr.f32.mxu1 %v10575_v1  ;;  %9152 = vmatprep.mubr.msk.f32.mxu0 %vm10578_vm9, %v10575_v1 }
 0xec2   :  { %10071 = vmatpush1.bf16.msra.mxu1 %v10070_v40  ;;  %10083 = vmatpush3.bf16.msra.mxu0 %v10082_v31 }
 0xec3   :  { %10074 = vmatprep.subr.msk.bf16.mxu1 %vm10672_vm4, %v10072_v13  ;;  %10084 = vmatprep.subr.bf16.mxu0 %v10577_v16 }
 0xec6   :  { %10077 = vmatpush1.bf16.msk.msra.mxu1 %vm10672_vm4, %v10075_v58  ;;  %10087 = vmatpush3.bf16.msk.msra.mxu0 %vm10672_vm4, %v10085_v54 }
 0xec7   :  { %10088 = vmatprep.subr.bf16.mxu1 %v10577_v16  ;;  %10099 = vmatprep.subr.bf16.mxu0 %v10098_v33 }
 0xec9   :  { %8465 = vmatmul.mubr.msk.f32.vlgmr.msra.gmra.mrb[66].mxu1 %vm167_vm8, %v6653_v42  ;;  %9153 = vmatmul.mubr.msk.f32.vlgmr.msra.gmra.mrb[68].mxu0 %vm167_vm8, %v6653_v42  ;;  %v7164_v42 = vld [vmem:[%s12511_s23 + $0x28] sm:$0xff] }
 0xeca   :  { %10090 = vmatpush3.bf16.msra.mxu1 %v10785_v43  ;;  %9167 = vmatprep.mubr.msk.f32.mxu1 %vm10578_vm9, %v10575_v1  ;;  %v10126_v24 = vpack.c.bf16 %v7171_v32, %v7164_v42  ;;  %v7176_v42 = vld [vmem:[%s12511_s23 + $0x88] sm:$0xff]  ;;  %v7183_v32 = vld [vmem:[%s12511_s23 + $0xc0] sm:$0xff] }
 0xecb   :  { %10091 = vmatprep.subr.bf16.mxu1 %v10577_v16  ;;  %7289 = vmatprep.mubr.f32.mxu0 %v10575_v1 }
 0xecc   :  { %10101 = vmatpush1.bf16.msra.mxu0 %v10100_v29 }
 0xecd   :  { %10103 = vmatprep.subr.bf16.mxu0 %v10102_v23 }
 0xece   :  { %10093 = vmatpush3.bf16.msra.mxu1 %v10795_v46 }
 0xecf   :  { %10094 = vmatprep.subr.bf16.mxu1 %v10577_v16 }
 0xed0   :  { %10105 = vmatpush1.bf16.msra.mxu0 %v10104_v6  ;;  %v7670_v6 = vld [vmem:[%s12645_s29 + $0x48] sm:$0xff] }
 0xed1   :  { %10108 = vmatprep.subr.msk.bf16.mxu0 %vm10672_vm4, %v10106_v28 }
 0xed2   :  { %10097 = vmatpush3.bf16.msk.msra.mxu1 %vm10672_vm4, %v10805_v49 }
 0xed3   :  { %10113 = vmatprep.subr.bf16.mxu1 %v10112_v27 }
 0xed4   :  { %10111 = vmatpush1.bf16.msk.msra.mxu0 %vm10672_vm4, %v10109_v9 }
 0xed5   :  { %10127 = vmatprep.subr.bf16.mxu0 %v10126_v24 }
 0xf79   :  { %v6603_v35 = vpop.f32.mrb[64].mxu0 }
 0xf7a   :  { %v12539_v3 = vadd.f32 %v12536_v50, %v6603_v35  ;;  %v9139_v14 = vpop.f32.mrb[65].mxu0  ;;  %v7127_v35 = vstv %s12505_s21 }
 0xf7b   :  { %vm12571_vm0 = vcmp.eq.s32.totalorder %v10650_v2, %v7127_v35 }
 0xf7c   :  { %v6607_v40 = vsel %vm582_vm12, %v12539_v3, -inf }
 0xf7d   :  { %6608 = vmax.xlane.f32.xlu0 %v6607_v40 }
 0xf90   :  { %v6789_v31 = vpop.f32.mrb[64].mxu1  ;;  %v6860_v0 = vpop.f32.mrb[66].mxu0 }
 0xf91   :  { %v6791_v13 = vpop.f32.mrb[65].mxu1  ;;  %v6862_v57 = vpop.f32.mrb[67].mxu0 }
 0xf92   :  { %v7006_v10 = vadd.f32 %v6862_v57, %v6789_v31  ;;  %v10116_v31 = vpack.c.bf16 %v7183_v32, %v7176_v42  ;;  %v7172_v42 = vld [vmem:[%s12511_s23 + $0x68] sm:$0xff]  ;;  %v7178_v32 = vld [vmem:[%s12511_s23 + $0x98] sm:$0xff] }
 0xf94   :  { %v8468_v20 = vmul.f32 -1.442695, %v7006_v10  ;;  %v7190_v10 = vld [vmem:[%s12511_s23 + $0xf8] sm:$0xff] }
 0xf96   :  { %10364 = vpow2.f32 %v8468_v20  ;;  %v7197_v20 = vld [vmem:[%s12511_s23 + $0x130] sm:$0x3] }
 0xf9c   :  { %v6931_v58 = vpop.f32.mrb[66].mxu1  ;;  %v7002_v54 = vpop.f32.mrb[68].mxu0 }
 0xf9d   :  { %v7007_v52 = vadd.f32 %v6931_v58, %v6791_v13  ;;  %v6933_v48 = vpop.f32.mrb[67].mxu1  ;;  %v9154_v51 = vpop.f32.mrb[69].mxu0  ;;  %v7034_v23 = vrot.slane %v7002_v54, %v10839_v37  ;;  %v7182_v13 = vld [vmem:[%s12511_s23 + $0xb8] sm:$0xff] }
 0xf9e   :  { %v7189_v51 = vld [vmem:[%s12511_s23 + $0xf0] sm:$0xff] }
 0xf9f   :  { %v8469_v33 = vmul.f32 -1.442695, %v7007_v52  ;;  %v12547_v19 = vsel %vm12416_vm13, %v7034_v23, %v12413_v22  ;;  %v7161_v22 = vld [vmem:[%s12511_s23 + $0x10] sm:$0xff] }
 0xfa0   :  { %v10365_v61 = vpop.eup %10364  ;;  %v7143_v25 = vsel %vm12550_vm15, %v12547_v19, 0.0  ;;  %v10114_v14 = vpack.c.bf16 %v7168_v44, %v7161_v22  ;;  %v7163_v22 = vld [vmem:[%s12511_s23 + $0x20] sm:$0xff] }
 0xfa1   :  { %v7014_v15 = vadd.f32 1.0, %v10365_v61  ;;  %10366 = vpow2.f32 %v8469_v33  ;;  %v7144_v26 = vsel %vm97_vm1, %v7143_v25, 0.0  ;;  %v7196_v33 = vld [vmem:[%s12511_s23 + $0x128] sm:$0x3] }
 0xfa2   :  { %v7145_v9 = vrot.slane %v7144_v26, 4 }
 0xfa3   :  { %10368 = vrcp.f32 %v7014_v15 }
 0xfa4   :  { %v7146_v57 = vadd.f32 %v7145_v9, %v7144_v26  ;;  %v7165_v9 = vld [vmem:[%s12511_s23 + $0x30] sm:$0xff] }
 0xfa6   :  { %v7147_v61 = vrot.slane %v7146_v57, 2 }
 0xfa8   :  { %v7148_v53 = vadd.f32 %v7147_v61, %v7146_v57  ;;  %v7184_v57 = vld [vmem:[%s12511_s23 + $0xc8] sm:$0xff] }
 0xfab   :  { %v10367_v45 = vpop.eup %10366 }
 0xfac   :  { %v7015_v12 = vadd.f32 1.0, %v10367_v45 }
 0xfad   :  { %v10369_v27 = vpop.eup %10368 }
 0xfae   :  { %v7020_v29 = vmul.f32 %v10369_v27, %v6933_v48  ;;  %v10120_v48 = vpack.c.bf16 %v7197_v20, %v7190_v10  ;;  %v7179_v10 = vld [vmem:[%s12511_s23 + $0xa0] sm:$0xff]  ;;  %v7186_v20 = vld [vmem:[%s12511_s23 + $0xd8] sm:$0xff] }
 0xfb0   :  { %v7021_v21 = vadd.f32 %v7020_v29, %v6860_v0  ;;  %v7175_v0 = vld [vmem:[%s12511_s23 + $0x80] sm:$0xff]  ;;  %v10123_v29 = vpack.c.bf16 %v7196_v33, %v7189_v51  ;;  %v10144_v51 = vpack.c.bf16 %v7186_v20, %v7179_v10 }
 0xfb1   :  { %v10118_v54 = vpack.c.bf16 %v7182_v13, %v7175_v0  ;;  %v7191_v33 = vld [vmem:[%s12511_s23 + $0x100] sm:$0xff] }
 0xfb2   :  { %10370 = vtanh.f32 %v7021_v21  ;;  %v7149_v21 = vrot.slane %v7148_v53, 1  ;;  %v7673_v10 = vld [vmem:[%s12645_s29 + $0x60] sm:$0xff] }
 0xfb3   :  { %10372 = vrcp.f32 %v7015_v12 }
 0xfb4   :  { %v7150_v26 = vadd.f32 %v7149_v21, %v7148_v53  ;;  %v7664_v21 = vld [vmem:[%s12645_s29 + $0x18] sm:$0xff] }
 0xfbc   :  { %v10371_v28 = vpop.eup %10370 }
 0xfbd   :  { %v7023_v63 = vsub.f32 %v12458_v34, %v10371_v28  ;;  %v10373_v5 = vpop.eup %10372 }
 0xfbf   :  { %v7024_v24 = vmul.f32 %v10373_v5, %v7023_v63  ;;  %v7153_v63 = vmul.f32 %v10723_v59, %v7152_v18  ;;  %v7170_v5 = vld [vmem:[%s12511_s23 + $0x58] sm:$0xff]  ;;  %v7671_v18 = vld [vmem:[%s12645_s29 + $0x50] sm:$0xff] }
 0xfc1   :  { %v7025_v40 = vadd.f32 %v10371_v28, %v7024_v24  ;;  %v7185_v24 = vld [vmem:[%s12511_s23 + $0xd0] sm:$0xff] }
 0xfc2   :  { %v10130_v13 = vpack.c.bf16 %v7185_v24, %v7178_v32  ;;  %v7682_v32 = vld [vmem:[%s12645_s29 + $0xa8] sm:$0xff] }
 0xfc3   :  { %v7029_v34 = vrot.slane %v7025_v40, %v10839_v37  ;;  %9168 = vmatmul.mubr.msk.f32.vlgmr.msra.gmra.mrb[68].mxu1 %vm167_vm8, %v7025_v40  ;;  %v10141_v40 = vpack.c.bf16 %v7172_v42, %v7165_v9  ;;  %v7675_v42 = vld [vmem:[%s12645_s29 + $0x70] sm:$0xff] }
 0xfc4   :  { %10115 = vmatpush1.bf16.msra.mxu1 %v10114_v14  ;;  %7360 = vmatprep.mubr.f32.mxu1 %v10575_v1  ;;  %v10128_v14 = vpack.c.bf16 %v7170_v5, %v7163_v22  ;;  %v7683_v5 = vld [vmem:[%s12645_s29 + $0xb0] sm:$0xff]  ;;  %v10166_v24 = vpack.c.bf16 %v7682_v32, %v7675_v42  ;;  %v7641_v32 = vstv %s8492_s5 }
 0xfc5   :  { %v12579_v52 = vsel %vm12437_vm14, %v7029_v34, %v12445_v56  ;;  %10117 = vmatprep.subr.bf16.mxu1 %v10116_v31  ;;  %v7177_v31 = vld [vmem:[%s12511_s23 + $0x90] sm:$0xff]  ;;  %v7192_v34 = vld [vmem:[%s12511_s23 + $0x108] sm:$0xff]  ;;  %vm12679_vm2 = vcmp.eq.s32.totalorder %v10650_v2, %v7641_v32  ;;  %v7654_v32 = vstv %s8493_s30 }
 0xfc6   :  { %v7131_v15 = vsel %vm12571_vm0, %v12579_v52, 0.0 }
 0xfc7   :  { %v7132_v45 = vsel %vm97_vm1, %v7131_v15, 0.0  ;;  %v7198_v15 = vld [vmem:[%s12511_s23 + $0x138] sm:$0x3] }
 0xfc8   :  { %v7133_v27 = vrot.slane %v7132_v45, 4  ;;  %10119 = vmatpush1.bf16.msra.mxu1 %v10118_v54  ;;  %v7199_v54 = vld [vmem:[%s12511_s23 + $0x140] sm:$0x3] }
 0xfc9   :  { %10122 = vmatprep.subr.msk.bf16.mxu1 %vm10672_vm4, %v10120_v48  ;;  %v10132_v48 = vpack.c.bf16 %v7184_v57, %v7177_v31  ;;  %v10134_v61 = vpack.c.bf16 %v7199_v54, %v7192_v34  ;;  %v7689_v31 = vld [vmem:[%s12645_s29 + $0xe0] sm:$0xff]  ;;  %v7666_v57 = vld [vmem:[%s12645_s29 + $0x28] sm:$0xff] }
 0xfca   :  { %v7134_v56 = vadd.f32 %v7133_v27, %v7132_v45  ;;  %v7193_v45 = vld [vmem:[%s12511_s23 + $0x110] sm:$0xff]  ;;  %v7200_v27 = vld [vmem:[%s12511_s23 + $0x148] sm:$0x3]  ;;  %v10188_v20 = vpack.c.bf16 %v7673_v10, %v7666_v57 }
 0xfcb   :  { %v10147_v53 = vpack.c.bf16 %v7200_v27, %v7193_v45  ;;  %v7678_v10 = vld [vmem:[%s12645_s29 + $0x88] sm:$0xff] }
 0xfcc   :  { %10125 = vmatpush1.bf16.msk.msra.mxu1 %vm10672_vm4, %v10123_v29  ;;  %v7135_v12 = vrot.slane %v7134_v56, 2  ;;  %v10137_v29 = vpack.c.bf16 %v7198_v15, %v7191_v33 }
 0xfcd   :  { %10140 = vmatprep.subr.bf16.mxu1 %v10577_v16 }
 0xfce   :  { %v7136_v23 = vadd.f32 %v7135_v12, %v7134_v56  ;;  %v7662_v56 = vld [vmem:[%s12645_s29 + $0x8] sm:$0xff]  ;;  %v7669_v12 = vld [vmem:[%s12645_s29 + $0x40] sm:$0xff] }
 0xfd0   :  { %v7137_v25 = vrot.slane %v7136_v23, 1 }
 0xfd2   :  { %v12592_v28 = vadd.f32 %v7137_v25, %v7136_v23  ;;  %v10160_v23 = vpack.c.bf16 %v7669_v12, %v7662_v56  ;;  %v7661_v25 = vld [vmem:[%s12645_s29] sm:$0xff] }
 0xfd4   :  { %v7151_v44 = vadd.f32 %v7150_v26, %v12592_v28  ;;  %v7668_v26 = vld [vmem:[%s12645_s29 + $0x38] sm:$0xff] }
 0xfd5   :  { %v10162_v22 = vpack.c.bf16 %v7668_v26, %v7661_v25 }
 0xfd6   :  { %v7154_v35 = vadd.f32 %v7153_v63, %v7151_v44  ;;  %v10174_v63 = vpack.c.bf16 %v7671_v18, %v7664_v21  ;;  %v7676_v44 = vld [vmem:[%s12645_s29 + $0x78] sm:$0xff] }
 0xfd7   :  { %v10164_v9 = vpack.c.bf16 %v7683_v5, %v7676_v44 }
 0xfd8   :  { %v7155_v0 = vadd.f32 %v10744_v17, %v7154_v35  ;;  %v7690_v35 = vld [vmem:[%s12645_s29 + $0xe8] sm:$0xff] }
 0xfda   :  { %8478 = vmatmul.mubr.msk.f32.vlgmr.msra.gmra.mrb[70].mxu0 %vm167_vm8, %v7155_v0  ;;  %8481 = vmatmul.mubr.msk.f32.vlgmr.msra.gmra.mrb[70].mxu1 %vm167_vm8, %v7155_v0 }
 0xfdb   :  { %10129 = vmatpush1.bf16.msra.mxu0 %v10128_v14  ;;  %10142 = vmatpush3.bf16.msra.mxu1 %v10141_v40  ;;  %v7697_v14 = vld [vmem:[%s12645_s29 + $0x120] sm:$0x3] }
 0xfdc   :  { %10131 = vmatprep.subr.bf16.mxu0 %v10130_v13  ;;  %10143 = vmatprep.subr.bf16.mxu1 %v10577_v16  ;;  %v10168_v40 = vpack.c.bf16 %v7697_v14, %v7690_v35 }
 0xfdd   :  { %7431 = vmatprep.mubr.f32.mxu0 %v10575_v1  ;;  %9182 = vmatprep.mubr.msk.f32.mxu1 %vm10578_vm9, %v10575_v1 }
 0xfdf   :  { %10133 = vmatpush1.bf16.msra.mxu0 %v10132_v48  ;;  %10145 = vmatpush3.bf16.msra.mxu1 %v10144_v51 }
 0xfe0   :  { %10136 = vmatprep.subr.msk.bf16.mxu0 %vm10672_vm4, %v10134_v61  ;;  %10146 = vmatprep.subr.bf16.mxu1 %v10577_v16 }
 0xfe3   :  { %10139 = vmatpush1.bf16.msk.msra.mxu0 %vm10672_vm4, %v10137_v29  ;;  %10149 = vmatpush3.bf16.msk.msra.mxu1 %vm10672_vm4, %v10147_v53 }
 0xfe4   :  { %10150 = vmatprep.subr.bf16.mxu0 %v10577_v16  ;;  %10161 = vmatprep.subr.bf16.mxu1 %v10160_v23 }
 0xfe6   :  { %8484 = vmatmul.mubr.msk.f32.vlgmr.msra.gmra.mrb[72].mxu0 %vm167_vm8, %v7155_v0  ;;  %9183 = vmatmul.mubr.msk.f32.vlgmr.msra.gmra.mrb[72].mxu1 %vm167_vm8, %v7155_v0  ;;  %v7696_v0 = vld [vmem:[%s12645_s29 + $0x118] sm:$0x3] }
 0xfe7   :  { %10152 = vmatpush3.bf16.msra.mxu0 %v10785_v43  ;;  %9197 = vmatprep.mubr.msk.f32.mxu0 %vm10578_vm9, %v10575_v1  ;;  %v10171_v13 = vpack.c.bf16 %v7696_v0, %v7689_v31 }
 0xfe8   :  { %10153 = vmatprep.subr.bf16.mxu0 %v10577_v16  ;;  %7791 = vmatprep.mubr.f32.mxu1 %v10575_v1 }
 0xfe9   :  { %10163 = vmatpush1.bf16.msra.mxu1 %v10162_v22 }
 0xfea   :  { %10165 = vmatprep.subr.bf16.mxu1 %v10164_v9 }
 0xfeb   :  { %10155 = vmatpush3.bf16.msra.mxu0 %v10795_v46 }
 0xfec   :  { %10156 = vmatprep.subr.bf16.mxu0 %v10577_v16 }
 0xfed   :  { %10167 = vmatpush1.bf16.msra.mxu1 %v10166_v24 }
 0xfee   :  { %10170 = vmatprep.subr.msk.bf16.mxu1 %vm10672_vm4, %v10168_v40 }
 0xfef   :  { %10159 = vmatpush3.bf16.msk.msra.mxu0 %vm10672_vm4, %v10805_v49 }
 0xff0   :  { %10175 = vmatprep.subr.bf16.mxu0 %v10174_v63 }
 0xff1   :  { %10173 = vmatpush1.bf16.msk.msra.mxu1 %vm10672_vm4, %v10171_v13 }
 0xff2   :  { %10189 = vmatprep.subr.bf16.mxu1 %v10188_v20  ;;  %v7685_v20 = vld [vmem:[%s12645_s29 + $0xc0] sm:$0xff] }
0x1096   :  { %v7105_v34 = vpop.f32.mrb[68].mxu1 }
0x1097   :  { %v12668_v54 = vadd.f32 %v12536_v50, %v7105_v34  ;;  %v9169_v48 = vpop.f32.mrb[69].mxu1 }
0x1098   :  { %v7629_v48 = vstv %s12639_s2 }
0x1099   :  { %v7109_v51 = vsel %vm582_vm12, %v12668_v54, -inf  ;;  %vm12700_vm3 = vcmp.eq.s32.totalorder %v10650_v2, %v7629_v48 }
0x109a   :  { %7110 = vmax.xlane.f32.xlu1 %v7109_v51 }
0x10ad   :  { %v7291_v33 = vpop.f32.mrb[70].mxu0  ;;  %v7362_v61 = vpop.f32.mrb[70].mxu1 }
0x10ae   :  { %v7293_v15 = vpop.f32.mrb[71].mxu0  ;;  %v7364_v45 = vpop.f32.mrb[71].mxu1 }
0x10af   :  { %v7508_v27 = vadd.f32 %v7364_v45, %v7291_v33  ;;  %v7684_v45 = vld [vmem:[%s12645_s29 + $0xb8] sm:$0xff] }
0x10b1   :  { %v8487_v29 = vmul.f32 -1.442695, %v7508_v27 }
0x10b3   :  { %10374 = vpow2.f32 %v8487_v29  ;;  %v7692_v29 = vld [vmem:[%s12645_s29 + $0xf8] sm:$0xff] }
0x10b9   :  { %v7433_v53 = vpop.f32.mrb[72].mxu0  ;;  %v7504_v56 = vpop.f32.mrb[72].mxu1 }
0x10ba   :  { %v7509_v12 = vadd.f32 %v7433_v53, %v7293_v15  ;;  %v7435_v21 = vpop.f32.mrb[73].mxu0  ;;  %v9184_v23 = vpop.f32.mrb[73].mxu1  ;;  %v7536_v42 = vrot.slane %v7504_v56, %v10839_v37  ;;  %v7677_v15 = vld [vmem:[%s12645_s29 + $0x80] sm:$0xff]  ;;  %v7699_v53 = vld [vmem:[%s12645_s29 + $0x130] sm:$0x3] }
0x10bb   :  { %v10182_v23 = vpack.c.bf16 %v7699_v53, %v7692_v29  ;;  %v7688_v29 = vld [vmem:[%s12645_s29 + $0xd8] sm:$0xff]  ;;  %v7694_v53 = vld [vmem:[%s12645_s29 + $0x108] sm:$0xff] }
0x10bc   :  { %v8488_v18 = vmul.f32 -1.442695, %v7509_v12  ;;  %v12676_v24 = vsel %vm12550_vm15, %v7536_v42, %v12547_v19  ;;  %v7663_v19 = vld [vmem:[%s12645_s29 + $0x10] sm:$0xff]  ;;  %v10180_v12 = vpack.c.bf16 %v7684_v45, %v7677_v15 }
0x10bd   :  { %v10375_v25 = vpop.eup %10374  ;;  %v7645_v14 = vsel %vm12679_vm2, %v12676_v24, 0.0  ;;  %v10176_v51 = vpack.c.bf16 %v7670_v6, %v7663_v19  ;;  %v7665_v19 = vld [vmem:[%s12645_s29 + $0x20] sm:$0xff] }
0x10be   :  { %v7516_v26 = vadd.f32 1.0, %v10375_v25  ;;  %10376 = vpow2.f32 %v8488_v18  ;;  %v7646_v40 = vsel %vm97_vm1, %v7645_v14, 0.0  ;;  %v7691_v18 = vld [vmem:[%s12645_s29 + $0xf0] sm:$0xff]  ;;  %v7698_v25 = vld [vmem:[%s12645_s29 + $0x128] sm:$0x3] }
0x10bf   :  { %v7647_v57 = vrot.slane %v7646_v40, 4 }
0x10c0   :  { %10378 = vrcp.f32 %v7516_v26 }
0x10c1   :  { %v7648_v27 = vadd.f32 %v7647_v57, %v7646_v40  ;;  %v7667_v57 = vld [vmem:[%s12645_s29 + $0x30] sm:$0xff] }
0x10c3   :  { %v7649_v26 = vrot.slane %v7648_v27, 2 }
0x10c5   :  { %v7650_v58 = vadd.f32 %v7649_v26, %v7648_v27  ;;  %v7681_v27 = vld [vmem:[%s12645_s29 + $0xa0] sm:$0xff]  ;;  %v7695_v26 = vld [vmem:[%s12645_s29 + $0x110] sm:$0xff] }
0x10c8   :  { %v10377_v63 = vpop.eup %10376 }
0x10c9   :  { %v7517_v5 = vadd.f32 1.0, %v10377_v63 }
0x10ca   :  { %v10379_v22 = vpop.eup %10378 }
0x10cb   :  { %v7522_v44 = vmul.f32 %v10379_v22, %v7435_v21 }
0x10cd   :  { %v7523_v9 = vadd.f32 %v7522_v44, %v7362_v61  ;;  %v10178_v61 = vpack.c.bf16 %v7685_v20, %v7678_v10  ;;  %v10185_v44 = vpack.c.bf16 %v7698_v25, %v7691_v18  ;;  %v7674_v10 = vld [vmem:[%s12645_s29 + $0x68] sm:$0xff]  ;;  %v7680_v20 = vld [vmem:[%s12645_s29 + $0x98] sm:$0xff]  ;;  %v7693_v18 = vld [vmem:[%s12645_s29 + $0x100] sm:$0xff] }
0x10ce   :  { %v7700_v25 = vld [vmem:[%s12645_s29 + $0x138] sm:$0x3] }
0x10cf   :  { %10380 = vtanh.f32 %v7523_v9  ;;  %v7651_v9 = vrot.slane %v7650_v58, 1 }
0x10d0   :  { %10382 = vrcp.f32 %v7517_v5 }
0x10d1   :  { %v7652_v40 = vadd.f32 %v7651_v9, %v7650_v58 }
0x10d9   :  { %v10381_v31 = vpop.eup %10380 }
0x10da   :  { %v7525_v0 = vsub.f32 %v12592_v28, %v10381_v31  ;;  %v10383_v13 = vpop.eup %10382 }
0x10dc   :  { %v7526_v34 = vmul.f32 %v10383_v13, %v7525_v0  ;;  %v7655_v0 = vmul.f32 %v10723_v59, %v7654_v32  ;;  %v7672_v13 = vld [vmem:[%s12645_s29 + $0x58] sm:$0xff]  ;;  %v7686_v59 = vld [vmem:[%s12645_s29 + $0xc8] sm:$0xff] }
0x10de   :  { %v7527_v33 = vadd.f32 %v10381_v31, %v7526_v34  ;;  %v7687_v34 = vld [vmem:[%s12645_s29 + $0xd0] sm:$0xff] }
0x10df   :  { %v10192_v45 = vpack.c.bf16 %v7687_v34, %v7680_v20 }
0x10e0   :  { %v7531_v28 = vrot.slane %v7527_v33, %v10839_v37  ;;  %9198 = vmatmul.mubr.msk.f32.vlgmr.msra.gmra.mrb[74].mxu0 %vm167_vm8, %v7527_v33  ;;  %v10203_v33 = vpack.c.bf16 %v7674_v10, %v7667_v57 }
0x10e1   :  { %10177 = vmatpush1.bf16.msra.mxu0 %v10176_v51  ;;  %7862 = vmatprep.mubr.f32.mxu0 %v10575_v1  ;;  %v10190_v51 = vpack.c.bf16 %v7672_v13, %v7665_v19 }
0x10e2   :  { %v12708_v21 = vsel %vm12571_vm0, %v7531_v28, %v12579_v52  ;;  %10179 = vmatprep.subr.bf16.mxu0 %v10178_v61  ;;  %v7679_v61 = vld [vmem:[%s12645_s29 + $0x90] sm:$0xff]  ;;  %v7701_v28 = vld [vmem:[%s12645_s29 + $0x140] sm:$0x3] }
0x10e3   :  { %v7633_v2 = vsel %vm12700_vm3, %v12708_v21, 0.0 }
0x10e4   :  { %v7634_v63 = vsel %vm97_vm1, %v7633_v2, 0.0  ;;  %v7702_v2 = vld [vmem:[%s12645_s29 + $0x148] sm:$0x3] }
0x10e5   :  { %v7635_v22 = vrot.slane %v7634_v63, 4  ;;  %10181 = vmatpush1.bf16.msra.mxu0 %v10180_v12  ;;  %v10194_v12 = vpack.c.bf16 %v7686_v59, %v7679_v61 }
0x10e6   :  { %10184 = vmatprep.subr.msk.bf16.mxu0 %vm10672_vm4, %v10182_v23  ;;  %v10206_v23 = vpack.c.bf16 %v7688_v29, %v7681_v27 }
0x10e7   :  { %v7636_v52 = vadd.f32 %v7635_v22, %v7634_v63  ;;  %v10199_v63 = vpack.c.bf16 %v7700_v25, %v7693_v18  ;;  %v10209_v22 = vpack.c.bf16 %v7702_v2, %v7695_v26 }
0x10e9   :  { %10187 = vmatpush1.bf16.msk.msra.mxu0 %vm10672_vm4, %v10185_v44  ;;  %v7637_v5 = vrot.slane %v7636_v52, 2  ;;  %v585_v44 = vpop.xlane.xlu0 %584 }
0x10ea   :  { %10202 = vmatprep.subr.bf16.mxu0 %v10577_v16  ;;  %v586_v58 = vsub.f32 %v10971_v36, %v585_v44 }
0x10eb   :  { %v7638_v42 = vadd.f32 %v7637_v5, %v7636_v52  ;;  %v1589_v5 = vpop.xlane.xlu1 %1588 }
0x10ec   :  { %v1590_v9 = vsub.f32 %v11229_v30, %v1589_v5 }
0x10ed   :  { %v7639_v14 = vrot.slane %v7638_v42, 1  ;;  %v12768_v52 = vpop.xlane.xlu0 %1086 }
0x10ef   :  { %v12721_v31 = vadd.f32 %v7639_v14, %v7638_v42  ;;  %v1591_v42 = vmul.f32 1.442695, %v1590_v9 }
0x10f1   :  { %v7653_v6 = vadd.f32 %v7652_v40, %v12721_v31 }
0x10f3   :  { %v7656_v48 = vadd.f32 %v7655_v0, %v7653_v6 }
0x10f5   :  { %v7657_v15 = vadd.f32 %v10744_v17, %v7656_v48  ;;  %v10196_v17 = vpack.c.bf16 %v7701_v28, %v7694_v53 }
0x10f7   :  { %8497 = vmatmul.mubr.msk.f32.vlgmr.msra.gmra.mrb[74].mxu1 %vm167_vm8, %v7657_v15  ;;  %8500 = vmatmul.mubr.msk.f32.vlgmr.msra.gmra.mrb[76].mxu0 %vm167_vm8, %v7657_v15 }
0x10f8   :  { %10191 = vmatpush1.bf16.msra.mxu1 %v10190_v51  ;;  %10204 = vmatpush3.bf16.msra.mxu0 %v10203_v33 }
0x10f9   :  { %10193 = vmatprep.subr.bf16.mxu1 %v10192_v45  ;;  %10205 = vmatprep.subr.bf16.mxu0 %v10577_v16 }
0x10fa   :  { %7933 = vmatprep.mubr.f32.mxu1 %v10575_v1  ;;  %9212 = vmatprep.mubr.msk.f32.mxu0 %vm10578_vm9, %v10575_v1 }
0x10fc   :  { %10195 = vmatpush1.bf16.msra.mxu1 %v10194_v12  ;;  %10207 = vmatpush3.bf16.msra.mxu0 %v10206_v23 }
0x10fd   :  { %10198 = vmatprep.subr.msk.bf16.mxu1 %vm10672_vm4, %v10196_v17  ;;  %10208 = vmatprep.subr.bf16.mxu0 %v10577_v16 }
0x1100   :  { %10201 = vmatpush1.bf16.msk.msra.mxu1 %vm10672_vm4, %v10199_v63  ;;  %10211 = vmatpush3.bf16.msk.msra.mxu0 %vm10672_vm4, %v10209_v22 }
0x1101   :  { %10212 = vmatprep.subr.bf16.mxu1 %v10577_v16 }
0x1103   :  { %8503 = vmatmul.mubr.msk.f32.vlgmr.msra.gmra.mrb[76].mxu1 %vm167_vm8, %v7657_v15  ;;  %9213 = vmatmul.mubr.msk.f32.vlgmr.msra.gmra.mrb[78].mxu0 %vm167_vm8, %v7657_v15 }
0x1104   :  { %10214 = vmatpush3.bf16.msra.mxu1 %v10785_v43  ;;  %9227 = vmatprep.mubr.msk.f32.mxu1 %vm10578_vm9, %v10575_v1  ;;  %v587_v43 = vmul.f32 1.442695, %v586_v58  ;;  %v2593_v1 = vpop.xlane.xlu0 %2592 }
0x1105   :  { %10215 = vmatprep.subr.bf16.mxu1 %v10577_v16 }
0x1106   :  { %10384 = vpow2.f32 %v587_v43 }
0x1107   :  { %10386 = vpow2.f32 %v1591_v42 }
0x1108   :  { %10217 = vmatpush3.bf16.msra.mxu1 %v10795_v46  ;;  %v2594_v46 = vsub.f32 %v11492_v47, %v2593_v1  ;;  %v3597_v32 = vpop.xlane.xlu0 %3596 }
0x1109   :  { %10218 = vmatprep.subr.bf16.mxu1 %v10577_v16  ;;  %v3598_v8 = vsub.f32 %v11755_v55, %v3597_v32 }
0x110a   :  { %v2595_v16 = vmul.f32 1.442695, %v2594_v46 }
0x110b   :  { %v3599_v0 = vmul.f32 1.442695, %v3598_v8 }
0x110c   :  { %10221 = vmatpush3.bf16.msk.msra.mxu1 %vm10672_vm4, %v10805_v49  ;;  %v4601_v49 = vpop.xlane.xlu0 %4600  ;;  %10388 = vpow2.f32 %v2595_v16 }
0x110d   :  { %v4602_v30 = vsub.f32 %v12013_v60, %v4601_v49  ;;  %10390 = vpow2.f32 %v3599_v0 }
0x110f   :  { %v4603_v13 = vmul.f32 1.442695, %v4602_v30 }
0x1110   :  { %v5605_v19 = vpop.xlane.xlu0 %5604  ;;  %v12779_v47 = vpop.eup %10384 }
0x1111   :  { %v5606_v55 = vsub.f32 %v12276_v39, %v5605_v19  ;;  %v589_v10 = vsel %vm582_vm12, %v12779_v47, 0.0  ;;  %v12784_v20 = vpop.eup %10386  ;;  %10392 = vpow2.f32 %v4603_v13 }
0x1112   :  { %v1593_v48 = vsel %vm582_vm12, %v12784_v20, 0.0 }
0x1113   :  { %v5607_v60 = vmul.f32 1.442695, %v5606_v55 }
0x1114   :  { %v6609_v57 = vpop.xlane.xlu0 %6608 }
0x1115   :  { %v6610_v34 = vsub.f32 %v12539_v3, %v6609_v57  ;;  %10394 = vpow2.f32 %v5607_v60 }
0x1116   :  { %v12789_v51 = vpop.eup %10388 }
0x1117   :  { %v6611_v33 = vmul.f32 1.442695, %v6610_v34  ;;  %v2597_v39 = vsel %vm582_vm12, %v12789_v51, 0.0  ;;  %v12793_v61 = vpop.eup %10390 }
0x1118   :  { %v3601_v15 = vsel %vm582_vm12, %v12793_v61, 0.0 }
0x1119   :  { %10396 = vpow2.f32 %v6611_v33 }
0x111b   :  { %v12797_v45 = vpop.eup %10392 }
0x111c   :  { %v4605_v27 = vsel %vm582_vm12, %v12797_v45, 0.0 }
0x111f   :  { %v12801_v29 = vpop.eup %10394 }
0x1120   :  { %v5609_v18 = vsel %vm582_vm12, %v12801_v29, 0.0 }
0x1123   :  { %v12805_v17 = vpop.eup %10396 }
0x1124   :  { %v6613_v25 = vsel %vm582_vm12, %v12805_v17, 0.0 }
0x11b3   :  { %v7607_v14 = vpop.f32.mrb[74].mxu0 }
0x11b4   :  { %v12774_v36 = vadd.f32 %v12536_v50, %v7607_v14  ;;  %v9199_v40 = vpop.f32.mrb[75].mxu0 }
0x11b6   :  { %v7611_v6 = vsel %vm582_vm12, %v12774_v36, -inf }
0x11b7   :  { %7612 = vmax.xlane.f32.xlu0 %v7611_v6 }
0x11bb   :  { %590 = vadd.xlane.f32.xlu0 %v589_v10 }
0x11bf   :  { %1594 = vadd.xlane.f32.xlu0 %v1593_v48 }
0x11c3   :  { %2598 = vadd.xlane.f32.xlu0 %v2597_v39 }
0x11c7   :  { %3602 = vadd.xlane.f32.xlu0 %v3601_v15 }
0x11ca   :  { %v7793_v3 = vpop.f32.mrb[74].mxu1  ;;  %v7864_v59 = vpop.f32.mrb[76].mxu0 }
0x11cb   :  { %4606 = vadd.xlane.f32.xlu0 %v4605_v27  ;;  %v7795_v53 = vpop.f32.mrb[75].mxu1  ;;  %v7866_v28 = vpop.f32.mrb[77].mxu0 }
0x11cc   :  { %v8010_v12 = vadd.f32 %v7866_v28, %v7793_v3 }
0x11ce   :  { %v8506_v23 = vmul.f32 -1.442695, %v8010_v12 }
0x11cf   :  { %5610 = vadd.xlane.f32.xlu0 %v5609_v18 }
0x11d0   :  { %10398 = vpow2.f32 %v8506_v23 }
0x11d3   :  { %6614 = vadd.xlane.f32.xlu0 %v6613_v25 }
0x11d6   :  { %v7935_v26 = vpop.f32.mrb[76].mxu1  ;;  %v8006_v2 = vpop.f32.mrb[78].mxu0 }
0x11d7   :  { %v8011_v63 = vadd.f32 %v7935_v26, %v7795_v53  ;;  %v8038_v22 = vrot.slane %v8006_v2, %v10839_v37  ;;  %v7937_v44 = vpop.f32.mrb[77].mxu1  ;;  %v9214_v58 = vpop.f32.mrb[79].mxu0 }
0x11d9   :  { %v8507_v5 = vmul.f32 -1.442695, %v8011_v63  ;;  %v8039_v43 = vsel %vm12679_vm2, %v8038_v22, %v12676_v24 }
0x11da   :  { %v10399_v9 = vpop.eup %10398  ;;  %8129 = vst.msk [vmem:[#allocation11] sm:$0xf] %vm97_vm1, %v8039_v43 }
0x11db   :  { %v8018_v1 = vadd.f32 1.0, %v10399_v9  ;;  %10400 = vpow2.f32 %v8507_v5 }
0x11dd   :  { %10402 = vrcp.f32 %v8018_v1 }
0x11e5   :  { %v10401_v42 = vpop.eup %10400 }
0x11e6   :  { %v8019_v16 = vadd.f32 1.0, %v10401_v42 }
0x11e7   :  { %v10403_v46 = vpop.eup %10402 }
0x11e8   :  { %v8024_v32 = vmul.f32 %v10403_v46, %v7937_v44 }
0x11ea   :  { %v8025_v8 = vadd.f32 %v8024_v32, %v7864_v59 }
0x11ec   :  { %10404 = vtanh.f32 %v8025_v8 }
0x11ed   :  { %10406 = vrcp.f32 %v8019_v16 }
0x11f6   :  { %v10405_v49 = vpop.eup %10404 }
0x11f7   :  { %v8027_v14 = vsub.f32 %v12721_v31, %v10405_v49  ;;  %v10407_v40 = vpop.eup %10406 }
0x11f9   :  { %v8028_v0 = vmul.f32 %v10407_v40, %v8027_v14 }
0x11fb   :  { %v8029_v35 = vadd.f32 %v10405_v49, %v8028_v0  ;;  %v2091_v0 = vpop.xlane.xlu1 %2090 }
0x11fd   :  { %9228 = vmatmul.mubr.msk.f32.vlgmr.msra.gmra.mrb[78].mxu1 %vm167_vm8, %v8029_v35  ;;  %v8033_v24 = vrot.slane %v8029_v35, %v10839_v37 }
0x11ff   :  { %v8034_v30 = vsel %vm12700_vm3, %v8033_v24, %v12708_v21  ;;  %v3095_v24 = vpop.xlane.xlu1 %3094 }
0x1200   :  { %8128 = vst.msk [vmem:[#allocation9] sm:$0xf] %vm97_vm1, %v8034_v30 }
0x1244   :  { %v7613_v19 = vpop.xlane.xlu0 %7612 }
0x1245   :  { %v7614_v6 = vsub.f32 %v12774_v36, %v7613_v19  ;;  %v3096_v19 = vsub.f32 %v11621_v41, %v3095_v24 }
0x1247   :  { %v7615_v13 = vmul.f32 1.442695, %v7614_v6  ;;  %v4099_v6 = vpop.xlane.xlu1 %4098 }
0x1248   :  { %v591_v55 = vpop.xlane.xlu0 %590 }
0x1249   :  { %10408 = vpow2.f32 %v7615_v13  ;;  %v4100_v13 = vsub.f32 %v11884_v11, %v4099_v6 }
0x124a   :  { %10410 = vrcp.f32 %v591_v55 }
0x124c   :  { %v1595_v31 = vpop.xlane.xlu0 %1594 }
0x124d   :  { %10412 = vrcp.f32 %v1595_v31 }
0x1250   :  { %v2599_v57 = vpop.xlane.xlu0 %2598 }
0x1251   :  { %10414 = vrcp.f32 %v2599_v57 }
0x1253   :  { %v12822_v10 = vpop.eup %10408 }
0x1254   :  { %v10411_v37 = vpop.eup %10410  ;;  %v3603_v60 = vpop.xlane.xlu0 %3602  ;;  %v7617_v56 = vsel %vm582_vm12, %v12822_v10, 0.0 }
0x1255   :  { %v593_v21 = vmul.f32 %v10411_v37, %v591_v55  ;;  %10416 = vrcp.f32 %v3603_v60  ;;  %7618 = vadd.xlane.f32.xlu0 %v7617_v56  ;;  %v5103_v55 = vpop.xlane.xlu1 %5102 }
0x1257   :  { %v10413_v34 = vpop.eup %10412  ;;  %v594_v36 = vsub.f32 2.0, %v593_v21 }
0x1258   :  { %v1597_v48 = vmul.f32 %v10413_v34, %v1595_v31  ;;  %v4607_v33 = vpop.xlane.xlu0 %4606 }
0x1259   :  { %v595_v39 = vmul.f32 %v10411_v37, %v594_v36  ;;  %10418 = vrcp.f32 %v4607_v33 }
0x125a   :  { %v1598_v15 = vsub.f32 2.0, %v1597_v48 }
0x125b   :  { %v10415_v3 = vpop.eup %10414  ;;  %v596_v59 = vmul.f32 %v12779_v47, %v595_v39 }
0x125c   :  { %v1599_v27 = vmul.f32 %v10413_v34, %v1598_v15  ;;  %v2601_v53 = vmul.f32 %v10415_v3, %v2599_v57  ;;  %v5611_v28 = vpop.xlane.xlu0 %5610 }
0x125d   :  { %597 = vst [vmem:[#allocation8] sm:$0x1] %v596_v59  ;;  %10420 = vrcp.f32 %v5611_v28 }
0x125e   :  { %v1600_v12 = vmul.f32 %v12784_v20, %v1599_v27  ;;  %v2602_v23 = vsub.f32 2.0, %v2601_v53 }
0x125f   :  { %v10417_v18 = vpop.eup %10416 }
0x1260   :  { %1601 = vst [vmem:[#allocation8 + $0x2] sm:$0x1] %v1600_v12  ;;  %v2603_v25 = vmul.f32 %v10415_v3, %v2602_v23  ;;  %v3605_v26 = vmul.f32 %v10417_v18, %v3603_v60  ;;  %v6615_v2 = vpop.xlane.xlu0 %6614 }
0x1261   :  { %10422 = vrcp.f32 %v6615_v2 }
0x1262   :  { %v2604_v63 = vmul.f32 %v12789_v51, %v2603_v25  ;;  %v3606_v22 = vsub.f32 2.0, %v3605_v26 }
0x1263   :  { %v10419_v44 = vpop.eup %10418 }
0x1264   :  { %2605 = vst [vmem:[#allocation8 + $0x4] sm:$0x1] %v2604_v63  ;;  %v3607_v47 = vmul.f32 %v10417_v18, %v3606_v22  ;;  %v4609_v58 = vmul.f32 %v10419_v44, %v4607_v33 }
0x1266   :  { %v3608_v5 = vmul.f32 %v12793_v61, %v3607_v47  ;;  %v4610_v43 = vsub.f32 2.0, %v4609_v58  ;;  %v1088_v61 = vsub.f32 %v11100_v62, %v12768_v52  ;;  %v4101_v62 = vmul.f32 1.442695, %v4100_v13 }
0x1267   :  { %v10421_v9 = vpop.eup %10420  ;;  %v5104_v52 = vsub.f32 %v12147_v38, %v5103_v55 }
0x1268   :  { %3609 = vst [vmem:[#allocation8 + $0x6] sm:$0x1] %v3608_v5  ;;  %v4611_v20 = vmul.f32 %v10419_v44, %v4610_v43  ;;  %v5613_v1 = vmul.f32 %v10421_v9, %v5611_v28  ;;  %v1089_v35 = vmul.f32 1.442695, %v1088_v61 }
0x1269   :  { %v5105_v41 = vmul.f32 1.442695, %v5104_v52 }
0x126a   :  { %v4612_v42 = vmul.f32 %v12797_v45, %v4611_v20  ;;  %v5614_v46 = vsub.f32 2.0, %v5613_v1  ;;  %v2092_v45 = vsub.f32 %v11363_v7, %v2091_v0  ;;  %10424 = vpow2.f32 %v1089_v35  ;;  %v6107_v7 = vpop.xlane.xlu1 %6106 }
0x126b   :  { %v10423_v32 = vpop.eup %10422  ;;  %v6108_v56 = vsub.f32 %v12405_v4, %v6107_v7 }
0x126c   :  { %4613 = vst [vmem:[#allocation8 + $0x8] sm:$0x1] %v4612_v42  ;;  %v5615_v16 = vmul.f32 %v10421_v9, %v5614_v46  ;;  %v6617_v8 = vmul.f32 %v10423_v32, %v6615_v2  ;;  %v2093_v30 = vmul.f32 1.442695, %v2092_v45 }
0x126d   :  { %v6109_v34 = vmul.f32 1.442695, %v6108_v56 }
0x126e   :  { %v5616_v51 = vmul.f32 %v12801_v29, %v5615_v16  ;;  %v6618_v49 = vsub.f32 2.0, %v6617_v8  ;;  %10426 = vpow2.f32 %v2093_v30  ;;  %v3097_v29 = vmul.f32 1.442695, %v3096_v19  ;;  %v7111_v11 = vpop.xlane.xlu1 %7110 }
0x126f   :  { %v7112_v38 = vsub.f32 %v12668_v54, %v7111_v11 }
0x1270   :  { %5617 = vst [vmem:[#allocation8 + $0xa] sm:$0x1] %v5616_v51  ;;  %v6619_v14 = vmul.f32 %v10423_v32, %v6618_v49  ;;  %10428 = vpow2.f32 %v3097_v29 }
0x1271   :  { %10430 = vpow2.f32 %v4101_v62  ;;  %v7113_v33 = vmul.f32 1.442695, %v7112_v38 }
0x1272   :  { %v6620_v40 = vmul.f32 %v12805_v17, %v6619_v14  ;;  %10432 = vpow2.f32 %v5105_v41 }
0x1273   :  { %10434 = vpow2.f32 %v6109_v34 }
0x1274   :  { %6621 = vst [vmem:[#allocation8 + $0xc] sm:$0x1] %v6620_v40  ;;  %v12841_v60 = vpop.eup %10424  ;;  %10436 = vpow2.f32 %v7113_v33 }
0x1275   :  { %v1091_v21 = vsel %vm582_vm12, %v12841_v60, 0.0 }
0x12d0   :  { %v8109_v17 = vpop.f32.mrb[78].mxu1 }
0x12d1   :  { %v8110_v31 = vadd.f32 %v12536_v50, %v8109_v17  ;;  %v9229_v57 = vpop.f32.mrb[79].mxu1  ;;  %v12846_v50 = vpop.eup %10426 }
0x12d2   :  { %v2095_v36 = vsel %vm582_vm12, %v12846_v50, 0.0  ;;  %v12851_v48 = vpop.eup %10428 }
0x12d3   :  { %v8113_v37 = vsel %vm582_vm12, %v8110_v31, -inf  ;;  %v3099_v4 = vsel %vm582_vm12, %v12851_v48, 0.0  ;;  %v12855_v39 = vpop.eup %10430 }
0x12d4   :  { %8114 = vmax.xlane.f32.xlu1 %v8113_v37  ;;  %v4103_v54 = vsel %vm582_vm12, %v12855_v39, 0.0  ;;  %v12859_v3 = vpop.eup %10432 }
0x12d5   :  { %v5107_v59 = vsel %vm582_vm12, %v12859_v3, 0.0  ;;  %v12863_v27 = vpop.eup %10434 }
0x12d6   :  { %v6111_v53 = vsel %vm582_vm12, %v12863_v27, 0.0  ;;  %v12867_v28 = vpop.eup %10436 }
0x12d7   :  { %v7115_v18 = vsel %vm582_vm12, %v12867_v28, 0.0 }
0x12d8   :  { %1092 = vadd.xlane.f32.xlu1 %v1091_v21 }
0x12dc   :  { %2096 = vadd.xlane.f32.xlu1 %v2095_v36 }
0x12e0   :  { %3100 = vadd.xlane.f32.xlu1 %v3099_v4 }
0x12e2   :  { %v7619_v15 = vpop.xlane.xlu0 %7618 }
0x12e3   :  { %10438 = vrcp.f32 %v7619_v15 }
0x12e4   :  { %4104 = vadd.xlane.f32.xlu1 %v4103_v54 }
0x12e8   :  { %5108 = vadd.xlane.f32.xlu1 %v5107_v59 }
0x12ec   :  { %6112 = vadd.xlane.f32.xlu1 %v6111_v53 }
0x12ed   :  { %v10439_v12 = vpop.eup %10438 }
0x12ee   :  { %v7621_v23 = vmul.f32 %v10439_v12, %v7619_v15 }
0x12f0   :  { %v7622_v25 = vsub.f32 2.0, %v7621_v23  ;;  %7116 = vadd.xlane.f32.xlu1 %v7115_v18 }
0x12f2   :  { %v7623_v26 = vmul.f32 %v10439_v12, %v7622_v25 }
0x12f4   :  { %v7624_v2 = vmul.f32 %v12822_v10, %v7623_v26 }
0x12f6   :  { %7625 = vst [vmem:[#allocation8 + $0xe] sm:$0x1] %v7624_v2 }
0x1361   :  { %v8115_v63 = vpop.xlane.xlu1 %8114 }
0x1362   :  { %v8116_v22 = vsub.f32 %v8110_v31, %v8115_v63 }
0x1364   :  { %v8117_v44 = vmul.f32 1.442695, %v8116_v22 }
0x1365   :  { %v1093_v47 = vpop.xlane.xlu1 %1092 }
0x1366   :  { %10440 = vpow2.f32 %v8117_v44 }
0x1367   :  { %10442 = vrcp.f32 %v1093_v47 }
0x1369   :  { %v2097_v58 = vpop.xlane.xlu1 %2096 }
0x136a   :  { %10444 = vrcp.f32 %v2097_v58 }
0x136d   :  { %v3101_v5 = vpop.xlane.xlu1 %3100 }
0x136e   :  { %10446 = vrcp.f32 %v3101_v5 }
0x1370   :  { %v12872_v43 = vpop.eup %10440 }
0x1371   :  { %v10443_v9 = vpop.eup %10442  ;;  %v4105_v20 = vpop.xlane.xlu1 %4104  ;;  %v8119_v1 = vsel %vm582_vm12, %v12872_v43, 0.0 }
0x1372   :  { %v1095_v42 = vmul.f32 %v10443_v9, %v1093_v47  ;;  %10448 = vrcp.f32 %v4105_v20  ;;  %8120 = vadd.xlane.f32.xlu1 %v8119_v1 }
0x1374   :  { %v10445_v10 = vpop.eup %10444  ;;  %v1096_v46 = vsub.f32 2.0, %v1095_v42 }
0x1375   :  { %v2099_v32 = vmul.f32 %v10445_v10, %v2097_v58  ;;  %v5109_v16 = vpop.xlane.xlu1 %5108 }
0x1376   :  { %v1097_v8 = vmul.f32 %v10443_v9, %v1096_v46  ;;  %10450 = vrcp.f32 %v5109_v16 }
0x1377   :  { %v2100_v51 = vsub.f32 2.0, %v2099_v32 }
0x1378   :  { %v10447_v49 = vpop.eup %10446  ;;  %v1098_v14 = vmul.f32 %v12841_v60, %v1097_v8 }
0x1379   :  { %v2101_v40 = vmul.f32 %v10445_v10, %v2100_v51  ;;  %v3103_v61 = vmul.f32 %v10447_v49, %v3101_v5  ;;  %v6113_v0 = vpop.xlane.xlu1 %6112 }
0x137a   :  { %1099 = vst [vmem:[#allocation8 + $0x1] sm:$0x1] %v1098_v14  ;;  %10452 = vrcp.f32 %v6113_v0 }
0x137b   :  { %v2102_v35 = vmul.f32 %v12846_v50, %v2101_v40  ;;  %v3104_v45 = vsub.f32 2.0, %v3103_v61 }
0x137c   :  { %v10449_v24 = vpop.eup %10448 }
0x137d   :  { %2103 = vst [vmem:[#allocation8 + $0x3] sm:$0x1] %v2102_v35  ;;  %v3105_v30 = vmul.f32 %v10447_v49, %v3104_v45  ;;  %v4107_v19 = vmul.f32 %v10449_v24, %v4105_v20  ;;  %v7117_v6 = vpop.xlane.xlu1 %7116 }
0x137e   :  { %10454 = vrcp.f32 %v7117_v6 }
0x137f   :  { %v3106_v29 = vmul.f32 %v12851_v48, %v3105_v30  ;;  %v4108_v13 = vsub.f32 2.0, %v4107_v19 }
0x1380   :  { %v10451_v55 = vpop.eup %10450 }
0x1381   :  { %3107 = vst [vmem:[#allocation8 + $0x5] sm:$0x1] %v3106_v29  ;;  %v4109_v17 = vmul.f32 %v10449_v24, %v4108_v13  ;;  %v5111_v31 = vmul.f32 %v10451_v55, %v5109_v16 }
0x1383   :  { %v4110_v57 = vmul.f32 %v12855_v39, %v4109_v17  ;;  %v5112_v62 = vsub.f32 2.0, %v5111_v31 }
0x1384   :  { %v10453_v52 = vpop.eup %10452 }
0x1385   :  { %4111 = vst [vmem:[#allocation8 + $0x7] sm:$0x1] %v4110_v57  ;;  %v5113_v7 = vmul.f32 %v10451_v55, %v5112_v62  ;;  %v6115_v37 = vmul.f32 %v10453_v52, %v6113_v0 }
0x1387   :  { %v5114_v60 = vmul.f32 %v12859_v3, %v5113_v7  ;;  %v6116_v41 = vsub.f32 2.0, %v6115_v37 }
0x1388   :  { %v10455_v56 = vpop.eup %10454 }
0x1389   :  { %5115 = vst [vmem:[#allocation8 + $0x9] sm:$0x1] %v5114_v60  ;;  %v6117_v11 = vmul.f32 %v10453_v52, %v6116_v41  ;;  %v7119_v21 = vmul.f32 %v10455_v56, %v7117_v6 }
0x138b   :  { %v6118_v50 = vmul.f32 %v12863_v27, %v6117_v11  ;;  %v7120_v34 = vsub.f32 2.0, %v7119_v21 }
0x138d   :  { %6119 = vst [vmem:[#allocation8 + $0xb] sm:$0x1] %v6118_v50  ;;  %v7121_v38 = vmul.f32 %v10455_v56, %v7120_v34 }
0x138f   :  { %v7122_v36 = vmul.f32 %v12867_v28, %v7121_v38 }
0x1391   :  { %7123 = vst [vmem:[#allocation8 + $0xd] sm:$0x1] %v7122_v36 }
0x1392   :  { %10509 = shalt.err (!%p10506_p5)
}
0x1393   :  { %s10510_s4 = scalar_lea.hbm %s12929_s9, 64 }
0x1394   :  { %p10511_p6 = scmp.ne.s32.totalorder %s12929_s9, %s10510_s4  ;;  %p10514_p7 = scmp.lt.u32.totalorder %s10510_s4, %s12929_s9 }
0x1396   :  { %p10516_p8 = pnand %p10514_p7, %p10511_p6 }
0x1398   :  { %10519 = shalt.err (!%p10516_p8)
}
0x1399   :  { %8151 = dma.vmem_to_hbm [thread:$0]  %s8149_s12, 64, %s12929_s9, [#allocation10]  }
0x139a   :  { %s10580_s21 = smov [#allocation11]  }
0x139b   :  { %s8158_s1 = sshll.u32 %s10580_s21, 4  ;;  %s8159_s1 = int_to_ptr.vmem [resolvable:$true] %s8158_s1 }
0x139c   :  { %s10520_s0 = scalar_lea.vmem %s8159_s1, 64  ;;  %p10525_p10 = scmp.lt.s32.totalorder %s8159_s1, %s8159_s1 }
0x139d   :  { %p10521_p9 = scmp.ne.s32.totalorder %s8159_s1, %s10520_s0  ;;  %p10526_p11 = scmp.lt.s32.totalorder %s10520_s0, %s10520_s0 }
0x139f   :  { %p10527_p12 = por %p10526_p11, %p10525_p10 }
0x13a1   :  { %p10528_p13 = pnand %p10527_p12, %p10521_p9 }
0x13a3   :  { %10531 = shalt.err (!%p10528_p13)
}
0x13a4   :  { %s10532_s24 = scalar_lea.hbm %s12930_s10, 64 }
0x13a5   :  { %p10533_p0 = scmp.ne.s32.totalorder %s12930_s10, %s10532_s24  ;;  %p10536_p1 = scmp.lt.u32.totalorder %s10532_s24, %s12930_s10 }
0x13a7   :  { %p10538_p2 = pnand %p10536_p1, %p10533_p0 }
0x13a9   :  { %10541 = shalt.err (!%p10538_p2)
}
0x13aa   :  { %8161 = dma.vmem_to_hbm [thread:$0]  %s8159_s1, 64, %s12930_s10, [#allocation10]  }
0x13ab   :  { %s10581_s6 = smov [#allocation8]  }
0x13ac   :  { %s8135_s28 = sshll.u32 %s10581_s6, 4  ;;  %s8136_s28 = int_to_ptr.vmem [resolvable:$true] %s8135_s28 }
0x13ad   :  { %s10542_s29 = scalar_lea.vmem %s8136_s28, 256  ;;  %p10547_p4 = scmp.lt.s32.totalorder %s8136_s28, %s8136_s28 }
0x13ae   :  { %p10543_p3 = scmp.ne.s32.totalorder %s8136_s28, %s10542_s29  ;;  %p10548_p5 = scmp.lt.s32.totalorder %s10542_s29, %s10542_s29 }
0x13b0   :  { %p10549_p6 = por %p10548_p5, %p10547_p4 }
0x13b2   :  { %p10550_p7 = pnand %p10549_p6, %p10543_p3 }
0x13ff   :  { %v8121_v48 = vpop.xlane.xlu1 %8120 }
0x1400   :  { %10456 = vrcp.f32 %v8121_v48 }
0x140a   :  { %v10457_v33 = vpop.eup %10456 }
0x140b   :  { %v8123_v4 = vmul.f32 %v10457_v33, %v8121_v48 }
0x140d   :  { %v8124_v39 = vsub.f32 2.0, %v8123_v4 }
0x140f   :  { %v8125_v15 = vmul.f32 %v10457_v33, %v8124_v39 }
0x1411   :  { %v8126_v54 = vmul.f32 %v12872_v43, %v8125_v15 }
0x1413   :  { %8127 = vst [vmem:[#allocation8 + $0xf] sm:$0x1] %v8126_v54 }
0x1414   :  { %10553 = shalt.err (!%p10550_p7)
}
0x1415   :  { %s10554_s30 = scalar_lea.hbm %s12928_s8, 256 }
0x1416   :  { %p10555_p8 = scmp.ne.s32.totalorder %s12928_s8, %s10554_s30  ;;  %p10558_p9 = scmp.lt.u32.totalorder %s10554_s30, %s12928_s8 }
0x1418   :  { %p10560_p10 = pnand %p10558_p9, %p10555_p8 }
0x141a   :  { %10563 = shalt.err (!%p10560_p10)
}
0x141b   :  { %s10582_s3 = smov 128   ;;  %s10583_s4 = smov 8  }
0x141c   :  { %8141 = dma.vmem_to_hbm [thread:$0]  %s8136_s28, 256, %s12928_s8, [#allocation3], %s10582_s3, %s10582_s3, %s10583_s4  }
0x141d   :  { %10568 = dma.done.wait [#allocation3], 256  }
0x141e   :  { %10569 = vsyncadd [#allocation3], 4294967040 }
0x141f   :  { %10570 = dma.done.wait [#allocation10], 128  }
0x1420   :  { %10571 = vsyncadd [#allocation10], 4294967168 }
0x1421   :  { %8171 = vsyncpa [#allocation3], 1 }
0x1422   :  { %8172 = vsyncpa [#allocation10], 1 }
0x1423   :  { %8173 = vsyncpa [#allocation4], 1 }
0x1424   :  { %8174 = vsyncpa [#allocation6], 1 }

</bundles_post_ra>
